<compile_context>
chip_gen: v5e
topology: v5e:2x2
jax: 0.10.0
libtpu: 0.0.40
codegen_flags: <defaults>
</compile_context>

<pallas_src>
import functools
import math

import jax
import jax.numpy as jnp
from jax import lax
from jax.experimental import pallas as pl
from jax.experimental.pallas import tpu as pltpu


GROUPS = 6            # spin-chain feature groups
SEQ_LEN = GROUPS + 1  # + CLS token


def _round_up(v, m):
    return ((v + m - 1) // m) * m


def _chain_dims(input_size):
    if input_size % 6 == 1:
        return (input_size - 1) // 6, False
    return (input_size + 1) // 6, True


# ----------------------------------------------------------------------------
# Pallas kernel: block-diag embedding -> pre-LN transformer layer -> head.
# Activation layout: (token, feature, TB) with the batch tile TB in lanes.
# ----------------------------------------------------------------------------
def transmodel_kernel(xs_ref, cols_ref, wpre_ref, wqkv_ref, wo_ref,
                      wff1_ref, wff2_ref, wout_ref, out_ref, *, nhead,
                      final_relu):
    f32 = jnp.float32
    bf16 = jnp.bfloat16
    S = SEQ_LEN
    TB = xs_ref.shape[1]              # batch-tile lanes
    D = wout_ref.shape[1]             # d_model
    H = wff1_ref.shape[0] // S        # FFN hidden size
    O = out_ref.shape[0]              # output features
    hd = D // nhead                   # head dim

    # --- unpack the packed per-feature constant columns ((rows, 1) -> lane bcast) ---
    c = cols_ref
    b_qkv = c[0:3 * D, :]             # Q part already carries 1/sqrt(hd)
    b_o = c[3 * D:4 * D, :]
    b_ff1 = c[4 * D:4 * D + H, :]
    b_ff2 = c[4 * D + H:5 * D + H, :]
    base = 5 * D + H
    ln1_g = c[base + 0 * D:base + 1 * D, :]
    ln1_b = c[base + 1 * D:base + 2 * D, :]
    ln2_g = c[base + 2 * D:base + 3 * D, :]
    ln2_b = c[base + 3 * D:base + 4 * D, :]
    lno_g = c[base + 4 * D:base + 5 * D, :]
    lno_b = c[base + 5 * D:base + 6 * D, :]
    b_out = c[base + 6 * D:base + 6 * D + O, :]

    def layer_norm(t, g, b, axis, eps=1e-5):
        mu = jnp.mean(t, axis=axis, keepdims=True)
        var = jnp.mean((t - mu) * (t - mu), axis=axis, keepdims=True)
        return (t - mu) * lax.rsqrt(var + eps) * g + b

    # --- embedding: one block-diag matmul; cls/pe/b_pre ride on the ones-row column ---
    x = jnp.dot(wpre_ref[...], xs_ref[...], preferred_element_type=f32)
    x = x.reshape(S, D, TB)                                  # (token, feature, batch)
    # dropout(p=0.0) is the identity -> omitted.

    # --- self-attention block (norm_first=True) ---
    h = layer_norm(x, ln1_g[None], ln1_b[None], axis=1)
    qkv = jnp.dot(wqkv_ref[...], h.reshape(S * D, TB).astype(bf16),
                  preferred_element_type=f32)
    qkv = qkv.reshape(S, 3 * D, TB) + b_qkv[None]
    heads = []
    for hh in range(nhead):           # static unroll; per-head temps stay small
        q = qkv[:, hh * hd:(hh + 1) * hd, :]                 # (S, hd, TB), scale folded
        k = qkv[:, D + hh * hd:D + (hh + 1) * hd, :]
        v = qkv[:, 2 * D + hh * hd:2 * D + (hh + 1) * hd, :]
        # scores[q, k, b] = sum_d Q[q, d, b] * K[k, d, b]  -> lane-dense VPU work
        s = jnp.sum(q[:, None, :, :] * k[None, :, :, :], axis=2)     # (Sq, Sk, TB)
        m = jnp.max(s, axis=1, keepdims=True)
        e = jnp.exp(s - m)
        p = e / jnp.sum(e, axis=1, keepdims=True)            # exact divide (parity)
        # ctx[q, d, b] = sum_k P[q, k, b] * V[k, d, b]
        heads.append(jnp.sum(p[:, :, None, :] * v[None, :, :, :], axis=1))
    # concat along 8-aligned sublane chunks (hd rows per head) -> plain copies
    ctx = jnp.concatenate(heads, axis=1)                     # (S, D, TB)
    attn = jnp.dot(wo_ref[...], ctx.reshape(S * D, TB).astype(bf16),
                   preferred_element_type=f32)
    x = x + attn.reshape(S, D, TB) + b_o[None]

    # --- feed-forward block (norm_first=True), activation = relu ---
    h = layer_norm(x, ln2_g[None], ln2_b[None], axis=1)
    f = jnp.dot(wff1_ref[...], h.reshape(S * D, TB).astype(bf16),
                preferred_element_type=f32)
    f = jnp.maximum(f.reshape(S, H, TB) + b_ff1[None], 0.0)
    f = jnp.dot(wff2_ref[...], f.reshape(S * H, TB).astype(bf16),
                preferred_element_type=f32)
    x = x + f.reshape(S, D, TB) + b_ff2[None]

    # --- head: CLS token -> LayerNorm -> Linear, lane-dense (O, TB) output ---
    cls = layer_norm(x[0], lno_g, lno_b, axis=0)             # (D, TB)   (pool=False)
    y = jnp.dot(wout_ref[...], cls, preferred_element_type=f32) + b_out
    if final_relu:                    # TranSModel_relu variant only; spec: False
        y = jnp.maximum(y, 0.0)
    out_ref[...] = y


# ----------------------------------------------------------------------------
# Glue: spin-chain feature preprocessing (split / flip / pad / stack).
# ----------------------------------------------------------------------------
def preprocess(x, N, gauge):
    B = x.shape[0]
    pad = jnp.zeros((B, 1), x.dtype)
    if gauge:
        sizes = [N + 1, N, N, N, N - 1, N - 1]
    else:
        sizes = [N + 1, N, N, N, N, N]
    offs, acc = [], 0
    for s in sizes[:-1]:
        acc += s
        offs.append(acc)
    x0, x1, x2, x3, x4, x5 = jnp.split(x, offs, axis=1)
    x1 = jnp.concatenate([pad, x1], axis=1)
    x2 = jnp.concatenate([pad, jnp.flip(x2, axis=1)], axis=1)
    x3 = jnp.concatenate([pad, x3], axis=1)
    if gauge:
        x4 = jnp.concatenate([pad, pad, jnp.flip(x4, axis=1)], axis=1)
        x5 = jnp.concatenate([pad, pad, x5], axis=1)
    else:
        x4 = jnp.concatenate([pad, jnp.flip(x4, axis=1)], axis=1)
        x5 = jnp.concatenate([pad, x5], axis=1)
    return jnp.stack([x0, x1, x2, x3, x4, x5], axis=1)       # (B, 6, N+1)


# ----------------------------------------------------------------------------
# One-time parameter packing / folding (do NOT re-run per forward call).
# ----------------------------------------------------------------------------
def pack_params(p, *, nhead):
    f32 = jnp.float32
    bf16 = jnp.bfloat16
    S = SEQ_LEN
    Np1, D = p['w_pre'].shape
    H = p['w_ff1'].shape[1]
    O = p['w_out'].shape[1]
    assert D % nhead == 0 and D % 8 == 0 and H % 8 == 0
    hd = D // nhead

    def bd(w):                        # (out, in) block -> (S*out, S*in) block-diag
        return jnp.kron(jnp.eye(S, dtype=f32), w.astype(f32))

    # pre-projection: token 0 (CLS) gets a zero block, tokens 1..6 get W_pre; the
    # trailing column (multiplied by the wrapper's ones-row) folds cls / pe / b_pre.
    add_c = jnp.concatenate(
        [(p['cls'] + p['pe'][0])[None, :],
         p['pe'][1:S] + p['b_pre'][None, :]], axis=0)        # (S, D)
    w_pre_t = p['w_pre'].T.astype(f32)                       # (D, Np1)
    w_pre_bd = jnp.zeros((S * D, S * Np1 + 1), f32)
    for s in range(1, S):
        w_pre_bd = w_pre_bd.at[s * D:(s + 1) * D, s * Np1:(s + 1) * Np1].set(w_pre_t)
    w_pre_bd = w_pre_bd.at[:, S * Np1].set(add_c.reshape(S * D))

    # fold 1/sqrt(head_dim) into the Q rows of the fused in-projection
    scale = 1.0 / math.sqrt(hd)
    col_scale = jnp.concatenate([jnp.full((D,), scale, f32), jnp.ones((2 * D,), f32)])
    w_qkv_t = (p['w_qkv'].astype(f32) * col_scale[None, :]).T       # (3D, D)
    b_qkv = p['b_qkv'].astype(f32) * col_scale

    # all small per-feature constants as one (rows, 1) column array
    cols = jnp.concatenate(
        [b_qkv, p['b_o'], p['b_ff1'], p['b_ff2'],
         p['ln1_g'], p['ln1_b'], p['ln2_g'], p['ln2_b'],
         p['lno_g'], p['lno_b'], p['b_out']]).astype(f32)[:, None]  # (11D+H+O, 1)

    return {
        'w_pre_bd': w_pre_bd,                                # f32 (tiny, exact consts)
        'w_qkv_bd': bd(w_qkv_t).astype(bf16),
        'w_o_bd': bd(p['w_o'].T).astype(bf16),
        'w_ff1_bd': bd(p['w_ff1'].T).astype(bf16),
        'w_ff2_bd': bd(p['w_ff2'].T).astype(bf16),
        'w_out_t': p['w_out'].T.astype(f32),                 # (O, D)
        'cols': cols,
    }


# ----------------------------------------------------------------------------
# Wrapper calling the Pallas kernel (batch tile in lanes, parallel grid).
# ----------------------------------------------------------------------------
def transmodel_forward(x, packed, *, input_size, nhead, block_b=512,
                       final_relu=False):
    N, gauge = _chain_dims(input_size)
    Np1 = N + 1
    S = SEQ_LEN
    B = x.shape[0]
    O, D = packed['w_out_t'].shape

    # spin-chain preprocessing is pure data movement -> plain JAX outside the kernel
    xs_g = preprocess(x.astype(jnp.float32), N, gauge)       # (B, 6, N+1)
    # batch-in-lanes: rows = token-major features (token 0 = CLS = zeros), last row = 1
    xs_t = jnp.transpose(xs_g, (1, 2, 0)).reshape(GROUPS * Np1, B)
    xs_all = jnp.concatenate(
        [jnp.zeros((Np1, B), jnp.float32), xs_t, jnp.ones((1, B), jnp.float32)],
        axis=0)                                              # (S*Np1 + 1, B)

    b128 = _round_up(B, 128)
    TB = min(_round_up(block_b, 128), b128)                  # lanes per batch tile
    if b128 // TB < 2 and b128 >= 256:                       # v7x: 2 TCs -> even grid
        TB = _round_up(-(-b128 // 2), 128)
    B_pad = _round_up(B, TB)
    if B_pad != B:
        xs_all = jnp.pad(xs_all, ((0, 0), (0, B_pad - B)))   # padded lanes discarded
    grid = (B_pad // TB,)

    const = lambda i: (0, 0)
    in_specs = [
        pl.BlockSpec((S * Np1 + 1, TB), lambda i: (0, i)),   # batch-tiled input
        pl.BlockSpec(packed['cols'].shape, const),           # VMEM-resident consts
        pl.BlockSpec(packed['w_pre_bd'].shape, const),
        pl.BlockSpec(packed['w_qkv_bd'].shape, const),
        pl.BlockSpec(packed['w_o_bd'].shape, const),
        pl.BlockSpec(packed['w_ff1_bd'].shape, const),
        pl.BlockSpec(packed['w_ff2_bd'].shape, const),
        pl.BlockSpec(packed['w_out_t'].shape, const),
    ]

    y = pl.pallas_call(
        functools.partial(transmodel_kernel, nhead=nhead, final_relu=final_relu),
        out_shape=jax.ShapeDtypeStruct((O, B_pad), jnp.float32),
        grid=grid,
        in_specs=in_specs,
        out_specs=pl.BlockSpec((O, TB), lambda i: (0, i)),   # lane-dense output row
        compiler_params=pltpu.CompilerParams(
            dimension_semantics=("parallel",),
            vmem_limit_bytes=32 * 1024 * 1024),
    )(xs_all, packed['cols'], packed['w_pre_bd'], packed['w_qkv_bd'],
      packed['w_o_bd'], packed['w_ff1_bd'], packed['w_ff2_bd'],
      packed['w_out_t'])

    return y[:, :B].T                                        # (B, O)


# ----------------------------------------------------------------------------
# Deterministic parameter init (shapes per TranSModel.__init__; synthetic).
# ----------------------------------------------------------------------------
def init_params(key, N, d_model, hidden_size, output_size, seq_len):
    ks = jax.random.split(key, 8)
    Np1 = N + 1
    f32 = jnp.float32

    def kaiming(k, shape, fan_in):
        return jax.random.normal(k, shape, f32) * (2.0 / fan_in) ** 0.5

    p = {}
    p['w_pre'] = kaiming(ks[0], (Np1, d_model), Np1)          # torch (D, N+1).T
    p['b_pre'] = jnp.zeros((d_model,), f32)
    p['cls'] = jax.random.normal(ks[1], (d_model,), f32)
    # TODO(synk): original code declares pe as (input_size+1, 1, d_model), which cannot
    # broadcast onto the length-7 token sequence; we use seq_len per-token rows instead.
    p['pe'] = jax.random.normal(ks[2], (seq_len, d_model), f32)
    p['ln1_g'] = jnp.ones((d_model,), f32)
    p['ln1_b'] = jnp.zeros((d_model,), f32)
    p['w_qkv'] = (jax.random.normal(ks[3], (d_model, 3 * d_model), f32)
                  * (1.0 / d_model) ** 0.5)                   # in_proj_weight.T
    p['b_qkv'] = jnp.zeros((3 * d_model,), f32)
    p['w_o'] = kaiming(ks[4], (d_model, d_model), d_model)    # out_proj.weight.T
    p['b_o'] = jnp.zeros((d_model,), f32)
    p['ln2_g'] = jnp.ones((d_model,), f32)
    p['ln2_b'] = jnp.zeros((d_model,), f32)
    p['w_ff1'] = kaiming(ks[5], (d_model, hidden_size), d_model)
    p['b_ff1'] = jnp.zeros((hidden_size,), f32)
    p['w_ff2'] = kaiming(ks[6], (hidden_size, d_model), hidden_size)
    p['b_ff2'] = jnp.zeros((d_model,), f32)
    p['lno_g'] = jnp.ones((d_model,), f32)
    p['lno_b'] = jnp.zeros((d_model,), f32)
    p['w_out'] = kaiming(ks[7], (d_model, output_size), d_model)
    p['b_out'] = jnp.zeros((output_size,), f32)
    return p


if __name__ == "__main__":
    # Small, module-consistent config: input_size = 6N+1 -> gauge=False, N=4.
    input_size = 25
    batch = 2
    nhead = 4
    embedding_size = 8
    d_model = nhead * embedding_size      # 32
    hidden_size = 64
    output_size = 1
    N = (input_size - 1) // 6             # 4
    seq_len = SEQ_LEN                     # 7 tokens (6 feature groups + CLS)

    key = jax.random.PRNGKey(0)
    kx, kp = jax.random.split(key)
    x = jax.random.normal(kx, (batch, input_size), jnp.float32)

    raw = init_params(kp, N, d_model, hidden_size, output_size, seq_len)
    packed = pack_params(raw, nhead=nhead)          # one-time parameter transform

    y = transmodel_forward(x, packed, input_size=input_size, nhead=nhead)
    jax.block_until_ready(y)
    assert y.shape == (batch, output_size)
    assert bool(jnp.all(jnp.isfinite(y)))
    print("KERNEL_OK")
</pallas_src>

<mosaic_0001>
module attributes {stable_mosaic.version = 11 : i64} {
  func.func @transmodel_kernel(%arg0: i32, %arg1: memref<36x128xf32, #tpu.memory_space<vmem>>, %arg2: memref<417x1xf32, #tpu.memory_space<vmem>>, %arg3: memref<224x36xf32, #tpu.memory_space<vmem>>, %arg4: memref<672x224xbf16, #tpu.memory_space<vmem>>, %arg5: memref<224x224xbf16, #tpu.memory_space<vmem>>, %arg6: memref<448x224xbf16, #tpu.memory_space<vmem>>, %arg7: memref<224x448xbf16, #tpu.memory_space<vmem>>, %arg8: memref<1x32xf32, #tpu.memory_space<vmem>>, %arg9: memref<1x128xf32, #tpu.memory_space<vmem>>) attributes {dimension_semantics = [#tpu.dimension_semantics<parallel>], iteration_bounds = array<i64: 1>, scalar_prefetch = 0 : i64, scratch_operands = 0 : i64, tpu.core_type = #tpu.core_type<tc>, window_params = [{transform_indices = @transform_0, window_bounds = array<i64: 36, 128>}, {pipeline_mode = #tpu.pipeline_mode<synchronous>, transform_indices = @transform_1, window_bounds = array<i64: 417, 1>}, {pipeline_mode = #tpu.pipeline_mode<synchronous>, transform_indices = @transform_2, window_bounds = array<i64: 224, 36>}, {pipeline_mode = #tpu.pipeline_mode<synchronous>, transform_indices = @transform_3, window_bounds = array<i64: 672, 224>}, {pipeline_mode = #tpu.pipeline_mode<synchronous>, transform_indices = @transform_4, window_bounds = array<i64: 224, 224>}, {pipeline_mode = #tpu.pipeline_mode<synchronous>, transform_indices = @transform_5, window_bounds = array<i64: 448, 224>}, {pipeline_mode = #tpu.pipeline_mode<synchronous>, transform_indices = @transform_6, window_bounds = array<i64: 224, 448>}, {pipeline_mode = #tpu.pipeline_mode<synchronous>, transform_indices = @transform_7, window_bounds = array<i64: 1, 32>}, {transform_indices = @transform_8, window_bounds = array<i64: 1, 128>}]} {
    %c0 = arith.constant 0 : index
    %c0_0 = arith.constant 0 : index
    %0 = vector.load %arg2[%c0, %c0_0] : memref<417x1xf32, #tpu.memory_space<vmem>>, vector<96x1xf32>
    %c96 = arith.constant 96 : index
    %c0_1 = arith.constant 0 : index
    %1 = vector.load %arg2[%c96, %c0_1] : memref<417x1xf32, #tpu.memory_space<vmem>>, vector<32x1xf32>
    %c128 = arith.constant 128 : index
    %c0_2 = arith.constant 0 : index
    %2 = vector.load %arg2[%c128, %c0_2] : memref<417x1xf32, #tpu.memory_space<vmem>>, vector<64x1xf32>
    %c192 = arith.constant 192 : index
    %c0_3 = arith.constant 0 : index
    %3 = vector.load %arg2[%c192, %c0_3] : memref<417x1xf32, #tpu.memory_space<vmem>>, vector<32x1xf32>
    %c224 = arith.constant 224 : index
    %c0_4 = arith.constant 0 : index
    %4 = vector.load %arg2[%c224, %c0_4] : memref<417x1xf32, #tpu.memory_space<vmem>>, vector<32x1xf32>
    %c256 = arith.constant 256 : index
    %c0_5 = arith.constant 0 : index
    %5 = vector.load %arg2[%c256, %c0_5] : memref<417x1xf32, #tpu.memory_space<vmem>>, vector<32x1xf32>
    %c288 = arith.constant 288 : index
    %c0_6 = arith.constant 0 : index
    %6 = vector.load %arg2[%c288, %c0_6] : memref<417x1xf32, #tpu.memory_space<vmem>>, vector<32x1xf32>
    %c320 = arith.constant 320 : index
    %c0_7 = arith.constant 0 : index
    %7 = vector.load %arg2[%c320, %c0_7] : memref<417x1xf32, #tpu.memory_space<vmem>>, vector<32x1xf32>
    %c352 = arith.constant 352 : index
    %c0_8 = arith.constant 0 : index
    %8 = vector.load %arg2[%c352, %c0_8] : memref<417x1xf32, #tpu.memory_space<vmem>>, vector<32x1xf32>
    %c384 = arith.constant 384 : index
    %c0_9 = arith.constant 0 : index
    %9 = vector.load %arg2[%c384, %c0_9] : memref<417x1xf32, #tpu.memory_space<vmem>>, vector<32x1xf32>
    %c416 = arith.constant 416 : index
    %c0_10 = arith.constant 0 : index
    %10 = vector.load %arg2[%c416, %c0_10] : memref<417x1xf32, #tpu.memory_space<vmem>>, vector<1x1xf32>
    %c0_11 = arith.constant 0 : index
    %c0_12 = arith.constant 0 : index
    %11 = vector.load %arg3[%c0_11, %c0_12] : memref<224x36xf32, #tpu.memory_space<vmem>>, vector<224x36xf32>
    %c0_13 = arith.constant 0 : index
    %c0_14 = arith.constant 0 : index
    %12 = vector.load %arg1[%c0_13, %c0_14] : memref<36x128xf32, #tpu.memory_space<vmem>>, vector<36x128xf32>
    %cst = arith.constant dense<0.000000e+00> : vector<224x128xf32>
    %13 = tpu.matmul %11, %12, %cst {dimension_numbers = #tpu.dot_dimension_numbers<[1], [0], [0], [1], [0, 0, 1, 1], [], []>} : vector<224x36xf32>, vector<36x128xf32>, vector<224x128xf32> -> vector<224x128xf32>
    %14 = vector.shape_cast %13 : vector<224x128xf32> to vector<7x32x128xf32>
    %15 = vector.shape_cast %4 : vector<32x1xf32> to vector<1x32x1xf32>
    %16 = vector.shape_cast %5 : vector<32x1xf32> to vector<1x32x1xf32>
    %cst_15 = arith.constant dense<0.000000e+00> : vector<7x128xf32>
    %17 = vector.multi_reduction <add>, %14, %cst_15 [1] : vector<7x32x128xf32> to vector<7x128xf32>
    %18 = vector.shape_cast %17 : vector<7x128xf32> to vector<7x1x128xf32>
    %cst_16 = arith.constant 3.200000e+01 : f32
    %19 = vector.broadcast %cst_16 : f32 to vector<7x1x128xf32>
    %20 = arith.divf %18, %19 : vector<7x1x128xf32>
    %21 = vector.broadcast %20 : vector<7x1x128xf32> to vector<7x32x128xf32>
    %22 = arith.subf %14, %21 : vector<7x32x128xf32>
    %23 = vector.broadcast %20 : vector<7x1x128xf32> to vector<7x32x128xf32>
    %24 = arith.subf %14, %23 : vector<7x32x128xf32>
    %25 = arith.mulf %22, %24 : vector<7x32x128xf32>
    %cst_17 = arith.constant dense<0.000000e+00> : vector<7x128xf32>
    %26 = vector.multi_reduction <add>, %25, %cst_17 [1] : vector<7x32x128xf32> to vector<7x128xf32>
    %27 = vector.shape_cast %26 : vector<7x128xf32> to vector<7x1x128xf32>
    %cst_18 = arith.constant 3.200000e+01 : f32
    %28 = vector.broadcast %cst_18 : f32 to vector<7x1x128xf32>
    %29 = arith.divf %27, %28 : vector<7x1x128xf32>
    %30 = vector.broadcast %20 : vector<7x1x128xf32> to vector<7x32x128xf32>
    %31 = arith.subf %14, %30 : vector<7x32x128xf32>
    %cst_19 = arith.constant 9.99999974E-6 : f32
    %32 = vector.broadcast %cst_19 : f32 to vector<7x1x128xf32>
    %33 = arith.addf %29, %32 : vector<7x1x128xf32>
    %34 = math.rsqrt %33 : vector<7x1x128xf32>
    %35 = vector.broadcast %34 : vector<7x1x128xf32> to vector<7x32x128xf32>
    %36 = arith.mulf %31, %35 : vector<7x32x128xf32>
    %37 = vector.broadcast %15 : vector<1x32x1xf32> to vector<7x32x128xf32>
    %38 = arith.mulf %36, %37 : vector<7x32x128xf32>
    %39 = vector.broadcast %16 : vector<1x32x1xf32> to vector<7x32x128xf32>
    %40 = arith.addf %38, %39 : vector<7x32x128xf32>
    %c0_20 = arith.constant 0 : index
    %c0_21 = arith.constant 0 : index
    %41 = vector.load %arg4[%c0_20, %c0_21] : memref<672x224xbf16, #tpu.memory_space<vmem>>, vector<672x224xbf16>
    %42 = vector.shape_cast %40 : vector<7x32x128xf32> to vector<224x128xf32>
    %43 = arith.truncf %42 : vector<224x128xf32> to vector<224x128xbf16>
    %cst_22 = arith.constant dense<0.000000e+00> : vector<672x128xf32>
    %44 = tpu.matmul %41, %43, %cst_22 {dimension_numbers = #tpu.dot_dimension_numbers<[1], [0], [0], [1], [0, 0, 1, 1], [], []>} : vector<672x224xbf16>, vector<224x128xbf16>, vector<672x128xf32> -> vector<672x128xf32>
    %45 = vector.shape_cast %44 : vector<672x128xf32> to vector<7x96x128xf32>
    %46 = vector.shape_cast %0 : vector<96x1xf32> to vector<1x96x1xf32>
    %47 = vector.broadcast %46 : vector<1x96x1xf32> to vector<7x96x128xf32>
    %48 = arith.addf %45, %47 : vector<7x96x128xf32>
    %49 = vector.extract_strided_slice %48 {offsets = [0, 0, 0], sizes = [7, 8, 128], strides = [1, 1, 1]} : vector<7x96x128xf32> to vector<7x8x128xf32>
    %50 = vector.extract_strided_slice %48 {offsets = [0, 32, 0], sizes = [7, 8, 128], strides = [1, 1, 1]} : vector<7x96x128xf32> to vector<7x8x128xf32>
    %51 = vector.extract_strided_slice %48 {offsets = [0, 64, 0], sizes = [7, 8, 128], strides = [1, 1, 1]} : vector<7x96x128xf32> to vector<7x8x128xf32>
    %52 = vector.shape_cast %49 : vector<7x8x128xf32> to vector<7x1x8x128xf32>
    %53 = vector.shape_cast %50 : vector<7x8x128xf32> to vector<1x7x8x128xf32>
    %54 = vector.broadcast %52 : vector<7x1x8x128xf32> to vector<7x7x8x128xf32>
    %55 = vector.broadcast %53 : vector<1x7x8x128xf32> to vector<7x7x8x128xf32>
    %56 = arith.mulf %54, %55 : vector<7x7x8x128xf32>
    %cst_23 = arith.constant dense<0.000000e+00> : vector<7x7x128xf32>
    %57 = vector.multi_reduction <add>, %56, %cst_23 [2] : vector<7x7x8x128xf32> to vector<7x7x128xf32>
    %cst_24 = arith.constant dense<0xFF800000> : vector<7x128xf32>
    %58 = vector.multi_reduction <maximumf>, %57, %cst_24 [1] : vector<7x7x128xf32> to vector<7x128xf32>
    %59 = vector.shape_cast %58 : vector<7x128xf32> to vector<7x1x128xf32>
    %60 = vector.broadcast %59 : vector<7x1x128xf32> to vector<7x7x128xf32>
    %61 = arith.subf %57, %60 : vector<7x7x128xf32>
    %62 = math.exp %61 : vector<7x7x128xf32>
    %cst_25 = arith.constant dense<0.000000e+00> : vector<7x128xf32>
    %63 = vector.multi_reduction <add>, %62, %cst_25 [1] : vector<7x7x128xf32> to vector<7x128xf32>
    %64 = vector.shape_cast %63 : vector<7x128xf32> to vector<7x1x128xf32>
    %65 = vector.broadcast %64 : vector<7x1x128xf32> to vector<7x7x128xf32>
    %66 = arith.divf %62, %65 : vector<7x7x128xf32>
    %67 = vector.shape_cast %66 : vector<7x7x128xf32> to vector<7x7x1x128xf32>
    %68 = vector.shape_cast %51 : vector<7x8x128xf32> to vector<1x7x8x128xf32>
    %69 = vector.broadcast %67 : vector<7x7x1x128xf32> to vector<7x7x8x128xf32>
    %70 = vector.broadcast %68 : vector<1x7x8x128xf32> to vector<7x7x8x128xf32>
    %71 = arith.mulf %69, %70 : vector<7x7x8x128xf32>
    %cst_26 = arith.constant dense<0.000000e+00> : vector<7x8x128xf32>
    %72 = vector.multi_reduction <add>, %71, %cst_26 [1] : vector<7x7x8x128xf32> to vector<7x8x128xf32>
    %73 = vector.extract_strided_slice %48 {offsets = [0, 8, 0], sizes = [7, 8, 128], strides = [1, 1, 1]} : vector<7x96x128xf32> to vector<7x8x128xf32>
    %74 = vector.extract_strided_slice %48 {offsets = [0, 40, 0], sizes = [7, 8, 128], strides = [1, 1, 1]} : vector<7x96x128xf32> to vector<7x8x128xf32>
    %75 = vector.extract_strided_slice %48 {offsets = [0, 72, 0], sizes = [7, 8, 128], strides = [1, 1, 1]} : vector<7x96x128xf32> to vector<7x8x128xf32>
    %76 = vector.shape_cast %73 : vector<7x8x128xf32> to vector<7x1x8x128xf32>
    %77 = vector.shape_cast %74 : vector<7x8x128xf32> to vector<1x7x8x128xf32>
    %78 = vector.broadcast %76 : vector<7x1x8x128xf32> to vector<7x7x8x128xf32>
    %79 = vector.broadcast %77 : vector<1x7x8x128xf32> to vector<7x7x8x128xf32>
    %80 = arith.mulf %78, %79 : vector<7x7x8x128xf32>
    %cst_27 = arith.constant dense<0.000000e+00> : vector<7x7x128xf32>
    %81 = vector.multi_reduction <add>, %80, %cst_27 [2] : vector<7x7x8x128xf32> to vector<7x7x128xf32>
    %cst_28 = arith.constant dense<0xFF800000> : vector<7x128xf32>
    %82 = vector.multi_reduction <maximumf>, %81, %cst_28 [1] : vector<7x7x128xf32> to vector<7x128xf32>
    %83 = vector.shape_cast %82 : vector<7x128xf32> to vector<7x1x128xf32>
    %84 = vector.broadcast %83 : vector<7x1x128xf32> to vector<7x7x128xf32>
    %85 = arith.subf %81, %84 : vector<7x7x128xf32>
    %86 = math.exp %85 : vector<7x7x128xf32>
    %cst_29 = arith.constant dense<0.000000e+00> : vector<7x128xf32>
    %87 = vector.multi_reduction <add>, %86, %cst_29 [1] : vector<7x7x128xf32> to vector<7x128xf32>
    %88 = vector.shape_cast %87 : vector<7x128xf32> to vector<7x1x128xf32>
    %89 = vector.broadcast %88 : vector<7x1x128xf32> to vector<7x7x128xf32>
    %90 = arith.divf %86, %89 : vector<7x7x128xf32>
    %91 = vector.shape_cast %90 : vector<7x7x128xf32> to vector<7x7x1x128xf32>
    %92 = vector.shape_cast %75 : vector<7x8x128xf32> to vector<1x7x8x128xf32>
    %93 = vector.broadcast %91 : vector<7x7x1x128xf32> to vector<7x7x8x128xf32>
    %94 = vector.broadcast %92 : vector<1x7x8x128xf32> to vector<7x7x8x128xf32>
    %95 = arith.mulf %93, %94 : vector<7x7x8x128xf32>
    %cst_30 = arith.constant dense<0.000000e+00> : vector<7x8x128xf32>
    %96 = vector.multi_reduction <add>, %95, %cst_30 [1] : vector<7x7x8x128xf32> to vector<7x8x128xf32>
    %97 = vector.extract_strided_slice %48 {offsets = [0, 16, 0], sizes = [7, 8, 128], strides = [1, 1, 1]} : vector<7x96x128xf32> to vector<7x8x128xf32>
    %98 = vector.extract_strided_slice %48 {offsets = [0, 48, 0], sizes = [7, 8, 128], strides = [1, 1, 1]} : vector<7x96x128xf32> to vector<7x8x128xf32>
    %99 = vector.extract_strided_slice %48 {offsets = [0, 80, 0], sizes = [7, 8, 128], strides = [1, 1, 1]} : vector<7x96x128xf32> to vector<7x8x128xf32>
    %100 = vector.shape_cast %97 : vector<7x8x128xf32> to vector<7x1x8x128xf32>
    %101 = vector.shape_cast %98 : vector<7x8x128xf32> to vector<1x7x8x128xf32>
    %102 = vector.broadcast %100 : vector<7x1x8x128xf32> to vector<7x7x8x128xf32>
    %103 = vector.broadcast %101 : vector<1x7x8x128xf32> to vector<7x7x8x128xf32>
    %104 = arith.mulf %102, %103 : vector<7x7x8x128xf32>
    %cst_31 = arith.constant dense<0.000000e+00> : vector<7x7x128xf32>
    %105 = vector.multi_reduction <add>, %104, %cst_31 [2] : vector<7x7x8x128xf32> to vector<7x7x128xf32>
    %cst_32 = arith.constant dense<0xFF800000> : vector<7x128xf32>
    %106 = vector.multi_reduction <maximumf>, %105, %cst_32 [1] : vector<7x7x128xf32> to vector<7x128xf32>
    %107 = vector.shape_cast %106 : vector<7x128xf32> to vector<7x1x128xf32>
    %108 = vector.broadcast %107 : vector<7x1x128xf32> to vector<7x7x128xf32>
    %109 = arith.subf %105, %108 : vector<7x7x128xf32>
    %110 = math.exp %109 : vector<7x7x128xf32>
    %cst_33 = arith.constant dense<0.000000e+00> : vector<7x128xf32>
    %111 = vector.multi_reduction <add>, %110, %cst_33 [1] : vector<7x7x128xf32> to vector<7x128xf32>
    %112 = vector.shape_cast %111 : vector<7x128xf32> to vector<7x1x128xf32>
    %113 = vector.broadcast %112 : vector<7x1x128xf32> to vector<7x7x128xf32>
    %114 = arith.divf %110, %113 : vector<7x7x128xf32>
    %115 = vector.shape_cast %114 : vector<7x7x128xf32> to vector<7x7x1x128xf32>
    %116 = vector.shape_cast %99 : vector<7x8x128xf32> to vector<1x7x8x128xf32>
    %117 = vector.broadcast %115 : vector<7x7x1x128xf32> to vector<7x7x8x128xf32>
    %118 = vector.broadcast %116 : vector<1x7x8x128xf32> to vector<7x7x8x128xf32>
    %119 = arith.mulf %117, %118 : vector<7x7x8x128xf32>
    %cst_34 = arith.constant dense<0.000000e+00> : vector<7x8x128xf32>
    %120 = vector.multi_reduction <add>, %119, %cst_34 [1] : vector<7x7x8x128xf32> to vector<7x8x128xf32>
    %121 = vector.extract_strided_slice %48 {offsets = [0, 24, 0], sizes = [7, 8, 128], strides = [1, 1, 1]} : vector<7x96x128xf32> to vector<7x8x128xf32>
    %122 = vector.extract_strided_slice %48 {offsets = [0, 56, 0], sizes = [7, 8, 128], strides = [1, 1, 1]} : vector<7x96x128xf32> to vector<7x8x128xf32>
    %123 = vector.extract_strided_slice %48 {offsets = [0, 88, 0], sizes = [7, 8, 128], strides = [1, 1, 1]} : vector<7x96x128xf32> to vector<7x8x128xf32>
    %124 = vector.shape_cast %121 : vector<7x8x128xf32> to vector<7x1x8x128xf32>
    %125 = vector.shape_cast %122 : vector<7x8x128xf32> to vector<1x7x8x128xf32>
    %126 = vector.broadcast %124 : vector<7x1x8x128xf32> to vector<7x7x8x128xf32>
    %127 = vector.broadcast %125 : vector<1x7x8x128xf32> to vector<7x7x8x128xf32>
    %128 = arith.mulf %126, %127 : vector<7x7x8x128xf32>
    %cst_35 = arith.constant dense<0.000000e+00> : vector<7x7x128xf32>
    %129 = vector.multi_reduction <add>, %128, %cst_35 [2] : vector<7x7x8x128xf32> to vector<7x7x128xf32>
    %cst_36 = arith.constant dense<0xFF800000> : vector<7x128xf32>
    %130 = vector.multi_reduction <maximumf>, %129, %cst_36 [1] : vector<7x7x128xf32> to vector<7x128xf32>
    %131 = vector.shape_cast %130 : vector<7x128xf32> to vector<7x1x128xf32>
    %132 = vector.broadcast %131 : vector<7x1x128xf32> to vector<7x7x128xf32>
    %133 = arith.subf %129, %132 : vector<7x7x128xf32>
    %134 = math.exp %133 : vector<7x7x128xf32>
    %cst_37 = arith.constant dense<0.000000e+00> : vector<7x128xf32>
    %135 = vector.multi_reduction <add>, %134, %cst_37 [1] : vector<7x7x128xf32> to vector<7x128xf32>
    %136 = vector.shape_cast %135 : vector<7x128xf32> to vector<7x1x128xf32>
    %137 = vector.broadcast %136 : vector<7x1x128xf32> to vector<7x7x128xf32>
    %138 = arith.divf %134, %137 : vector<7x7x128xf32>
    %139 = vector.shape_cast %138 : vector<7x7x128xf32> to vector<7x7x1x128xf32>
    %140 = vector.shape_cast %123 : vector<7x8x128xf32> to vector<1x7x8x128xf32>
    %141 = vector.broadcast %139 : vector<7x7x1x128xf32> to vector<7x7x8x128xf32>
    %142 = vector.broadcast %140 : vector<1x7x8x128xf32> to vector<7x7x8x128xf32>
    %143 = arith.mulf %141, %142 : vector<7x7x8x128xf32>
    %cst_38 = arith.constant dense<0.000000e+00> : vector<7x8x128xf32>
    %144 = vector.multi_reduction <add>, %143, %cst_38 [1] : vector<7x7x8x128xf32> to vector<7x8x128xf32>
    %145 = tpu.concatenate %72, %96, %120, %144 in 1 : vector<7x8x128xf32>, vector<7x8x128xf32>, vector<7x8x128xf32>, vector<7x8x128xf32> -> vector<7x32x128xf32>
    %c0_39 = arith.constant 0 : index
    %c0_40 = arith.constant 0 : index
    %146 = vector.load %arg5[%c0_39, %c0_40] : memref<224x224xbf16, #tpu.memory_space<vmem>>, vector<224x224xbf16>
    %147 = vector.shape_cast %145 : vector<7x32x128xf32> to vector<224x128xf32>
    %148 = arith.truncf %147 : vector<224x128xf32> to vector<224x128xbf16>
    %cst_41 = arith.constant dense<0.000000e+00> : vector<224x128xf32>
    %149 = tpu.matmul %146, %148, %cst_41 {dimension_numbers = #tpu.dot_dimension_numbers<[1], [0], [0], [1], [0, 0, 1, 1], [], []>} : vector<224x224xbf16>, vector<224x128xbf16>, vector<224x128xf32> -> vector<224x128xf32>
    %150 = vector.shape_cast %149 : vector<224x128xf32> to vector<7x32x128xf32>
    %151 = arith.addf %14, %150 : vector<7x32x128xf32>
    %152 = vector.shape_cast %1 : vector<32x1xf32> to vector<1x32x1xf32>
    %153 = vector.broadcast %152 : vector<1x32x1xf32> to vector<7x32x128xf32>
    %154 = arith.addf %151, %153 : vector<7x32x128xf32>
    %155 = vector.shape_cast %6 : vector<32x1xf32> to vector<1x32x1xf32>
    %156 = vector.shape_cast %7 : vector<32x1xf32> to vector<1x32x1xf32>
    %cst_42 = arith.constant dense<0.000000e+00> : vector<7x128xf32>
    %157 = vector.multi_reduction <add>, %154, %cst_42 [1] : vector<7x32x128xf32> to vector<7x128xf32>
    %158 = vector.shape_cast %157 : vector<7x128xf32> to vector<7x1x128xf32>
    %cst_43 = arith.constant 3.200000e+01 : f32
    %159 = vector.broadcast %cst_43 : f32 to vector<7x1x128xf32>
    %160 = arith.divf %158, %159 : vector<7x1x128xf32>
    %161 = vector.broadcast %160 : vector<7x1x128xf32> to vector<7x32x128xf32>
    %162 = arith.subf %154, %161 : vector<7x32x128xf32>
    %163 = vector.broadcast %160 : vector<7x1x128xf32> to vector<7x32x128xf32>
    %164 = arith.subf %154, %163 : vector<7x32x128xf32>
    %165 = arith.mulf %162, %164 : vector<7x32x128xf32>
    %cst_44 = arith.constant dense<0.000000e+00> : vector<7x128xf32>
    %166 = vector.multi_reduction <add>, %165, %cst_44 [1] : vector<7x32x128xf32> to vector<7x128xf32>
    %167 = vector.shape_cast %166 : vector<7x128xf32> to vector<7x1x128xf32>
    %cst_45 = arith.constant 3.200000e+01 : f32
    %168 = vector.broadcast %cst_45 : f32 to vector<7x1x128xf32>
    %169 = arith.divf %167, %168 : vector<7x1x128xf32>
    %170 = vector.broadcast %160 : vector<7x1x128xf32> to vector<7x32x128xf32>
    %171 = arith.subf %154, %170 : vector<7x32x128xf32>
    %cst_46 = arith.constant 9.99999974E-6 : f32
    %172 = vector.broadcast %cst_46 : f32 to vector<7x1x128xf32>
    %173 = arith.addf %169, %172 : vector<7x1x128xf32>
    %174 = math.rsqrt %173 : vector<7x1x128xf32>
    %175 = vector.broadcast %174 : vector<7x1x128xf32> to vector<7x32x128xf32>
    %176 = arith.mulf %171, %175 : vector<7x32x128xf32>
    %177 = vector.broadcast %155 : vector<1x32x1xf32> to vector<7x32x128xf32>
    %178 = arith.mulf %176, %177 : vector<7x32x128xf32>
    %179 = vector.broadcast %156 : vector<1x32x1xf32> to vector<7x32x128xf32>
    %180 = arith.addf %178, %179 : vector<7x32x128xf32>
    %c0_47 = arith.constant 0 : index
    %c0_48 = arith.constant 0 : index
    %181 = vector.load %arg6[%c0_47, %c0_48] : memref<448x224xbf16, #tpu.memory_space<vmem>>, vector<448x224xbf16>
    %182 = vector.shape_cast %180 : vector<7x32x128xf32> to vector<224x128xf32>
    %183 = arith.truncf %182 : vector<224x128xf32> to vector<224x128xbf16>
    %cst_49 = arith.constant dense<0.000000e+00> : vector<448x128xf32>
    %184 = tpu.matmul %181, %183, %cst_49 {dimension_numbers = #tpu.dot_dimension_numbers<[1], [0], [0], [1], [0, 0, 1, 1], [], []>} : vector<448x224xbf16>, vector<224x128xbf16>, vector<448x128xf32> -> vector<448x128xf32>
    %185 = vector.shape_cast %184 : vector<448x128xf32> to vector<7x64x128xf32>
    %186 = vector.shape_cast %2 : vector<64x1xf32> to vector<1x64x1xf32>
    %187 = vector.broadcast %186 : vector<1x64x1xf32> to vector<7x64x128xf32>
    %188 = arith.addf %185, %187 : vector<7x64x128xf32>
    %cst_50 = arith.constant 0.000000e+00 : f32
    %189 = vector.broadcast %cst_50 : f32 to vector<7x64x128xf32>
    %190 = arith.maximumf %188, %189 : vector<7x64x128xf32>
    %c0_51 = arith.constant 0 : index
    %c0_52 = arith.constant 0 : index
    %191 = vector.load %arg7[%c0_51, %c0_52] : memref<224x448xbf16, #tpu.memory_space<vmem>>, vector<224x448xbf16>
    %192 = vector.shape_cast %190 : vector<7x64x128xf32> to vector<448x128xf32>
    %193 = arith.truncf %192 : vector<448x128xf32> to vector<448x128xbf16>
    %cst_53 = arith.constant dense<0.000000e+00> : vector<224x128xf32>
    %194 = tpu.matmul %191, %193, %cst_53 {dimension_numbers = #tpu.dot_dimension_numbers<[1], [0], [0], [1], [0, 0, 1, 1], [], []>} : vector<224x448xbf16>, vector<448x128xbf16>, vector<224x128xf32> -> vector<224x128xf32>
    %195 = vector.shape_cast %194 : vector<224x128xf32> to vector<7x32x128xf32>
    %196 = arith.addf %154, %195 : vector<7x32x128xf32>
    %197 = vector.shape_cast %3 : vector<32x1xf32> to vector<1x32x1xf32>
    %198 = vector.broadcast %197 : vector<1x32x1xf32> to vector<7x32x128xf32>
    %199 = arith.addf %196, %198 : vector<7x32x128xf32>
    %200 = vector.extract_strided_slice %199 {offsets = [0, 0, 0], sizes = [1, 32, 128], strides = [1, 1, 1]} : vector<7x32x128xf32> to vector<1x32x128xf32>
    %201 = vector.shape_cast %200 : vector<1x32x128xf32> to vector<32x128xf32>
    %cst_54 = arith.constant dense<0.000000e+00> : vector<128xf32>
    %202 = vector.multi_reduction <add>, %201, %cst_54 [0] : vector<32x128xf32> to vector<128xf32>
    %203 = vector.shape_cast %202 : vector<128xf32> to vector<1x128xf32>
    %cst_55 = arith.constant 3.200000e+01 : f32
    %204 = vector.broadcast %cst_55 : f32 to vector<1x128xf32>
    %205 = arith.divf %203, %204 : vector<1x128xf32>
    %206 = vector.broadcast %205 : vector<1x128xf32> to vector<32x128xf32>
    %207 = arith.subf %201, %206 : vector<32x128xf32>
    %208 = vector.broadcast %205 : vector<1x128xf32> to vector<32x128xf32>
    %209 = arith.subf %201, %208 : vector<32x128xf32>
    %210 = arith.mulf %207, %209 : vector<32x128xf32>
    %cst_56 = arith.constant dense<0.000000e+00> : vector<128xf32>
    %211 = vector.multi_reduction <add>, %210, %cst_56 [0] : vector<32x128xf32> to vector<128xf32>
    %212 = vector.shape_cast %211 : vector<128xf32> to vector<1x128xf32>
    %cst_57 = arith.constant 3.200000e+01 : f32
    %213 = vector.broadcast %cst_57 : f32 to vector<1x128xf32>
    %214 = arith.divf %212, %213 : vector<1x128xf32>
    %215 = vector.broadcast %205 : vector<1x128xf32> to vector<32x128xf32>
    %216 = arith.subf %201, %215 : vector<32x128xf32>
    %cst_58 = arith.constant 9.99999974E-6 : f32
    %217 = vector.broadcast %cst_58 : f32 to vector<1x128xf32>
    %218 = arith.addf %214, %217 : vector<1x128xf32>
    %219 = math.rsqrt %218 : vector<1x128xf32>
    %220 = vector.broadcast %219 : vector<1x128xf32> to vector<32x128xf32>
    %221 = arith.mulf %216, %220 : vector<32x128xf32>
    %222 = vector.broadcast %8 : vector<32x1xf32> to vector<32x128xf32>
    %223 = arith.mulf %221, %222 : vector<32x128xf32>
    %224 = vector.broadcast %9 : vector<32x1xf32> to vector<32x128xf32>
    %225 = arith.addf %223, %224 : vector<32x128xf32>
    %c0_59 = arith.constant 0 : index
    %c0_60 = arith.constant 0 : index
    %226 = vector.load %arg8[%c0_59, %c0_60] : memref<1x32xf32, #tpu.memory_space<vmem>>, vector<1x32xf32>
    %cst_61 = arith.constant dense<0.000000e+00> : vector<1x128xf32>
    %227 = tpu.matmul %226, %225, %cst_61 {dimension_numbers = #tpu.dot_dimension_numbers<[1], [0], [0], [1], [0, 0, 1, 1], [], []>} : vector<1x32xf32>, vector<32x128xf32>, vector<1x128xf32> -> vector<1x128xf32>
    %228 = vector.broadcast %10 : vector<1x1xf32> to vector<1x128xf32>
    %229 = arith.addf %227, %228 : vector<1x128xf32>
    %c0_62 = arith.constant 0 : index
    %c0_63 = arith.constant 0 : index
    %230 = vector.load %arg9[%c0_62, %c0_63] : memref<1x128xf32, #tpu.memory_space<vmem>>, vector<1x128xf32>
    tpu.vector_store %arg9[%c0_62, %c0_63], %229 {strides = array<i32>} : memref<1x128xf32, #tpu.memory_space<vmem>>, vector<1x128xf32>,
    return
  }
  func.func @transform_0(%arg0: i32) -> (i32, i32) {
    %c0_i32 = arith.constant 0 : i32
    %c0_i32_0 = arith.constant 0 : i32
    return %c0_i32, %arg0 : i32, i32
  }
  func.func @transform_1(%arg0: i32) -> (i32, i32) {
    %c0_i32 = arith.constant 0 : i32
    %c0_i32_0 = arith.constant 0 : i32
    %c0_i32_1 = arith.constant 0 : i32
    return %c0_i32, %c0_i32_0 : i32, i32
  }
  func.func @transform_2(%arg0: i32) -> (i32, i32) {
    %c0_i32 = arith.constant 0 : i32
    %c0_i32_0 = arith.constant 0 : i32
    %c0_i32_1 = arith.constant 0 : i32
    return %c0_i32, %c0_i32_0 : i32, i32
  }
  func.func @transform_3(%arg0: i32) -> (i32, i32) {
    %c0_i32 = arith.constant 0 : i32
    %c0_i32_0 = arith.constant 0 : i32
    %c0_i32_1 = arith.constant 0 : i32
    return %c0_i32, %c0_i32_0 : i32, i32
  }
  func.func @transform_4(%arg0: i32) -> (i32, i32) {
    %c0_i32 = arith.constant 0 : i32
    %c0_i32_0 = arith.constant 0 : i32
    %c0_i32_1 = arith.constant 0 : i32
    return %c0_i32, %c0_i32_0 : i32, i32
  }
  func.func @transform_5(%arg0: i32) -> (i32, i32) {
    %c0_i32 = arith.constant 0 : i32
    %c0_i32_0 = arith.constant 0 : i32
    %c0_i32_1 = arith.constant 0 : i32
    return %c0_i32, %c0_i32_0 : i32, i32
  }
  func.func @transform_6(%arg0: i32) -> (i32, i32) {
    %c0_i32 = arith.constant 0 : i32
    %c0_i32_0 = arith.constant 0 : i32
    %c0_i32_1 = arith.constant 0 : i32
    return %c0_i32, %c0_i32_0 : i32, i32
  }
  func.func @transform_7(%arg0: i32) -> (i32, i32) {
    %c0_i32 = arith.constant 0 : i32
    %c0_i32_0 = arith.constant 0 : i32
    %c0_i32_1 = arith.constant 0 : i32
    return %c0_i32, %c0_i32_0 : i32, i32
  }
  func.func @transform_8(%arg0: i32) -> (i32, i32) {
    %c0_i32 = arith.constant 0 : i32
    %c0_i32_0 = arith.constant 0 : i32
    return %c0_i32, %arg0 : i32, i32
  }
}

</mosaic_0001>

<bundles_post_ra>
// kernel: tpu_custom_call.1
= control target key start
LH: loop header
LB: loop body
LE: loop exit
PB: predicated region body
PF: predicated region fallthrough
CT: control target
= control target key end

     0   :  { %13 = vsyncpa [#allocation3], 0  ;;  %s16007_s0 = inlined_call_operand.vmem [shape: f32[36,128], index: 0, kind: input, shape index: {}]   ;;  %s16008_s1 = inlined_call_operand.vmem [shape: f32[417,1], index: 1, kind: input, shape index: {}]   ;;  %s16009_s2 = inlined_call_operand.vmem [shape: f32[224,36], index: 2, kind: input, shape index: {}]   ;;  %s16010_s3 = inlined_call_operand.vmem [shape: bf16[672,224], index: 3, kind: input, shape index: {}]   ;;  %s16011_s4 = inlined_call_operand.hbm [shape: bf16[224,224], index: 4, kind: input, shape index: {}]   ;;  %s16012_s5 = inlined_call_operand.hbm [shape: bf16[448,224], index: 5, kind: input, shape index: {}]   ;;  %s16013_s6 = inlined_call_operand.hbm [shape: bf16[224,448], index: 6, kind: input, shape index: {}]   ;;  %s16014_s7 = inlined_call_operand.vmem [shape: f32[1,32], index: 7, kind: input, shape index: {}]   ;;  %s16015_s8 = inlined_call_operand.hbm [shape: f32[1,128], index: 8, kind: output, shape index: {}]  }
   0x1   :  { %14 = vsyncpa [#allocation6], 0 }
   0x2   :  { %15 = vsyncpa [#allocation4], 0  ;;  %s41_s29 = sshll.u32 %s16012_s5, 4  ;;  %s10346_s30 = smov [#allocation5]   ;;  %s42_s29 = int_to_ptr.hbm [resolvable:$true] %s41_s29 }
   0x3   :  { %s43_s9 = sshll.u32 %s10346_s30, 4  ;;  %s28_s12 = sshll.u32 %s16011_s4, 4  ;;  %s44_s9 = int_to_ptr.vmem [resolvable:$true] %s43_s9  ;;  %s29_s12 = int_to_ptr.hbm [resolvable:$true] %s28_s12 }
   0x4   :  { %s10347_s13 = smov 128   ;;  %s10348_s14 = smov 8  }
   0x5   :  { %49 = dma.hbm_to_vmem [thread:$0]  %s42_s29, 7168, %s44_s9, [#allocation6], %s10347_s13, %s10347_s13, %s10348_s14  }
   0x6   :  { %s10349_s15 = smov [#allocation2]   ;;  %s54_s19 = sshll.u32 %s16013_s6, 4  ;;  %s55_s19 = int_to_ptr.hbm [resolvable:$true] %s54_s19 }
   0x7   :  { %s30_s16 = sshll.u32 %s10349_s15, 4  ;;  %s10350_s5 = smov [#allocation7]   ;;  %s31_s16 = int_to_ptr.vmem [resolvable:$true] %s30_s16 }
   0x8   :  { %36 = dma.hbm_to_vmem [thread:$0]  %s29_s12, 3584, %s31_s16, [#allocation3], %s10347_s13, %s10347_s13, %s10348_s14  }
   0x9   :  { %s56_s20 = sshll.u32 %s10350_s5, 4  ;;  %s10351_s21 = smov 256   ;;  %s57_s20 = int_to_ptr.vmem [resolvable:$true] %s56_s20 }
   0xa   :  { %s10352_s22 = smov 16  }
   0xb   :  { %62 = dma.hbm_to_vmem [thread:$0]  %s55_s19, 7168, %s57_s20, [#allocation6], %s10351_s21, %s10351_s21, %s10352_s22  }
   0xc   :  { %10340 = dma.done.wait [#allocation3], 3584  }
   0xd   :  { %10341 = vsyncadd [#allocation3], 4294963712 }
   0xe   :  { %10342 = dma.done.wait [#allocation6], 14336  }
   0xf   :  { %10343 = vsyncadd [#allocation6], 4294952960  ;;  %v10353_v0 = vmov 0   ;;  %vm249_vm0 = vcmask 1043456   ;;  %v163_v1 = vld [vmem:[%s16007_s0 + $0x20] sm:$0xf] }
  0x10   :  { %9762 = vset.pattern.permute.xlu1 %v10353_v0  ;;  %9761 = vset.pattern.permute.xlu0 %v10353_v0  ;;  %v112_v2 = vld [vmem:[%s16008_s1 + $0x110] sm:$0xff]  ;;  %v162_v4 = vld [vmem:[%s16007_s0 + $0x18] sm:$0xff]  ;;  %v160_v6 = vld [vmem:[%s16007_s0 + $0x8] sm:$0xff]  ;;  %vm164_vm1 = vcmask 293888   ;;  %s8477_s16 = sshll.u32 %s16015_s8, 4  ;;  %s8478_s16 = int_to_ptr.hbm [resolvable:$true] %s8477_s16 }
  0x11   :  { %9763 = vset.pattern.permute.xlu2 %v10353_v0  ;;  %v108_v3 = vld [vmem:[%s16008_s1 + $0xf0] sm:$0xff]  ;;  %8488 = vmatpush.msk.msra.mxu0 %vm249_vm0, %v163_v1  ;;  %v159_v7 = vld [vmem:[%s16007_s0] sm:$0xff]  ;;  %v113_v8 = vld [vmem:[%s16008_s1 + $0x118] sm:$0xff] }
  0x12   :  { %9736 = vmatpush.msk.msra.mxu1 %vm249_vm0, %v163_v1  ;;  %9738 = vmatpush.msk.msra.mxu3 %vm249_vm0, %v163_v1  ;;  %v161_v5 = vld [vmem:[%s16007_s0 + $0x10] sm:$0xff]  ;;  %v109_v9 = vld [vmem:[%s16008_s1 + $0xf8] sm:$0xff]  ;;  %v131_v10 = vld [vmem:[%s16009_s2] sm:$0xff] }
  0x13   :  { %722 = vperm.xlu1 %9762, %v112_v2   ;;  %674 = vperm.xlu0 %9761, %v108_v3   ;;  %v140_v11 = vld [vmem:[%s16009_s2 + $0x48] sm:$0xff]  ;;  %v151_v12 = vld [vmem:[%s16009_s2 + $0xa0] sm:$0xff]  ;;  %v141_v18 = vld [vmem:[%s16009_s2 + $0x50] sm:$0xff] }
  0x14   :  { %265 = vmatpush.msra.mxu0 %v162_v4  ;;  %9739 = vmatpush.msra.mxu1 %v162_v4  ;;  %v106_v13 = vld [vmem:[%s16008_s1 + $0xe0] sm:$0xff]  ;;  %v148_v14 = vld [vmem:[%s16009_s2 + $0x88] sm:$0xff]  ;;  %v149_v21 = vld [vmem:[%s16009_s2 + $0x90] sm:$0xff] }
  0x15   :  { %9741 = vmatpush.msra.mxu3 %v162_v4  ;;  %9737 = vmatpush.msk.msra.mxu2 %vm249_vm0, %v163_v1  ;;  %v111_v15 = vld [vmem:[%s16008_s1 + $0x108] sm:$0xff]  ;;  %v110_v16 = vld [vmem:[%s16008_s1 + $0x100] sm:$0xff]  ;;  %v84_v22 = vld [vmem:[%s16008_s1 + $0x30] sm:$0xff] }
  0x16   :  { %266 = vmatpush.msra.mxu0 %v161_v5  ;;  %9742 = vmatpush.msra.mxu1 %v161_v5  ;;  %v132_v17 = vld [vmem:[%s16009_s2 + $0x8] sm:$0xff]  ;;  %v81_v23 = vld [vmem:[%s16008_s1 + $0x18] sm:$0xff]  ;;  %v133_v24 = vld [vmem:[%s16009_s2 + $0x10] sm:$0xff] }
  0x17   :  { %9744 = vmatpush.msra.mxu3 %v161_v5  ;;  %9740 = vmatpush.msra.mxu2 %v162_v4  ;;  %v152_v19 = vld [vmem:[%s16009_s2 + $0xa8] sm:$0xff]  ;;  %v142_v25 = vld [vmem:[%s16009_s2 + $0x58] sm:$0xff]  ;;  %v153_v26 = vld [vmem:[%s16009_s2 + $0xb0] sm:$0xff] }
  0x18   :  { %267 = vmatpush.msra.mxu0 %v160_v6  ;;  %9745 = vmatpush.msra.mxu1 %v160_v6  ;;  %v107_v20 = vld [vmem:[%s16008_s1 + $0xe8] sm:$0xff]  ;;  %v80_v27 = vld [vmem:[%s16008_s1 + $0x10] sm:$0xff]  ;;  %v150_v28 = vld [vmem:[%s16009_s2 + $0x98] sm:$0xff] }
  0x19   :  { %9747 = vmatpush.msra.mxu3 %v160_v6  ;;  %9743 = vmatpush.msra.mxu2 %v161_v5  ;;  %v79_v29 = vld [vmem:[%s16008_s1 + $0x8] sm:$0xff]  ;;  %v78_v30 = vld [vmem:[%s16008_s1] sm:$0xff]  ;;  %v134_v31 = vld [vmem:[%s16009_s2 + $0x18] sm:$0xff] }
  0x1a   :  { %268 = vmatpush.msra.mxu0 %v159_v7  ;;  %9748 = vmatpush.msra.mxu1 %v159_v7  ;;  %v143_v32 = vld [vmem:[%s16009_s2 + $0x60] sm:$0xff]  ;;  %v154_v33 = vld [vmem:[%s16009_s2 + $0xb8] sm:$0xff]  ;;  %v88_v35 = vld [vmem:[%s16008_s1 + $0x50] sm:$0xff] }
  0x1b   :  { %9750 = vmatpush.msra.mxu3 %v159_v7  ;;  %727 = vperm.xlu1 %9762, %v113_v8   ;;  %v85_v34 = vld [vmem:[%s16008_s1 + $0x38] sm:$0xff]  ;;  %v83_v36 = vld [vmem:[%s16008_s1 + $0x28] sm:$0xff]  ;;  %v135_v37 = vld [vmem:[%s16009_s2 + $0x20] sm:$0xff] }
  0x1c   :  { %679 = vperm.xlu0 %9761, %v109_v9   ;;  %8489 = vmatmul.msk.f32.vlgmr.msra.gmra.mxu0 %vm164_vm1, %v131_v10  ;;  %v144_v38 = vld [vmem:[%s16009_s2 + $0x68] sm:$0xff]  ;;  %v155_v39 = vld [vmem:[%s16009_s2 + $0xc0] sm:$0xff]  ;;  %v145_v44 = vld [vmem:[%s16009_s2 + $0x70] sm:$0xff] }
  0x1d   :  { %8498 = vmatmul.msk.f32.vlgmr.msra.gmra.mxu1 %vm164_vm1, %v140_v11  ;;  %8509 = vmatmul.msk.f32.vlgmr.msra.gmra.mxu3 %vm164_vm1, %v151_v12  ;;  %v82_v40 = vld [vmem:[%s16008_s1 + $0x20] sm:$0xff]  ;;  %v87_v41 = vld [vmem:[%s16008_s1 + $0x48] sm:$0xff]  ;;  %v89_v46 = vld [vmem:[%s16008_s1 + $0x58] sm:$0xff] }
  0x1e   :  { %664 = vperm.xlu2 %9763, %v106_v13   ;;  %9746 = vmatpush.msra.mxu2 %v160_v6  ;;  %v86_v42 = vld [vmem:[%s16008_s1 + $0x40] sm:$0xff]  ;;  %v136_v43 = vld [vmem:[%s16009_s2 + $0x28] sm:$0xff]  ;;  %v92_v47 = vld [vmem:[%s16008_s1 + $0x70] sm:$0xff] }
  0x1f   :  { %v156_v45 = vld [vmem:[%s16009_s2 + $0xc8] sm:$0xff]  ;;  %v137_v49 = vld [vmem:[%s16009_s2 + $0x30] sm:$0xff]  ;;  %v146_v50 = vld [vmem:[%s16009_s2 + $0x78] sm:$0xff] }
  0x20   :  { %9749 = vmatpush.msra.mxu2 %v159_v7  ;;  %v91_v48 = vld [vmem:[%s16008_s1 + $0x68] sm:$0xff]  ;;  %v157_v51 = vld [vmem:[%s16009_s2 + $0xd0] sm:$0xff]  ;;  %v90_v52 = vld [vmem:[%s16008_s1 + $0x60] sm:$0xff] }
  0x21   :  { %8506 = vmatmul.msk.f32.vlgmr.msra.gmra.mxu2 %vm164_vm1, %v148_v14  ;;  %v117_v53 = vld [vmem:[%s16008_s1 + $0x138] sm:$0xff]  ;;  %v116_v54 = vld [vmem:[%s16008_s1 + $0x130] sm:$0xff]  ;;  %v147_v56 = vld [vmem:[%s16009_s2 + $0x80] sm:$0xff] }
  0x22   :  { %v138_v55 = vld [vmem:[%s16009_s2 + $0x38] sm:$0xff]  ;;  %v114_v59 = vld [vmem:[%s16008_s1 + $0x120] sm:$0xff]  ;;  %v120_v62 = vld [vmem:[%s16008_s1 + $0x150] sm:$0xff] }
  0x23   :  { %717 = vperm.xlu1 %9762, %v111_v15   ;;  %v158_v57 = vld [vmem:[%s16009_s2 + $0xd8] sm:$0xff]  ;;  %v139_v61 = vld [vmem:[%s16009_s2 + $0x40] sm:$0xff]  ;;  %v119_v63 = vld [vmem:[%s16008_s1 + $0x148] sm:$0xff] }
  0x24   :  { %712 = vperm.xlu0 %9761, %v110_v16   ;;  %8490 = vmatmul.msk.f32.gmra.mxu0 %vm164_vm1, %v132_v17  ;;  %v93_v58 = vld [vmem:[%s16008_s1 + $0x78] sm:$0xff]  ;;  %v118_v0 = vld [vmem:[%s16008_s1 + $0x140] sm:$0xff]  ;;  %v115_v1 = vld [vmem:[%s16008_s1 + $0x128] sm:$0xff] }
  0x25   :  { %8499 = vmatmul.msk.f32.gmra.mxu1 %vm164_vm1, %v141_v18  ;;  %8510 = vmatmul.msk.f32.gmra.mxu3 %vm164_vm1, %v152_v19  ;;  %v121_v60 = vld [vmem:[%s16008_s1 + $0x158] sm:$0xff]  ;;  %v98_v2 = vld [vmem:[%s16008_s1 + $0xa0] sm:$0xff]  ;;  %v100_v4 = vld [vmem:[%s16008_s1 + $0xb0] sm:$0xff] }
  0x26   :  { %669 = vperm.xlu2 %9763, %v107_v20   ;;  %v101_v3 = vld [vmem:[%s16008_s1 + $0xb8] sm:$0xff]  ;;  %v96_v6 = vld [vmem:[%s16008_s1 + $0x90] sm:$0xff]  ;;  %v99_v7 = vld [vmem:[%s16008_s1 + $0xa8] sm:$0xff] }
  0x27   :  { %v97_v5 = vld [vmem:[%s16008_s1 + $0x98] sm:$0xff]  ;;  %v102_v8 = vld [vmem:[%s16008_s1 + $0xc0] sm:$0xff]  ;;  %v95_v9 = vld [vmem:[%s16008_s1 + $0x88] sm:$0xff] }
  0x28   :  { %v94_v10 = vld [vmem:[%s16008_s1 + $0x80] sm:$0xff]  ;;  %v105_v11 = vld [vmem:[%s16008_s1 + $0xd8] sm:$0xff]  ;;  %v104_v12 = vld [vmem:[%s16008_s1 + $0xd0] sm:$0xff] }
  0x29   :  { %8507 = vmatmul.msk.f32.gmra.mxu2 %vm164_vm1, %v149_v21  ;;  %v103_v13 = vld [vmem:[%s16008_s1 + $0xc8] sm:$0xff]  ;;  %v129_v14 = vld [vmem:[%s16008_s1 + $0x198] sm:$0xff]  ;;  %v124_v15 = vld [vmem:[%s16008_s1 + $0x170] sm:$0xff] }
  0x2a   :  { %v125_v16 = vld [vmem:[%s16008_s1 + $0x178] sm:$0xff]  ;;  %v122_v17 = vld [vmem:[%s16008_s1 + $0x160] sm:$0xff]  ;;  %v128_v18 = vld [vmem:[%s16008_s1 + $0x190] sm:$0xff] }
  0x2b   :  { %1831 = vperm.xlu1 %9762, %v84_v22   ;;  %v123_v19 = vld [vmem:[%s16008_s1 + $0x168] sm:$0xff]  ;;  %v130_v20 = vld [vmem:[%s16008_s1 + $0x1a0] sm:$0x1] }
  0x2c   :  { %1816 = vperm.xlu0 %9761, %v81_v23   ;;  %8491 = vmatmul.msk.f32.gmra.mxu0 %vm164_vm1, %v133_v24  ;;  %v126_v21 = vld [vmem:[%s16008_s1 + $0x180] sm:$0xff]  ;;  %v127_v24 = vld [vmem:[%s16008_s1 + $0x188] sm:$0xff] }
  0x2d   :  { %8500 = vmatmul.msk.f32.gmra.mxu1 %vm164_vm1, %v142_v25  ;;  %8511 = vmatmul.msk.f32.gmra.mxu3 %vm164_vm1, %v153_v26 }
  0x2e   :  { %1811 = vperm.xlu2 %9763, %v80_v27  }
  0x31   :  { %8508 = vmatmul.msk.f32.gmra.mxu2 %vm164_vm1, %v150_v28  ;;  %v10354_v28 = vmov 32.0  }
  0x32   :  { %9764 = vrcp.f32 %v10354_v28 }
  0x33   :  { %1806 = vperm.xlu1 %9762, %v79_v29  }
  0x34   :  { %1801 = vperm.xlu0 %9761, %v78_v30   ;;  %8492 = vmatmul.msk.f32.gmra.mxu0 %vm164_vm1, %v134_v31 }
  0x35   :  { %8501 = vmatmul.msk.f32.gmra.mxu1 %vm164_vm1, %v143_v32  ;;  %8512 = vmatmul.msk.f32.gmra.mxu3 %vm164_vm1, %v154_v33 }
  0x36   :  { %1836 = vperm.xlu2 %9763, %v85_v34  }
  0x38   :  { %v9765_v32 = vpop.eup %9764 }
  0x39   :  { %v418_v33 = vmul.f32 32.0, %v9765_v32  ;;  %vm422_vm2 = vweird.f32 %v9765_v32 }
  0x3b   :  { %1851 = vperm.xlu1 %9762, %v88_v35  }
  0x3c   :  { %1826 = vperm.xlu0 %9761, %v83_v36   ;;  %8493 = vmatmul.msk.f32.gmra.mxu0 %vm164_vm1, %v135_v37 }
  0x3d   :  { %8502 = vmatmul.msk.f32.gmra.mxu1 %vm164_vm1, %v144_v38  ;;  %8513 = vmatmul.msk.f32.gmra.mxu3 %vm164_vm1, %v155_v39  ;;  %v419_v38 = vsub.f32 1.0, %v418_v33 }
  0x3e   :  { %1821 = vperm.xlu2 %9763, %v82_v40  }
  0x43   :  { %1846 = vperm.xlu1 %9762, %v87_v41  }
  0x44   :  { %1841 = vperm.xlu0 %9761, %v86_v42   ;;  %8494 = vmatmul.msk.f32.gmra.mxu0 %vm164_vm1, %v136_v43  ;;  %v420_v43 = vmul.f32 %v9765_v32, %v419_v38 }
  0x45   :  { %8503 = vmatmul.msk.f32.gmra.mxu1 %vm164_vm1, %v145_v44  ;;  %8514 = vmatmul.msk.f32.gmra.mxu3 %vm164_vm1, %v156_v45 }
  0x46   :  { %1856 = vperm.xlu2 %9763, %v89_v46  }
  0x4b   :  { %6418 = vperm.xlu1 %9762, %v92_v47  }
  0x4c   :  { %6413 = vperm.xlu0 %9761, %v91_v48   ;;  %8495 = vmatmul.msk.f32.gmra.mxu0 %vm164_vm1, %v137_v49  ;;  %v421_v48 = vadd.f32 %v9765_v32, %v420_v43 }
  0x4d   :  { %8504 = vmatmul.msk.f32.gmra.mxu1 %vm164_vm1, %v146_v50  ;;  %8515 = vmatmul.msk.f32.gmra.mxu3 %vm164_vm1, %v157_v51 }
  0x4e   :  { %6408 = vperm.xlu2 %9763, %v90_v52  }
  0x53   :  { %6772 = vperm.xlu1 %9762, %v117_v53  }
  0x54   :  { %6767 = vperm.xlu0 %9761, %v116_v54   ;;  %8496 = vmatmul.msk.f32.gmra.mxu0 %vm164_vm1, %v138_v55  ;;  %v10736_v55 = vsel %vm422_vm2, %v9765_v32, %v421_v48 }
  0x55   :  { %8505 = vmatmul.msk.f32.gmra.mxu1 %vm164_vm1, %v147_v56  ;;  %8516 = vmatmul.msk.f32.gmra.mxu3 %vm164_vm1, %v158_v57  ;;  %16400 = vst [vmem:[#allocation26_spill] sm:$0xff] %v10736_v55 }
  0x56   :  { %6423 = vperm.xlu2 %9763, %v93_v58  }
  0x5b   :  { %6757 = vperm.xlu1 %9762, %v114_v59  }
  0x5c   :  { %6820 = vperm.xlu0 %9761, %v121_v60   ;;  %8497 = vmatmul.msk.f32.gmra.mxu0 %vm164_vm1, %v139_v61 }
  0x5e   :  { %6815 = vperm.xlu2 %9763, %v120_v62  }
  0x63   :  { %6810 = vperm.xlu1 %9762, %v119_v63  }
  0x64   :  { %6805 = vperm.xlu0 %9761, %v118_v0  }
  0x66   :  { %6762 = vperm.xlu2 %9763, %v115_v1  }
  0x6b   :  { %7577 = vperm.xlu1 %9762, %v98_v2  }
  0x6c   :  { %7592 = vperm.xlu0 %9761, %v101_v3  }
  0x6e   :  { %7587 = vperm.xlu2 %9763, %v100_v4  }
  0x73   :  { %7572 = vperm.xlu1 %9762, %v97_v5  }
  0x74   :  { %7567 = vperm.xlu0 %9761, %v96_v6  }
  0x76   :  { %7582 = vperm.xlu2 %9763, %v99_v7  }
  0x7b   :  { %8326 = vperm.xlu1 %9762, %v102_v8  }
  0x7c   :  { %7562 = vperm.xlu0 %9761, %v95_v9  }
  0x7e   :  { %7557 = vperm.xlu2 %9763, %v94_v10  }
  0x83   :  { %8341 = vperm.xlu1 %9762, %v105_v11  }
  0x84   :  { %8336 = vperm.xlu0 %9761, %v104_v12  }
  0x86   :  { %8331 = vperm.xlu2 %9763, %v103_v13  }
  0x8b   :  { %8432 = vperm.xlu1 %9762, %v129_v14  }
  0x8c   :  { %8403 = vperm.xlu0 %9761, %v124_v15  }
  0x8e   :  { %8408 = vperm.xlu2 %9763, %v125_v16  }
  0x93   :  { %8393 = vperm.xlu1 %9762, %v122_v17  }
  0x94   :  { %8427 = vperm.xlu0 %9761, %v128_v18  }
  0x96   :  { %8398 = vperm.xlu2 %9763, %v123_v19  }
  0x99   :  { %v10697_v22 = vpop.f32.mrf.mxu0 }
  0x9a   :  { %16386 = vst [vmem:[#allocation12_spill] sm:$0xff] %v10697_v22  ;;  %v10699_v23 = vpop.f32.mrf.mxu1 }
  0x9b   :  { %16387 = vst [vmem:[#allocation13_spill] sm:$0xff] %v10699_v23  ;;  %8442 = vperm.xlu1 %9762, %v130_v20  }
  0x9c   :  { %8417 = vperm.xlu0 %9761, %v126_v21  }
  0x9e   :  { %8422 = vperm.xlu2 %9763, %v127_v24  }
  0xa0   :  { %v10704_v25 = vpop.f32.mrf.mxu3 }
  0xa1   :  { %16388 = vst [vmem:[#allocation14_spill] sm:$0xff] %v10704_v25  ;;  %v10706_v26 = vpop.f32.mrf.mxu0 }
  0xa2   :  { %16389 = vst [vmem:[#allocation15_spill] sm:$0xff] %v10706_v26  ;;  %v10708_v27 = vpop.f32.mrf.mxu1  ;;  %v354_v34 = vadd.f32 %v10706_v26, %v10697_v22 }
  0xa3   :  { %16390 = vst [vmem:[#allocation16_spill] sm:$0xff] %v10708_v27 }
  0xa4   :  { %v10738_v58 = vpop.f32.mrf.mxu2 }
  0xa5   :  { %16401 = vst [vmem:[#allocation27_spill] sm:$0xff] %v10738_v58 }
  0xa8   :  { %v10710_v29 = vpop.f32.mrf.mxu3 }
  0xa9   :  { %16391 = vst [vmem:[#allocation17_spill] sm:$0xff] %v10710_v29  ;;  %v10712_v30 = vpop.f32.mrf.mxu0  ;;  %v399_v42 = vadd.f32 %v10710_v29, %v10704_v25 }
  0xaa   :  { %16392 = vst [vmem:[#allocation18_spill] sm:$0xff] %v10712_v30  ;;  %v10714_v31 = vpop.f32.mrf.mxu1  ;;  %v355_v36 = vadd.f32 %v354_v34, %v10712_v30 }
  0xab   :  { %16393 = vst [vmem:[#allocation19_spill] sm:$0xff] %v10714_v31 }
  0xac   :  { %v10771_v15 = vpop.f32.mrf.mxu2 }
  0xad   :  { %16406 = vst [vmem:[#allocation32_spill] sm:$0xff] %v10771_v15 }
  0xb0   :  { %v10718_v35 = vpop.f32.mrf.mxu3 }
  0xb1   :  { %16394 = vst [vmem:[#allocation20_spill] sm:$0xff] %v10718_v35  ;;  %v10721_v37 = vpop.f32.mrf.mxu0  ;;  %v400_v45 = vadd.f32 %v399_v42, %v10718_v35 }
  0xb2   :  { %16395 = vst [vmem:[#allocation21_spill] sm:$0xff] %v10721_v37  ;;  %v10723_v39 = vpop.f32.mrf.mxu1  ;;  %v356_v40 = vadd.f32 %v355_v36, %v10721_v37 }
  0xb3   :  { %16396 = vst [vmem:[#allocation22_spill] sm:$0xff] %v10723_v39 }
  0xb4   :  { %v357_v41 = vrot.slane %v356_v40, 4 }
  0xb6   :  { %v358_v44 = vadd.f32 %v357_v41, %v356_v40 }
  0xb8   :  { %v359_v46 = vrot.slane %v358_v44, 2  ;;  %v10729_v47 = vpop.f32.mrf.mxu3 }
  0xb9   :  { %16397 = vst [vmem:[#allocation23_spill] sm:$0xff] %v10729_v47  ;;  %v401_v49 = vadd.f32 %v400_v45, %v10729_v47  ;;  %v10732_v50 = vpop.f32.mrf.mxu0 }
  0xba   :  { %16398 = vst [vmem:[#allocation24_spill] sm:$0xff] %v10732_v50  ;;  %v10734_v51 = vpop.f32.mrf.mxu1  ;;  %v360_v52 = vadd.f32 %v359_v46, %v358_v44 }
  0xbb   :  { %16399 = vst [vmem:[#allocation25_spill] sm:$0xff] %v10734_v51  ;;  %v402_v53 = vrot.slane %v401_v49, 4  ;;  %v381_v9 = vadd.f32 %v10734_v51, %v10723_v39 }
  0xbc   :  { %v361_v54 = vrot.slane %v360_v52, 1 }
  0xbd   :  { %v403_v56 = vadd.f32 %v402_v53, %v401_v49 }
  0xbe   :  { %v362_v57 = vadd.f32 %v361_v54, %v360_v52 }
  0xbf   :  { %v404_v59 = vrot.slane %v403_v56, 2 }
  0xc0   :  { %v424_v60 = vmul.f32 %v10736_v55, %v362_v57  ;;  %v10741_v61 = vpop.f32.mrf.mxu3 }
  0xc1   :  { %16402 = vst [vmem:[#allocation28_spill] sm:$0xff] %v10741_v61  ;;  %v405_v62 = vadd.f32 %v404_v59, %v403_v56  ;;  %v10743_v63 = vpop.f32.mrf.mxu0 }
  0xc2   :  { %16403 = vst [vmem:[#allocation29_spill] sm:$0xff] %v10743_v63  ;;  %v10745_v0 = vpop.f32.mrf.mxu1  ;;  %v10748_v1 = vsub.f32 %v10697_v22, %v424_v60  ;;  %v10751_v2 = vsub.f32 %v10706_v26, %v424_v60  ;;  %v10754_v4 = vsub.f32 %v10712_v30, %v424_v60  ;;  %v10764_v11 = vsub.f32 %v10721_v37, %v424_v60 }
  0xc3   :  { %16404 = vst [vmem:[#allocation30_spill] sm:$0xff] %v10745_v0  ;;  %v406_v3 = vrot.slane %v405_v62, 1  ;;  %v382_v14 = vadd.f32 %v381_v9, %v10745_v0  ;;  %v363_v42 = vadd.f32 %v10743_v63, %v10732_v50 }
  0xc4   :  { %v459_v5 = vmul.f32 %v10748_v1, %v10748_v1  ;;  %v460_v6 = vmul.f32 %v10751_v2, %v10751_v2  ;;  %v461_v12 = vmul.f32 %v10754_v4, %v10754_v4  ;;  %v462_v34 = vmul.f32 %v10764_v11, %v10764_v11 }
  0xc5   :  { %v407_v7 = vadd.f32 %v406_v3, %v405_v62  ;;  %v10812_v62 = vpop.f32.mrf.mxu2 }
  0xc6   :  { %v487_v8 = vadd.f32 %v460_v6, %v459_v5  ;;  %16412 = vst [vmem:[#allocation38_spill] sm:$0xff] %v10812_v62 }
  0xc7   :  { %v429_v10 = vmul.f32 %v10736_v55, %v407_v7 }
  0xc8   :  { %v10768_v13 = vpop.f32.mrf.mxu3  ;;  %v488_v20 = vadd.f32 %v487_v8, %v461_v12 }
  0xc9   :  { %16405 = vst [vmem:[#allocation31_spill] sm:$0xff] %v10768_v13  ;;  %v10773_v16 = vpop.f32.mrf.mxu0  ;;  %v10778_v18 = vsub.f32 %v10704_v25, %v429_v10  ;;  %v10781_v19 = vsub.f32 %v10710_v29, %v429_v10  ;;  %v10785_v24 = vsub.f32 %v10718_v35, %v429_v10  ;;  %v10788_v28 = vsub.f32 %v10729_v47, %v429_v10 }
  0xca   :  { %16407 = vst [vmem:[#allocation33_spill] sm:$0xff] %v10773_v16  ;;  %v10775_v17 = vpop.f32.mrf.mxu1  ;;  %v489_v41 = vadd.f32 %v488_v20, %v462_v34  ;;  %v364_v49 = vadd.f32 %v363_v42, %v10773_v16  ;;  %v408_v8 = vadd.f32 %v10768_v13, %v10741_v61 }
  0xcb   :  { %16408 = vst [vmem:[#allocation34_spill] sm:$0xff] %v10775_v17  ;;  %v383_v21 = vadd.f32 %v382_v14, %v10775_v17  ;;  %v479_v32 = vmul.f32 %v10778_v18, %v10778_v18  ;;  %v480_v33 = vmul.f32 %v10781_v19, %v10781_v19  ;;  %v481_v38 = vmul.f32 %v10785_v24, %v10785_v24 }
  0xcc   :  { %v482_v44 = vmul.f32 %v10788_v28, %v10788_v28  ;;  %v490_v56 = vrot.slane %v489_v41, 4 }
  0xcd   :  { %v384_v36 = vrot.slane %v383_v21, 4  ;;  %v532_v40 = vadd.f32 %v480_v33, %v479_v32 }
  0xce   :  { %v491_v10 = vadd.f32 %v490_v56, %v489_v41 }
  0xcf   :  { %v385_v43 = vadd.f32 %v384_v36, %v383_v21  ;;  %v533_v45 = vadd.f32 %v532_v40, %v481_v38 }
  0xd0   :  { %v10802_v48 = vpop.f32.mrf.mxu3  ;;  %v492_v42 = vrot.slane %v491_v10, 2 }
  0xd1   :  { %v386_v46 = vrot.slane %v385_v43, 2  ;;  %16409 = vst [vmem:[#allocation35_spill] sm:$0xff] %v10802_v48  ;;  %v10805_v52 = vpop.f32.mrf.mxu0  ;;  %v534_v54 = vadd.f32 %v533_v45, %v482_v44  ;;  %v409_v21 = vadd.f32 %v408_v8, %v10802_v48 }
  0xd2   :  { %16410 = vst [vmem:[#allocation36_spill] sm:$0xff] %v10805_v52  ;;  %v10807_v53 = vpop.f32.mrf.mxu1  ;;  %v365_v59 = vadd.f32 %v364_v49, %v10805_v52 }
  0xd3   :  { %16411 = vst [vmem:[#allocation37_spill] sm:$0xff] %v10807_v53  ;;  %v387_v57 = vadd.f32 %v386_v46, %v385_v43  ;;  %v390_v60 = vadd.f32 %v10738_v58, %v10807_v53  ;;  %v535_v3 = vrot.slane %v534_v54, 4 }
  0xd4   :  { %v366_v6 = vrot.slane %v365_v59, 4 }
  0xd5   :  { %v388_v5 = vrot.slane %v387_v57, 1  ;;  %v391_v7 = vadd.f32 %v390_v60, %v10771_v15  ;;  %v536_v9 = vadd.f32 %v535_v3, %v534_v54 }
  0xd6   :  { %v367_v14 = vadd.f32 %v366_v6, %v365_v59 }
  0xd7   :  { %v389_v12 = vadd.f32 %v388_v5, %v387_v57  ;;  %v392_v20 = vadd.f32 %v391_v7, %v10812_v62  ;;  %v537_v38 = vrot.slane %v536_v9, 2 }
  0xd8   :  { %v368_v33 = vrot.slane %v367_v14, 2  ;;  %v10820_v36 = vpop.f32.mrf.mxu3 }
  0xd9   :  { %v427_v32 = vmul.f32 %v10736_v55, %v389_v12  ;;  %v393_v34 = vrot.slane %v392_v20, 4  ;;  %16413 = vst [vmem:[#allocation39_spill] sm:$0xff] %v10820_v36  ;;  %v410_v40 = vadd.f32 %v409_v21, %v10820_v36  ;;  %v10835_v56 = vpop.f32.mrf.mxu0  ;;  %v538_v60 = vadd.f32 %v537_v38, %v536_v9 }
  0xda   :  { %v369_v46 = vadd.f32 %v368_v33, %v367_v14  ;;  %16414 = vst [vmem:[#allocation40_spill] sm:$0xff] %v10835_v56  ;;  %v372_v12 = vadd.f32 %v10699_v23, %v10835_v56  ;;  %v493_v14 = vadd.f32 %v492_v42, %v491_v10 }
  0xdb   :  { %v10824_v43 = vsub.f32 %v10723_v39, %v427_v32  ;;  %v10827_v41 = vsub.f32 %v10734_v51, %v427_v32  ;;  %v10830_v44 = vsub.f32 %v10745_v0, %v427_v32  ;;  %v10833_v45 = vsub.f32 %v10775_v17, %v427_v32 }
  0xdc   :  { %v394_v49 = vadd.f32 %v393_v34, %v392_v20  ;;  %v411_v54 = vrot.slane %v410_v40, 4  ;;  %v370_v3 = vrot.slane %v369_v46, 1  ;;  %v373_v9 = vadd.f32 %v372_v12, %v10708_v27 }
  0xdd   :  { %v471_v57 = vmul.f32 %v10824_v43, %v10824_v43  ;;  %v472_v59 = vmul.f32 %v10827_v41, %v10827_v41  ;;  %v473_v6 = vmul.f32 %v10830_v44, %v10830_v44  ;;  %v474_v20 = vmul.f32 %v10833_v45, %v10833_v45 }
  0xde   :  { %v395_v5 = vrot.slane %v394_v49, 2  ;;  %v412_v8 = vadd.f32 %v411_v54, %v410_v40  ;;  %v371_v21 = vadd.f32 %v370_v3, %v369_v46  ;;  %v539_v38 = vrot.slane %v538_v60, 1 }
  0xdf   :  { %v514_v7 = vadd.f32 %v472_v59, %v471_v57  ;;  %v494_v40 = vrot.slane %v493_v14, 1  ;;  %v374_v42 = vadd.f32 %v373_v9, %v10714_v31 }
  0xe0   :  { %v396_v32 = vadd.f32 %v395_v5, %v394_v49  ;;  %v413_v34 = vrot.slane %v412_v8, 2  ;;  %v425_v47 = vmul.f32 %v10736_v55, %v371_v21  ;;  %v540_v3 = vadd.f32 %v539_v38, %v538_v60 }
  0xe1   :  { %v515_v33 = vadd.f32 %v514_v7, %v473_v6  ;;  %v495_v60 = vadd.f32 %v494_v40, %v493_v14 }
  0xe2   :  { %v397_v35 = vrot.slane %v396_v32, 1  ;;  %v414_v57 = vadd.f32 %v413_v34, %v412_v8  ;;  %v10850_v54 = vsub.f32 %v10732_v50, %v425_v47  ;;  %v10853_v10 = vsub.f32 %v10743_v63, %v425_v47 }
  0xe3   :  { %v516_v25 = vadd.f32 %v515_v33, %v474_v20  ;;  %v10857_v49 = vsub.f32 %v10773_v16, %v425_v47  ;;  %v10860_v5 = vsub.f32 %v10805_v52, %v425_v47  ;;  %v555_v47 = vmul.f32 %v540_v3, %v10736_v55 }
  0xe4   :  { %v398_v59 = vadd.f32 %v397_v35, %v396_v32  ;;  %v463_v6 = vmul.f32 %v10850_v54, %v10850_v54  ;;  %v464_v7 = vmul.f32 %v10853_v10, %v10853_v10  ;;  %v415_v8 = vrot.slane %v414_v57, 1 }
  0xe5   :  { %v517_v46 = vrot.slane %v516_v25, 4  ;;  %v465_v20 = vmul.f32 %v10857_v49, %v10857_v49  ;;  %v375_v35 = vrot.slane %v374_v42, 4  ;;  %v466_v9 = vmul.f32 %v10860_v5, %v10860_v5 }
  0xe6   :  { %v496_v21 = vadd.f32 %v464_v7, %v463_v6  ;;  %v428_v33 = vmul.f32 %v10736_v55, %v398_v59  ;;  %v416_v34 = vadd.f32 %v415_v8, %v414_v57  ;;  %v550_v3 = vmul.f32 %v495_v60, %v10736_v55 }
  0xe7   :  { %v518_v12 = vadd.f32 %v517_v46, %v516_v25  ;;  %v376_v37 = vadd.f32 %v375_v35, %v374_v42  ;;  %v10886_v8 = vadd.f32 1e-05, %v555_v47 }
  0xe8   :  { %v497_v38 = vadd.f32 %v496_v21, %v465_v20  ;;  %v430_v29 = vmul.f32 %v10736_v55, %v416_v34  ;;  %v10874_v6 = vsub.f32 %v10807_v53, %v428_v33  ;;  %v10898_v60 = vsub.f32 %v10738_v58, %v428_v33 }
  0xe9   :  { %v519_v32 = vrot.slane %v518_v12, 2  ;;  %v377_v30 = vrot.slane %v376_v37, 2  ;;  %9766 = vrsqrt.f32 %v10886_v8  ;;  %vm620_vm7 = vweird.f32 %v10886_v8 }
  0xea   :  { %v498_v46 = vadd.f32 %v497_v38, %v466_v9  ;;  %v10877_v57 = vsub.f32 %v10741_v61, %v430_v29  ;;  %v10880_v14 = vsub.f32 %v10768_v13, %v430_v29  ;;  %v10883_v40 = vsub.f32 %v10802_v48, %v430_v29 }
  0xeb   :  { %v520_v25 = vadd.f32 %v519_v32, %v518_v12  ;;  %v378_v42 = vadd.f32 %v377_v30, %v376_v37  ;;  %v10889_v20 = vsub.f32 %v10820_v36, %v430_v29  ;;  %v10902_v29 = vsub.f32 %v10771_v15, %v428_v33 }
  0xec   :  { %v499_v7 = vrot.slane %v498_v46, 4  ;;  %v483_v21 = vmul.f32 %v10877_v57, %v10877_v57  ;;  %v484_v34 = vmul.f32 %v10880_v14, %v10880_v14  ;;  %v485_v9 = vmul.f32 %v10883_v40, %v10883_v40 }
  0xed   :  { %v521_v59 = vrot.slane %v520_v25, 1  ;;  %v379_v32 = vrot.slane %v378_v42, 1  ;;  %v475_v47 = vmul.f32 %v10874_v6, %v10874_v6  ;;  %v10906_v38 = vadd.f32 1e-05, %v550_v3 }
  0xee   :  { %v500_v35 = vadd.f32 %v499_v7, %v498_v46  ;;  %v541_v37 = vadd.f32 %v484_v34, %v483_v21  ;;  %v10909_v46 = vsub.f32 %v10812_v62, %v428_v33  ;;  %v486_v36 = vmul.f32 %v10889_v20, %v10889_v20 }
  0xef   :  { %v522_v12 = vadd.f32 %v521_v59, %v520_v25  ;;  %v380_v59 = vadd.f32 %v379_v32, %v378_v42  ;;  %v476_v21 = vmul.f32 %v10898_v60, %v10898_v60  ;;  %v477_v33 = vmul.f32 %v10902_v29, %v10902_v29  ;;  %v10945_v62 = vpop.eup %9766 }
  0xf0   :  { %v501_v25 = vrot.slane %v500_v35, 2  ;;  %vm621_vm6 = vweird.f32 %v10945_v62  ;;  %vm570_vm10 = vweird.f32 %v10906_v38 }
  0xf1   :  { %v553_v30 = vmul.f32 %v522_v12, %v10736_v55  ;;  %v542_v12 = vadd.f32 %v541_v37, %v485_v9  ;;  %v426_v48 = vmul.f32 %v10736_v55, %v380_v59  ;;  %v523_v42 = vadd.f32 %v476_v21, %v475_v47  ;;  %v10934_v59 = vpop.permute.xlu1 %722  ;;  %v10936_v47 = vpop.permute.xlu0 %674  ;;  %vm622_vm9 = vmor %vm620_vm7, %vm621_vm6 }
  0xf2   :  { %v502_v34 = vadd.f32 %v501_v25, %v500_v35  ;;  %v478_v37 = vmul.f32 %v10909_v46, %v10909_v46 }
  0xf3   :  { %v10911_v7 = vadd.f32 1e-05, %v553_v30  ;;  %v543_v3 = vadd.f32 %v542_v12, %v486_v36  ;;  %v10923_v30 = vsub.f32 %v10835_v56, %v426_v48  ;;  %v10926_v9 = vsub.f32 %v10699_v23, %v426_v48 }
  0xf4   :  { %v503_v32 = vrot.slane %v502_v34, 1  ;;  %v10929_v35 = vsub.f32 %v10708_v27, %v426_v48  ;;  %v524_v25 = vadd.f32 %v523_v42, %v477_v33  ;;  %v10943_v13 = vsub.f32 %v10714_v31, %v426_v48 }
  0xf5   :  { %9768 = vrsqrt.f32 %v10911_v7  ;;  %v544_v36 = vrot.slane %v543_v3, 4  ;;  %v467_v21 = vmul.f32 %v10923_v30, %v10923_v30  ;;  %v468_v61 = vmul.f32 %v10926_v9, %v10926_v9 }
  0xf6   :  { %9770 = vrsqrt.f32 %v10906_v38  ;;  %v504_v12 = vadd.f32 %v503_v32, %v502_v34  ;;  %v525_v26 = vadd.f32 %v524_v25, %v478_v37  ;;  %v469_v15 = vmul.f32 %v10929_v35, %v10929_v35 }
  0xf7   :  { %v545_v22 = vadd.f32 %v544_v36, %v543_v3  ;;  %v505_v42 = vadd.f32 %v468_v61, %v467_v21  ;;  %v470_v48 = vmul.f32 %v10943_v13, %v10943_v13  ;;  %v10957_v21 = vpop.permute.xlu2 %664  ;;  %v615_v56 = vmul.f32 %v10945_v62, %v10886_v8 }
  0xf8   :  { %v551_v33 = vmul.f32 %v504_v12, %v10736_v55  ;;  %v526_v53 = vrot.slane %v525_v26, 4  ;;  %vm600_vm4 = vweird.f32 %v10911_v7 }
  0xf9   :  { %v546_v32 = vrot.slane %v545_v22, 2  ;;  %v506_v3 = vadd.f32 %v505_v42, %v469_v15  ;;  %v10964_v0 = vpop.permute.xlu1 %727 }
  0xfa   :  { %v10951_v27 = vadd.f32 1e-05, %v551_v33  ;;  %v527_v25 = vadd.f32 %v526_v53, %v525_v26 }
  0xfb   :  { %v9769_v34 = vpop.eup %9768  ;;  %v547_v36 = vadd.f32 %v546_v32, %v545_v22  ;;  %v507_v61 = vadd.f32 %v506_v3, %v470_v48  ;;  %v10966_v22 = vpop.permute.xlu0 %679  ;;  %v616_v48 = vmul.f32 %v10945_v62, %v615_v56 }
  0xfc   :  { %v595_v58 = vmul.f32 %v9769_v34, %v10911_v7  ;;  %v10955_v37 = vpop.eup %9770  ;;  %9772 = vrsqrt.f32 %v10951_v27  ;;  %v528_v23 = vrot.slane %v527_v25, 2  ;;  %vm601_vm3 = vweird.f32 %v9769_v34 }
  0xfd   :  { %v548_v31 = vrot.slane %v547_v36, 1  ;;  %v508_v33 = vrot.slane %v507_v61, 4  ;;  %v565_v15 = vmul.f32 %v10955_v37, %v10906_v38  ;;  %vm602_vm5 = vmor %vm600_vm4, %vm601_vm3  ;;  %vm571_vm8 = vweird.f32 %v10955_v37 }
  0xfe   :  { %v596_v12 = vmul.f32 %v9769_v34, %v595_v58  ;;  %v529_v53 = vadd.f32 %v528_v23, %v527_v25  ;;  %vm572_vm11 = vmor %vm570_vm10, %vm571_vm8  ;;  %vm580_vm13 = vweird.f32 %v10951_v27  ;;  %vm1234_vm8 = vcmask 785408  }
  0xff   :  { %v549_v42 = vadd.f32 %v548_v31, %v547_v36  ;;  %v509_v58 = vadd.f32 %v508_v33, %v507_v61  ;;  %v566_v36 = vmul.f32 %v10955_v37, %v565_v15  ;;  %v617_v33 = vmul.f32 0.5, %v616_v48 }
 0x100   :  { %v597_v17 = vmul.f32 0.5, %v596_v12  ;;  %v530_v39 = vrot.slane %v529_v53, 1  ;;  %vm2528_vm10 = vcmask 1042434  }
 0x101   :  { %v556_v32 = vmul.f32 %v549_v42, %v10736_v55  ;;  %v510_v12 = vrot.slane %v509_v58, 2  ;;  %v618_v48 = vsub.f32 1.5, %v617_v33 }
 0x102   :  { %v598_v26 = vsub.f32 1.5, %v597_v17  ;;  %v10973_v31 = vpop.eup %9772  ;;  %v531_v61 = vadd.f32 %v530_v39, %v529_v53 }
 0x103   :  { %v10971_v51 = vadd.f32 1e-05, %v556_v32  ;;  %v511_v52 = vadd.f32 %v510_v12, %v509_v58  ;;  %v575_v15 = vmul.f32 %v10973_v31, %v10951_v27  ;;  %v10994_v12 = vpop.permute.xlu0 %712  ;;  %vm581_vm15 = vweird.f32 %v10973_v31 }
 0x104   :  { %v599_v3 = vmul.f32 %v9769_v34, %v598_v26  ;;  %v10981_v26 = vpop.permute.xlu2 %669  ;;  %vm582_vm2 = vmor %vm580_vm13, %vm581_vm15  ;;  %vm2537_vm13 = vcmask 1045509   ;;  %vm2621_vm15 = vcmask 1046528  }
 0x105   :  { %9774 = vrsqrt.f32 %v10971_v51  ;;  %v512_v42 = vrot.slane %v511_v52, 1  ;;  %vm630_vm14 = vweird.f32 %v10971_v51 }
 0x106   :  { %v603_v17 = vsel %vm602_vm5, %v9769_v34, %v599_v3  ;;  %v10992_v3 = vpop.permute.xlu1 %717 }
 0x107   :  { %v649_v23 = vmul.f32 %v603_v17, %v10833_v45  ;;  %v648_v25 = vmul.f32 %v603_v17, %v10830_v44  ;;  %v646_v56 = vmul.f32 %v603_v17, %v10824_v43  ;;  %v647_v7 = vmul.f32 %v603_v17, %v10827_v41 }
 0x108   :  { %v567_v44 = vmul.f32 0.5, %v566_v36  ;;  %v513_v58 = vadd.f32 %v512_v42, %v511_v52  ;;  %v554_v41 = vmul.f32 %v531_v61, %v10736_v55  ;;  %v576_v36 = vmul.f32 %v10973_v31, %v575_v15 }
 0x109   :  { %v696_v34 = vmul.f32 %v10936_v47, %v648_v25  ;;  %v697_v39 = vmul.f32 %v10966_v22, %v649_v23  ;;  %v694_v45 = vmul.f32 %v10957_v21, %v646_v56  ;;  %v695_v43 = vmul.f32 %v10981_v26, %v647_v7 }
 0x10a   :  { %v552_v17 = vmul.f32 %v513_v58, %v10736_v55  ;;  %v10997_v23 = vadd.f32 1e-05, %v554_v41  ;;  %v568_v7 = vsub.f32 1.5, %v567_v44  ;;  %v577_v15 = vmul.f32 0.5, %v576_v36 }
 0x10b   :  { %v744_v53 = vadd.f32 %v10934_v59, %v696_v34  ;;  %v745_v32 = vadd.f32 %v10964_v0, %v697_v39  ;;  %v742_v52 = vadd.f32 %v10994_v12, %v694_v45  ;;  %v743_v61 = vadd.f32 %v10992_v3, %v695_v43  ;;  %v9775_v56 = vpop.eup %9774 }
 0x10c   :  { %v11002_v42 = vadd.f32 1e-05, %v552_v17  ;;  %9776 = vrsqrt.f32 %v10997_v23  ;;  %v625_v33 = vmul.f32 %v9775_v56, %v10971_v51  ;;  %v619_v34 = vmul.f32 %v10945_v62, %v618_v48 }
 0x10d   :  { %v849_v25 = vpack.c.bf16 %v745_v32, %v744_v53  ;;  %v848_v39 = vpack.c.bf16 %v743_v61, %v742_v52  ;;  %v569_v44 = vmul.f32 %v10955_v37, %v568_v7  ;;  %v578_v53 = vsub.f32 1.5, %v577_v15 }
 0x10e   :  { %9778 = vrsqrt.f32 %v11002_v42  ;;  %v626_v45 = vmul.f32 %v9775_v56, %v625_v33  ;;  %v623_v58 = vsel %vm622_vm9, %v10945_v62, %v619_v34  ;;  %vm631_vm12 = vweird.f32 %v9775_v56 }
 0x10f   :  { %1361 = vmatpush.bf16.msrb.mxu1 %v849_v25  ;;  %v11016_v8 = vsel %vm572_vm11, %v10955_v37, %v569_v44  ;;  %v656_v36 = vmul.f32 %v623_v58, %v10785_v24  ;;  %vm632_vm0 = vmor %vm630_vm14, %vm631_vm12  ;;  %v657_v52 = vmul.f32 %v623_v58, %v10788_v28  ;;  %v654_v61 = vmul.f32 %v623_v58, %v10778_v18 }
 0x110   :  { %v627_v43 = vmul.f32 0.5, %v626_v45  ;;  %v655_v37 = vmul.f32 %v623_v58, %v10781_v19  ;;  %v579_v7 = vmul.f32 %v10973_v31, %v578_v53  ;;  %vm610_vm4 = vweird.f32 %v10997_v23 }
 0x111   :  { %v704_v28 = vmul.f32 %v10936_v47, %v656_v36  ;;  %vm590_vm5 = vweird.f32 %v11002_v42  ;;  %vm2525_vm9 = vcmask 1041409   ;;  %vm2531_vm11 = vcmask 1043459  }
 0x112   :  { %v9777_v41 = vpop.eup %9776  ;;  %v628_v32 = vsub.f32 1.5, %v627_v43  ;;  %vm2534_vm12 = vcmask 1044484   ;;  %vm2540_vm14 = vcmask 1046534  }
 0x113   :  { %1362 = vmatpush.bf16.msrb.mxu1 %v848_v39  ;;  %v605_v48 = vmul.f32 %v9777_v41, %v10997_v23  ;;  %vm611_vm1 = vweird.f32 %v9777_v41 }
 0x114   :  { %v9779_v17 = vpop.eup %9778  ;;  %v629_v25 = vmul.f32 %v9775_v56, %v628_v32  ;;  %vm612_vm6 = vmor %vm610_vm4, %vm611_vm1 }
 0x115   :  { %v585_v62 = vmul.f32 %v9779_v17, %v11002_v42  ;;  %v606_v38 = vmul.f32 %v9777_v41, %v605_v48  ;;  %vm591_vm3 = vweird.f32 %v9779_v17 }
 0x116   :  { %v633_v33 = vsel %vm632_vm0, %v9775_v56, %v629_v25  ;;  %vm592_vm7 = vmor %vm590_vm5, %vm591_vm3 }
 0x117   :  { %v586_v34 = vmul.f32 %v9779_v17, %v585_v62  ;;  %v607_v24 = vmul.f32 0.5, %v606_v38  ;;  %v660_v15 = vmul.f32 %v633_v33, %v10883_v40  ;;  %v661_v51 = vmul.f32 %v633_v33, %v10889_v20 }
 0x118   :  { %v658_v39 = vmul.f32 %v633_v33, %v10877_v57  ;;  %v659_v45 = vmul.f32 %v633_v33, %v10880_v14  ;;  %v705_v14 = vmul.f32 %v10966_v22, %v657_v52  ;;  %v583_v20 = vsel %vm582_vm2, %v10973_v31, %v579_v7 }
 0x119   :  { %v587_v44 = vmul.f32 0.5, %v586_v34  ;;  %v608_v43 = vsub.f32 1.5, %v607_v24  ;;  %v708_v18 = vmul.f32 %v10936_v47, %v660_v15  ;;  %v709_v19 = vmul.f32 %v10966_v22, %v661_v51 }
 0x11a   :  { %v706_v56 = vmul.f32 %v10957_v21, %v658_v39  ;;  %v707_v58 = vmul.f32 %v10981_v26, %v659_v45  ;;  %v702_v62 = vmul.f32 %v10957_v21, %v654_v61  ;;  %v703_v31 = vmul.f32 %v10981_v26, %v655_v37 }
 0x11b   :  { %v588_v57 = vsub.f32 1.5, %v587_v44  ;;  %v609_v40 = vmul.f32 %v9777_v41, %v608_v43  ;;  %v756_v53 = vadd.f32 %v10934_v59, %v708_v18  ;;  %v757_v32 = vadd.f32 %v10964_v0, %v709_v19 }
 0x11c   :  { %v754_v48 = vadd.f32 %v10994_v12, %v706_v56  ;;  %v755_v36 = vadd.f32 %v10992_v3, %v707_v58  ;;  %v752_v7 = vadd.f32 %v10934_v59, %v704_v28  ;;  %v753_v23 = vadd.f32 %v10964_v0, %v705_v14 }
 0x11d   :  { %v589_v25 = vmul.f32 %v9779_v17, %v588_v57  ;;  %v855_v27 = vpack.c.bf16 %v757_v32, %v756_v53  ;;  %v613_v38 = vsel %vm612_vm6, %v9777_v41, %v609_v40  ;;  %v640_v33 = vmul.f32 %v583_v20, %v10857_v49 }
 0x11e   :  { %v641_v61 = vmul.f32 %v583_v20, %v10860_v5  ;;  %v854_v37 = vpack.c.bf16 %v755_v36, %v754_v48  ;;  %v652_v41 = vmul.f32 %v613_v38, %v10902_v29  ;;  %v638_v5 = vmul.f32 %v583_v20, %v10850_v54 }
 0x11f   :  { %v593_v52 = vsel %vm592_vm7, %v9779_v17, %v589_v25  ;;  %1582 = vmatpush.bf16.msrb.mxu2 %v855_v27  ;;  %v653_v17 = vmul.f32 %v613_v38, %v10909_v46  ;;  %v688_v45 = vmul.f32 %v10936_v47, %v640_v33  ;;  %v639_v44 = vmul.f32 %v583_v20, %v10853_v10 }
 0x120   :  { %v644_v34 = vmul.f32 %v593_v52, %v10929_v35  ;;  %v645_v42 = vmul.f32 %v593_v52, %v10943_v13  ;;  %v642_v24 = vmul.f32 %v593_v52, %v10923_v30  ;;  %v643_v15 = vmul.f32 %v593_v52, %v10926_v9 }
 0x121   :  { %v853_v13 = vpack.c.bf16 %v753_v23, %v752_v7  ;;  %v750_v30 = vadd.f32 %v10994_v12, %v702_v62  ;;  %v751_v9 = vadd.f32 %v10992_v3, %v703_v31  ;;  %v689_v28 = vmul.f32 %v10966_v22, %v641_v61 }
 0x122   :  { %v692_v51 = vmul.f32 %v10936_v47, %v644_v34  ;;  %v693_v49 = vmul.f32 %v10966_v22, %v645_v42  ;;  %v690_v39 = vmul.f32 %v10957_v21, %v642_v24  ;;  %v691_v35 = vmul.f32 %v10981_v26, %v643_v15 }
 0x123   :  { %1583 = vmatpush.bf16.msrb.mxu2 %v854_v37  ;;  %v700_v43 = vmul.f32 %v10936_v47, %v652_v41  ;;  %v650_v18 = vmul.f32 %v613_v38, %v10874_v6  ;;  %v651_v19 = vmul.f32 %v613_v38, %v10898_v60  ;;  %v701_v57 = vmul.f32 %v10966_v22, %v653_v17 }
 0x124   :  { %v740_v29 = vadd.f32 %v10934_v59, %v692_v51  ;;  %v741_v46 = vadd.f32 %v10964_v0, %v693_v49  ;;  %v738_v54 = vadd.f32 %v10994_v12, %v690_v39  ;;  %v739_v58 = vadd.f32 %v10992_v3, %v691_v35  ;;  %v8527_v49 = vld [vmem:[%s16010_s3 + $0x10] sm:$0xf]  ;;  %v9515_v39 = vld [vmem:[%s16010_s3 + $0x14] sm:$0xf0] }
 0x125   :  { %v637_v14 = vmul.f32 %v11016_v8, %v10764_v11  ;;  %v852_v10 = vpack.c.bf16 %v751_v9, %v750_v30  ;;  %v686_v40 = vmul.f32 %v10957_v21, %v638_v5  ;;  %v636_v6 = vmul.f32 %v11016_v8, %v10754_v4  ;;  %v8537_v30 = vld [vmem:[%s16010_s3 + $0x28] sm:$0xf0]  ;;  %v8535_v5 = vld [vmem:[%s16010_s3 + $0x20] sm:$0xf] }
 0x126   :  { %v847_v56 = vpack.c.bf16 %v741_v46, %v740_v29  ;;  %v736_v60 = vadd.f32 %v10934_v59, %v688_v45  ;;  %v737_v20 = vadd.f32 %v10964_v0, %v689_v28  ;;  %v687_v53 = vmul.f32 %v10981_v26, %v639_v44  ;;  %v9517_v29 = vld [vmem:[%s16010_s3 + $0x24] sm:$0xf0]  ;;  %v9518_v45 = vld [vmem:[%s16010_s3 + $0x34] sm:$0xf]  ;;  %v8545_v44 = vld [vmem:[%s16010_s3 + $0x38] sm:$0xf0] }
 0x127   :  { %1584 = vmatpush.bf16.msrb.mxu2 %v853_v13  ;;  %v698_v32 = vmul.f32 %v10957_v21, %v650_v18  ;;  %v846_v48 = vpack.c.bf16 %v739_v58, %v738_v54  ;;  %v748_v36 = vadd.f32 %v10934_v59, %v700_v43  ;;  %v749_v11 = vadd.f32 %v10964_v0, %v701_v57  ;;  %v9516_v13 = vld [vmem:[%s16010_s3 + $0x24] sm:$0xf]  ;;  %v8543_v43 = vld [vmem:[%s16010_s3 + $0x30] sm:$0xf]  ;;  %v9519_v18 = vld [vmem:[%s16010_s3 + $0x34] sm:$0xf0] }
 0x128   :  { %1363 = vmatpush.bf16.msrb.mxu1 %v847_v56  ;;  %v699_v25 = vmul.f32 %v10981_v26, %v651_v19  ;;  %v684_v27 = vmul.f32 %v10936_v47, %v636_v6  ;;  %v685_v4 = vmul.f32 %v10966_v22, %v637_v14  ;;  %v845_v62 = vpack.c.bf16 %v737_v20, %v736_v60  ;;  %v9512_v47 = vld [vmem:[%s16010_s3 + $0x4] sm:$0xf]  ;;  %v8553_v54 = vld [vmem:[%s16010_s3 + $0x48] sm:$0xf0]  ;;  %v8551_v57 = vld [vmem:[%s16010_s3 + $0x40] sm:$0xf] }
 0x129   :  { %v734_v31 = vadd.f32 %v10994_v12, %v686_v40  ;;  %v634_v38 = vmul.f32 %v11016_v8, %v10748_v1  ;;  %v635_v52 = vmul.f32 %v11016_v8, %v10751_v2  ;;  %v851_v7 = vpack.c.bf16 %v749_v11, %v748_v36  ;;  %v8521_v1 = vld [vmem:[%s16010_s3 + $0x8] sm:$0xf0]  ;;  %v9520_v56 = vld [vmem:[%s16010_s3 + $0x44] sm:$0xf]  ;;  %v9521_v14 = vld [vmem:[%s16010_s3 + $0x44] sm:$0xf0] }
 0x12a   :  { %v735_v23 = vadd.f32 %v10992_v3, %v687_v53  ;;  %v746_v33 = vadd.f32 %v10994_v12, %v698_v32  ;;  %v747_v34 = vadd.f32 %v10992_v3, %v699_v25  ;;  %v732_v22 = vadd.f32 %v10934_v59, %v684_v27  ;;  %v9513_v59 = vld [vmem:[%s16010_s3 + $0x4] sm:$0xf0]  ;;  %v9522_v40 = vld [vmem:[%s16010_s3 + $0x54] sm:$0xf]  ;;  %v8561_v6 = vld [vmem:[%s16010_s3 + $0x58] sm:$0xf0] }
 0x12b   :  { %1585 = vmatpush.bf16.msrb.mxu2 %v852_v10  ;;  %v733_v2 = vadd.f32 %v10964_v0, %v685_v4  ;;  %v682_v24 = vmul.f32 %v10957_v21, %v634_v38  ;;  %v683_v15 = vmul.f32 %v10981_v26, %v635_v52  ;;  %v8524_v61 = vor.u32 %v9512_v47, %v8521_v1  ;;  %v8519_v0 = vld [vmem:[%s16010_s3] sm:$0xf]  ;;  %v8559_v20 = vld [vmem:[%s16010_s3 + $0x50] sm:$0xf]  ;;  %v9523_v53 = vld [vmem:[%s16010_s3 + $0x54] sm:$0xf0] }
 0x12c   :  { %1364 = vmatpush.bf16.msrb.mxu1 %v846_v48  ;;  %v844_v8 = vpack.c.bf16 %v735_v23, %v734_v31  ;;  %v850_v42 = vpack.c.bf16 %v747_v34, %v746_v33  ;;  %v8520_v26 = vor.u32 %v9513_v59, %v8519_v0  ;;  %v8528_v35 = vor.u32 %v9515_v39, %v8527_v49  ;;  %v9524_v48 = vld [vmem:[%s16010_s3 + $0x64] sm:$0xf]  ;;  %v8569_v36 = vld [vmem:[%s16010_s3 + $0x68] sm:$0xf0]  ;;  %v8567_v25 = vld [vmem:[%s16010_s3 + $0x60] sm:$0xf] }
 0x12d   :  { %v843_v37 = vpack.c.bf16 %v733_v2, %v732_v22  ;;  %v730_v41 = vadd.f32 %v10994_v12, %v682_v24  ;;  %v731_v17 = vadd.f32 %v10992_v3, %v683_v15  ;;  %v9514_v12 = vld [vmem:[%s16010_s3 + $0x14] sm:$0xf]  ;;  %v8529_v3 = vld [vmem:[%s16010_s3 + $0x18] sm:$0xf0]  ;;  %v8540_v9 = vor.u32 %v9516_v13, %v8537_v30  ;;  %v9525_v27 = vld [vmem:[%s16010_s3 + $0x64] sm:$0xf0] }
 0x12e   :  { %v8532_v51 = vor.u32 %v9514_v12, %v8529_v3  ;;  %v8536_v46 = vor.u32 %v9517_v29, %v8535_v5  ;;  %v8548_v28 = vor.u32 %v9518_v45, %v8545_v44  ;;  %v8544_v19 = vor.u32 %v9519_v18, %v8543_v43  ;;  %v8577_v31 = vld [vmem:[%s16010_s3 + $0x78] sm:$0xf0]  ;;  %v8575_v52 = vld [vmem:[%s16010_s3 + $0x70] sm:$0xf]  ;;  %v9528_v33 = vld [vmem:[%s16010_s3 + $0x84] sm:$0xf] }
 0x12f   :  { %1586 = vmatpush.bf16.msrb.mxu2 %v851_v7  ;;  %v842_v21 = vpack.c.bf16 %v731_v17, %v730_v41  ;;  %v8556_v58 = vor.u32 %v9520_v56, %v8553_v54  ;;  %v8552_v10 = vor.u32 %v9521_v14, %v8551_v57  ;;  %v8564_v60 = vor.u32 %v9522_v40, %v8561_v6  ;;  %v9527_v7 = vld [vmem:[%s16010_s3 + $0x74] sm:$0xf0]  ;;  %v8585_v34 = vld [vmem:[%s16010_s3 + $0x88] sm:$0xf0]  ;;  %v8583_v1 = vld [vmem:[%s16010_s3 + $0x80] sm:$0xf] }
 0x130   :  { %1365 = vmatpush.bf16.msrb.mxu1 %v845_v62  ;;  %v8560_v32 = vor.u32 %v9523_v53, %v8559_v20  ;;  %v8572_v11 = vor.u32 %v9524_v48, %v8569_v36  ;;  %v8568_v4 = vor.u32 %v9525_v27, %v8567_v25  ;;  %v9526_v62 = vld [vmem:[%s16010_s3 + $0x74] sm:$0xf]  ;;  %v8576_v23 = vor.u32 %v9527_v7, %v8575_v52  ;;  %v9529_v22 = vld [vmem:[%s16010_s3 + $0x84] sm:$0xf0]  ;;  %v8591_v59 = vld [vmem:[%s16010_s3 + $0x90] sm:$0xf] }
 0x131   :  { %v8580_v38 = vor.u32 %v9526_v62, %v8577_v31  ;;  %v8588_v47 = vor.u32 %v9528_v33, %v8585_v34  ;;  %v9530_v15 = vld [vmem:[%s16010_s3 + $0x94] sm:$0xf]  ;;  %v9532_v49 = vld [vmem:[%s16010_s3 + $0xa4] sm:$0xf]  ;;  %v8601_v39 = vld [vmem:[%s16010_s3 + $0xa8] sm:$0xf0] }
 0x132   :  { %v8604_v13 = vor.u32 %v9532_v49, %v8601_v39  ;;  %v8599_v5 = vld [vmem:[%s16010_s3 + $0xa0] sm:$0xf]  ;;  %v9533_v29 = vld [vmem:[%s16010_s3 + $0xa4] sm:$0xf0]  ;;  %v9534_v43 = vld [vmem:[%s16010_s3 + $0xb4] sm:$0xf] }
 0x133   :  { %1587 = vmatpush.bf16.msrb.mxu2 %v850_v42  ;;  %v8600_v45 = vor.u32 %v9533_v29, %v8599_v5  ;;  %v8609_v18 = vld [vmem:[%s16010_s3 + $0xb8] sm:$0xf0]  ;;  %v8607_v57 = vld [vmem:[%s16010_s3 + $0xb0] sm:$0xf]  ;;  %v9535_v14 = vld [vmem:[%s16010_s3 + $0xb4] sm:$0xf0] }
 0x134   :  { %1366 = vmatpush.bf16.msrb.mxu1 %v844_v8  ;;  %v8584_v8 = vor.u32 %v9529_v22, %v8583_v1  ;;  %v8612_v56 = vor.u32 %v9534_v43, %v8609_v18  ;;  %v8608_v40 = vor.u32 %v9535_v14, %v8607_v57  ;;  %v9536_v20 = vld [vmem:[%s16010_s3 + $0xc4] sm:$0xf]  ;;  %v8617_v53 = vld [vmem:[%s16010_s3 + $0xc8] sm:$0xf0]  ;;  %v8615_v25 = vld [vmem:[%s16010_s3 + $0xc0] sm:$0xf] }
 0x135   :  { %v8620_v48 = vor.u32 %v9536_v20, %v8617_v53  ;;  %v9537_v27 = vld [vmem:[%s16010_s3 + $0xc4] sm:$0xf0]  ;;  %v9538_v52 = vld [vmem:[%s16010_s3 + $0xd4] sm:$0xf]  ;;  %v8625_v7 = vld [vmem:[%s16010_s3 + $0xd8] sm:$0xf0] }
 0x136   :  { %8853 = vmatmul.msk.bf16.vlgmr.msrb.gmra.mxu2 %vm1234_vm8, %v8524_v61  ;;  %v8593_v61 = vld [vmem:[%s16010_s3 + $0x98] sm:$0xf0]  ;;  %v8616_v62 = vor.u32 %v9537_v27, %v8615_v25  ;;  %v8628_v33 = vor.u32 %v9538_v52, %v8625_v7  ;;  %v8623_v1 = vld [vmem:[%s16010_s3 + $0xd0] sm:$0xf]  ;;  %v9539_v22 = vld [vmem:[%s16010_s3 + $0xd4] sm:$0xf0] }
 0x137   :  { %v8596_v41 = vor.u32 %v9530_v15, %v8593_v61  ;;  %v9540_v61 = vld [vmem:[%s16010_s3 + $0xe4] sm:$0xf]  ;;  %v9543_v43 = vld [vmem:[%s16010_s3 + $0xf4] sm:$0xf0]  ;;  %v8649_v14 = vld [vmem:[%s16010_s3 + $0x108] sm:$0xf0] }
 0x138   :  { %1367 = vmatpush.bf16.msrb.mxu1 %v843_v37  ;;  %v9544_v57 = vld [vmem:[%s16010_s3 + $0x104] sm:$0xf]  ;;  %v8647_v53 = vld [vmem:[%s16010_s3 + $0x100] sm:$0xf] }
 0x13c   :  { %1368 = vmatpush.bf16.msrb.mxu1 %v842_v21  ;;  %v9531_v21 = vld [vmem:[%s16010_s3 + $0x94] sm:$0xf0] }
 0x13d   :  { %v8592_v12 = vor.u32 %v9531_v21, %v8591_v59 }
 0x13f   :  { %1369 = vmatmul.bf16.vlgmr.msrb.gmra.mxu1 %v8520_v26 }
 0x146   :  { %8854 = vmatmul.msk.bf16.gmra.mxu2 %vm1234_vm8, %v8532_v51 }
 0x14f   :  { %1374 = vmatmul.bf16.gmra.mxu1 %v8528_v35 }
 0x156   :  { %8855 = vmatmul.msk.bf16.gmra.mxu2 %vm1234_vm8, %v8540_v9 }
 0x15f   :  { %1379 = vmatmul.bf16.gmra.mxu1 %v8536_v46 }
 0x166   :  { %8856 = vmatmul.msk.bf16.gmra.mxu2 %vm1234_vm8, %v8548_v28 }
 0x16f   :  { %1384 = vmatmul.bf16.gmra.mxu1 %v8544_v19 }
 0x176   :  { %8857 = vmatmul.msk.bf16.gmra.mxu2 %vm1234_vm8, %v8556_v58 }
 0x17f   :  { %1389 = vmatmul.bf16.gmra.mxu1 %v8552_v10 }
 0x186   :  { %8858 = vmatmul.msk.bf16.gmra.mxu2 %vm1234_vm8, %v8564_v60 }
 0x18f   :  { %1394 = vmatmul.bf16.gmra.mxu1 %v8560_v32 }
 0x196   :  { %8859 = vmatmul.msk.bf16.gmra.mxu2 %vm1234_vm8, %v8572_v11 }
 0x19f   :  { %1399 = vmatmul.bf16.gmra.mxu1 %v8568_v4 }
 0x1a6   :  { %8860 = vmatmul.msk.bf16.gmra.mxu2 %vm1234_vm8, %v8580_v38 }
 0x1af   :  { %1404 = vmatmul.bf16.gmra.mxu1 %v8576_v23 }
 0x1b6   :  { %8861 = vmatmul.msk.bf16.gmra.mxu2 %vm1234_vm8, %v8588_v47 }
 0x1b9   :  { %v1589_v2 = vpop.f32.mrf.mxu2 }
 0x1bc   :  { %v1370_v42 = vpop.f32.mrf.mxu1 }
 0x1bd   :  { %v11224_v24 = vadd.f32 %v1589_v2, %v1370_v42 }
 0x1bf   :  { %16415 = vst [vmem:[#allocation41_spill] sm:$0xff] %v11224_v24  ;;  %1409 = vmatmul.bf16.gmra.mxu1 %v8584_v8  ;;  %v8624_v8 = vor.u32 %v9539_v22, %v8623_v1 }
 0x1c1   :  { %v1591_v37 = vpop.f32.mrf.mxu2 }
 0x1c4   :  { %v1372_v17 = vpop.f32.mrf.mxu1 }
 0x1c5   :  { %v11232_v0 = vadd.f32 %v1591_v37, %v1372_v17  ;;  %v8633_v37 = vld [vmem:[%s16010_s3 + $0xe8] sm:$0xf0] }
 0x1c6   :  { %8862 = vmatmul.msk.bf16.gmra.mxu2 %vm1234_vm8, %v8596_v41  ;;  %v8636_v17 = vor.u32 %v9540_v61, %v8633_v37  ;;  %v8665_v61 = vld [vmem:[%s16010_s3 + $0x128] sm:$0xf0] }
 0x1c7   :  { %16416 = vst [vmem:[#allocation42_spill] sm:$0xff] %v11232_v0 }
 0x1c9   :  { %v1594_v26 = vpop.f32.mrf.mxu2 }
 0x1cc   :  { %v1375_v3 = vpop.f32.mrf.mxu1 }
 0x1cd   :  { %v11241_v51 = vadd.f32 %v1594_v26, %v1375_v3  ;;  %v8631_v26 = vld [vmem:[%s16010_s3 + $0xe0] sm:$0xf] }
 0x1cf   :  { %16417 = vst [vmem:[#allocation43_spill] sm:$0xff] %v11241_v51  ;;  %1414 = vmatmul.bf16.gmra.mxu1 %v8592_v12  ;;  %v9541_v12 = vld [vmem:[%s16010_s3 + $0xe4] sm:$0xf0] }
 0x1d0   :  { %v8632_v49 = vor.u32 %v9541_v12, %v8631_v26  ;;  %v8663_v26 = vld [vmem:[%s16010_s3 + $0x120] sm:$0xf]  ;;  %v9549_v12 = vld [vmem:[%s16010_s3 + $0x124] sm:$0xf0] }
 0x1d1   :  { %v1596_v35 = vpop.f32.mrf.mxu2 }
 0x1d4   :  { %v1377_v30 = vpop.f32.mrf.mxu1 }
 0x1d5   :  { %v11249_v9 = vadd.f32 %v1596_v35, %v1377_v30  ;;  %v8641_v30 = vld [vmem:[%s16010_s3 + $0xf8] sm:$0xf0] }
 0x1d6   :  { %8863 = vmatmul.msk.bf16.gmra.mxu2 %vm1234_vm8, %v8604_v13  ;;  %v9542_v13 = vld [vmem:[%s16010_s3 + $0xf4] sm:$0xf] }
 0x1d7   :  { %16418 = vst [vmem:[#allocation44_spill] sm:$0xff] %v11249_v9  ;;  %v8644_v29 = vor.u32 %v9542_v13, %v8641_v30  ;;  %v9550_v30 = vld [vmem:[%s16010_s3 + $0x134] sm:$0xf] }
 0x1d9   :  { %v1599_v46 = vpop.f32.mrf.mxu2 }
 0x1dc   :  { %v1380_v44 = vpop.f32.mrf.mxu1 }
 0x1dd   :  { %v11258_v28 = vadd.f32 %v1599_v46, %v1380_v44  ;;  %v8639_v44 = vld [vmem:[%s16010_s3 + $0xf0] sm:$0xf] }
 0x1df   :  { %1419 = vmatmul.bf16.gmra.mxu1 %v8600_v45 }
 0x1e1   :  { %v1601_v19 = vpop.f32.mrf.mxu2 }
 0x1e4   :  { %v1382_v54 = vpop.f32.mrf.mxu1 }
 0x1e5   :  { %v11266_v58 = vadd.f32 %v1601_v19, %v1382_v54  ;;  %v8640_v19 = vor.u32 %v9543_v43, %v8639_v44 }
 0x1e6   :  { %8864 = vmatmul.msk.bf16.gmra.mxu2 %vm1234_vm8, %v8612_v56 }
 0x1e9   :  { %v1604_v10 = vpop.f32.mrf.mxu2 }
 0x1ec   :  { %v1385_v6 = vpop.f32.mrf.mxu1 }
 0x1ed   :  { %v11275_v60 = vadd.f32 %v1604_v10, %v1385_v6 }
 0x1ef   :  { %1424 = vmatmul.bf16.gmra.mxu1 %v8608_v40  ;;  %v8652_v40 = vor.u32 %v9544_v57, %v8649_v14 }
 0x1f1   :  { %v1606_v32 = vpop.f32.mrf.mxu2 }
 0x1f4   :  { %v1387_v36 = vpop.f32.mrf.mxu1 }
 0x1f5   :  { %v11283_v11 = vadd.f32 %v1606_v32, %v1387_v36  ;;  %v9545_v32 = vld [vmem:[%s16010_s3 + $0x104] sm:$0xf0] }
 0x1f6   :  { %8865 = vmatmul.msk.bf16.gmra.mxu2 %vm1234_vm8, %v8620_v48  ;;  %v8648_v36 = vor.u32 %v9545_v32, %v8647_v53 }
 0x1f9   :  { %v1609_v4 = vpop.f32.mrf.mxu2 }
 0x1fc   :  { %v1390_v31 = vpop.f32.mrf.mxu1 }
 0x1fd   :  { %v11292_v38 = vadd.f32 %v1609_v4, %v1390_v31  ;;  %v9546_v4 = vld [vmem:[%s16010_s3 + $0x114] sm:$0xf] }
 0x1ff   :  { %1429 = vmatmul.bf16.gmra.mxu1 %v8616_v62  ;;  %v8657_v62 = vld [vmem:[%s16010_s3 + $0x118] sm:$0xf0] }
 0x200   :  { %v8660_v52 = vor.u32 %v9546_v4, %v8657_v62  ;;  %v9553_v4 = vld [vmem:[%s16010_s3 + $0x144] sm:$0xf0] }
 0x201   :  { %v1611_v23 = vpop.f32.mrf.mxu2 }
 0x204   :  { %v1392_v34 = vpop.f32.mrf.mxu1 }
 0x205   :  { %v11300_v47 = vadd.f32 %v1611_v23, %v1392_v34  ;;  %v9547_v34 = vld [vmem:[%s16010_s3 + $0x114] sm:$0xf0] }
 0x206   :  { %8866 = vmatmul.msk.bf16.gmra.mxu2 %vm1234_vm8, %v8628_v33  ;;  %v8655_v33 = vld [vmem:[%s16010_s3 + $0x110] sm:$0xf] }
 0x207   :  { %v8656_v22 = vor.u32 %v9547_v34, %v8655_v33  ;;  %v9554_v33 = vld [vmem:[%s16010_s3 + $0x154] sm:$0xf]  ;;  %v8689_v34 = vld [vmem:[%s16010_s3 + $0x158] sm:$0xf0] }
 0x209   :  { %v1614_v2 = vpop.f32.mrf.mxu2 }
 0x20c   :  { %v1395_v42 = vpop.f32.mrf.mxu1 }
 0x20d   :  { %v11309_v15 = vadd.f32 %v1614_v2, %v1395_v42  ;;  %v9548_v42 = vld [vmem:[%s16010_s3 + $0x124] sm:$0xf] }
 0x20f   :  { %1434 = vmatmul.bf16.gmra.mxu1 %v8624_v8 }
 0x211   :  { %v1616_v41 = vpop.f32.mrf.mxu2 }
 0x214   :  { %v1397_v59 = vpop.f32.mrf.mxu1 }
 0x215   :  { %v11317_v21 = vadd.f32 %v1616_v41, %v1397_v59  ;;  %v8668_v41 = vor.u32 %v9548_v42, %v8665_v61  ;;  %v8687_v61 = vld [vmem:[%s16010_s3 + $0x150] sm:$0xf] }
 0x216   :  { %8867 = vmatmul.msk.bf16.gmra.mxu2 %vm1234_vm8, %v8636_v17 }
 0x219   :  { %v1619_v3 = vpop.f32.mrf.mxu2 }
 0x21c   :  { %v1400_v39 = vpop.f32.mrf.mxu1 }
 0x21d   :  { %v11326_v35 = vadd.f32 %v1619_v3, %v1400_v39 }
 0x21f   :  { %16419 = vst [vmem:[#allocation45_spill] sm:$0xff] %v11326_v35  ;;  %1439 = vmatmul.bf16.gmra.mxu1 %v8632_v49  ;;  %v8664_v49 = vor.u32 %v9549_v12, %v8663_v26 }
 0x221   :  { %v1621_v5 = vpop.f32.mrf.mxu2 }
 0x224   :  { %v1402_v46 = vpop.f32.mrf.mxu1 }
 0x225   :  { %v11334_v45 = vadd.f32 %v1621_v5, %v1402_v46  ;;  %v8673_v5 = vld [vmem:[%s16010_s3 + $0x138] sm:$0xf0] }
 0x226   :  { %8868 = vmatmul.msk.bf16.gmra.mxu2 %vm1234_vm8, %v8644_v29  ;;  %v8676_v46 = vor.u32 %v9550_v30, %v8673_v5 }
 0x227   :  { %16420 = vst [vmem:[#allocation46_spill] sm:$0xff] %v11334_v45 }
 0x229   :  { %v1624_v18 = vpop.f32.mrf.mxu2 }
 0x22c   :  { %v1405_v56 = vpop.f32.mrf.mxu1 }
 0x22d   :  { %v11343_v54 = vadd.f32 %v1624_v18, %v1405_v56  ;;  %v8671_v18 = vld [vmem:[%s16010_s3 + $0x130] sm:$0xf] }
 0x22f   :  { %16421 = vst [vmem:[#allocation47_spill] sm:$0xff] %v11343_v54  ;;  %1444 = vmatmul.bf16.gmra.mxu1 %v8640_v19  ;;  %v9551_v19 = vld [vmem:[%s16010_s3 + $0x134] sm:$0xf0] }
 0x230   :  { %v8672_v57 = vor.u32 %v9551_v19, %v8671_v18 }
 0x231   :  { %v1626_v10 = vpop.f32.mrf.mxu2 }
 0x234   :  { %v1407_v6 = vpop.f32.mrf.mxu1 }
 0x235   :  { %v11351_v20 = vadd.f32 %v1626_v10, %v1407_v6  ;;  %v8681_v6 = vld [vmem:[%s16010_s3 + $0x148] sm:$0xf0] }
 0x236   :  { %8869 = vmatmul.msk.bf16.gmra.mxu2 %vm1234_vm8, %v8652_v40  ;;  %v9552_v40 = vld [vmem:[%s16010_s3 + $0x144] sm:$0xf] }
 0x237   :  { %16422 = vst [vmem:[#allocation48_spill] sm:$0xff] %v11351_v20  ;;  %v8684_v32 = vor.u32 %v9552_v40, %v8681_v6  ;;  %v8705_v40 = vld [vmem:[%s16010_s3 + $0x178] sm:$0xf0]  ;;  %v11784_v20 = vpop.permute.xlu2 %1811 }
 0x238   :  { %16447 = vst [vmem:[#allocation73_spill] sm:$0xff] %v11784_v20 }
 0x239   :  { %v1629_v48 = vpop.f32.mrf.mxu2 }
 0x23c   :  { %v1410_v25 = vpop.f32.mrf.mxu1 }
 0x23d   :  { %v11360_v27 = vadd.f32 %v1629_v48, %v1410_v25  ;;  %v8679_v25 = vld [vmem:[%s16010_s3 + $0x140] sm:$0xf] }
 0x23f   :  { %1449 = vmatmul.bf16.gmra.mxu1 %v8648_v36  ;;  %v11799_v54 = vpop.permute.xlu2 %1836 }
 0x240   :  { %16450 = vst [vmem:[#allocation76_spill] sm:$0xff] %v11799_v54 }
 0x241   :  { %v1631_v31 = vpop.f32.mrf.mxu2 }
 0x244   :  { %v1412_v7 = vpop.f32.mrf.mxu1 }
 0x245   :  { %v11368_v23 = vadd.f32 %v1631_v31, %v1412_v7  ;;  %v8680_v31 = vor.u32 %v9553_v4, %v8679_v25  ;;  %v8703_v25 = vld [vmem:[%s16010_s3 + $0x170] sm:$0xf]  ;;  %v9559_v4 = vld [vmem:[%s16010_s3 + $0x174] sm:$0xf0] }
 0x246   :  { %8870 = vmatmul.msk.bf16.gmra.mxu2 %vm1234_vm8, %v8660_v52 }
 0x249   :  { %v1634_v1 = vpop.f32.mrf.mxu2 }
 0x24c   :  { %v1415_v2 = vpop.f32.mrf.mxu1 }
 0x24d   :  { %v11377_v8 = vadd.f32 %v1634_v1, %v1415_v2 }
 0x24f   :  { %1454 = vmatmul.bf16.gmra.mxu1 %v8656_v22  ;;  %v8692_v22 = vor.u32 %v9554_v33, %v8689_v34  ;;  %v9560_v34 = vld [vmem:[%s16010_s3 + $0x184] sm:$0xf] }
 0x251   :  { %v1636_v37 = vpop.f32.mrf.mxu2 }
 0x254   :  { %v1417_v17 = vpop.f32.mrf.mxu1 }
 0x255   :  { %v11385_v59 = vadd.f32 %v1636_v37, %v1417_v17  ;;  %v9555_v37 = vld [vmem:[%s16010_s3 + $0x154] sm:$0xf0] }
 0x256   :  { %8871 = vmatmul.msk.bf16.gmra.mxu2 %vm1234_vm8, %v8668_v41  ;;  %v8688_v17 = vor.u32 %v9555_v37, %v8687_v61 }
 0x259   :  { %v1639_v3 = vpop.f32.mrf.mxu2 }
 0x25c   :  { %v1420_v39 = vpop.f32.mrf.mxu1 }
 0x25d   :  { %v11394_v13 = vadd.f32 %v1639_v3, %v1420_v39  ;;  %v9556_v3 = vld [vmem:[%s16010_s3 + $0x164] sm:$0xf] }
 0x25f   :  { %1459 = vmatmul.bf16.gmra.mxu1 %v8664_v49  ;;  %v8697_v49 = vld [vmem:[%s16010_s3 + $0x168] sm:$0xf0] }
 0x260   :  { %v8700_v30 = vor.u32 %v9556_v3, %v8697_v49 }
 0x261   :  { %v1641_v29 = vpop.f32.mrf.mxu2 }
 0x264   :  { %v1422_v44 = vpop.f32.mrf.mxu1 }
 0x265   :  { %v11402_v43 = vadd.f32 %v1641_v29, %v1422_v44  ;;  %v9557_v44 = vld [vmem:[%s16010_s3 + $0x164] sm:$0xf0] }
 0x266   :  { %8872 = vmatmul.msk.bf16.gmra.mxu2 %vm1234_vm8, %v8676_v46  ;;  %v8695_v46 = vld [vmem:[%s16010_s3 + $0x160] sm:$0xf] }
 0x267   :  { %v8696_v19 = vor.u32 %v9557_v44, %v8695_v46 }
 0x269   :  { %v1644_v56 = vpop.f32.mrf.mxu2 }
 0x26c   :  { %v1425_v14 = vpop.f32.mrf.mxu1 }
 0x26d   :  { %v11411_v10 = vadd.f32 %v1644_v56, %v1425_v14  ;;  %v9558_v14 = vld [vmem:[%s16010_s3 + $0x174] sm:$0xf] }
 0x26f   :  { %1464 = vmatmul.bf16.gmra.mxu1 %v8672_v57 }
 0x271   :  { %v1646_v53 = vpop.f32.mrf.mxu2 }
 0x274   :  { %v1427_v48 = vpop.f32.mrf.mxu1 }
 0x275   :  { %v11419_v36 = vadd.f32 %v1646_v53, %v1427_v48  ;;  %v8708_v53 = vor.u32 %v9558_v14, %v8705_v40  ;;  %v9563_v14 = vld [vmem:[%s16010_s3 + $0x194] sm:$0xf0] }
 0x276   :  { %8873 = vmatmul.msk.bf16.gmra.mxu2 %vm1234_vm8, %v8684_v32 }
 0x279   :  { %v1649_v62 = vpop.f32.mrf.mxu2 }
 0x27c   :  { %v1430_v52 = vpop.f32.mrf.mxu1 }
 0x27d   :  { %v11428_v7 = vadd.f32 %v1649_v62, %v1430_v52 }
 0x27f   :  { %16423 = vst [vmem:[#allocation49_spill] sm:$0xff] %v11428_v7  ;;  %1469 = vmatmul.bf16.gmra.mxu1 %v8680_v31  ;;  %v8704_v31 = vor.u32 %v9559_v4, %v8703_v25  ;;  %v9564_v25 = vld [vmem:[%s16010_s3 + $0x1a4] sm:$0xf]  ;;  %v8729_v4 = vld [vmem:[%s16010_s3 + $0x1a8] sm:$0xf0] }
 0x281   :  { %v1651_v1 = vpop.f32.mrf.mxu2 }
 0x284   :  { %v1432_v2 = vpop.f32.mrf.mxu1 }
 0x285   :  { %v11436_v42 = vadd.f32 %v1651_v1, %v1432_v2  ;;  %v8713_v1 = vld [vmem:[%s16010_s3 + $0x188] sm:$0xf0] }
 0x286   :  { %8874 = vmatmul.msk.bf16.gmra.mxu2 %vm1234_vm8, %v8692_v22  ;;  %v8716_v2 = vor.u32 %v9560_v34, %v8713_v1  ;;  %v8727_v1 = vld [vmem:[%s16010_s3 + $0x1a0] sm:$0xf] }
 0x287   :  { %16424 = vst [vmem:[#allocation50_spill] sm:$0xff] %v11436_v42 }
 0x289   :  { %v1654_v41 = vpop.f32.mrf.mxu2 }
 0x28c   :  { %v1435_v26 = vpop.f32.mrf.mxu1 }
 0x28d   :  { %v11445_v12 = vadd.f32 %v1654_v41, %v1435_v26  ;;  %v8711_v41 = vld [vmem:[%s16010_s3 + $0x180] sm:$0xf] }
 0x28f   :  { %16425 = vst [vmem:[#allocation51_spill] sm:$0xff] %v11445_v12  ;;  %1474 = vmatmul.bf16.gmra.mxu1 %v8688_v17  ;;  %v9561_v17 = vld [vmem:[%s16010_s3 + $0x184] sm:$0xf0] }
 0x290   :  { %v8712_v3 = vor.u32 %v9561_v17, %v8711_v41 }
 0x291   :  { %v1656_v39 = vpop.f32.mrf.mxu2 }
 0x294   :  { %v1437_v5 = vpop.f32.mrf.mxu1 }
 0x295   :  { %v11453_v29 = vadd.f32 %v1656_v39, %v1437_v5  ;;  %v8721_v5 = vld [vmem:[%s16010_s3 + $0x198] sm:$0xf0] }
 0x296   :  { %8875 = vmatmul.msk.bf16.gmra.mxu2 %vm1234_vm8, %v8700_v30  ;;  %v9562_v30 = vld [vmem:[%s16010_s3 + $0x194] sm:$0xf] }
 0x297   :  { %16426 = vst [vmem:[#allocation52_spill] sm:$0xff] %v11453_v29  ;;  %v8724_v44 = vor.u32 %v9562_v30, %v8721_v5 }
 0x299   :  { %v1659_v18 = vpop.f32.mrf.mxu2 }
 0x29c   :  { %v1440_v56 = vpop.f32.mrf.mxu1 }
 0x29d   :  { %v11462_v57 = vadd.f32 %v1659_v18, %v1440_v56  ;;  %v8719_v56 = vld [vmem:[%s16010_s3 + $0x190] sm:$0xf] }
 0x29f   :  { %1479 = vmatmul.bf16.gmra.mxu1 %v8696_v19 }
 0x2a1   :  { %v1661_v6 = vpop.f32.mrf.mxu2 }
 0x2a4   :  { %v1442_v32 = vpop.f32.mrf.mxu1 }
 0x2a5   :  { %v11470_v48 = vadd.f32 %v1661_v6, %v1442_v32  ;;  %v8720_v6 = vor.u32 %v9563_v14, %v8719_v56 }
 0x2a6   :  { %8876 = vmatmul.msk.bf16.gmra.mxu2 %vm1234_vm8, %v8708_v53 }
 0x2a9   :  { %v1664_v62 = vpop.f32.mrf.mxu2 }
 0x2ac   :  { %v1445_v52 = vpop.f32.mrf.mxu1 }
 0x2ad   :  { %v11479_v33 = vadd.f32 %v1664_v62, %v1445_v52 }
 0x2af   :  { %1484 = vmatmul.bf16.gmra.mxu1 %v8704_v31  ;;  %v8732_v31 = vor.u32 %v9564_v25, %v8729_v4  ;;  %v8745_v25 = vld [vmem:[%s16010_s3 + $0x1c8] sm:$0xf0] }
 0x2b1   :  { %v1666_v22 = vpop.f32.mrf.mxu2 }
 0x2b4   :  { %v1447_v61 = vpop.f32.mrf.mxu1 }
 0x2b5   :  { %v11487_v37 = vadd.f32 %v1666_v22, %v1447_v61  ;;  %v9565_v22 = vld [vmem:[%s16010_s3 + $0x1a4] sm:$0xf0] }
 0x2b6   :  { %8877 = vmatmul.msk.bf16.gmra.mxu2 %vm1234_vm8, %v8716_v2  ;;  %v8728_v61 = vor.u32 %v9565_v22, %v8727_v1  ;;  %v8743_v1 = vld [vmem:[%s16010_s3 + $0x1c0] sm:$0xf]  ;;  %v9569_v22 = vld [vmem:[%s16010_s3 + $0x1c4] sm:$0xf0] }
 0x2b9   :  { %v1669_v26 = vpop.f32.mrf.mxu2 }
 0x2bc   :  { %v1450_v49 = vpop.f32.mrf.mxu1 }
 0x2bd   :  { %v11496_v39 = vadd.f32 %v1669_v26, %v1450_v49  ;;  %v9566_v26 = vld [vmem:[%s16010_s3 + $0x1b4] sm:$0xf] }
 0x2bf   :  { %1489 = vmatmul.bf16.gmra.mxu1 %v8712_v3  ;;  %v8737_v3 = vld [vmem:[%s16010_s3 + $0x1b8] sm:$0xf0] }
 0x2c0   :  { %v8740_v30 = vor.u32 %v9566_v26, %v8737_v3  ;;  %v9570_v3 = vld [vmem:[%s16010_s3 + $0x1d4] sm:$0xf] }
 0x2c1   :  { %v1671_v46 = vpop.f32.mrf.mxu2 }
 0x2c4   :  { %v1452_v18 = vpop.f32.mrf.mxu1 }
 0x2c5   :  { %v11504_v19 = vadd.f32 %v1671_v46, %v1452_v18  ;;  %v9567_v18 = vld [vmem:[%s16010_s3 + $0x1b4] sm:$0xf0] }
 0x2c6   :  { %8878 = vmatmul.msk.bf16.gmra.mxu2 %vm1234_vm8, %v8724_v44  ;;  %v8735_v44 = vld [vmem:[%s16010_s3 + $0x1b0] sm:$0xf] }
 0x2c7   :  { %v8736_v14 = vor.u32 %v9567_v18, %v8735_v44 }
 0x2c9   :  { %v1674_v40 = vpop.f32.mrf.mxu2 }
 0x2cc   :  { %v1455_v53 = vpop.f32.mrf.mxu1 }
 0x2cd   :  { %v11513_v32 = vadd.f32 %v1674_v40, %v1455_v53  ;;  %v9568_v53 = vld [vmem:[%s16010_s3 + $0x1c4] sm:$0xf] }
 0x2cf   :  { %1494 = vmatmul.bf16.gmra.mxu1 %v8720_v6 }
 0x2d1   :  { %v1676_v62 = vpop.f32.mrf.mxu2 }
 0x2d4   :  { %v1457_v52 = vpop.f32.mrf.mxu1 }
 0x2d5   :  { %v11521_v34 = vadd.f32 %v1676_v62, %v1457_v52  ;;  %v8748_v62 = vor.u32 %v9568_v53, %v8745_v25 }
 0x2d6   :  { %8879 = vmatmul.msk.bf16.gmra.mxu2 %vm1234_vm8, %v8732_v31 }
 0x2d9   :  { %v1679_v2 = vpop.f32.mrf.mxu2 }
 0x2dc   :  { %v1460_v41 = vpop.f32.mrf.mxu1 }
 0x2dd   :  { %v11530_v17 = vadd.f32 %v1679_v2, %v1460_v41 }
 0x2df   :  { %1499 = vmatmul.bf16.gmra.mxu1 %v8728_v61  ;;  %v8744_v61 = vor.u32 %v9569_v22, %v8743_v1 }
 0x2e1   :  { %v1681_v49 = vpop.f32.mrf.mxu2 }
 0x2e4   :  { %v1462_v5 = vpop.f32.mrf.mxu1 }
 0x2e5   :  { %v11538_v46 = vadd.f32 %v1681_v49, %v1462_v5  ;;  %v8753_v49 = vld [vmem:[%s16010_s3 + $0x1d8] sm:$0xf0] }
 0x2e6   :  { %8880 = vmatmul.msk.bf16.gmra.mxu2 %vm1234_vm8, %v8740_v30  ;;  %v8756_v5 = vor.u32 %v9570_v3, %v8753_v49  ;;  %v9573_v3 = vld [vmem:[%s16010_s3 + $0x1e4] sm:$0xf0] }
 0x2e9   :  { %v1684_v56 = vpop.f32.mrf.mxu2 }
 0x2ec   :  { %v1465_v40 = vpop.f32.mrf.mxu1 }
 0x2ed   :  { %v11547_v6 = vadd.f32 %v1684_v56, %v1465_v40  ;;  %v8751_v56 = vld [vmem:[%s16010_s3 + $0x1d0] sm:$0xf] }
 0x2ef   :  { %1504 = vmatmul.bf16.gmra.mxu1 %v8736_v14  ;;  %v9571_v14 = vld [vmem:[%s16010_s3 + $0x1d4] sm:$0xf0] }
 0x2f0   :  { %v8752_v53 = vor.u32 %v9571_v14, %v8751_v56  ;;  %v9574_v56 = vld [vmem:[%s16010_s3 + $0x1f4] sm:$0xf]  ;;  %v8769_v14 = vld [vmem:[%s16010_s3 + $0x1f8] sm:$0xf0] }
 0x2f1   :  { %v1686_v4 = vpop.f32.mrf.mxu2 }
 0x2f4   :  { %v1467_v31 = vpop.f32.mrf.mxu1 }
 0x2f5   :  { %v11555_v52 = vadd.f32 %v1686_v4, %v1467_v31  ;;  %v8761_v31 = vld [vmem:[%s16010_s3 + $0x1e8] sm:$0xf0] }
 0x2f6   :  { %8881 = vmatmul.msk.bf16.gmra.mxu2 %vm1234_vm8, %v8748_v62  ;;  %v9572_v62 = vld [vmem:[%s16010_s3 + $0x1e4] sm:$0xf] }
 0x2f7   :  { %v8764_v22 = vor.u32 %v9572_v62, %v8761_v31  ;;  %v8767_v31 = vld [vmem:[%s16010_s3 + $0x1f0] sm:$0xf] }
 0x2f9   :  { %v1689_v2 = vpop.f32.mrf.mxu2 }
 0x2fc   :  { %v1470_v41 = vpop.f32.mrf.mxu1 }
 0x2fd   :  { %v11564_v26 = vadd.f32 %v1689_v2, %v1470_v41  ;;  %v8759_v41 = vld [vmem:[%s16010_s3 + $0x1e0] sm:$0xf] }
 0x2ff   :  { %1509 = vmatmul.bf16.gmra.mxu1 %v8744_v61 }
 0x301   :  { %v1691_v30 = vpop.f32.mrf.mxu2 }
 0x304   :  { %v1472_v44 = vpop.f32.mrf.mxu1 }
 0x305   :  { %v11572_v18 = vadd.f32 %v1691_v30, %v1472_v44  ;;  %v8760_v30 = vor.u32 %v9573_v3, %v8759_v41 }
 0x306   :  { %8882 = vmatmul.msk.bf16.gmra.mxu2 %vm1234_vm8, %v8756_v5 }
 0x309   :  { %v1694_v40 = vpop.f32.mrf.mxu2 }
 0x30c   :  { %v1475_v25 = vpop.f32.mrf.mxu1 }
 0x30d   :  { %v11581_v4 = vadd.f32 %v1694_v40, %v1475_v25 }
 0x30f   :  { %1514 = vmatmul.bf16.gmra.mxu1 %v8752_v53  ;;  %v8772_v53 = vor.u32 %v9574_v56, %v8769_v14 }
 0x311   :  { %v1696_v1 = vpop.f32.mrf.mxu2 }
 0x314   :  { %v1477_v2 = vpop.f32.mrf.mxu1 }
 0x315   :  { %v11589_v61 = vadd.f32 %v1696_v1, %v1477_v2  ;;  %v9575_v1 = vld [vmem:[%s16010_s3 + $0x1f4] sm:$0xf0] }
 0x316   :  { %8883 = vmatmul.msk.bf16.gmra.mxu2 %vm1234_vm8, %v8764_v22  ;;  %v8768_v2 = vor.u32 %v9575_v1, %v8767_v31 }
 0x319   :  { %v1699_v49 = vpop.f32.mrf.mxu2 }
 0x31c   :  { %v1480_v5 = vpop.f32.mrf.mxu1 }
 0x31d   :  { %v11598_v44 = vadd.f32 %v1699_v49, %v1480_v5  ;;  %v9576_v49 = vld [vmem:[%s16010_s3 + $0x204] sm:$0xf] }
 0x31f   :  { %16427 = vst [vmem:[#allocation53_spill] sm:$0xff] %v11598_v44  ;;  %1519 = vmatmul.bf16.gmra.mxu1 %v8760_v30  ;;  %v8777_v30 = vld [vmem:[%s16010_s3 + $0x208] sm:$0xf0] }
 0x320   :  { %v8780_v56 = vor.u32 %v9576_v49, %v8777_v30  ;;  %v8785_v49 = vld [vmem:[%s16010_s3 + $0x218] sm:$0xf0] }
 0x321   :  { %v1701_v40 = vpop.f32.mrf.mxu2 }
 0x324   :  { %v1482_v25 = vpop.f32.mrf.mxu1 }
 0x325   :  { %v11606_v62 = vadd.f32 %v1701_v40, %v1482_v25  ;;  %v9577_v25 = vld [vmem:[%s16010_s3 + $0x204] sm:$0xf0] }
 0x326   :  { %8884 = vmatmul.msk.bf16.gmra.mxu2 %vm1234_vm8, %v8772_v53  ;;  %v8775_v53 = vld [vmem:[%s16010_s3 + $0x200] sm:$0xf] }
 0x327   :  { %16428 = vst [vmem:[#allocation54_spill] sm:$0xff] %v11606_v62  ;;  %v8776_v1 = vor.u32 %v9577_v25, %v8775_v53  ;;  %v8783_v53 = vld [vmem:[%s16010_s3 + $0x210] sm:$0xf]  ;;  %v9579_v25 = vld [vmem:[%s16010_s3 + $0x214] sm:$0xf0] }
 0x329   :  { %v1704_v22 = vpop.f32.mrf.mxu2 }
 0x32c   :  { %v1485_v41 = vpop.f32.mrf.mxu1 }
 0x32d   :  { %v11615_v3 = vadd.f32 %v1704_v22, %v1485_v41  ;;  %v9578_v41 = vld [vmem:[%s16010_s3 + $0x214] sm:$0xf] }
 0x32f   :  { %16429 = vst [vmem:[#allocation55_spill] sm:$0xff] %v11615_v3  ;;  %1524 = vmatmul.bf16.gmra.mxu1 %v8768_v2 }
 0x331   :  { %v1706_v5 = vpop.f32.mrf.mxu2 }
 0x334   :  { %v1487_v14 = vpop.f32.mrf.mxu1 }
 0x335   :  { %v11623_v40 = vadd.f32 %v1706_v5, %v1487_v14  ;;  %v8788_v5 = vor.u32 %v9578_v41, %v8785_v49  ;;  %v9580_v41 = vld [vmem:[%s16010_s3 + $0x224] sm:$0xf]  ;;  %v8793_v49 = vld [vmem:[%s16010_s3 + $0x228] sm:$0xf0] }
 0x336   :  { %8885 = vmatmul.msk.bf16.gmra.mxu2 %vm1234_vm8, %v8780_v56 }
 0x337   :  { %16430 = vst [vmem:[#allocation56_spill] sm:$0xff] %v11623_v40 }
 0x339   :  { %v1709_v31 = vpop.f32.mrf.mxu2 }
 0x33c   :  { %v1490_v22 = vpop.f32.mrf.mxu1 }
 0x33d   :  { %v11632_v2 = vadd.f32 %v1709_v31, %v1490_v22 }
 0x33f   :  { %16431 = vst [vmem:[#allocation57_spill] sm:$0xff] %v11632_v2  ;;  %1529 = vmatmul.bf16.gmra.mxu1 %v8776_v1  ;;  %v8784_v1 = vor.u32 %v9579_v25, %v8783_v53  ;;  %v8791_v53 = vld [vmem:[%s16010_s3 + $0x220] sm:$0xf]  ;;  %v9581_v25 = vld [vmem:[%s16010_s3 + $0x224] sm:$0xf0] }
 0x341   :  { %v1711_v30 = vpop.f32.mrf.mxu2 }
 0x344   :  { %v1492_v56 = vpop.f32.mrf.mxu1 }
 0x345   :  { %v11640_v14 = vadd.f32 %v1711_v30, %v1492_v56 }
 0x346   :  { %8886 = vmatmul.msk.bf16.gmra.mxu2 %vm1234_vm8, %v8788_v5  ;;  %v8796_v5 = vor.u32 %v9580_v41, %v8793_v49  ;;  %v9582_v41 = vld [vmem:[%s16010_s3 + $0x234] sm:$0xf]  ;;  %v8801_v49 = vld [vmem:[%s16010_s3 + $0x238] sm:$0xf0] }
 0x347   :  { %16432 = vst [vmem:[#allocation58_spill] sm:$0xff] %v11640_v14 }
 0x349   :  { %v1714_v31 = vpop.f32.mrf.mxu2 }
 0x34c   :  { %v1495_v22 = vpop.f32.mrf.mxu1 }
 0x34d   :  { %v11649_v55 = vadd.f32 %v1714_v31, %v1495_v22 }
 0x34f   :  { %16433 = vst [vmem:[#allocation59_spill] sm:$0xff] %v11649_v55  ;;  %1534 = vmatmul.bf16.gmra.mxu1 %v8784_v1  ;;  %v8792_v1 = vor.u32 %v9581_v25, %v8791_v53  ;;  %v8799_v53 = vld [vmem:[%s16010_s3 + $0x230] sm:$0xf]  ;;  %v9583_v25 = vld [vmem:[%s16010_s3 + $0x234] sm:$0xf0] }
 0x351   :  { %v1716_v30 = vpop.f32.mrf.mxu2 }
 0x354   :  { %v1497_v56 = vpop.f32.mrf.mxu1 }
 0x355   :  { %v11657_v16 = vadd.f32 %v1716_v30, %v1497_v56 }
 0x356   :  { %8887 = vmatmul.msk.bf16.gmra.mxu2 %vm1234_vm8, %v8796_v5  ;;  %v8804_v5 = vor.u32 %v9582_v41, %v8801_v49  ;;  %v9584_v41 = vld [vmem:[%s16010_s3 + $0x244] sm:$0xf]  ;;  %v8809_v49 = vld [vmem:[%s16010_s3 + $0x248] sm:$0xf0] }
 0x357   :  { %16434 = vst [vmem:[#allocation60_spill] sm:$0xff] %v11657_v16 }
 0x359   :  { %v1719_v31 = vpop.f32.mrf.mxu2 }
 0x35c   :  { %v1500_v22 = vpop.f32.mrf.mxu1 }
 0x35d   :  { %v11666_v50 = vadd.f32 %v1719_v31, %v1500_v22 }
 0x35f   :  { %1539 = vmatmul.bf16.gmra.mxu1 %v8792_v1  ;;  %v8800_v1 = vor.u32 %v9583_v25, %v8799_v53  ;;  %v8807_v53 = vld [vmem:[%s16010_s3 + $0x240] sm:$0xf]  ;;  %v9585_v25 = vld [vmem:[%s16010_s3 + $0x244] sm:$0xf0] }
 0x361   :  { %v1721_v30 = vpop.f32.mrf.mxu2 }
 0x364   :  { %v1502_v56 = vpop.f32.mrf.mxu1 }
 0x365   :  { %v11674_v63 = vadd.f32 %v1721_v30, %v1502_v56 }
 0x366   :  { %8888 = vmatmul.msk.bf16.gmra.mxu2 %vm1234_vm8, %v8804_v5  ;;  %v8812_v5 = vor.u32 %v9584_v41, %v8809_v49  ;;  %v9586_v41 = vld [vmem:[%s16010_s3 + $0x254] sm:$0xf]  ;;  %v8817_v49 = vld [vmem:[%s16010_s3 + $0x258] sm:$0xf0] }
 0x369   :  { %v1724_v31 = vpop.f32.mrf.mxu2 }
 0x36c   :  { %v1505_v22 = vpop.f32.mrf.mxu1 }
 0x36d   :  { %v11683_v0 = vadd.f32 %v1724_v31, %v1505_v22 }
 0x36f   :  { %1544 = vmatmul.bf16.gmra.mxu1 %v8800_v1  ;;  %v8808_v1 = vor.u32 %v9585_v25, %v8807_v53  ;;  %v8815_v53 = vld [vmem:[%s16010_s3 + $0x250] sm:$0xf]  ;;  %v9587_v25 = vld [vmem:[%s16010_s3 + $0x254] sm:$0xf0] }
 0x371   :  { %v1726_v30 = vpop.f32.mrf.mxu2 }
 0x374   :  { %v1507_v56 = vpop.f32.mrf.mxu1 }
 0x375   :  { %v11691_v24 = vadd.f32 %v1726_v30, %v1507_v56 }
 0x376   :  { %8889 = vmatmul.msk.bf16.gmra.mxu2 %vm1234_vm8, %v8812_v5  ;;  %v8820_v5 = vor.u32 %v9586_v41, %v8817_v49  ;;  %v9588_v41 = vld [vmem:[%s16010_s3 + $0x264] sm:$0xf]  ;;  %v8825_v49 = vld [vmem:[%s16010_s3 + $0x268] sm:$0xf0] }
 0x379   :  { %v1729_v31 = vpop.f32.mrf.mxu2 }
 0x37c   :  { %v1510_v22 = vpop.f32.mrf.mxu1 }
 0x37d   :  { %v11700_v9 = vadd.f32 %v1729_v31, %v1510_v22 }
 0x37f   :  { %16435 = vst [vmem:[#allocation61_spill] sm:$0xff] %v11700_v9  ;;  %1549 = vmatmul.bf16.gmra.mxu1 %v8808_v1  ;;  %v8816_v1 = vor.u32 %v9587_v25, %v8815_v53  ;;  %v8823_v53 = vld [vmem:[%s16010_s3 + $0x260] sm:$0xf]  ;;  %v9589_v25 = vld [vmem:[%s16010_s3 + $0x264] sm:$0xf0] }
 0x381   :  { %v1731_v30 = vpop.f32.mrf.mxu2 }
 0x384   :  { %v1512_v56 = vpop.f32.mrf.mxu1 }
 0x385   :  { %v11708_v51 = vadd.f32 %v1731_v30, %v1512_v56 }
 0x386   :  { %8890 = vmatmul.msk.bf16.gmra.mxu2 %vm1234_vm8, %v8820_v5  ;;  %v8828_v5 = vor.u32 %v9588_v41, %v8825_v49  ;;  %v9590_v41 = vld [vmem:[%s16010_s3 + $0x274] sm:$0xf]  ;;  %v8833_v49 = vld [vmem:[%s16010_s3 + $0x278] sm:$0xf0] }
 0x387   :  { %16436 = vst [vmem:[#allocation62_spill] sm:$0xff] %v11708_v51 }
 0x389   :  { %v1734_v31 = vpop.f32.mrf.mxu2 }
 0x38c   :  { %v1515_v22 = vpop.f32.mrf.mxu1 }
 0x38d   :  { %v11717_v16 = vadd.f32 %v1734_v31, %v1515_v22 }
 0x38f   :  { %16437 = vst [vmem:[#allocation63_spill] sm:$0xff] %v11717_v16  ;;  %1554 = vmatmul.bf16.gmra.mxu1 %v8816_v1  ;;  %v8824_v1 = vor.u32 %v9589_v25, %v8823_v53  ;;  %v8831_v53 = vld [vmem:[%s16010_s3 + $0x270] sm:$0xf]  ;;  %v9591_v25 = vld [vmem:[%s16010_s3 + $0x274] sm:$0xf0] }
 0x391   :  { %v1736_v30 = vpop.f32.mrf.mxu2 }
 0x394   :  { %v1517_v56 = vpop.f32.mrf.mxu1 }
 0x395   :  { %v11725_v55 = vadd.f32 %v1736_v30, %v1517_v56 }
 0x396   :  { %8891 = vmatmul.msk.bf16.gmra.mxu2 %vm1234_vm8, %v8828_v5  ;;  %v8836_v5 = vor.u32 %v9590_v41, %v8833_v49  ;;  %v9592_v41 = vld [vmem:[%s16010_s3 + $0x284] sm:$0xf]  ;;  %v8841_v49 = vld [vmem:[%s16010_s3 + $0x288] sm:$0xf0] }
 0x397   :  { %16438 = vst [vmem:[#allocation64_spill] sm:$0xff] %v11725_v55 }
 0x399   :  { %v1739_v31 = vpop.f32.mrf.mxu2 }
 0x39c   :  { %v1520_v22 = vpop.f32.mrf.mxu1 }
 0x39d   :  { %v11734_v14 = vadd.f32 %v1739_v31, %v1520_v22 }
 0x39f   :  { %16439 = vst [vmem:[#allocation65_spill] sm:$0xff] %v11734_v14  ;;  %1559 = vmatmul.bf16.gmra.mxu1 %v8824_v1  ;;  %v8832_v1 = vor.u32 %v9591_v25, %v8831_v53  ;;  %v8839_v53 = vld [vmem:[%s16010_s3 + $0x280] sm:$0xf]  ;;  %v9593_v25 = vld [vmem:[%s16010_s3 + $0x284] sm:$0xf0] }
 0x3a1   :  { %v11742_v30 = vpop.f32.mrf.mxu2 }
 0x3a2   :  { %16440 = vst [vmem:[#allocation66_spill] sm:$0xff] %v11742_v30  ;;  %v8844_v30 = vor.u32 %v9592_v41, %v8841_v49  ;;  %v9594_v41 = vld [vmem:[%s16010_s3 + $0x294] sm:$0xf] }
 0x3a4   :  { %v11744_v56 = vpop.f32.mrf.mxu1 }
 0x3a5   :  { %16441 = vst [vmem:[#allocation67_spill] sm:$0xff] %v11744_v56 }
 0x3a6   :  { %8892 = vmatmul.msk.bf16.gmra.mxu2 %vm1234_vm8, %v8836_v5 }
 0x3a9   :  { %v1744_v31 = vpop.f32.mrf.mxu2 }
 0x3ac   :  { %v1525_v22 = vpop.f32.mrf.mxu1 }
 0x3ad   :  { %v11753_v14 = vadd.f32 %v1744_v31, %v1525_v22 }
 0x3af   :  { %16442 = vst [vmem:[#allocation68_spill] sm:$0xff] %v11753_v14  ;;  %1564 = vmatmul.bf16.gmra.mxu1 %v8832_v1  ;;  %v8840_v1 = vor.u32 %v9593_v25, %v8839_v53  ;;  %v11786_v53 = vpop.permute.xlu1 %1831  ;;  %v11789_v25 = vpop.permute.xlu0 %1816 }
 0x3b0   :  { %16448 = vst [vmem:[#allocation74_spill] sm:$0xff] %v11786_v53  ;;  %v11855_v51 = vadd.f32 %v11786_v53, %v11479_v33 }
 0x3b1   :  { %v11761_v5 = vpop.f32.mrf.mxu2  ;;  %16449 = vst [vmem:[#allocation75_spill] sm:$0xff] %v11789_v25 }
 0x3b2   :  { %16443 = vst [vmem:[#allocation69_spill] sm:$0xff] %v11761_v5 }
 0x3b3   :  { %16463 = vst [vmem:[#allocation89_spill] sm:$0xff] %v11855_v51 }
 0x3b4   :  { %v11763_v56 = vpop.f32.mrf.mxu1 }
 0x3b5   :  { %16444 = vst [vmem:[#allocation70_spill] sm:$0xff] %v11763_v56 }
 0x3b6   :  { %8893 = vmatmul.msk.bf16.gmra.mxu2 %vm1234_vm8, %v8844_v30  ;;  %v8849_v30 = vld [vmem:[%s16010_s3 + $0x298] sm:$0xf0] }
 0x3b7   :  { %v8852_v42 = vor.u32 %v9594_v41, %v8849_v30  ;;  %v11801_v35 = vpop.permute.xlu1 %1806 }
 0x3b8   :  { %16451 = vst [vmem:[#allocation77_spill] sm:$0xff] %v11801_v35 }
 0x3b9   :  { %v1749_v31 = vpop.f32.mrf.mxu2 }
 0x3bc   :  { %v1530_v22 = vpop.f32.mrf.mxu1 }
 0x3bd   :  { %v11772_v2 = vadd.f32 %v1749_v31, %v1530_v22  ;;  %v8847_v31 = vld [vmem:[%s16010_s3 + $0x290] sm:$0xf] }
 0x3bf   :  { %1569 = vmatmul.bf16.gmra.mxu1 %v8840_v1  ;;  %v9595_v1 = vld [vmem:[%s16010_s3 + $0x294] sm:$0xf0]  ;;  %v11835_v29 = vpop.permute.xlu1 %1851 }
 0x3c0   :  { %v8848_v41 = vor.u32 %v9595_v1, %v8847_v31  ;;  %v11815_v31 = vadd.f32 %v11784_v20, %v11547_v6  ;;  %v11817_v1 = vpop.permute.xlu2 %1821  ;;  %16460 = vst [vmem:[#allocation86_spill] sm:$0xff] %v11835_v29 }
 0x3c1   :  { %v11780_v49 = vpop.f32.mrf.mxu2  ;;  %16455 = vst [vmem:[#allocation81_spill] sm:$0xff] %v11817_v1  ;;  %v11851_v16 = vadd.f32 %v11817_v1, %v11462_v57 }
 0x3c2   :  { %16445 = vst [vmem:[#allocation71_spill] sm:$0xff] %v11780_v49  ;;  %v4003_v40 = vmul.f32 %v11815_v31, %v11855_v51  ;;  %v11875_v51 = vadd.f32 %v11799_v54, %v11283_v11  ;;  %v11893_v11 = vadd.f32 %v11835_v29, %v11309_v15 }
 0x3c3   :  { %16454 = vst [vmem:[#allocation80_spill] sm:$0xff] %v11815_v31 }
 0x3c4   :  { %v11782_v7 = vpop.f32.mrf.mxu1  ;;  %16462 = vst [vmem:[#allocation88_spill] sm:$0xff] %v11851_v16  ;;  %v4167_v44 = vrot.slane %v4003_v40, 4 }
 0x3c5   :  { %16446 = vst [vmem:[#allocation72_spill] sm:$0xff] %v11782_v7 }
 0x3c6   :  { %8894 = vmatmul.msk.bf16.gmra.mxu2 %vm1234_vm8, %v8852_v42  ;;  %v11803_v42 = vpop.permute.xlu0 %1801  ;;  %16468 = vst [vmem:[#allocation94_spill] sm:$0xff] %v11875_v51 }
 0x3c7   :  { %16452 = vst [vmem:[#allocation78_spill] sm:$0xff] %v11803_v42  ;;  %v11811_v14 = vadd.f32 %v11803_v42, %v11530_v17  ;;  %v11833_v17 = vadd.f32 %v11786_v53, %v11377_v8  ;;  %v11865_v33 = vpop.permute.xlu1 %1846 }
 0x3c8   :  { %16465 = vst [vmem:[#allocation91_spill] sm:$0xff] %v11865_v33  ;;  %v11913_v15 = vadd.f32 %v11865_v33, %v11402_v43 }
 0x3c9   :  { %v1754_v22 = vpop.f32.mrf.mxu2  ;;  %16453 = vst [vmem:[#allocation79_spill] sm:$0xff] %v11811_v14  ;;  %v1966_v9 = vmul.f32 %v11811_v14, %v11851_v16 }
 0x3ca   :  { %16459 = vst [vmem:[#allocation85_spill] sm:$0xff] %v11833_v17 }
 0x3cb   :  { %v2130_v16 = vrot.slane %v1966_v9, 4  ;;  %16473 = vst [vmem:[#allocation99_spill] sm:$0xff] %v11893_v11 }
 0x3cc   :  { %v1535_v30 = vpop.f32.mrf.mxu1  ;;  %16478 = vst [vmem:[#allocation104_spill] sm:$0xff] %v11913_v15 }
 0x3cd   :  { %v11797_v45 = vadd.f32 %v1754_v22, %v1535_v30  ;;  %v11821_v22 = vadd.f32 %v11817_v1, %v11258_v28  ;;  %v11829_v30 = vadd.f32 %v11817_v1, %v11360_v27  ;;  %v4002_v27 = vmul.f32 %v11815_v31, %v11833_v17 }
 0x3ce   :  { %v11837_v12 = vpop.permute.xlu0 %1826 }
 0x3cf   :  { %1574 = vmatmul.bf16.gmra.mxu1 %v8848_v41  ;;  %16456 = vst [vmem:[#allocation82_spill] sm:$0xff] %v11821_v22  ;;  %v11825_v41 = vadd.f32 %v11786_v53, %v11275_v60  ;;  %v1964_v28 = vmul.f32 %v11811_v14, %v11821_v22  ;;  %v1965_v60 = vmul.f32 %v11811_v14, %v11829_v30  ;;  %v4161_v7 = vrot.slane %v4002_v27, 4 }
 0x3d0   :  { %16458 = vst [vmem:[#allocation84_spill] sm:$0xff] %v11829_v30  ;;  %v11871_v62 = vadd.f32 %v11837_v12, %v11266_v58  ;;  %v11889_v58 = vpop.permute.xlu2 %1856 }
 0x3d1   :  { %v11805_v5 = vpop.f32.mrf.mxu2  ;;  %16457 = vst [vmem:[#allocation83_spill] sm:$0xff] %v11825_v41  ;;  %v4001_v42 = vmul.f32 %v11815_v31, %v11825_v41  ;;  %v2118_v22 = vrot.slane %v1964_v28, 4  ;;  %v2124_v49 = vrot.slane %v1965_v60, 4  ;;  %v4162_v3 = vadd.f32 %v4161_v7, %v4002_v27 }
 0x3d2   :  { %16467 = vst [vmem:[#allocation93_spill] sm:$0xff] %v11871_v62  ;;  %v11883_v7 = vadd.f32 %v11865_v33, %v11300_v47  ;;  %v11901_v47 = vadd.f32 %v11837_v12, %v11368_v23  ;;  %v11921_v23 = vadd.f32 %v11889_v58, %v11419_v36 }
 0x3d3   :  { %v4155_v30 = vrot.slane %v4001_v42, 4  ;;  %16472 = vst [vmem:[#allocation98_spill] sm:$0xff] %v11889_v58 }
 0x3d4   :  { %v11807_v56 = vpop.f32.mrf.mxu1  ;;  %16470 = vst [vmem:[#allocation96_spill] sm:$0xff] %v11883_v7  ;;  %v2131_v7 = vadd.f32 %v2130_v16, %v1966_v9 }
 0x3d5   :  { %v4156_v57 = vadd.f32 %v4155_v30, %v4001_v42  ;;  %v11887_v42 = vadd.f32 %v11789_v25, %v11555_v52  ;;  %16475 = vst [vmem:[#allocation101_spill] sm:$0xff] %v11901_v47  ;;  %v11905_v52 = vadd.f32 %v11799_v54, %v11385_v59  ;;  %v11925_v59 = vadd.f32 %v11799_v54, %v11487_v37 }
 0x3d6   :  { %v11867_v41 = vpop.permute.xlu0 %1841  ;;  %16480 = vst [vmem:[#allocation106_spill] sm:$0xff] %v11921_v23 }
 0x3d7   :  { %16466 = vst [vmem:[#allocation92_spill] sm:$0xff] %v11867_v41  ;;  %v11909_v27 = vadd.f32 %v11867_v41, %v11394_v13  ;;  %v5016_v13 = vmul.f32 %v11887_v42, %v11875_v51  ;;  %v5017_v36 = vmul.f32 %v11887_v42, %v11905_v52 }
 0x3d8   :  { %16471 = vst [vmem:[#allocation97_spill] sm:$0xff] %v11887_v42 }
 0x3d9   :  { %v1759_v6 = vpop.f32.mrf.mxu2  ;;  %16476 = vst [vmem:[#allocation102_spill] sm:$0xff] %v11905_v52 }
 0x3da   :  { %16477 = vst [vmem:[#allocation103_spill] sm:$0xff] %v11909_v27  ;;  %v11941_v27 = vadd.f32 %v11837_v12, %v11470_v48 }
 0x3db   :  { %16481 = vst [vmem:[#allocation107_spill] sm:$0xff] %v11925_v59 }
 0x3dc   :  { %v1540_v55 = vpop.f32.mrf.mxu1  ;;  %16484 = vst [vmem:[#allocation110_spill] sm:$0xff] %v11941_v27 }
 0x3dd   :  { %v11847_v8 = vadd.f32 %v1759_v6, %v1540_v55  ;;  %v2119_v6 = vadd.f32 %v2118_v22, %v1964_v28  ;;  %v4157_v28 = vrot.slane %v4156_v57, 2 }
 0x3df   :  { %16461 = vst [vmem:[#allocation87_spill] sm:$0xff] %v11847_v8  ;;  %v2125_v8 = vadd.f32 %v2124_v49, %v1965_v60  ;;  %v11879_v49 = vadd.f32 %v11867_v41, %v11292_v38  ;;  %v2120_v22 = vrot.slane %v2119_v6, 2  ;;  %v4163_v60 = vrot.slane %v4162_v3, 2 }
 0x3e0   :  { %v11897_v38 = vadd.f32 %v11889_v58, %v11317_v21  ;;  %v4158_v15 = vadd.f32 %v4157_v28, %v4156_v57  ;;  %v11953_v57 = vadd.f32 %v11835_v29, %v11513_v32  ;;  %v11967_v32 = vadd.f32 %v11889_v58, %v11521_v34 }
 0x3e1   :  { %v11861_v55 = vpop.f32.mrf.mxu2  ;;  %16469 = vst [vmem:[#allocation95_spill] sm:$0xff] %v11879_v49  ;;  %v2126_v30 = vrot.slane %v2125_v8, 2  ;;  %v4168_v49 = vadd.f32 %v4167_v44, %v4003_v40  ;;  %v4164_v16 = vadd.f32 %v4163_v60, %v4162_v3  ;;  %v2121_v9 = vadd.f32 %v2120_v22, %v2119_v6 }
 0x3e2   :  { %16464 = vst [vmem:[#allocation90_spill] sm:$0xff] %v11861_v55  ;;  %v5018_v40 = vmul.f32 %v11887_v42, %v11925_v59  ;;  %v11945_v3 = vadd.f32 %v11867_v41, %v11496_v39  ;;  %v2132_v6 = vrot.slane %v2131_v7, 2  ;;  %v5170_v22 = vrot.slane %v5016_v13, 4 }
 0x3e3   :  { %16474 = vst [vmem:[#allocation100_spill] sm:$0xff] %v11897_v38  ;;  %v11917_v38 = vadd.f32 %v11835_v29, %v11411_v10  ;;  %v2127_v44 = vadd.f32 %v2126_v30, %v2125_v8  ;;  %v11931_v10 = vadd.f32 %v11801_v35, %v11538_v46  ;;  %v4169_v8 = vrot.slane %v4168_v49, 2 }
 0x3e4   :  { %v11863_v17 = vpop.f32.mrf.mxu1  ;;  %16485 = vst [vmem:[#allocation111_spill] sm:$0xff] %v11945_v3  ;;  %v11949_v46 = vadd.f32 %v11865_v33, %v11504_v19  ;;  %v11957_v30 = vadd.f32 %v11817_v1, %v11564_v26  ;;  %v4159_v48 = vrot.slane %v4158_v15, 1  ;;  %v4165_v28 = vrot.slane %v4164_v16, 1 }
 0x3e5   :  { %16479 = vst [vmem:[#allocation105_spill] sm:$0xff] %v11917_v38  ;;  %v2122_v60 = vrot.slane %v2121_v9, 1  ;;  %v2128_v39 = vrot.slane %v2127_v44, 1  ;;  %v5182_v3 = vrot.slane %v5018_v40, 4  ;;  %v11963_v19 = vadd.f32 %v11786_v53, %v11581_v4 }
 0x3e6   :  { %16482 = vst [vmem:[#allocation108_spill] sm:$0xff] %v11931_v10  ;;  %v2987_v26 = vmul.f32 %v11931_v10, %v11901_v47  ;;  %v4170_v35 = vadd.f32 %v4169_v8, %v4168_v49  ;;  %v2133_v23 = vadd.f32 %v2132_v6, %v2131_v7  ;;  %v1967_v38 = vmul.f32 %v11957_v30, %v11811_v14 }
 0x3e7   :  { %16486 = vst [vmem:[#allocation112_spill] sm:$0xff] %v11949_v46  ;;  %v11979_v4 = vadd.f32 %v11799_v54, %v11589_v61  ;;  %v11985_v47 = vadd.f32 %v4165_v28, %v4164_v16  ;;  %v11987_v11 = vadd.f32 %v2122_v60, %v2121_v9  ;;  %v11989_v49 = vadd.f32 %v2128_v39, %v2127_v44 }
 0x3e8   :  { %16487 = vst [vmem:[#allocation113_spill] sm:$0xff] %v11953_v57  ;;  %v5171_v57 = vadd.f32 %v5170_v22, %v5016_v13  ;;  %v4004_v13 = vmul.f32 %v11963_v19, %v11815_v31  ;;  %v5183_v6 = vadd.f32 %v5182_v3, %v5018_v40  ;;  %v3146_v22 = vrot.slane %v2987_v26, 4 }
 0x3e9   :  { %v1764_v21 = vpop.f32.mrf.mxu2  ;;  %16488 = vst [vmem:[#allocation114_spill] sm:$0xff] %v11957_v30  ;;  %v11995_v61 = vadd.f32 %v11837_v12, %v11572_v18  ;;  %v2136_v16 = vrot.slane %v1967_v38, 4  ;;  %v5019_v9 = vmul.f32 %v11979_v4, %v11887_v42  ;;  %v12005_v40 = vadd.f32 %v11786_v53, %v11683_v0 }
 0x3ea   :  { %16489 = vst [vmem:[#allocation115_spill] sm:$0xff] %v11963_v19  ;;  %v5172_v44 = vrot.slane %v5171_v57, 2  ;;  %v2304_v3 = vmax.f32 %v11987_v11, %v11989_v49  ;;  %v4173_v60 = vrot.slane %v4004_v13, 4 }
 0x3eb   :  { %16490 = vst [vmem:[#allocation116_spill] sm:$0xff] %v11967_v32  ;;  %v11983_v32 = vadd.f32 %v4159_v48, %v4158_v15  ;;  %v2134_v15 = vrot.slane %v2133_v23, 1  ;;  %v2989_v30 = vmul.f32 %v11995_v61, %v11931_v10  ;;  %v5188_v55 = vrot.slane %v5019_v9, 4 }
 0x3ec   :  { %v1545_v43 = vpop.f32.mrf.mxu1  ;;  %16491 = vst [vmem:[#allocation117_spill] sm:$0xff] %v11979_v4 }
 0x3ed   :  { %v11937_v37 = vadd.f32 %v1764_v21, %v1545_v43  ;;  %v2986_v21 = vmul.f32 %v11931_v10, %v11871_v62  ;;  %v5176_v43 = vrot.slane %v5017_v36, 4  ;;  %v2988_v62 = vmul.f32 %v11931_v10, %v11941_v27  ;;  %16492 = vst [vmem:[#allocation118_spill] sm:$0xff] %v11983_v32 }
 0x3ee   :  { %16493 = vst [vmem:[#allocation119_spill] sm:$0xff] %v11985_v47  ;;  %v4171_v27 = vrot.slane %v4170_v35, 1  ;;  %v4341_v18 = vmax.f32 %v11983_v32, %v11985_v47  ;;  %v12019_v4 = vadd.f32 %v2134_v15, %v2133_v23  ;;  %v3147_v47 = vadd.f32 %v3146_v22, %v2987_v26 }
 0x3ef   :  { %16483 = vst [vmem:[#allocation109_spill] sm:$0xff] %v11937_v37  ;;  %v3140_v7 = vrot.slane %v2986_v21, 4  ;;  %v5177_v8 = vadd.f32 %v5176_v43, %v5017_v36  ;;  %v3152_v48 = vrot.slane %v2988_v62, 4  ;;  %v12001_v36 = vadd.f32 %v11817_v1, %v11666_v50 }
 0x3f0   :  { %16494 = vst [vmem:[#allocation120_spill] sm:$0xff] %v11987_v11  ;;  %v5184_v43 = vrot.slane %v5183_v6, 2  ;;  %v12015_v50 = vadd.f32 %v11799_v54, %v11691_v24  ;;  %v12017_v0 = vadd.f32 %v4171_v27, %v4170_v35  ;;  %v5173_v32 = vadd.f32 %v5172_v44, %v5171_v57 }
 0x3f1   :  { %v11971_v46 = vpop.f32.mrf.mxu2  ;;  %16495 = vst [vmem:[#allocation121_spill] sm:$0xff] %v11989_v49  ;;  %v3141_v28 = vadd.f32 %v3140_v7, %v2986_v21  ;;  %v5178_v39 = vrot.slane %v5177_v8, 2  ;;  %v2137_v49 = vadd.f32 %v2136_v16, %v1967_v38  ;;  %v1968_v21 = vmul.f32 %v12001_v36, %v11811_v14 }
 0x3f2   :  { %16496 = vst [vmem:[#allocation122_spill] sm:$0xff] %v11995_v61  ;;  %v4005_v7 = vmul.f32 %v12005_v40, %v11815_v31  ;;  %v12026_v11 = vmax.f32 %v4341_v18, %v12017_v0  ;;  %v12029_v24 = vmax.f32 %v2304_v3, %v12019_v4  ;;  %v4174_v27 = vadd.f32 %v4173_v60, %v4004_v13 }
 0x3f3   :  { %16497 = vst [vmem:[#allocation123_spill] sm:$0xff] %v12001_v36  ;;  %v5179_v23 = vadd.f32 %v5178_v39, %v5177_v8  ;;  %v5185_v57 = vadd.f32 %v5184_v43, %v5183_v6  ;;  %v12035_v38 = vadd.f32 %v11837_v12, %v11674_v63  ;;  %v12039_v26 = vadd.f32 %v11817_v1, %v11772_v2 }
 0x3f4   :  { %v11981_v34 = vpop.f32.mrf.mxu1  ;;  %16498 = vst [vmem:[#allocation124_spill] sm:$0xff] %v12005_v40  ;;  %v5020_v22 = vmul.f32 %v12015_v50, %v11887_v42  ;;  %v3158_v15 = vrot.slane %v2989_v30, 4  ;;  %v1757_v16 = vadd.f32 %v11805_v5, %v11807_v56  ;;  %v2138_v13 = vrot.slane %v2137_v49, 2 }
 0x3f5   :  { %16499 = vst [vmem:[#allocation125_spill] sm:$0xff] %v12015_v50  ;;  %v4179_v8 = vrot.slane %v4005_v7, 4  ;;  %v2142_v6 = vrot.slane %v1968_v21, 4  ;;  %v3142_v44 = vrot.slane %v3141_v28, 2  ;;  %v3148_v18 = vrot.slane %v3147_v47, 2 }
 0x3f6   :  { %16500 = vst [vmem:[#allocation126_spill] sm:$0xff] %v12017_v0  ;;  %v12047_v63 = vadd.f32 %v11786_v53, %v11797_v45  ;;  %v4175_v2 = vrot.slane %v4174_v27, 2  ;;  %v5180_v3 = vrot.slane %v5179_v23, 1  ;;  %v3153_v60 = vadd.f32 %v3152_v48, %v2988_v62 }
 0x3f7   :  { %16501 = vst [vmem:[#allocation127_spill] sm:$0xff] %v12019_v4  ;;  %v5194_v43 = vrot.slane %v5020_v22, 4  ;;  %v1969_v56 = vmul.f32 %v12039_v26, %v11811_v14  ;;  %v2990_v5 = vmul.f32 %v12035_v38, %v11931_v10  ;;  %v5186_v4 = vrot.slane %v5185_v57, 1 }
 0x3f8   :  { %16502 = vst [vmem:[#allocation128_spill] sm:$0xff] %v12035_v38  ;;  %v2139_v45 = vadd.f32 %v2138_v13, %v2137_v49  ;;  %v4180_v1 = vadd.f32 %v4179_v8, %v4005_v7  ;;  %v2143_v62 = vadd.f32 %v2142_v6, %v1968_v21  ;;  %v3143_v48 = vadd.f32 %v3142_v44, %v3141_v28 }
 0x3f9   :  { %v1769_v37 = vpop.f32.mrf.mxu2  ;;  %16503 = vst [vmem:[#allocation129_spill] sm:$0xff] %v12039_v26  ;;  %v4006_v36 = vmul.f32 %v12047_v63, %v11815_v31  ;;  %v4176_v26 = vadd.f32 %v4175_v2, %v4174_v27  ;;  %v3154_v38 = vrot.slane %v3153_v60, 2  ;;  %v12066_v13 = vadd.f32 %v5180_v3, %v5179_v23 }
 0x3fa   :  { %16504 = vst [vmem:[#allocation130_spill] sm:$0xff] %v12047_v63  ;;  %v2140_v21 = vrot.slane %v2139_v45, 1  ;;  %v4181_v28 = vrot.slane %v4180_v1, 2  ;;  %v3144_v8 = vrot.slane %v3143_v48, 1 }
 0x3fb   :  { %v4177_v44 = vrot.slane %v4176_v26, 1  ;;  %v4185_v27 = vrot.slane %v4006_v36, 4 }
 0x3fc   :  { %v1550_v61 = vpop.f32.mrf.mxu1  ;;  %v12072_v23 = vadd.f32 %v2140_v21, %v2139_v45  ;;  %v4182_v3 = vadd.f32 %v4181_v28, %v4180_v1  ;;  %v12074_v50 = vadd.f32 %v3144_v8, %v3143_v48 }
 0x3fd   :  { %v12031_v35 = vadd.f32 %v1769_v37, %v1550_v61  ;;  %v5174_v37 = vrot.slane %v5173_v32, 1  ;;  %v5189_v61 = vadd.f32 %v5188_v55, %v5019_v9  ;;  %v3159_v55 = vadd.f32 %v3158_v15, %v2989_v30 }
 0x3fe   :  { %v12056_v9 = vadd.f32 %v11799_v54, %v1757_v16  ;;  %v5195_v30 = vadd.f32 %v5194_v43, %v5020_v22  ;;  %v2148_v15 = vrot.slane %v1969_v56, 4  ;;  %v3164_v54 = vrot.slane %v2990_v5, 4  ;;  %16508 = vst [vmem:[#allocation134_spill] sm:$0xff] %v12072_v23 }
 0x3ff   :  { %v5190_v0 = vrot.slane %v5189_v61, 2  ;;  %v12062_v14 = vadd.f32 %v5174_v37, %v5173_v32  ;;  %v3160_v16 = vrot.slane %v3159_v55, 2  ;;  %v12068_v32 = vadd.f32 %v5186_v4, %v5185_v57  ;;  %16509 = vst [vmem:[#allocation135_spill] sm:$0xff] %v12074_v50 }
 0x400   :  { %16506 = vst [vmem:[#allocation132_spill] sm:$0xff] %v12056_v9  ;;  %v5021_v49 = vmul.f32 %v12056_v9, %v11887_v42  ;;  %v3155_v37 = vadd.f32 %v3154_v38, %v3153_v60  ;;  %v2149_v2 = vadd.f32 %v2148_v15, %v1969_v56  ;;  %v12078_v38 = vadd.f32 %v4177_v44, %v4176_v26 }
 0x401   :  { %v12049_v39 = vpop.f32.mrf.mxu2  ;;  %v5191_v7 = vadd.f32 %v5190_v0, %v5189_v61  ;;  %v3161_v43 = vadd.f32 %v3160_v16, %v3159_v55  ;;  %v5356_v0 = vmax.f32 %v12062_v14, %v12066_v13  ;;  %v4186_v60 = vadd.f32 %v4185_v27, %v4006_v36  ;;  %v16517_v27 = vld [vmem:[#allocation83_spill] sm:$0xff] }
 0x402   :  { %16505 = vst [vmem:[#allocation131_spill] sm:$0xff] %v12049_v39  ;;  %v3149_v39 = vadd.f32 %v3148_v18, %v3147_v47  ;;  %v2144_v47 = vrot.slane %v2143_v62, 2  ;;  %v5196_v18 = vrot.slane %v5195_v30, 2  ;;  %v5200_v42 = vrot.slane %v5021_v49, 4 }
 0x403   :  { %v5192_v31 = vrot.slane %v5191_v7, 1  ;;  %v3156_v56 = vrot.slane %v3155_v37, 1  ;;  %v3162_v55 = vrot.slane %v3161_v43, 1  ;;  %v5357_v1 = vmax.f32 %v5356_v0, %v12068_v32 }
 0x404   :  { %v12058_v53 = vpop.f32.mrf.mxu1  ;;  %v3150_v6 = vrot.slane %v3149_v39, 1  ;;  %v2145_v9 = vadd.f32 %v2144_v47, %v2143_v62  ;;  %v5201_v45 = vadd.f32 %v5200_v42, %v5021_v49  ;;  %v2306_v62 = vmax.f32 %v12029_v24, %v12072_v23 }
 0x405   :  { %16507 = vst [vmem:[#allocation133_spill] sm:$0xff] %v12058_v53  ;;  %v3165_v53 = vadd.f32 %v3164_v54, %v2990_v5  ;;  %v5197_v54 = vadd.f32 %v5196_v18, %v5195_v30  ;;  %v2150_v5 = vrot.slane %v2149_v2, 2  ;;  %v12086_v48 = vadd.f32 %v5192_v31, %v5191_v7  ;;  %v16511_v30 = vld [vmem:[#allocation53_spill] sm:$0xff]  ;;  %v16515_v7 = vld [vmem:[#allocation54_spill] sm:$0xff] }
 0x406   :  { %v12076_v4 = vadd.f32 %v3150_v6, %v3149_v39  ;;  %v4183_v39 = vrot.slane %v4182_v3, 1  ;;  %v2146_v26 = vrot.slane %v2145_v9, 1  ;;  %v12092_v21 = vadd.f32 %v11867_v41, %v16511_v30  ;;  %v16518_v18 = vld [vmem:[#allocation85_spill] sm:$0xff] }
 0x407   :  { %v3166_v15 = vrot.slane %v3165_v53, 2  ;;  %v4187_v28 = vrot.slane %v4186_v60, 2  ;;  %v4343_v42 = vmax.f32 %v12026_v11, %v12078_v38  ;;  %v12096_v49 = vadd.f32 %v3156_v56, %v3155_v37 }
 0x408   :  { %16510 = vst [vmem:[#allocation136_spill] sm:$0xff] %v12076_v4  ;;  %v3326_v36 = vmax.f32 %v12074_v50, %v12076_v4  ;;  %v5198_v8 = vrot.slane %v5197_v54, 1  ;;  %v2151_v24 = vadd.f32 %v2150_v5, %v2149_v2  ;;  %v12098_v6 = vadd.f32 %v3162_v55, %v3161_v43  ;;  %v16520_v43 = vld [vmem:[#allocation55_spill] sm:$0xff]  ;;  %v16522_v5 = vld [vmem:[#allocation56_spill] sm:$0xff] }
 0x409   :  { %v1774_v22 = vpop.f32.mrf.mxu2  ;;  %16512 = vst [vmem:[#allocation53_spill] sm:$0xff] %v12092_v21  ;;  %v3167_v31 = vadd.f32 %v3166_v15, %v3165_v53  ;;  %v12102_v44 = vadd.f32 %v11865_v33, %v16515_v7  ;;  %v12108_v37 = vadd.f32 %v4183_v39, %v4182_v3  ;;  %v12111_v2 = vadd.f32 %v2146_v26, %v2145_v9 }
 0x40a   :  { %16513 = vst [vmem:[#allocation137_spill] sm:$0xff] %v12096_v49  ;;  %v3327_v53 = vmax.f32 %v3326_v36, %v12096_v49  ;;  %v12116_v56 = vadd.f32 %v11835_v29, %v16520_v43  ;;  %v12120_v55 = vadd.f32 %v11889_v58, %v16522_v5  ;;  %v4188_v30 = vadd.f32 %v4187_v28, %v4186_v60  ;;  %v16524_v43 = vld [vmem:[#allocation61_spill] sm:$0xff]  ;;  %v16526_v5 = vld [vmem:[#allocation72_spill] sm:$0xff] }
 0x40b   :  { %16514 = vst [vmem:[#allocation138_spill] sm:$0xff] %v12098_v6  ;;  %v12122_v7 = vadd.f32 %v5198_v8, %v5197_v54  ;;  %v2152_v3 = vrot.slane %v2151_v24, 1  ;;  %v3168_v39 = vrot.slane %v3167_v31, 1  ;;  %v12135_v60 = vmax.f32 %v4343_v42, %v12108_v37  ;;  %v16528_v28 = vld [vmem:[#allocation89_spill] sm:$0xff] }
 0x40c   :  { %v1555_v61 = vpop.f32.mrf.mxu1  ;;  %16516 = vst [vmem:[#allocation54_spill] sm:$0xff] %v12102_v44  ;;  %v12138_v54 = vmax.f32 %v2306_v62, %v12111_v2 }
 0x40d   :  { %v1775_v57 = vadd.f32 %v1774_v22, %v1555_v61  ;;  %v5202_v61 = vrot.slane %v5201_v45, 2  ;;  %16519 = vst [vmem:[#allocation139_spill] sm:$0xff] %v12111_v2  ;;  %v12153_v62 = vadd.f32 %v2152_v3, %v2151_v24 }
 0x40e   :  { %16521 = vst [vmem:[#allocation55_spill] sm:$0xff] %v12116_v56 }
 0x40f   :  { %v12081_v16 = vadd.f32 %v11784_v20, %v1775_v57  ;;  %v5358_v57 = vmax.f32 %v5357_v1, %v12086_v48  ;;  %16523 = vst [vmem:[#allocation56_spill] sm:$0xff] %v12120_v55  ;;  %v3328_v1 = vmax.f32 %v3327_v53, %v12098_v6  ;;  %v16527_v20 = vld [vmem:[#allocation71_spill] sm:$0xff]  ;;  %v16529_v53 = vld [vmem:[#allocation62_spill] sm:$0xff]  ;;  %v16550_v6 = vld [vmem:[#allocation125_spill] sm:$0xff] }
 0x411   :  { %v1776_v47 = vpop.f32.mrf.mxu2  ;;  %v4022_v22 = vmul.f32 %v12081_v16, %v16517_v27  ;;  %v4023_v0 = vmul.f32 %v12081_v16, %v16518_v18  ;;  %v5203_v18 = vadd.f32 %v5202_v61, %v5201_v45  ;;  %v12130_v27 = vadd.f32 %v11867_v41, %v16524_v43 }
 0x412   :  { %v4024_v8 = vmul.f32 %v12081_v16, %v16528_v28  ;;  %v4189_v61 = vrot.slane %v4188_v30, 1  ;;  %v12151_v42 = vmax.f32 %v5358_v57, %v12122_v7  ;;  %v12155_v43 = vadd.f32 %v3168_v39, %v3167_v31 }
 0x413   :  { %v4281_v9 = vrot.slane %v4022_v22, 4  ;;  %v4287_v26 = vrot.slane %v4023_v0, 4  ;;  %16525 = vst [vmem:[#allocation61_spill] sm:$0xff] %v12130_v27  ;;  %v5204_v28 = vrot.slane %v5203_v18, 1 }
 0x414   :  { %v1557_v11 = vpop.f32.mrf.mxu1  ;;  %16531 = vst [vmem:[#allocation71_spill] sm:$0xff] %v12155_v43  ;;  %v4293_v3 = vrot.slane %v4024_v8, 4 }
 0x415   :  { %v1777_v15 = vadd.f32 %v1776_v47, %v1557_v11  ;;  %v1752_v47 = vadd.f32 %v16527_v20, %v16526_v5  ;;  %v4025_v5 = vmul.f32 %v12081_v16, %v11963_v19  ;;  %v12170_v19 = vadd.f32 %v4189_v61, %v4188_v30 }
 0x416   :  { %v12181_v21 = vadd.f32 %v5204_v28, %v5203_v18  ;;  %v1767_v61 = vadd.f32 %v11971_v46, %v11981_v34  ;;  %v16542_v28 = vld [vmem:[#allocation90_spill] sm:$0xff] }
 0x417   :  { %v12126_v36 = vadd.f32 %v11789_v25, %v1777_v15  ;;  %v12148_v15 = vadd.f32 %v11865_v33, %v16529_v53  ;;  %v4288_v25 = vadd.f32 %v4287_v26, %v4023_v0  ;;  %v16534_v53 = vld [vmem:[#allocation64_spill] sm:$0xff]  ;;  %v12168_v31 = vadd.f32 %v11837_v12, %v1752_v47 }
 0x418   :  { %v4299_v47 = vrot.slane %v4025_v5, 4 }
 0x419   :  { %v5037_v11 = vmul.f32 %v12126_v36, %v11875_v51  ;;  %v5038_v45 = vmul.f32 %v12126_v36, %v11905_v52  ;;  %16530 = vst [vmem:[#allocation72_spill] sm:$0xff] %v12148_v15  ;;  %v1779_v20 = vpop.f32.mrf.mxu2  ;;  %v4282_v51 = vadd.f32 %v4281_v9, %v4022_v22  ;;  %v16532_v52 = vld [vmem:[#allocation63_spill] sm:$0xff]  ;;  %v12165_v15 = vadd.f32 %v11889_v58, %v16534_v53 }
 0x41a   :  { %v12161_v44 = vadd.f32 %v11835_v29, %v16532_v52  ;;  %16536 = vst [vmem:[#allocation64_spill] sm:$0xff] %v12168_v31  ;;  %v4026_v22 = vmul.f32 %v12081_v16, %v12005_v40  ;;  %v5039_v52 = vmul.f32 %v12126_v36, %v11925_v59  ;;  %v12179_v9 = vmax.f32 %v3328_v1, %v12155_v43  ;;  %v16540_v40 = vld [vmem:[#allocation78_spill] sm:$0xff] }
 0x41b   :  { %16535 = vst [vmem:[#allocation63_spill] sm:$0xff] %v12165_v15  ;;  %v5296_v57 = vrot.slane %v5037_v11, 4  ;;  %v5302_v27 = vrot.slane %v5038_v45, 4  ;;  %v4283_v26 = vrot.slane %v4282_v51, 2  ;;  %v4289_v53 = vrot.slane %v4288_v25, 2 }
 0x41c   :  { %16533 = vst [vmem:[#allocation62_spill] sm:$0xff] %v12161_v44  ;;  %v1560_v24 = vpop.f32.mrf.mxu1  ;;  %v12191_v0 = vadd.f32 %v16540_v40, %v12031_v35  ;;  %v4294_v1 = vadd.f32 %v4293_v3, %v4024_v8  ;;  %v2991_v18 = vmul.f32 %v12168_v31, %v11931_v10  ;;  %v5308_v34 = vrot.slane %v5039_v52, 4  ;;  %v16545_v3 = vld [vmem:[#allocation109_spill] sm:$0xff] }
 0x41d   :  { %v1780_v39 = vadd.f32 %v1779_v20, %v1560_v24  ;;  %16537 = vst [vmem:[#allocation140_spill] sm:$0xff] %v12179_v9  ;;  %v16538_v20 = vld [vmem:[#allocation87_spill] sm:$0xff]  ;;  %v5297_v24 = vadd.f32 %v5296_v57, %v5037_v11  ;;  %v5303_v59 = vadd.f32 %v5302_v27, %v5038_v45  ;;  %v4305_v11 = vrot.slane %v4026_v22, 4 }
 0x41e   :  { %v12185_v30 = vadd.f32 %v11867_v41, %v16538_v20  ;;  %16541 = vst [vmem:[#allocation141_spill] sm:$0xff] %v12191_v0  ;;  %v12199_v20 = vadd.f32 %v16542_v28, %v11863_v17  ;;  %v16544_v41 = vld [vmem:[#allocation117_spill] sm:$0xff]  ;;  %v4284_v8 = vadd.f32 %v4283_v26, %v4282_v51  ;;  %v4290_v45 = vadd.f32 %v4289_v53, %v4288_v25  ;;  %v16549_v26 = vld [vmem:[#allocation84_spill] sm:$0xff] }
 0x41f   :  { %v5040_v46 = vmul.f32 %v12126_v36, %v16544_v41  ;;  %v4300_v57 = vadd.f32 %v4299_v47, %v4025_v5  ;;  %v12209_v33 = vadd.f32 %v11835_v29, %v16545_v3  ;;  %v12212_v17 = vadd.f32 %v11889_v58, %v1767_v61 }
 0x420   :  { %16539 = vst [vmem:[#allocation87_spill] sm:$0xff] %v12185_v30  ;;  %v5298_v40 = vrot.slane %v5297_v24, 2  ;;  %v5304_v41 = vrot.slane %v5303_v59, 2  ;;  %v16548_v30 = vld [vmem:[#allocation82_spill] sm:$0xff]  ;;  %v4027_v51 = vmul.f32 %v12081_v16, %v12047_v63  ;;  %v4295_v25 = vrot.slane %v4294_v1, 2  ;;  %v16552_v63 = vld [vmem:[#allocation132_spill] sm:$0xff] }
 0x421   :  { %16543 = vst [vmem:[#allocation90_spill] sm:$0xff] %v12199_v20  ;;  %v12203_v27 = vpop.f32.mrf.mxu2  ;;  %v12218_v20 = vmul.f32 %v12191_v0, %v16548_v30  ;;  %v3170_v5 = vrot.slane %v2991_v18, 4  ;;  %v12224_v53 = vmul.f32 %v12191_v0, %v16549_v26  ;;  %v4306_v47 = vadd.f32 %v4305_v11, %v4026_v22  ;;  %v16551_v30 = vld [vmem:[#allocation88_spill] sm:$0xff]  ;;  %v16553_v26 = vld [vmem:[#allocation114_spill] sm:$0xff] }
 0x422   :  { %16546 = vst [vmem:[#allocation109_spill] sm:$0xff] %v12209_v33  ;;  %v5309_v61 = vadd.f32 %v5308_v34, %v5039_v52  ;;  %v5314_v3 = vrot.slane %v5040_v46, 4  ;;  %v4285_v35 = vrot.slane %v4284_v8, 1  ;;  %v4291_v31 = vrot.slane %v4290_v45, 1  ;;  %v16554_v52 = vld [vmem:[#allocation123_spill] sm:$0xff] }
 0x423   :  { %16547 = vst [vmem:[#allocation142_spill] sm:$0xff] %v12212_v17  ;;  %v4301_v43 = vrot.slane %v4300_v57, 2  ;;  %v5041_v50 = vmul.f32 %v12126_v36, %v16550_v6  ;;  %v12230_v49 = vmul.f32 %v12191_v0, %v16551_v30  ;;  %v5042_v4 = vmul.f32 %v12126_v36, %v16552_v63  ;;  %v16556_v6 = vld [vmem:[#allocation81_spill] sm:$0xff] }
 0x424   :  { %v12214_v28 = vpop.f32.mrf.mxu1  ;;  %v5299_v9 = vadd.f32 %v5298_v40, %v5297_v24  ;;  %v5305_v17 = vadd.f32 %v5304_v41, %v5303_v59  ;;  %v12236_v22 = vmul.f32 %v12191_v0, %v16553_v26  ;;  %v12240_v34 = vmul.f32 %v12191_v0, %v16554_v52 }
 0x425   :  { %v4296_v11 = vadd.f32 %v4295_v25, %v4294_v1  ;;  %v4311_v15 = vrot.slane %v4027_v51, 4  ;;  %v12243_v55 = vadd.f32 %v16556_v6, %v1780_v39  ;;  %v4307_v33 = vrot.slane %v4306_v47, 2 }
 0x426   :  { %16555 = vst [vmem:[#allocation143_spill] sm:$0xff] %v12240_v34  ;;  %v5310_v44 = vrot.slane %v5309_v61, 2  ;;  %v5315_v56 = vadd.f32 %v5314_v3, %v5040_v46  ;;  %v12245_v63 = vadd.f32 %v4285_v35, %v4284_v8  ;;  %v12247_v41 = vadd.f32 %v4291_v31, %v4290_v45  ;;  %v16558_v35 = vld [vmem:[#allocation79_spill] sm:$0xff]  ;;  %v16559_v8 = vld [vmem:[#allocation74_spill] sm:$0xff] }
 0x427   :  { %16557 = vst [vmem:[#allocation81_spill] sm:$0xff] %v12243_v55  ;;  %v4302_v59 = vadd.f32 %v4301_v43, %v4300_v57  ;;  %v5320_v40 = vrot.slane %v5041_v50, 4  ;;  %v5300_v26 = vrot.slane %v5299_v9, 1  ;;  %v5306_v10 = vrot.slane %v5305_v17, 1 }
 0x428   :  { %v5326_v52 = vrot.slane %v5042_v4, 4  ;;  %v12249_v34 = vadd.f32 %v3170_v5, %v2991_v18  ;;  %v4297_v39 = vrot.slane %v4296_v11, 1  ;;  %v4312_v25 = vadd.f32 %v4311_v15, %v4027_v51 }
 0x429   :  { %v1784_v30 = vpop.f32.mrf.mxu2  ;;  %v4308_v0 = vadd.f32 %v4307_v33, %v4306_v47  ;;  %v5311_v58 = vadd.f32 %v5310_v44, %v5309_v61  ;;  %v5316_v46 = vrot.slane %v5315_v56, 2  ;;  %v1970_v31 = vmul.f32 %v12243_v55, %v16558_v35  ;;  %v16561_v44 = vld [vmem:[#allocation80_spill] sm:$0xff] }
 0x42a   :  { %v4303_v45 = vrot.slane %v4302_v59, 1  ;;  %v4359_v57 = vmax.f32 %v12245_v63, %v12247_v41  ;;  %v5321_v18 = vadd.f32 %v5320_v40, %v5041_v50  ;;  %v12259_v5 = vadd.f32 %v5300_v26, %v5299_v9  ;;  %v16562_v55 = vld [vmem:[#allocation76_spill] sm:$0xff] }
 0x42b   :  { %v12261_v3 = vadd.f32 %v5306_v10, %v5305_v17  ;;  %v2154_v15 = vrot.slane %v1970_v31, 4  ;;  %v2250_v33 = vrot.slane %v12224_v53, 4  ;;  %v12268_v61 = vadd.f32 %v4297_v39, %v4296_v11 }
 0x42c   :  { %v1565_v24 = vpop.f32.mrf.mxu1  ;;  %v5312_v35 = vrot.slane %v5311_v58, 1  ;;  %v5317_v50 = vadd.f32 %v5316_v46, %v5315_v56  ;;  %v5322_v17 = vrot.slane %v5321_v18, 2  ;;  %v12271_v40 = vadd.f32 %v4303_v45, %v4302_v59 }
 0x42d   :  { %v1785_v6 = vadd.f32 %v1784_v30, %v1565_v24  ;;  %v5327_v30 = vadd.f32 %v5326_v52, %v5042_v4  ;;  %v2155_v9 = vadd.f32 %v2154_v15, %v1970_v31  ;;  %v4360_v4 = vmax.f32 %v4359_v57, %v12268_v61 }
 0x42e   :  { %v12276_v31 = vadd.f32 %v5312_v35, %v5311_v58  ;;  %v5318_v15 = vrot.slane %v5317_v50, 1  ;;  %v5323_v2 = vadd.f32 %v5322_v17, %v5321_v18 }
 0x42f   :  { %v12255_v43 = vadd.f32 %v16559_v8, %v1785_v6  ;;  %v4313_v6 = vrot.slane %v4312_v25, 2  ;;  %v4309_v8 = vrot.slane %v4308_v0, 1  ;;  %v4361_v45 = vmax.f32 %v4360_v4, %v12271_v40 }
 0x430   :  { %v12290_v4 = vadd.f32 %v5318_v15, %v5317_v50  ;;  %v5324_v17 = vrot.slane %v5323_v2, 1  ;;  %v12305_v15 = vadd.f32 %v2250_v33, %v12224_v53 }
 0x431   :  { %16560 = vst [vmem:[#allocation79_spill] sm:$0xff] %v12255_v43  ;;  %v4007_v51 = vmul.f32 %v12255_v43, %v16561_v44  ;;  %v4028_v47 = vmul.f32 %v12255_v43, %v12081_v16  ;;  %v1786_v24 = vpop.f32.mrf.mxu2  ;;  %v5328_v44 = vrot.slane %v5327_v30, 2  ;;  %v5374_v16 = vmax.f32 %v12259_v5, %v12261_v3 }
 0x432   :  { %v2156_v43 = vrot.slane %v2155_v9, 2  ;;  %v4314_v46 = vadd.f32 %v4313_v6, %v4312_v25  ;;  %v12286_v25 = vadd.f32 %v4309_v8, %v4308_v0 }
 0x433   :  { %v4191_v26 = vrot.slane %v4007_v51, 4  ;;  %v4317_v10 = vrot.slane %v4028_v47, 4 }
 0x434   :  { %v1567_v52 = vpop.f32.mrf.mxu1  ;;  %v2157_v6 = vadd.f32 %v2156_v43, %v2155_v9 }
 0x435   :  { %v1787_v11 = vadd.f32 %v1786_v24, %v1567_v52  ;;  %v4192_v39 = vadd.f32 %v4191_v26, %v4007_v51  ;;  %v4318_v1 = vadd.f32 %v4317_v10, %v4028_v47  ;;  %v5329_v24 = vadd.f32 %v5328_v44, %v5327_v30  ;;  %v16564_v47 = vld [vmem:[#allocation97_spill] sm:$0xff] }
 0x436   :  { %v5375_v51 = vmax.f32 %v5374_v16, %v12276_v31  ;;  %v4315_v10 = vrot.slane %v4314_v46, 1  ;;  %v4362_v30 = vmax.f32 %v4361_v45, %v12286_v25 }
 0x437   :  { %v12280_v59 = vadd.f32 %v16562_v55, %v1787_v11  ;;  %v4193_v29 = vrot.slane %v4192_v39, 2  ;;  %v4319_v23 = vrot.slane %v4318_v1, 2  ;;  %v5330_v0 = vrot.slane %v5329_v24, 1 }
 0x438   :  { %v5376_v8 = vmax.f32 %v5375_v51, %v12290_v4  ;;  %v12301_v9 = vadd.f32 %v4315_v10, %v4314_v46 }
 0x439   :  { %16563 = vst [vmem:[#allocation74_spill] sm:$0xff] %v12280_v59  ;;  %v5022_v26 = vmul.f32 %v12280_v59, %v16564_v47  ;;  %v5043_v58 = vmul.f32 %v12280_v59, %v12126_v36  ;;  %v1789_v35 = vpop.f32.mrf.mxu2  ;;  %v4194_v55 = vadd.f32 %v4193_v29, %v4192_v39  ;;  %v4320_v52 = vadd.f32 %v4319_v23, %v4318_v1 }
 0x43a   :  { %v2158_v29 = vrot.slane %v2157_v6, 1  ;;  %v16566_v23 = vrot.slane %v12218_v20, 4  ;;  %v3172_v39 = vrot.slane %v12249_v34, 2  ;;  %v4363_v46 = vmax.f32 %v4362_v30, %v12301_v9 }
 0x43b   :  { %v5206_v18 = vrot.slane %v5022_v26, 4  ;;  %v5332_v44 = vrot.slane %v5043_v58, 4  ;;  %v4195_v11 = vrot.slane %v4194_v55, 1  ;;  %v4321_v47 = vrot.slane %v4320_v52, 1 }
 0x43c   :  { %v1570_v16 = vpop.f32.mrf.mxu1  ;;  %v12299_v1 = vadd.f32 %v16566_v23, %v12218_v20  ;;  %v16567_v20 = vmax.f32 %v12135_v60, %v12170_v19  ;;  %v12322_v33 = vadd.f32 %v2158_v29, %v2157_v6  ;;  %v16572_v29 = vld [vmem:[#allocation131_spill] sm:$0xff] }
 0x43d   :  { %v12294_v57 = vadd.f32 %v1789_v35, %v1570_v16  ;;  %v5207_v36 = vadd.f32 %v5206_v18, %v5022_v26  ;;  %v5333_v43 = vadd.f32 %v5332_v44, %v5043_v58  ;;  %v4196_v50 = vadd.f32 %v4195_v11, %v4194_v55 }
 0x43e   :  { %v12307_v51 = vadd.f32 %v4321_v47, %v4320_v52  ;;  %v12309_v35 = vadd.f32 %v5324_v17, %v5323_v2  ;;  %v1782_v26 = vadd.f32 %v12203_v27, %v12214_v28  ;;  %v12317_v55 = vadd.f32 %v5330_v0, %v5329_v24  ;;  %v16568_v2 = vld [vmem:[#allocation118_spill] sm:$0xff]  ;;  %v16569_v17 = vld [vmem:[#allocation119_spill] sm:$0xff] }
 0x43f   :  { %16565 = vst [vmem:[#allocation80_spill] sm:$0xff] %v12294_v57  ;;  %v5208_v45 = vrot.slane %v5207_v36, 2  ;;  %v4346_v58 = vmax.f32 %v16567_v20, %v4196_v50  ;;  %v5334_v18 = vrot.slane %v5333_v43, 2  ;;  %v16570_v27 = vld [vmem:[#allocation126_spill] sm:$0xff]  ;;  %v12345_v20 = vadd.f32 %v3172_v39, %v12249_v34 }
 0x440   :  { %v12320_v53 = vmax.f32 %v5376_v8, %v12309_v35  ;;  %v12331_v11 = vmax.f32 %v4363_v46, %v12307_v51  ;;  %v16577_v39 = vmax.f32 %v12151_v42, %v12181_v21 }
 0x441   :  { %v5209_v10 = vadd.f32 %v5208_v45, %v5207_v36  ;;  %v4386_v52 = vsub.f32 %v16568_v2, %v4346_v58  ;;  %v4387_v44 = vsub.f32 %v16569_v17, %v4346_v58  ;;  %v4388_v28 = vsub.f32 %v16570_v27, %v4346_v58  ;;  %v16571_v36 = vld [vmem:[#allocation133_spill] sm:$0xff] }
 0x442   :  { %v4389_v60 = vsub.f32 %v12078_v38, %v4346_v58  ;;  %v4390_v16 = vsub.f32 %v12108_v37, %v4346_v58  ;;  %v4391_v24 = vsub.f32 %v12170_v19, %v4346_v58  ;;  %v4392_v47 = vsub.f32 %v4196_v50, %v4346_v58  ;;  %v12342_v37 = vpop.f32.mrf.mxu2 }
 0x443   :  { %v5210_v30 = vrot.slane %v5209_v10, 1  ;;  %v4456_v0 = vmul.f32 1.442695, %v4386_v52  ;;  %v4458_v6 = vmul.f32 1.442695, %v4387_v44  ;;  %v12335_v23 = vadd.f32 %v16572_v29, %v16571_v36  ;;  %16575 = vst [vmem:[#allocation118_spill] sm:$0xff] %v12342_v37 }
 0x444   :  { %v4460_v8 = vmul.f32 1.442695, %v4388_v28  ;;  %v12338_v45 = vadd.f32 %v11837_v12, %v1782_v26  ;;  %v12340_v38 = vpop.f32.mrf.mxu1  ;;  %v4462_v19 = vmul.f32 1.442695, %v4389_v60  ;;  %v4464_v50 = vmul.f32 1.442695, %v4390_v16 }
 0x445   :  { %16574 = vst [vmem:[#allocation97_spill] sm:$0xff] %v12340_v38  ;;  %9780 = vpow2.f32 %v4456_v0  ;;  %v5211_v58 = vadd.f32 %v5210_v30, %v5209_v10  ;;  %v5378_v46 = vmax.f32 %v12320_v53, %v12317_v55  ;;  %v4466_v2 = vmul.f32 1.442695, %v4391_v24 }
 0x446   :  { %16573 = vst [vmem:[#allocation76_spill] sm:$0xff] %v12338_v45  ;;  %9782 = vpow2.f32 %v4458_v6  ;;  %v12349_v52 = vadd.f32 %v5334_v18, %v5333_v43  ;;  %v16576_v12 = vmax.f32 %v12138_v54, %v12153_v62  ;;  %v4468_v34 = vmul.f32 1.442695, %v4392_v47 }
 0x447   :  { %9784 = vpow2.f32 %v4460_v8  ;;  %v5361_v10 = vmax.f32 %v16577_v39, %v5211_v58  ;;  %v4407_v17 = vsub.f32 %v12245_v63, %v12331_v11  ;;  %v4408_v43 = vsub.f32 %v12247_v41, %v12331_v11 }
 0x448   :  { %v12355_v26 = vmax.f32 %v16576_v12, %v12322_v33  ;;  %9786 = vpow2.f32 %v4462_v19  ;;  %v4409_v54 = vsub.f32 %v12268_v61, %v12331_v11  ;;  %v4410_v18 = vsub.f32 %v12271_v40, %v12331_v11 }
 0x449   :  { %9788 = vpow2.f32 %v4464_v50  ;;  %v5401_v44 = vsub.f32 %v12062_v14, %v5361_v10  ;;  %v5402_v42 = vsub.f32 %v12066_v13, %v5361_v10  ;;  %v5403_v27 = vsub.f32 %v12068_v32, %v5361_v10 }
 0x44a   :  { %9790 = vpow2.f32 %v4466_v2  ;;  %v5404_v63 = vsub.f32 %v12086_v48, %v5361_v10  ;;  %v5405_v41 = vsub.f32 %v12122_v7, %v5361_v10  ;;  %v5406_v28 = vsub.f32 %v12181_v21, %v5361_v10  ;;  %v1794_v8 = vpop.f32.mrf.mxu2 }
 0x44b   :  { %v12374_v61 = vpop.eup %9780  ;;  %9792 = vpow2.f32 %v4468_v34  ;;  %v5407_v40 = vsub.f32 %v5211_v58, %v5361_v10  ;;  %v5471_v60 = vmul.f32 1.442695, %v5401_v44  ;;  %v5473_v16 = vmul.f32 1.442695, %v5402_v42 }
 0x44c   :  { %v12376_v14 = vpop.eup %9782  ;;  %v5475_v13 = vmul.f32 1.442695, %v5403_v27  ;;  %v5477_v32 = vmul.f32 1.442695, %v5404_v63  ;;  %v4411_v24 = vsub.f32 %v12286_v25, %v12331_v11  ;;  %v4412_v48 = vsub.f32 %v12301_v9, %v12331_v11  ;;  %v1575_v6 = vpop.f32.mrf.mxu1 }
 0x44d   :  { %v12382_v7 = vpop.eup %9784  ;;  %v4597_v21 = vrot.slane %v12376_v14, 7  ;;  %9794 = vpow2.f32 %v5471_v60  ;;  %v5479_v30 = vmul.f32 1.442695, %v5405_v41  ;;  %v4413_v47 = vsub.f32 %v12307_v51, %v12331_v11 }
 0x44e   :  { %v12387_v0 = vpop.eup %9786  ;;  %v4599_v36 = vrot.slane %v12382_v7, 6  ;;  %9796 = vpow2.f32 %v5473_v16  ;;  %v5481_v25 = vmul.f32 1.442695, %v5406_v28  ;;  %v4498_v29 = vmul.f32 1.442695, %v4407_v17 }
 0x44f   :  { %v12390_v19 = vpop.eup %9788  ;;  %v4598_v9 = vsel %vm2525_vm9, %v4597_v21, %v12374_v61  ;;  %v4601_v50 = vrot.slane %v12387_v0, 5  ;;  %9798 = vpow2.f32 %v5475_v13  ;;  %v5483_v58 = vmul.f32 1.442695, %v5407_v40 }
 0x450   :  { %v12395_v2 = vpop.eup %9790  ;;  %v4600_v51 = vsel %vm2528_vm10, %v4599_v36, %v4598_v9  ;;  %v4603_v11 = vrot.slane %v12390_v19, 4  ;;  %9800 = vpow2.f32 %v5477_v32  ;;  %v4500_v12 = vmul.f32 1.442695, %v4408_v43 }
 0x451   :  { %v12399_v34 = vpop.eup %9792  ;;  %v12401_v39 = vadd.f32 %v1794_v8, %v1575_v6  ;;  %v4602_v10 = vsel %vm2531_vm11, %v4601_v50, %v4600_v51  ;;  %v4605_v17 = vrot.slane %v12395_v2, 3  ;;  %9802 = vpow2.f32 %v5479_v30 }
 0x452   :  { %v4604_v44 = vsel %vm2534_vm12, %v4603_v11, %v4602_v10  ;;  %v4607_v42 = vrot.slane %v12399_v34, 2  ;;  %9804 = vpow2.f32 %v5481_v25  ;;  %v4502_v27 = vmul.f32 1.442695, %v4409_v54 }
 0x453   :  { %v12407_v63 = vpop.eup %9794  ;;  %v4606_v41 = vsel %vm2537_vm13, %v4605_v17, %v4604_v44  ;;  %9806 = vpow2.f32 %v5483_v58  ;;  %v4504_v43 = vmul.f32 1.442695, %v4410_v18  ;;  %v5336_v28 = vrot.slane %v12349_v52, 1 }
 0x454   :  { %v12411_v40 = vpop.eup %9796  ;;  %v4608_v60 = vsel %vm2540_vm14, %v4607_v42, %v4606_v41  ;;  %9808 = vpow2.f32 %v4498_v29  ;;  %v4506_v16 = vmul.f32 1.442695, %v4411_v24  ;;  %v4508_v13 = vmul.f32 1.442695, %v4412_v48 }
 0x455   :  { %v12414_v32 = vpop.eup %9798  ;;  %v4673_v21 = vsel %vm2621_vm15, %v4608_v60, 0.0  ;;  %v5612_v54 = vrot.slane %v12411_v40, 7  ;;  %9810 = vpow2.f32 %v4500_v12  ;;  %v12419_v30 = vadd.f32 %v5336_v28, %v12349_v52 }
 0x456   :  { %v12421_v18 = vpop.eup %9800  ;;  %v4674_v6 = vrot.slane %v4673_v21, 4  ;;  %v5614_v8 = vrot.slane %v12414_v32, 6  ;;  %9812 = vpow2.f32 %v4502_v27  ;;  %v4510_v36 = vmul.f32 1.442695, %v4413_v47 }
 0x457   :  { %v12424_v25 = vpop.eup %9802  ;;  %v5613_v24 = vsel %vm2525_vm9, %v5612_v54, %v12407_v63  ;;  %v5616_v48 = vrot.slane %v12421_v18, 5  ;;  %9814 = vpow2.f32 %v4504_v43  ;;  %v12433_v52 = vmax.f32 %v5378_v46, %v12419_v30 }
 0x458   :  { %v12435_v29 = vpop.eup %9804  ;;  %v4675_v9 = vadd.f32 %v4674_v6, %v4673_v21  ;;  %v5615_v50 = vsel %vm2528_vm10, %v5614_v8, %v5613_v24  ;;  %v5618_v47 = vrot.slane %v12424_v25, 4  ;;  %9816 = vpow2.f32 %v4506_v16 }
 0x459   :  { %v12439_v58 = vpop.eup %9806  ;;  %v5617_v51 = vsel %vm2531_vm11, %v5616_v48, %v5615_v50  ;;  %v5620_v11 = vrot.slane %v12435_v29, 3  ;;  %9818 = vpow2.f32 %v4508_v13  ;;  %v5422_v53 = vsub.f32 %v12259_v5, %v12433_v52 }
 0x45a   :  { %v12445_v46 = vpop.eup %9808  ;;  %v4676_v12 = vrot.slane %v4675_v9, 2  ;;  %v5619_v10 = vsel %vm2534_vm12, %v5618_v47, %v5617_v51  ;;  %v5622_v17 = vrot.slane %v12439_v58, 2  ;;  %9820 = vpow2.f32 %v4510_v36 }
 0x45b   :  { %v12449_v44 = vpop.eup %9810  ;;  %v5621_v42 = vsel %vm2537_vm13, %v5620_v11, %v5619_v10  ;;  %v5423_v27 = vsub.f32 %v12261_v3, %v12433_v52  ;;  %v5424_v41 = vsub.f32 %v12276_v31, %v12433_v52  ;;  %v5425_v5 = vsub.f32 %v12290_v4, %v12433_v52 }
 0x45c   :  { %v12458_v43 = vpop.eup %9812  ;;  %v4677_v28 = vadd.f32 %v4676_v12, %v4675_v9  ;;  %v5623_v60 = vsel %vm2540_vm14, %v5622_v17, %v5621_v42  ;;  %v4633_v16 = vrot.slane %v12449_v44, 7  ;;  %v5426_v13 = vsub.f32 %v12309_v35, %v12433_v52 }
 0x45d   :  { %v12464_v21 = vpop.eup %9814  ;;  %v5688_v3 = vsel %vm2621_vm15, %v5623_v60, 0.0  ;;  %v4635_v54 = vrot.slane %v12458_v43, 6  ;;  %v5427_v31 = vsub.f32 %v12317_v55, %v12433_v52  ;;  %v5428_v4 = vsub.f32 %v12419_v30, %v12433_v52 }
 0x45e   :  { %v12472_v6 = vpop.eup %9816  ;;  %v4678_v8 = vrot.slane %v4677_v28, 1  ;;  %v5689_v36 = vrot.slane %v5688_v3, 4  ;;  %v4634_v24 = vsel %vm2525_vm9, %v4633_v16, %v12445_v46  ;;  %v4637_v35 = vrot.slane %v12464_v21, 5 }
 0x45f   :  { %v12477_v48 = vpop.eup %9818  ;;  %v4636_v9 = vsel %vm2528_vm10, %v4635_v54, %v4634_v24  ;;  %v4639_v50 = vrot.slane %v12472_v6, 4  ;;  %v5513_v47 = vmul.f32 1.442695, %v5422_v53  ;;  %v5515_v55 = vmul.f32 1.442695, %v5423_v27  ;;  %v1577_v27 = vpop.f32.mrf.mxu1 }
 0x460   :  { %v12481_v51 = vpop.eup %9820  ;;  %v4679_v30 = vadd.f32 %v4678_v8, %v4677_v28  ;;  %v5690_v52 = vadd.f32 %v5689_v36, %v5688_v3  ;;  %v4638_v11 = vsel %vm2531_vm11, %v4637_v35, %v4636_v9  ;;  %v4641_v12 = vrot.slane %v12477_v48, 3  ;;  %v1796_v54 = vpop.f32.mrf.mxu2  ;;  %v16578_v36 = vld [vmem:[#allocation120_spill] sm:$0xff]  ;;  %v16580_v9 = vld [vmem:[#allocation127_spill] sm:$0xff] }
 0x461   :  { %v4640_v10 = vsel %vm2534_vm12, %v4639_v50, %v4638_v11  ;;  %v4643_v17 = vrot.slane %v12481_v51, 2  ;;  %9822 = vpow2.f32 %v5513_v47  ;;  %v5517_v42 = vmul.f32 1.442695, %v5424_v41  ;;  %v16579_v41 = vld [vmem:[#allocation121_spill] sm:$0xff] }
 0x462   :  { %v12487_v60 = vperm.slane %v4679_v30, 0  ;;  %v5691_v16 = vrot.slane %v5690_v52, 2  ;;  %v4642_v53 = vsel %vm2537_vm13, %v4641_v12, %v4640_v10  ;;  %9824 = vpow2.f32 %v5515_v55 }
 0x463   :  { %v4644_v28 = vsel %vm2540_vm14, %v4643_v17, %v4642_v53  ;;  %9826 = vpow2.f32 %v5517_v42  ;;  %v5519_v3 = vmul.f32 1.442695, %v5425_v5  ;;  %v5521_v8 = vmul.f32 1.442695, %v5426_v13  ;;  %v16581_v5 = vld [vmem:[#allocation134_spill] sm:$0xff] }
 0x464   :  { %9828 = vrcp.f32 %v12487_v60  ;;  %v2349_v24 = vsub.f32 %v16578_v36, %v12355_v26  ;;  %v2350_v35 = vsub.f32 %v16579_v41, %v12355_v26  ;;  %v2351_v50 = vsub.f32 %v16580_v9, %v12355_v26  ;;  %v16582_v17 = vld [vmem:[#allocation86_spill] sm:$0xff] }
 0x465   :  { %v5692_v47 = vadd.f32 %v5691_v16, %v5690_v52  ;;  %v4694_v55 = vsel %vm2621_vm15, %v4644_v28, 0.0  ;;  %9830 = vpow2.f32 %v5519_v3  ;;  %v5523_v30 = vmul.f32 1.442695, %v5427_v31  ;;  %v16584_v52 = vld [vmem:[#allocation139_spill] sm:$0xff] }
 0x466   :  { %v1797_v11 = vadd.f32 %v1796_v54, %v1577_v27  ;;  %v4695_v12 = vrot.slane %v4694_v55, 4  ;;  %9832 = vpow2.f32 %v5521_v8  ;;  %v2352_v13 = vsub.f32 %v16581_v5, %v12355_v26  ;;  %v16587_v5 = vld [vmem:[#allocation98_spill] sm:$0xff] }
 0x467   :  { %v12501_v10 = vpop.eup %9822  ;;  %v12505_v42 = vadd.f32 %v16582_v17, %v12401_v39  ;;  %v5693_v53 = vrot.slane %v5692_v47, 1  ;;  %v5525_v36 = vmul.f32 1.442695, %v5428_v4  ;;  %v2353_v16 = vsub.f32 %v16584_v52, %v12355_v26 }
 0x468   :  { %v12509_v28 = vpop.eup %9824  ;;  %v4780_v31 = vand.u32 2147483647, %v12487_v60  ;;  %v4696_v27 = vadd.f32 %v4695_v12, %v4694_v55  ;;  %9834 = vpow2.f32 %v5523_v30  ;;  %v2354_v54 = vsub.f32 %v12153_v62, %v12355_v26 }
 0x469   :  { %16583 = vst [vmem:[#allocation119_spill] sm:$0xff] %v12505_v42  ;;  %v12514_v3 = vpop.eup %9826  ;;  %v4782_v8 = vand.u32 2147483648, %v12487_v60  ;;  %v5694_v39 = vadd.f32 %v5693_v53, %v5692_v47  ;;  %v5648_v41 = vrot.slane %v12509_v28, 7  ;;  %v12521_v17 = vadd.f32 %v16587_v5, %v1797_v11 }
 0x46a   :  { %16585 = vst [vmem:[#allocation126_spill] sm:$0xff] %v12509_v28  ;;  %v9829_v9 = vpop.eup %9828  ;;  %vm4776_vm0 = vweird.f32 %v12487_v60  ;;  %v4697_v55 = vrot.slane %v4696_v27, 2  ;;  %v5650_v30 = vrot.slane %v12514_v3, 6  ;;  %9836 = vpow2.f32 %v5525_v36 }
 0x46b   :  { %16586 = vst [vmem:[#allocation133_spill] sm:$0xff] %v12514_v3  ;;  %v12525_v62 = vpop.eup %9830  ;;  %v4772_v12 = vmul.f32 %v9829_v9, %v12487_v60  ;;  %v12528_v52 = vperm.slane %v5694_v39, 0  ;;  %v5649_v47 = vsel %vm2525_vm9, %v5648_v41, %v12501_v10  ;;  %vm12534_vm1 = vcmp.eq.f32.partialorder %v4780_v31, 8.507059e+37 }
 0x46c   :  { %16588 = vst [vmem:[#allocation131_spill] sm:$0xff] %v12521_v17  ;;  %v12532_v53 = vpop.eup %9832  ;;  %v4698_v5 = vadd.f32 %v4697_v55, %v4696_v27  ;;  %v5651_v56 = vsel %vm2528_vm10, %v5650_v30, %v5649_v47  ;;  %v5652_v4 = vrot.slane %v12525_v62, 5  ;;  %v4783_v57 = vor.u32 1.1754944e-38, %v4782_v8 }
 0x46d   :  { %16589 = vst [vmem:[#allocation120_spill] sm:$0xff] %v12525_v62  ;;  %v4773_v59 = vsub.f32 1.0, %v4772_v12  ;;  %9838 = vrcp.f32 %v12528_v52  ;;  %v2419_v39 = vmul.f32 1.442695, %v2349_v24  ;;  %v5654_v31 = vrot.slane %v12532_v53, 4 }
 0x46e   :  { %v12541_v36 = vpop.eup %9834  ;;  %v4699_v37 = vrot.slane %v4698_v5, 1  ;;  %v5653_v41 = vsel %vm2531_vm11, %v5652_v4, %v5651_v56  ;;  %v2421_v38 = vmul.f32 1.442695, %v2350_v35  ;;  %vm4777_vm2 = vweird.f32 %v9829_v9 }
 0x46f   :  { %v4774_v3 = vmul.f32 %v9829_v9, %v4773_v59  ;;  %v5797_v27 = vand.u32 2147483648, %v12528_v52  ;;  %v2423_v55 = vmul.f32 1.442695, %v2351_v50  ;;  %v5795_v30 = vand.u32 2147483647, %v12528_v52  ;;  %vm4778_vm3 = vmor %vm4776_vm0, %vm4777_vm2 }
 0x470   :  { %v4700_v12 = vadd.f32 %v4699_v37, %v4698_v5  ;;  %v5655_v8 = vsel %vm2534_vm12, %v5654_v31, %v5653_v41  ;;  %v2425_v47 = vmul.f32 1.442695, %v2352_v13  ;;  %v12548_v24 = vpop.eup %9836  ;;  %v5656_v28 = vrot.slane %v12541_v36, 3 }
 0x471   :  { %16592 = vst [vmem:[#allocation121_spill] sm:$0xff] %v12548_v24  ;;  %v4775_v62 = vadd.f32 %v9829_v9, %v4774_v3  ;;  %9840 = vpow2.f32 %v2419_v39  ;;  %v2427_v56 = vmul.f32 1.442695, %v2353_v16  ;;  %vm5791_vm4 = vweird.f32 %v12528_v52 }
 0x472   :  { %v12554_v59 = vperm.slane %v4700_v12, 0  ;;  %9842 = vpow2.f32 %v2421_v38  ;;  %v2429_v35 = vmul.f32 1.442695, %v2354_v54  ;;  %v5798_v4 = vor.u32 1.1754944e-38, %v5797_v27 }
 0x473   :  { %v9839_v37 = vpop.eup %9838  ;;  %v4779_v50 = vsel %vm4778_vm3, %v9829_v9, %v4775_v62  ;;  %v5657_v13 = vsel %vm2537_vm13, %v5656_v28, %v5655_v8  ;;  %9844 = vpow2.f32 %v2423_v55  ;;  %vm12560_vm5 = vcmp.eq.f32.partialorder %v5795_v30, 8.507059e+37 }
 0x474   :  { %v4784_v3 = vsel %vm12534_vm1, %v4783_v57, %v4779_v50  ;;  %v5787_v16 = vmul.f32 %v9839_v37, %v12528_v52  ;;  %9846 = vrcp.f32 %v12554_v59  ;;  %v5658_v38 = vrot.slane %v12548_v24, 2  ;;  %v16598_v50 = vld [vmem:[#allocation105_spill] sm:$0xff] }
 0x475   :  { %v4785_v54 = vmul.f32 %v12374_v61, %v4784_v3  ;;  %v4786_v9 = vmul.f32 %v12376_v14, %v4784_v3  ;;  %v4787_v28 = vmul.f32 %v12382_v7, %v4784_v3  ;;  %v4788_v62 = vmul.f32 %v12387_v0, %v4784_v3 }
 0x476   :  { %v4789_v57 = vmul.f32 %v12390_v19, %v4784_v3  ;;  %v5788_v11 = vsub.f32 1.0, %v5787_v16  ;;  %v5659_v5 = vsel %vm2540_vm14, %v5658_v38, %v5657_v13  ;;  %9848 = vpow2.f32 %v2425_v47  ;;  %v16597_v47 = vld [vmem:[#allocation99_spill] sm:$0xff] }
 0x477   :  { %v12572_v39 = vpop.eup %9840  ;;  %v4790_v41 = vmul.f32 %v12395_v2, %v4784_v3  ;;  %v4876_v31 = vperm.slane %v4785_v54, 0  ;;  %v4877_v27 = vperm.slane %v4786_v9, 0  ;;  %v4878_v55 = vperm.slane %v4787_v28, 0 }
 0x478   :  { %v12575_v61 = vpop.eup %9842  ;;  %v12578_v14 = vmul.f32 %v12399_v34, %v4784_v3  ;;  %v5789_v7 = vmul.f32 %v9839_v37, %v5788_v11  ;;  %vm5792_vm6 = vweird.f32 %v9839_v37  ;;  %v16596_v0 = vsub.f32 %v12322_v33, %v12355_v26  ;;  %v16599_v3 = vld [vmem:[#allocation108_spill] sm:$0xff]  ;;  %v16600_v26 = vld [vmem:[#allocation113_spill] sm:$0xff] }
 0x479   :  { %16595 = vst [vmem:[#allocation127_spill] sm:$0xff] %v12575_v61  ;;  %v12583_v30 = vpop.eup %9844  ;;  %v4879_v12 = vperm.slane %v4788_v62, 0  ;;  %v4880_v8 = vperm.slane %v4789_v57, 0  ;;  %v4925_v2 = vmul.f32 %v4876_v31, %v16597_v47  ;;  %v4926_v13 = vmul.f32 %v4877_v27, %v16598_v50  ;;  %vm5793_vm7 = vmor %vm5791_vm4, %vm5792_vm6  ;;  %v16601_v31 = vld [vmem:[#allocation55_spill] sm:$0xff]  ;;  %v16602_v27 = vld [vmem:[#allocation62_spill] sm:$0xff] }
 0x47a   :  { %v2431_v19 = vmul.f32 1.442695, %v16596_v0  ;;  %v12587_v16 = vpop.eup %9846  ;;  %v5790_v38 = vadd.f32 %v9839_v37, %v5789_v7  ;;  %v5709_v34 = vsel %vm2621_vm15, %v5659_v5, 0.0  ;;  %9850 = vpow2.f32 %v2427_v56 }
 0x47b   :  { %v12592_v54 = vmul.f32 %v12338_v45, %v16599_v3  ;;  %v4881_v33 = vperm.slane %v4790_v41, 0  ;;  %v4927_v9 = vmul.f32 %v4878_v55, %v16600_v26  ;;  %v4971_v28 = vadd.f32 %v4926_v13, %v4925_v2 }
 0x47c   :  { %v4835_v62 = vmul.f32 %v12587_v16, %v12554_v59  ;;  %v12600_v57 = vpop.eup %9848  ;;  %v4882_v11 = vperm.slane %v12578_v14, 0  ;;  %v5794_v56 = vsel %vm5793_vm7, %v9839_v37, %v5790_v38  ;;  %9852 = vpow2.f32 %v2429_v35  ;;  %v16603_v37 = vld [vmem:[#allocation109_spill] sm:$0xff] }
 0x47d   :  { %v2566_v5 = vrot.slane %v12575_v61, 7  ;;  %v4928_v41 = vmul.f32 %v4879_v12, %v16601_v31  ;;  %v4929_v55 = vmul.f32 %v4880_v8, %v16602_v27  ;;  %v4972_v7 = vadd.f32 %v4971_v28, %v4927_v9 }
 0x47e   :  { %v5799_v52 = vsel %vm12560_vm5, %v5798_v4, %v5794_v56  ;;  %v4930_v35 = vmul.f32 %v4881_v33, %v16603_v37  ;;  %v4836_v12 = vsub.f32 1.0, %v4835_v62  ;;  %vm4839_vm0 = vweird.f32 %v12554_v59  ;;  %v16605_v62 = vld [vmem:[#allocation106_spill] sm:$0xff] }
 0x47f   :  { %v5800_v0 = vmul.f32 %v12407_v63, %v5799_v52  ;;  %v5801_v2 = vmul.f32 %v12411_v40, %v5799_v52  ;;  %v5802_v13 = vmul.f32 %v12414_v32, %v5799_v52  ;;  %v5803_v14 = vmul.f32 %v12421_v18, %v5799_v52 }
 0x480   :  { %v4973_v38 = vadd.f32 %v4972_v7, %v4928_v41  ;;  %v5804_v3 = vmul.f32 %v12424_v25, %v5799_v52  ;;  %v12614_v45 = vpop.eup %9850  ;;  %v5805_v8 = vmul.f32 %v12435_v29, %v5799_v52  ;;  %v5806_v63 = vmul.f32 %v12439_v58, %v5799_v52  ;;  %v16604_v25 = vld [vmem:[#allocation100_spill] sm:$0xff] }
 0x481   :  { %v5891_v60 = vperm.slane %v5800_v0, 0  ;;  %v5892_v4 = vperm.slane %v5801_v2, 0  ;;  %v5893_v9 = vperm.slane %v5802_v13, 0  ;;  %vm4840_vm1 = vweird.f32 %v12587_v16  ;;  %v16606_v52 = vld [vmem:[#allocation116_spill] sm:$0xff] }
 0x482   :  { %v5710_v40 = vrot.slane %v5709_v34, 4  ;;  %v12620_v32 = vpop.eup %9852  ;;  %v4974_v18 = vadd.f32 %v4973_v38, %v4929_v55  ;;  %v5894_v33 = vperm.slane %v5803_v14, 0  ;;  %v5895_v41 = vperm.slane %v5804_v3, 0  ;;  %v16607_v3 = vld [vmem:[#allocation56_spill] sm:$0xff]  ;;  %vm4841_vm2 = vmor %vm4839_vm0, %vm4840_vm1 }
 0x483   :  { %v5940_v28 = vmul.f32 %v5891_v60, %v16604_v25  ;;  %v5941_v56 = vmul.f32 %v5892_v4, %v16605_v62  ;;  %v4843_v29 = vand.u32 2147483647, %v12554_v59  ;;  %v4845_v7 = vand.u32 2147483648, %v12554_v59 }
 0x484   :  { %9854 = vpow2.f32 %v2431_v19  ;;  %v5896_v58 = vperm.slane %v5805_v8, 0  ;;  %v5942_v0 = vmul.f32 %v5893_v9, %v16606_v52  ;;  %v4837_v13 = vmul.f32 %v12587_v16, %v4836_v12  ;;  %v16608_v19 = vld [vmem:[#allocation63_spill] sm:$0xff] }
 0x485   :  { %v5986_v2 = vadd.f32 %v5941_v56, %v5940_v28  ;;  %v5897_v61 = vperm.slane %v5806_v63, 0  ;;  %v5711_v24 = vadd.f32 %v5710_v40, %v5709_v34  ;;  %v2567_v55 = vsel %vm2525_vm9, %v2566_v5, %v12572_v39 }
 0x486   :  { %v2568_v14 = vrot.slane %v12583_v30, 6  ;;  %v4975_v38 = vadd.f32 %v4974_v18, %v4930_v35  ;;  %v5943_v60 = vmul.f32 %v5894_v33, %v16607_v3  ;;  %v4838_v62 = vadd.f32 %v12587_v16, %v4837_v13  ;;  %v16609_v33 = vld [vmem:[#allocation142_spill] sm:$0xff] }
 0x487   :  { %v5987_v4 = vadd.f32 %v5986_v2, %v5942_v0  ;;  %v5944_v8 = vmul.f32 %v5895_v41, %v16608_v19  ;;  %v4846_v12 = vor.u32 1.1754944e-38, %v4845_v7  ;;  %v2570_v5 = vrot.slane %v12600_v57, 5 }
 0x488   :  { %v2569_v34 = vsel %vm2528_vm10, %v2568_v14, %v2567_v55  ;;  %v4842_v35 = vsel %vm4841_vm2, %v12587_v16, %v4838_v62  ;;  %vm4844_vm3 = vcmp.eq.f32.partialorder %v4843_v29, 8.507059e+37  ;;  %v5712_v63 = vrot.slane %v5711_v24, 2  ;;  %v16610_v16 = vld [vmem:[#allocation77_spill] sm:$0xff] }
 0x489   :  { %v5988_v9 = vadd.f32 %v5987_v4, %v5943_v60  ;;  %v4931_v18 = vmul.f32 %v4882_v11, %v12505_v42  ;;  %v5945_v28 = vmul.f32 %v5896_v58, %v16609_v33  ;;  %v4847_v56 = vsel %vm4844_vm3, %v4846_v12, %v4842_v35 }
 0x48a   :  { %v12641_v40 = vpop.eup %9854  ;;  %v2571_v59 = vsel %vm2531_vm11, %v2570_v5, %v2569_v34  ;;  %v4848_v7 = vmul.f32 %v12445_v46, %v4847_v56  ;;  %v4849_v0 = vmul.f32 %v12449_v44, %v4847_v56  ;;  %v4850_v2 = vmul.f32 %v12458_v43, %v4847_v56 }
 0x48b   :  { %v5989_v41 = vadd.f32 %v5988_v9, %v5944_v8  ;;  %v12651_v62 = vadd.f32 %v16610_v16, %v12335_v23  ;;  %v4976_v29 = vadd.f32 %v4975_v38, %v4931_v18  ;;  %v5946_v13 = vmul.f32 %v5897_v61, %v12521_v17 }
 0x48c   :  { %v2572_v11 = vrot.slane %v12614_v45, 4  ;;  %v4897_v55 = vperm.slane %v4848_v7, 0  ;;  %v4898_v14 = vperm.slane %v4849_v0, 0  ;;  %v5713_v60 = vadd.f32 %v5712_v63, %v5711_v24 }
 0x48d   :  { %v5990_v58 = vadd.f32 %v5989_v41, %v5945_v28  ;;  %v4851_v4 = vmul.f32 %v12464_v21, %v4847_v56  ;;  %v2574_v44 = vrot.slane %v12620_v32, 3  ;;  %v3176_v43 = vrot.slane %v12592_v54, 4  ;;  %v16612_v28 = vld [vmem:[#allocation93_spill] sm:$0xff] }
 0x48e   :  { %v2573_v46 = vsel %vm2534_vm12, %v2572_v11, %v2571_v59  ;;  %v4899_v23 = vperm.slane %v4850_v2, 0  ;;  %v4946_v38 = vmul.f32 %v4897_v55, %v16597_v47  ;;  %v4947_v61 = vmul.f32 %v4898_v14, %v16598_v50  ;;  %v16613_v11 = vld [vmem:[#allocation101_spill] sm:$0xff]  ;;  %v16614_v55 = vld [vmem:[#allocation110_spill] sm:$0xff] }
 0x48f   :  { %v5991_v8 = vadd.f32 %v5990_v58, %v5946_v13  ;;  %v2246_v12 = vrot.slane %v12299_v1, 2  ;;  %v16611_v34 = vrot.slane %v12230_v49, 4  ;;  %v2576_v21 = vrot.slane %v12641_v40, 2 }
 0x490   :  { %v3174_v5 = vrot.slane %v12345_v20, 1  ;;  %v4989_v35 = vadd.f32 %v4947_v61, %v4946_v38  ;;  %v5714_v63 = vrot.slane %v5713_v60, 1  ;;  %v2575_v18 = vsel %vm2537_vm13, %v2574_v44, %v2573_v46 }
 0x491   :  { %v12665_v24 = vadd.f32 %v16611_v34, %v12230_v49  ;;  %v6045_v9 = vpack.c.bf16 %v5991_v8, %v4976_v29  ;;  %v3007_v59 = vmul.f32 %v12651_v62, %v16612_v28  ;;  %v4852_v41 = vmul.f32 %v12472_v6, %v4847_v56 }
 0x492   :  { %v2577_v7 = vsel %vm2540_vm14, %v2576_v21, %v2575_v18  ;;  %v3177_v0 = vadd.f32 %v3176_v43, %v12592_v54  ;;  %v4900_v49 = vperm.slane %v4851_v4, 0  ;;  %v4948_v2 = vmul.f32 %v4899_v23, %v16600_v26 }
 0x493   :  { %6220 = vmatpush.bf16.msrb.mxu3 %v6045_v9  ;;  %v5715_v13 = vadd.f32 %v5714_v63, %v5713_v60  ;;  %v2643_v29 = vsel %vm2621_vm15, %v2577_v7, 0.0  ;;  %v3008_v58 = vmul.f32 %v12651_v62, %v16613_v11  ;;  %v12681_v14 = vmul.f32 %v12651_v62, %v16614_v55  ;;  %v16615_v9 = vld [vmem:[#allocation122_spill] sm:$0xff] }
 0x494   :  { %v2644_v46 = vrot.slane %v2643_v29, 4  ;;  %v3178_v6 = vrot.slane %v3177_v0, 2  ;;  %v4853_v44 = vmul.f32 %v12477_v48, %v4847_v56  ;;  %v4854_v54 = vmul.f32 %v12481_v51, %v4847_v56 }
 0x495   :  { %v4990_v43 = vadd.f32 %v4989_v35, %v4948_v2  ;;  %v5722_v4 = vperm.slane %v5715_v13, 0  ;;  %v2252_v8 = vrot.slane %v12305_v15, 2  ;;  %v12687_v23 = vadd.f32 %v3174_v5, %v12345_v20 }
 0x496   :  { %v2645_v60 = vadd.f32 %v2644_v46, %v2643_v29  ;;  %v3179_v38 = vadd.f32 %v3178_v6, %v3177_v0  ;;  %v3266_v61 = vrot.slane %v3007_v59, 4  ;;  %v4901_v34 = vperm.slane %v4852_v41, 0  ;;  %v16616_v41 = vld [vmem:[#allocation140_spill] sm:$0xff] }
 0x497   :  { %v4949_v21 = vmul.f32 %v4900_v49, %v16601_v31  ;;  %9856 = vrcp.f32 %v5722_v4  ;;  %v12692_v63 = vmul.f32 %v12651_v62, %v16615_v9  ;;  %v3272_v48 = vrot.slane %v3008_v58, 4 }
 0x498   :  { %v2646_v51 = vrot.slane %v2645_v60, 2  ;;  %v3180_v56 = vrot.slane %v3179_v38, 1  ;;  %v4902_v18 = vperm.slane %v4853_v44, 0  ;;  %v4903_v7 = vperm.slane %v4854_v54, 0 }
 0x499   :  { %v4991_v2 = vadd.f32 %v4990_v43, %v4949_v21  ;;  %v3330_v0 = vmax.f32 %v16616_v41, %v12687_v23  ;;  %v2247_v49 = vadd.f32 %v2246_v12, %v12299_v1  ;;  %v12700_v13 = vadd.f32 %v3266_v61, %v3007_v59  ;;  %v16617_v43 = vld [vmem:[#allocation129_spill] sm:$0xff] }
 0x49a   :  { %v2647_v20 = vadd.f32 %v2646_v51, %v2645_v60  ;;  %v12695_v5 = vadd.f32 %v3180_v56, %v3179_v38  ;;  %v4950_v29 = vmul.f32 %v4901_v34, %v16602_v27  ;;  %v2253_v46 = vadd.f32 %v2252_v8, %v12305_v15  ;;  %v16618_v60 = vld [vmem:[#allocation141_spill] sm:$0xff]  ;;  %v16621_v56 = vld [vmem:[#allocation136_spill] sm:$0xff] }
 0x49b   :  { %v2258_v6 = vrot.slane %v12665_v24, 2  ;;  %v12705_v35 = vadd.f32 %v3272_v48, %v3008_v58  ;;  %v12712_v38 = vmul.f32 %v16618_v60, %v16617_v43  ;;  %v4951_v1 = vmul.f32 %v4902_v18, %v16603_v37  ;;  %v16620_v34 = vld [vmem:[#allocation81_spill] sm:$0xff] }
 0x49c   :  { %v2648_v44 = vrot.slane %v2647_v20, 1  ;;  %v12708_v54 = vmax.f32 %v3330_v0, %v12695_v5  ;;  %v4952_v12 = vmul.f32 %v4903_v7, %v12505_v42  ;;  %v4992_v59 = vadd.f32 %v4991_v2, %v4950_v29  ;;  %v16622_v0 = vld [vmem:[#allocation137_spill] sm:$0xff] }
 0x49d   :  { %v9857_v21 = vpop.eup %9856  ;;  %v16619_v15 = vrot.slane %v12236_v22, 4  ;;  %v12721_v48 = vmul.f32 %v16620_v34, %v16618_v60  ;;  %v2248_v51 = vrot.slane %v2247_v49, 1  ;;  %v2254_v43 = vrot.slane %v2253_v46, 1 }
 0x49e   :  { %v5850_v58 = vmul.f32 %v9857_v21, %v5722_v4  ;;  %v2649_v61 = vadd.f32 %v2648_v44, %v2647_v20  ;;  %v3372_v41 = vsub.f32 %v16621_v56, %v12708_v54  ;;  %v3373_v18 = vsub.f32 %v16622_v0, %v12708_v54  ;;  %v16623_v44 = vld [vmem:[#allocation135_spill] sm:$0xff] }
 0x49f   :  { %v2263_v8 = vadd.f32 %v16619_v15, %v12236_v22  ;;  %v12728_v7 = vadd.f32 %v2258_v6, %v12665_v24  ;;  %v5858_v29 = vand.u32 2147483647, %v5722_v4  ;;  %v5860_v22 = vand.u32 2147483648, %v5722_v4  ;;  %v16624_v24 = vld [vmem:[#allocation138_spill] sm:$0xff] }
 0x4a0   :  { %v5851_v2 = vsub.f32 1.0, %v5850_v58  ;;  %v12730_v15 = vperm.slane %v2649_v61, 0  ;;  %v4993_v20 = vadd.f32 %v4992_v59, %v4951_v1  ;;  %v3371_v60 = vsub.f32 %v16623_v44, %v12708_v54 }
 0x4a1   :  { %v3443_v34 = vmul.f32 1.442695, %v3372_v41  ;;  %v2264_v9 = vrot.slane %v2263_v8, 2  ;;  %vm5855_vm4 = vweird.f32 %v9857_v21  ;;  %v3445_v56 = vmul.f32 1.442695, %v3373_v18  ;;  %v16625_v41 = vld [vmem:[#allocation71_spill] sm:$0xff] }
 0x4a2   :  { %v5852_v55 = vmul.f32 %v9857_v21, %v5851_v2  ;;  %9858 = vrcp.f32 %v12730_v15  ;;  %vm5854_vm5 = vweird.f32 %v5722_v4  ;;  %v3374_v6 = vsub.f32 %v16624_v24, %v12708_v54  ;;  %v16626_v18 = vld [vmem:[#allocation143_spill] sm:$0xff] }
 0x4a3   :  { %v12737_v58 = vadd.f32 %v2248_v51, %v2247_v49  ;;  %v12739_v0 = vadd.f32 %v2254_v43, %v2253_v46  ;;  %vm5859_vm6 = vcmp.eq.f32.partialorder %v5858_v29, 8.507059e+37  ;;  %v5861_v1 = vor.u32 1.1754944e-38, %v5860_v22  ;;  %vm5856_vm7 = vmor %vm5854_vm5, %vm5855_vm4  ;;  %v16627_v22 = vld [vmem:[#allocation126_spill] sm:$0xff] }
 0x4a4   :  { %v5853_v61 = vadd.f32 %v9857_v21, %v5852_v55  ;;  %v3375_v2 = vsub.f32 %v16625_v41, %v12708_v54  ;;  %v3441_v44 = vmul.f32 1.442695, %v3371_v60  ;;  %9860 = vpow2.f32 %v3443_v34 }
 0x4a5   :  { %v2268_v4 = vrot.slane %v16626_v18, 4  ;;  %v12745_v11 = vadd.f32 %v4993_v20, %v4952_v12  ;;  %9862 = vpow2.f32 %v3445_v56  ;;  %v12747_v49 = vadd.f32 %v2264_v9, %v2263_v8  ;;  %v16628_v12 = vld [vmem:[#allocation133_spill] sm:$0xff] }
 0x4a6   :  { %v5857_v24 = vsel %vm5856_vm7, %v9857_v21, %v5853_v61  ;;  %v3376_v55 = vsub.f32 %v12687_v23, %v12708_v54  ;;  %v3377_v43 = vsub.f32 %v12695_v5, %v12708_v54  ;;  %v3447_v51 = vmul.f32 1.442695, %v3374_v6  ;;  %v16629_v21 = vld [vmem:[#allocation120_spill] sm:$0xff] }
 0x4a7   :  { %v5862_v46 = vsel %vm5859_vm6, %v5861_v1, %v5857_v24  ;;  %9864 = vpow2.f32 %v3441_v44  ;;  %v3449_v23 = vmul.f32 1.442695, %v3375_v2  ;;  %v2274_v6 = vrot.slane %v12712_v38, 4  ;;  %v16630_v44 = vld [vmem:[#allocation106_spill] sm:$0xff] }
 0x4a8   :  { %v12753_v29 = vpop.eup %9858  ;;  %v5863_v34 = vmul.f32 %v12501_v10, %v5862_v46  ;;  %v5864_v60 = vmul.f32 %v16627_v22, %v5862_v46  ;;  %v5865_v20 = vmul.f32 %v16628_v12, %v5862_v46  ;;  %v5866_v56 = vmul.f32 %v16629_v21, %v5862_v46 }
 0x4a9   :  { %v5867_v9 = vmul.f32 %v12532_v53, %v5862_v46  ;;  %v2742_v8 = vmul.f32 %v12753_v29, %v12730_v15  ;;  %v5868_v10 = vmul.f32 %v12541_v36, %v5862_v46  ;;  %9866 = vpow2.f32 %v3447_v51 }
 0x4aa   :  { %v5912_v61 = vperm.slane %v5863_v34, 0  ;;  %v5913_v5 = vperm.slane %v5864_v60, 0  ;;  %v5914_v54 = vperm.slane %v5865_v20, 0  ;;  %v12763_v1 = vpop.eup %9860  ;;  %v2269_v24 = vadd.f32 %v2268_v4, %v16626_v18  ;;  %v16631_v60 = vld [vmem:[#allocation121_spill] sm:$0xff] }
 0x4ab   :  { %v2743_v41 = vsub.f32 1.0, %v2742_v8  ;;  %v12767_v22 = vpop.eup %9862  ;;  %v5915_v53 = vperm.slane %v5866_v56, 0  ;;  %v3451_v34 = vmul.f32 1.442695, %v3376_v55  ;;  %v5869_v20 = vmul.f32 %v16631_v60, %v5862_v46 }
 0x4ac   :  { %v5961_v12 = vmul.f32 %v5912_v61, %v16604_v25  ;;  %v5962_v2 = vmul.f32 %v5913_v5, %v16630_v44  ;;  %v5916_v21 = vperm.slane %v5867_v9, 0  ;;  %9868 = vpow2.f32 %v3449_v23  ;;  %v16667_v44 = vld [vmem:[#allocation124_spill] sm:$0xff] }
 0x4ad   :  { %v3453_v59 = vmul.f32 1.442695, %v3377_v43  ;;  %v5963_v28 = vmul.f32 %v5914_v54, %v16606_v52  ;;  %v2744_v51 = vmul.f32 %v12753_v29, %v2743_v41  ;;  %v3582_v18 = vrot.slane %v12763_v1, 7  ;;  %v12775_v4 = vpop.eup %9864  ;;  %v16654_v52 = vld [vmem:[#allocation54_spill] sm:$0xff] }
 0x4ae   :  { %v6004_v36 = vadd.f32 %v5962_v2, %v5961_v12  ;;  %v5917_v56 = vperm.slane %v5868_v10, 0  ;;  %v3584_v8 = vrot.slane %v12767_v22, 6  ;;  %v2266_v61 = vrot.slane %v12747_v49, 1 }
 0x4af   :  { %v2270_v55 = vrot.slane %v2269_v24, 2  ;;  %v5964_v46 = vmul.f32 %v5915_v53, %v16607_v3  ;;  %9870 = vpow2.f32 %v3451_v34  ;;  %v3583_v43 = vsel %vm2525_vm9, %v3582_v18, %v12775_v4  ;;  %v12782_v23 = vpop.eup %9866 }
 0x4b0   :  { %v6005_v9 = vadd.f32 %v6004_v36, %v5963_v28  ;;  %v5918_v5 = vperm.slane %v5869_v20, 0  ;;  %v2752_v54 = vand.u32 2147483648, %v12730_v15  ;;  %9872 = vpow2.f32 %v3453_v59 }
 0x4b1   :  { %v2275_v10 = vadd.f32 %v2274_v6, %v12712_v38  ;;  %v5965_v41 = vmul.f32 %v5916_v21, %v16608_v19  ;;  %v2745_v2 = vadd.f32 %v12753_v29, %v2744_v51  ;;  %vm2747_vm0 = vweird.f32 %v12753_v29 }
 0x4b2   :  { %v6006_v12 = vadd.f32 %v6005_v9, %v5964_v46  ;;  %v12789_v28 = vpop.eup %9868  ;;  %vm2746_vm1 = vweird.f32 %v12730_v15  ;;  %v3585_v53 = vsel %vm2528_vm10, %v3584_v8, %v3583_v43  ;;  %v2271_v34 = vadd.f32 %v2270_v55, %v2269_v24  ;;  %v16635_v8 = vld [vmem:[#allocation128_spill] sm:$0xff] }
 0x4b3   :  { %v2322_v60 = vmax.f32 %v12737_v58, %v12739_v0  ;;  %v5966_v59 = vmul.f32 %v5917_v56, %v16609_v33  ;;  %v2750_v6 = vand.u32 2147483647, %v12730_v15  ;;  %v3586_v20 = vrot.slane %v12782_v23, 5  ;;  %vm12798_vm2 = vmor %vm2746_vm1, %vm2747_vm0 }
 0x4b4   :  { %v6007_v38 = vadd.f32 %v6006_v12, %v5965_v41  ;;  %v2753_v36 = vor.u32 1.1754944e-38, %v2752_v54  ;;  %v16634_v51 = vrot.slane %v12728_v7, 1  ;;  %v2276_v24 = vrot.slane %v2275_v10, 2 }
 0x4b5   :  { %v3011_v55 = vmul.f32 %v12651_v62, %v16635_v8  ;;  %v12809_v56 = vpop.eup %9870  ;;  %v5967_v15 = vmul.f32 %v5918_v5, %v12521_v17  ;;  %v2749_v9 = vsel %vm12798_vm2, %v12753_v29, %v2745_v2  ;;  %v3587_v43 = vsel %vm2531_vm11, %v3586_v20, %v3585_v53 }
 0x4b6   :  { %v12805_v18 = vadd.f32 %v16634_v51, %v12728_v7  ;;  %v6008_v46 = vadd.f32 %v6007_v38, %v5966_v59  ;;  %v12816_v54 = vpop.eup %9872  ;;  %v3588_v7 = vrot.slane %v12789_v28, 4  ;;  %v2272_v41 = vrot.slane %v2271_v34, 1  ;;  %v16636_v59 = vld [vmem:[#allocation64_spill] sm:$0xff] }
 0x4b7   :  { %v3268_v51 = vrot.slane %v12700_v13, 2  ;;  %vm2751_vm3 = vcmp.eq.f32.partialorder %v2750_v6, 8.507059e+37  ;;  %v12822_v5 = vadd.f32 %v2266_v61, %v12747_v49  ;;  %v3012_v38 = vmul.f32 %v12651_v62, %v16636_v59 }
 0x4b8   :  { %v2323_v12 = vmax.f32 %v2322_v60, %v12805_v18  ;;  %v6009_v8 = vadd.f32 %v6008_v46, %v5967_v15  ;;  %v2754_v29 = vsel %vm2751_vm3, %v2753_v36, %v2749_v9  ;;  %v3589_v2 = vsel %vm2534_vm12, %v3588_v7, %v3587_v43 }
 0x4b9   :  { %v3590_v53 = vrot.slane %v12809_v56, 3  ;;  %v2277_v20 = vadd.f32 %v2276_v24, %v2275_v10  ;;  %v3592_v60 = vrot.slane %v12816_v54, 2  ;;  %v2280_v16 = vrot.slane %v12721_v48, 4 }
 0x4ba   :  { %v6051_v21 = vpack.c.bf16 %v6009_v8, %v12745_v11  ;;  %v16637_v6 = vrot.slane %v12681_v14, 4  ;;  %v12835_v15 = vadd.f32 %v2272_v41, %v2271_v34  ;;  %v2324_v36 = vmax.f32 %v2323_v12, %v12822_v5  ;;  %v16638_v11 = vld [vmem:[#allocation127_spill] sm:$0xff] }
 0x4bb   :  { %v3591_v61 = vsel %vm2537_vm13, %v3590_v53, %v3589_v2  ;;  %v3269_v46 = vadd.f32 %v3268_v51, %v12700_v13  ;;  %v12840_v10 = vmul.f32 %v12572_v39, %v2754_v29  ;;  %v12843_v24 = vmul.f32 %v16638_v11, %v2754_v29  ;;  %v16639_v2 = vld [vmem:[#allocation76_spill] sm:$0xff] }
 0x4bc   :  { %v3279_v49 = vadd.f32 %v16637_v6, %v12681_v14  ;;  %6301 = vmatpush.bf16.msrb.mxu0 %v6051_v21  ;;  %v3593_v8 = vsel %vm2540_vm14, %v3592_v60, %v3591_v61  ;;  %v2281_v9 = vadd.f32 %v2280_v16, %v12721_v48  ;;  %v12848_v14 = vmul.f32 %v12583_v30, %v2754_v29 }
 0x4bd   :  { %v3658_v34 = vsel %vm2621_vm15, %v3593_v8, 0.0  ;;  %v2278_v43 = vrot.slane %v2277_v20, 1  ;;  %v3274_v7 = vrot.slane %v12705_v35, 2  ;;  %v3270_v12 = vrot.slane %v3269_v46, 1 }
 0x4be   :  { %v3659_v13 = vrot.slane %v3658_v34, 4  ;;  %v2282_v41 = vrot.slane %v2281_v9, 2  ;;  %v3280_v39 = vrot.slane %v3279_v49, 2  ;;  %v2325_v51 = vmax.f32 %v2324_v36, %v12835_v15 }
 0x4bf   :  { %v3013_v53 = vmul.f32 %v16639_v2, %v12651_v62  ;;  %v3275_v21 = vadd.f32 %v3274_v7, %v12705_v35  ;;  %v3284_v16 = vrot.slane %v12692_v63, 4  ;;  %v3290_v6 = vrot.slane %v3011_v55, 4 }
 0x4c0   :  { %v3660_v30 = vadd.f32 %v3659_v13, %v3658_v34  ;;  %v2283_v48 = vadd.f32 %v2282_v41, %v2281_v9  ;;  %v3281_v60 = vadd.f32 %v3280_v39, %v3279_v49  ;;  %v2279_v61 = vadd.f32 %v2278_v43, %v2277_v20 }
 0x4c1   :  { %v3276_v11 = vrot.slane %v3275_v21, 1  ;;  %v3285_v8 = vadd.f32 %v3284_v16, %v12692_v63  ;;  %v3296_v59 = vrot.slane %v3012_v38, 4  ;;  %v12858_v33 = vadd.f32 %v3270_v12, %v3269_v46 }
 0x4c2   :  { %v3661_v17 = vrot.slane %v3660_v30, 2  ;;  %v2284_v42 = vrot.slane %v2283_v48, 1  ;;  %v3291_v36 = vadd.f32 %v3290_v6, %v3011_v55  ;;  %v3282_v62 = vrot.slane %v3281_v60, 1 }
 0x4c3   :  { %v12860_v19 = vadd.f32 %v3276_v11, %v3275_v21  ;;  %v3286_v35 = vrot.slane %v3285_v8, 2  ;;  %v3297_v7 = vadd.f32 %v3296_v59, %v3012_v38  ;;  %v12863_v34 = vmul.f32 %v12600_v57, %v2754_v29 }
 0x4c4   :  { %v3662_v49 = vadd.f32 %v3661_v17, %v3660_v30  ;;  %v2285_v9 = vadd.f32 %v2284_v42, %v2283_v48  ;;  %v2326_v20 = vmax.f32 %v2325_v51, %v2279_v61  ;;  %v12866_v43 = vmul.f32 %v12614_v45, %v2754_v29 }
 0x4c5   :  { %v12869_v63 = vmul.f32 %v12620_v32, %v2754_v29  ;;  %v3287_v46 = vadd.f32 %v3286_v35, %v3285_v8  ;;  %v3292_v13 = vrot.slane %v3291_v36, 2  ;;  %v12872_v55 = vmul.f32 %v12641_v40, %v2754_v29  ;;  %v16640_v35 = vld [vmem:[#allocation95_spill] sm:$0xff] }
 0x4c6   :  { %v2846_v41 = vperm.slane %v12840_v10, 0  ;;  %v3663_v59 = vrot.slane %v3662_v49, 1  ;;  %v2327_v38 = vmax.f32 %v2326_v20, %v2285_v9  ;;  %v12875_v57 = vadd.f32 %v3282_v62, %v3281_v60 }
 0x4c7   :  { %v3298_v17 = vrot.slane %v3297_v7, 2  ;;  %v3302_v42 = vrot.slane %v3013_v53, 4  ;;  %v3344_v45 = vmax.f32 %v12858_v33, %v12860_v19  ;;  %v3288_v10 = vrot.slane %v3287_v46, 1 }
 0x4c8   :  { %v3664_v12 = vadd.f32 %v3663_v59, %v3662_v49  ;;  %v2370_v32 = vsub.f32 %v12737_v58, %v2327_v38  ;;  %v2371_v39 = vsub.f32 %v12739_v0, %v2327_v38  ;;  %v2372_v51 = vsub.f32 %v12805_v18, %v2327_v38 }
 0x4c9   :  { %v2373_v40 = vsub.f32 %v12822_v5, %v2327_v38  ;;  %v2374_v29 = vsub.f32 %v12835_v15, %v2327_v38  ;;  %v3293_v21 = vadd.f32 %v3292_v13, %v3291_v36  ;;  %v2375_v30 = vsub.f32 %v2279_v61, %v2327_v38  ;;  %v16641_v13 = vld [vmem:[#allocation103_spill] sm:$0xff] }
 0x4ca   :  { %v12884_v16 = vperm.slane %v3664_v12, 0  ;;  %v2461_v48 = vmul.f32 1.442695, %v2370_v32  ;;  %v2463_v60 = vmul.f32 1.442695, %v2371_v39  ;;  %v2376_v6 = vsub.f32 %v2285_v9, %v2327_v38  ;;  %v16645_v12 = vld [vmem:[#allocation97_spill] sm:$0xff] }
 0x4cb   :  { %v2465_v11 = vmul.f32 1.442695, %v2372_v51  ;;  %v3303_v8 = vadd.f32 %v3302_v42, %v3013_v53  ;;  %v3345_v58 = vmax.f32 %v3344_v45, %v12875_v57  ;;  %v2847_v0 = vperm.slane %v12843_v24, 0  ;;  %v16646_v32 = vld [vmem:[#allocation118_spill] sm:$0xff] }
 0x4cc   :  { %9874 = vrcp.f32 %v12884_v16  ;;  %v2467_v18 = vmul.f32 1.442695, %v2373_v40  ;;  %v3299_v5 = vadd.f32 %v3298_v17, %v3297_v7  ;;  %v2469_v15 = vmul.f32 1.442695, %v2374_v29  ;;  %v16643_v17 = vld [vmem:[#allocation91_spill] sm:$0xff] }
 0x4cd   :  { %9876 = vpow2.f32 %v2461_v48  ;;  %v12889_v62 = vadd.f32 %v3288_v10, %v3287_v46  ;;  %v3294_v36 = vrot.slane %v3293_v21, 1  ;;  %v2848_v61 = vperm.slane %v12848_v14, 0  ;;  %v16642_v46 = vld [vmem:[#allocation90_spill] sm:$0xff] }
 0x4ce   :  { %v2895_v49 = vmul.f32 %v2846_v41, %v16640_v35  ;;  %9878 = vpow2.f32 %v2463_v60  ;;  %v2471_v9 = vmul.f32 1.442695, %v2375_v30  ;;  %v2473_v53 = vmul.f32 1.442695, %v2376_v6  ;;  %v16647_v60 = vld [vmem:[#allocation111_spill] sm:$0xff] }
 0x4cf   :  { %9880 = vpow2.f32 %v2465_v11  ;;  %v3304_v20 = vrot.slane %v3303_v8, 2  ;;  %v3346_v24 = vmax.f32 %v3345_v58, %v12889_v62  ;;  %v2896_v59 = vmul.f32 %v2847_v0, %v16641_v13  ;;  %v16648_v58 = vld [vmem:[#allocation53_spill] sm:$0xff] }
 0x4d0   :  { %9882 = vpow2.f32 %v2467_v18  ;;  %v12895_v7 = vadd.f32 %v3294_v36, %v3293_v21  ;;  %v3300_v38 = vrot.slane %v3299_v5, 1  ;;  %v12899_v42 = vadd.f32 %v16643_v17, %v16642_v46 }
 0x4d1   :  { %v2849_v14 = vperm.slane %v12863_v34, 0  ;;  %9884 = vpow2.f32 %v2469_v15  ;;  %v3305_v41 = vadd.f32 %v3304_v20, %v3303_v8  ;;  %v12904_v39 = vadd.f32 %v16646_v32, %v16645_v12 }
 0x4d2   :  { %16644 = vst [vmem:[#allocation134_spill] sm:$0xff] %v12899_v42  ;;  %v9875_v45 = vpop.eup %9874  ;;  %v2850_v51 = vperm.slane %v12866_v43, 0  ;;  %9886 = vpow2.f32 %v2471_v9  ;;  %v3347_v40 = vmax.f32 %v3346_v24, %v12895_v7  ;;  %v2851_v10 = vperm.slane %v12869_v63, 0 }
 0x4d3   :  { %v12908_v29 = vpop.eup %9876  ;;  %v3757_v21 = vmul.f32 %v9875_v45, %v12884_v16  ;;  %9888 = vpow2.f32 %v2473_v53  ;;  %v3306_v34 = vrot.slane %v3305_v41, 1  ;;  %v2897_v6 = vmul.f32 %v2848_v61, %v16647_v60 }
 0x4d4   :  { %v12912_v30 = vpop.eup %9878  ;;  %v2941_v11 = vadd.f32 %v2896_v59, %v2895_v49  ;;  %v12916_v8 = vadd.f32 %v3300_v38, %v3299_v5  ;;  %v2898_v0 = vmul.f32 %v2849_v14, %v16648_v58  ;;  %v3765_v9 = vand.u32 2147483647, %v12884_v16 }
 0x4d5   :  { %v12918_v43 = vpop.eup %9880  ;;  %v3758_v18 = vsub.f32 1.0, %v3757_v21  ;;  %v2602_v63 = vrot.slane %v12912_v30, 7  ;;  %v12922_v15 = vadd.f32 %v3306_v34, %v3305_v41  ;;  %v3767_v53 = vand.u32 2147483648, %v12884_v16 }
 0x4d6   :  { %v12924_v36 = vpop.eup %9882  ;;  %v2604_v61 = vrot.slane %v12918_v43, 6  ;;  %v3348_v5 = vmax.f32 %v3347_v40, %v12916_v8  ;;  %vm3762_vm4 = vweird.f32 %v9875_v45  ;;  %v2942_v46 = vadd.f32 %v2941_v11, %v2897_v6 }
 0x4d7   :  { %v12930_v49 = vpop.eup %9884  ;;  %v3759_v20 = vmul.f32 %v9875_v45, %v3758_v18  ;;  %v2603_v24 = vsel %vm2525_vm9, %v2602_v63, %v12908_v29  ;;  %v2606_v59 = vrot.slane %v12924_v36, 5  ;;  %vm3761_vm5 = vweird.f32 %v12884_v16  ;;  %v16649_v18 = vld [vmem:[#allocation61_spill] sm:$0xff] }
 0x4d8   :  { %v12935_v38 = vpop.eup %9886  ;;  %v2605_v14 = vsel %vm2528_vm10, %v2604_v61, %v2603_v24  ;;  %v2608_v41 = vrot.slane %v12930_v49, 4  ;;  %v3349_v12 = vmax.f32 %v3348_v5, %v12922_v15  ;;  %v2899_v63 = vmul.f32 %v2850_v51, %v16649_v18  ;;  %vm3763_vm6 = vmor %vm3761_vm5, %vm3762_vm4  ;;  %v16650_v61 = vld [vmem:[#allocation87_spill] sm:$0xff] }
 0x4d9   :  { %v12940_v32 = vpop.eup %9888  ;;  %v3760_v40 = vadd.f32 %v9875_v45, %v3759_v20  ;;  %v2607_v21 = vsel %vm2531_vm11, %v2606_v59, %v2605_v14  ;;  %v2610_v34 = vrot.slane %v12935_v38, 3  ;;  %v3768_v48 = vor.u32 1.1754944e-38, %v3767_v53 }
 0x4da   :  { %v2609_v6 = vsel %vm2534_vm12, %v2608_v41, %v2607_v21  ;;  %v2612_v11 = vrot.slane %v12940_v32, 2  ;;  %v2900_v24 = vmul.f32 %v2851_v10, %v16650_v61  ;;  %vm3766_vm7 = vcmp.eq.f32.partialorder %v3765_v9, 8.507059e+37 }
 0x4db   :  { %v3764_v5 = vsel %vm3763_vm6, %v9875_v45, %v3760_v40  ;;  %v2611_v20 = vsel %vm2537_vm13, %v2610_v34, %v2609_v6  ;;  %v2943_v2 = vadd.f32 %v2942_v46, %v2898_v0  ;;  %v3392_v14 = vsub.f32 %v12858_v33, %v3349_v12 }
 0x4dc   :  { %v3769_v16 = vsel %vm3766_vm7, %v3768_v48, %v3764_v5  ;;  %v2613_v59 = vsel %vm2540_vm14, %v2612_v11, %v2611_v20  ;;  %v3393_v9 = vsub.f32 %v12860_v19, %v3349_v12  ;;  %v3394_v48 = vsub.f32 %v12875_v57, %v3349_v12  ;;  %v16652_v11 = vld [vmem:[#allocation104_spill] sm:$0xff] }
 0x4dd   :  { %v3770_v51 = vmul.f32 %v12775_v4, %v3769_v16  ;;  %v3771_v53 = vmul.f32 %v12763_v1, %v3769_v16  ;;  %v3772_v41 = vmul.f32 %v12767_v22, %v3769_v16  ;;  %v3773_v21 = vmul.f32 %v12782_v23, %v3769_v16 }
 0x4de   :  { %v3774_v10 = vmul.f32 %v12789_v28, %v3769_v16  ;;  %v2664_v45 = vsel %vm2621_vm15, %v2613_v59, 0.0  ;;  %v3395_v33 = vsub.f32 %v12889_v62, %v3349_v12  ;;  %v3775_v4 = vmul.f32 %v12809_v56, %v3769_v16  ;;  %v16651_v28 = vld [vmem:[#allocation96_spill] sm:$0xff] }
 0x4df   :  { %v3861_v0 = vperm.slane %v3770_v51, 0  ;;  %v3862_v46 = vperm.slane %v3771_v53, 0  ;;  %v3863_v40 = vperm.slane %v3772_v41, 0  ;;  %v2665_v1 = vrot.slane %v2664_v45, 4  ;;  %v16653_v59 = vld [vmem:[#allocation112_spill] sm:$0xff] }
 0x4e0   :  { %v3396_v22 = vsub.f32 %v12895_v7, %v3349_v12  ;;  %v3397_v23 = vsub.f32 %v12916_v8, %v3349_v12  ;;  %v3864_v34 = vperm.slane %v3773_v21, 0  ;;  %v3398_v19 = vsub.f32 %v12922_v15, %v3349_v12 }
 0x4e1   :  { %v3910_v6 = vmul.f32 %v3861_v0, %v16651_v28  ;;  %v3911_v5 = vmul.f32 %v3862_v46, %v16652_v11  ;;  %v3776_v57 = vmul.f32 %v12816_v54, %v3769_v16  ;;  %v3865_v20 = vperm.slane %v3774_v10, 0  ;;  %v16655_v16 = vld [vmem:[#allocation72_spill] sm:$0xff] }
 0x4e2   :  { %v3912_v51 = vmul.f32 %v3863_v40, %v16653_v59  ;;  %v2666_v62 = vadd.f32 %v2665_v1, %v2664_v45  ;;  %v3483_v56 = vmul.f32 1.442695, %v3392_v14  ;;  %v3485_v41 = vmul.f32 1.442695, %v3393_v9  ;;  %v16656_v9 = vld [vmem:[#allocation80_spill] sm:$0xff] }
 0x4e3   :  { %v3956_v53 = vadd.f32 %v3911_v5, %v3910_v6  ;;  %v3487_v37 = vmul.f32 1.442695, %v3394_v48  ;;  %v2944_v7 = vadd.f32 %v2943_v2, %v2899_v63  ;;  %v3866_v3 = vperm.slane %v3775_v4, 0  ;;  %v16657_v48 = vld [vmem:[#allocation92_spill] sm:$0xff] }
 0x4e4   :  { %v2667_v8 = vrot.slane %v2666_v62, 2  ;;  %v3489_v21 = vmul.f32 1.442695, %v3395_v33  ;;  %v3913_v0 = vmul.f32 %v3864_v34, %v16654_v52  ;;  %9890 = vpow2.f32 %v3483_v56 }
 0x4e5   :  { %v3957_v27 = vadd.f32 %v3956_v53, %v3912_v51  ;;  %v3491_v46 = vmul.f32 1.442695, %v3396_v22  ;;  %v3867_v15 = vperm.slane %v3776_v57, 0  ;;  %9892 = vpow2.f32 %v3485_v41 }
 0x4e6   :  { %v2668_v12 = vadd.f32 %v2667_v8, %v2666_v62  ;;  %v3493_v54 = vmul.f32 1.442695, %v3397_v23  ;;  %v3914_v10 = vmul.f32 %v3865_v20, %v16655_v16  ;;  %9894 = vpow2.f32 %v3487_v37  ;;  %v16663_v8 = vld [vmem:[#allocation83_spill] sm:$0xff] }
 0x4e7   :  { %v3958_v45 = vadd.f32 %v3957_v27, %v3913_v0  ;;  %v3495_v14 = vmul.f32 1.442695, %v3398_v19  ;;  %v12973_v2 = vadd.f32 %v16657_v48, %v16656_v9  ;;  %v12977_v63 = vadd.f32 %v16643_v17, %v12904_v39  ;;  %v16661_v39 = vld [vmem:[#allocation51_spill] sm:$0xff]  ;;  %v16664_v0 = vld [vmem:[#allocation85_spill] sm:$0xff] }
 0x4e8   :  { %v2669_v40 = vrot.slane %v2668_v12, 1  ;;  %9896 = vpow2.f32 %v3489_v21  ;;  %v2945_v33 = vadd.f32 %v2944_v7, %v2900_v24  ;;  %v3915_v4 = vmul.f32 %v3866_v3, %v12899_v42  ;;  %v16662_v24 = vld [vmem:[#allocation73_spill] sm:$0xff] }
 0x4e9   :  { %16658 = vst [vmem:[#allocation86_spill] sm:$0xff] %v12973_v2  ;;  %v3959_v1 = vadd.f32 %v3958_v45, %v3914_v10  ;;  %9898 = vpow2.f32 %v3491_v46  ;;  %v16660_v37 = vperm.slane %v12872_v55, 0  ;;  %v3916_v34 = vmul.f32 %v3867_v15, %v12977_v63  ;;  %v16665_v9 = vld [vmem:[#allocation89_spill] sm:$0xff] }
 0x4ea   :  { %16659 = vst [vmem:[#allocation139_spill] sm:$0xff] %v12977_v63  ;;  %v2670_v22 = vadd.f32 %v2669_v40, %v2668_v12  ;;  %9900 = vpow2.f32 %v3493_v54  ;;  %v12980_v27 = vpop.eup %9890  ;;  %v12990_v5 = vadd.f32 %v16662_v24, %v16661_v39 }
 0x4eb   :  { %v2901_v23 = vmul.f32 %v16660_v37, %v12973_v2  ;;  %v3960_v6 = vadd.f32 %v3959_v1, %v3915_v4  ;;  %9902 = vpow2.f32 %v3495_v14  ;;  %v12986_v17 = vpop.eup %9892  ;;  %v16666_v37 = vld [vmem:[#allocation115_spill] sm:$0xff] }
 0x4ec   :  { %v2677_v3 = vperm.slane %v2670_v22, 0  ;;  %v12992_v19 = vpop.eup %9894  ;;  %v3618_v51 = vrot.slane %v12986_v17, 7  ;;  %v3994_v21 = vmul.f32 %v12990_v5, %v16663_v8  ;;  %v3995_v46 = vmul.f32 %v12990_v5, %v16664_v0 }
 0x4ed   :  { %v2946_v57 = vadd.f32 %v2945_v33, %v2901_v23  ;;  %v3961_v20 = vadd.f32 %v3960_v6, %v3916_v34  ;;  %v3620_v41 = vrot.slane %v12992_v19, 6  ;;  %v3996_v48 = vmul.f32 %v16665_v9, %v12990_v5 }
 0x4ee   :  { %v12995_v62 = vpop.eup %9896  ;;  %9904 = vrcp.f32 %v2677_v3  ;;  %v3619_v56 = vsel %vm2525_vm9, %v3618_v51, %v12980_v27  ;;  %v4113_v1 = vrot.slane %v3994_v21, 4  ;;  %v4119_v22 = vrot.slane %v3995_v46, 4 }
 0x4ef   :  { %v12997_v55 = vpop.eup %9898  ;;  %v6044_v53 = vpack.c.bf16 %v3961_v20, %v2946_v57  ;;  %v3622_v15 = vrot.slane %v12995_v62, 5  ;;  %v3621_v54 = vsel %vm2528_vm10, %v3620_v41, %v3619_v56  ;;  %v3997_v23 = vmul.f32 %v16666_v37, %v12990_v5 }
 0x4f0   :  { %v13002_v7 = vpop.eup %9900  ;;  %v3624_v10 = vrot.slane %v12997_v55, 4  ;;  %v4125_v20 = vrot.slane %v3996_v48, 4  ;;  %v4114_v56 = vadd.f32 %v4113_v1, %v3994_v21  ;;  %v4120_v41 = vadd.f32 %v4119_v22, %v3995_v46 }
 0x4f1   :  { %v13009_v12 = vpop.eup %9902  ;;  %6221 = vmatpush.bf16.msrb.mxu3 %v6044_v53  ;;  %v3623_v45 = vsel %vm2531_vm11, %v3622_v15, %v3621_v54  ;;  %v3626_v14 = vrot.slane %v13002_v7, 3  ;;  %v4131_v15 = vrot.slane %v3997_v23, 4  ;;  %v3998_v25 = vmul.f32 %v16667_v44, %v12990_v5 }
 0x4f2   :  { %v3625_v40 = vsel %vm2534_vm12, %v3624_v10, %v3623_v45  ;;  %v3628_v33 = vrot.slane %v13009_v12, 2  ;;  %v2815_v10 = vand.u32 2147483648, %v2677_v3  ;;  %v2813_v31 = vand.u32 2147483647, %v2677_v3 }
 0x4f3   :  { %v3627_v34 = vsel %vm2537_vm13, %v3626_v14, %v3625_v40  ;;  %v4126_v14 = vadd.f32 %v4125_v20, %v3996_v48  ;;  %vm2809_vm1 = vweird.f32 %v2677_v3  ;;  %v4132_v46 = vadd.f32 %v4131_v15, %v3997_v23 }
 0x4f4   :  { %v9905_v4 = vpop.eup %9904  ;;  %v3629_v39 = vsel %vm2540_vm14, %v3628_v33, %v3627_v34  ;;  %v4115_v34 = vrot.slane %v4114_v56, 2  ;;  %v2816_v26 = vor.u32 1.1754944e-38, %v2815_v10  ;;  %vm2814_vm3 = vcmp.eq.f32.partialorder %v2813_v31, 8.507059e+37 }
 0x4f5   :  { %v2805_v6 = vmul.f32 %v9905_v4, %v2677_v3  ;;  %v3679_v57 = vsel %vm2621_vm15, %v3629_v39, 0.0  ;;  %vm2810_vm0 = vweird.f32 %v9905_v4  ;;  %v4121_v39 = vrot.slane %v4120_v41, 2 }
 0x4f6   :  { %v3680_v53 = vrot.slane %v3679_v57, 4  ;;  %vm2811_vm2 = vmor %vm2809_vm1, %vm2810_vm0  ;;  %v4137_v1 = vrot.slane %v3998_v25, 4  ;;  %v4133_v50 = vrot.slane %v4132_v46, 2 }
 0x4f7   :  { %v2806_v51 = vsub.f32 1.0, %v2805_v6  ;;  %v4122_v44 = vadd.f32 %v4121_v39, %v4120_v41 }
 0x4f8   :  { %v3681_v45 = vadd.f32 %v3680_v53, %v3679_v57  ;;  %v4127_v57 = vrot.slane %v4126_v14, 2  ;;  %v4116_v53 = vadd.f32 %v4115_v34, %v4114_v56  ;;  %v4134_v15 = vadd.f32 %v4133_v50, %v4132_v46  ;;  %v16668_v56 = vld [vmem:[#allocation130_spill] sm:$0xff] }
 0x4f9   :  { %v2807_v54 = vmul.f32 %v9905_v4, %v2806_v51  ;;  %v4123_v31 = vrot.slane %v4122_v44, 1  ;;  %v3999_v41 = vmul.f32 %v16668_v56, %v12990_v5 }
 0x4fa   :  { %v3682_v33 = vrot.slane %v3681_v45, 2  ;;  %v4117_v23 = vrot.slane %v4116_v53, 1 }
 0x4fb   :  { %v2808_v40 = vadd.f32 %v9905_v4, %v2807_v54  ;;  %v4128_v54 = vadd.f32 %v4127_v57, %v4126_v14  ;;  %v13040_v14 = vadd.f32 %v4123_v31, %v4122_v44 }
 0x4fc   :  { %v3683_v21 = vadd.f32 %v3682_v33, %v3681_v45  ;;  %v16669_v33 = vld [vmem:[#allocation79_spill] sm:$0xff] }
 0x4fd   :  { %v2812_v6 = vsel %vm2811_vm2, %v9905_v4, %v2808_v40  ;;  %v4138_v4 = vadd.f32 %v4137_v1, %v3998_v25  ;;  %v4129_v34 = vrot.slane %v4128_v54, 1  ;;  %v13038_v25 = vadd.f32 %v4117_v23, %v4116_v53 }
 0x4fe   :  { %v13026_v22 = vsel %vm2814_vm3, %v2816_v26, %v2812_v6  ;;  %v3684_v51 = vrot.slane %v3683_v21, 1  ;;  %v4135_v6 = vrot.slane %v4134_v15, 1  ;;  %v4143_v1 = vrot.slane %v3999_v41, 4 }
 0x4ff   :  { %v2818_v3 = vmul.f32 %v12908_v29, %v13026_v22  ;;  %v2819_v48 = vmul.f32 %v12912_v30, %v13026_v22  ;;  %v4139_v40 = vrot.slane %v4138_v4, 2  ;;  %v4000_v29 = vmul.f32 %v16669_v33, %v12990_v5 }
 0x500   :  { %v3685_v20 = vadd.f32 %v3684_v51, %v3683_v21  ;;  %v2820_v30 = vmul.f32 %v12918_v43, %v13026_v22  ;;  %v13044_v46 = vadd.f32 %v4129_v34, %v4128_v54  ;;  %v2821_v5 = vmul.f32 %v12924_v36, %v13026_v22 }
 0x501   :  { %v2867_v26 = vperm.slane %v2818_v3, 0  ;;  %v2868_v45 = vperm.slane %v2819_v48, 0  ;;  %v4140_v21 = vadd.f32 %v4139_v40, %v4138_v4  ;;  %v4149_v57 = vrot.slane %v4000_v29, 4 }
 0x502   :  { %v3692_v10 = vperm.slane %v3685_v20, 0  ;;  %v2869_v3 = vperm.slane %v2820_v30, 0  ;;  %v4144_v53 = vadd.f32 %v4143_v1, %v3999_v41  ;;  %v4335_v44 = vmax.f32 %v13038_v25, %v13040_v14 }
 0x503   :  { %v2916_v50 = vmul.f32 %v2867_v26, %v16640_v35  ;;  %v2917_v39 = vmul.f32 %v2868_v45, %v16641_v13  ;;  %v13050_v20 = vadd.f32 %v4135_v6, %v4134_v15  ;;  %v4141_v23 = vrot.slane %v4140_v21, 1  ;;  %v16705_v35 = vld [vmem:[#allocation46_spill] sm:$0xff] }
 0x504   :  { %9906 = vrcp.f32 %v3692_v10  ;;  %v4150_v31 = vadd.f32 %v4149_v57, %v4000_v29  ;;  %v2822_v4 = vmul.f32 %v12930_v49, %v13026_v22  ;;  %v4145_v26 = vrot.slane %v4144_v53, 2 }
 0x505   :  { %v2959_v48 = vadd.f32 %v2917_v39, %v2916_v50  ;;  %v4336_v45 = vmax.f32 %v4335_v44, %v13044_v46  ;;  %v2870_v40 = vperm.slane %v2821_v5, 0  ;;  %v2918_v36 = vmul.f32 %v2869_v3, %v16647_v60 }
 0x506   :  { %v3830_v34 = vand.u32 2147483648, %v3692_v10  ;;  %v4151_v41 = vrot.slane %v4150_v31, 2  ;;  %v3828_v1 = vand.u32 2147483647, %v3692_v10  ;;  %v4146_v50 = vadd.f32 %v4145_v26, %v4144_v53 }
 0x507   :  { %v2960_v15 = vadd.f32 %v2959_v48, %v2918_v36  ;;  %v4142_v39 = vadd.f32 %v4141_v23, %v4140_v21  ;;  %v4337_v29 = vmax.f32 %v4336_v45, %v13050_v20  ;;  %v2823_v49 = vmul.f32 %v12935_v38, %v13026_v22 }
 0x508   :  { %v4152_v6 = vadd.f32 %v4151_v41, %v4150_v31  ;;  %vm3824_vm5 = vweird.f32 %v3692_v10  ;;  %v2871_v5 = vperm.slane %v2822_v4, 0  ;;  %v2919_v3 = vmul.f32 %v2870_v40, %v16648_v58 }
 0x509   :  { %v3831_v44 = vor.u32 1.1754944e-38, %v3830_v34  ;;  %v2824_v53 = vmul.f32 %v12940_v32, %v13026_v22  ;;  %vm3829_vm7 = vcmp.eq.f32.partialorder %v3828_v1, 8.507059e+37  ;;  %v4338_v45 = vmax.f32 %v4337_v29, %v4142_v39 }
 0x50a   :  { %v9907_v51 = vpop.eup %9906  ;;  %v2961_v23 = vadd.f32 %v2960_v15, %v2919_v3  ;;  %v2920_v36 = vmul.f32 %v2871_v5, %v16649_v18 }
 0x50b   :  { %v3820_v43 = vmul.f32 %v9907_v51, %v3692_v10  ;;  %vm3825_vm4 = vweird.f32 %v9907_v51  ;;  %v2873_v15 = vperm.slane %v2824_v53, 0 }
 0x50c   :  { %vm3826_vm6 = vmor %vm3824_vm5, %vm3825_vm4 }
 0x50d   :  { %v3821_v54 = vsub.f32 1.0, %v3820_v43  ;;  %v4147_v43 = vrot.slane %v4146_v50, 1 }
 0x50f   :  { %v3822_v30 = vmul.f32 %v9907_v51, %v3821_v54  ;;  %v4153_v54 = vrot.slane %v4152_v6, 1  ;;  %v4148_v21 = vadd.f32 %v4147_v43, %v4146_v50  ;;  %v2872_v50 = vperm.slane %v2823_v49, 0 }
 0x511   :  { %v3823_v57 = vadd.f32 %v9907_v51, %v3822_v30  ;;  %v4154_v26 = vadd.f32 %v4153_v54, %v4152_v6  ;;  %v4339_v22 = vmax.f32 %v4338_v45, %v4148_v21 }
 0x513   :  { %v3827_v48 = vsel %vm3826_vm6, %v9907_v51, %v3823_v57  ;;  %v4340_v6 = vmax.f32 %v4339_v22, %v4154_v26 }
 0x514   :  { %v3832_v31 = vsel %vm3829_vm7, %v3831_v44, %v3827_v48 }
 0x515   :  { %v3833_v38 = vmul.f32 %v12980_v27, %v3832_v31  ;;  %v3834_v10 = vmul.f32 %v12986_v17, %v3832_v31  ;;  %v3835_v4 = vmul.f32 %v12992_v19, %v3832_v31  ;;  %v3836_v40 = vmul.f32 %v12995_v62, %v3832_v31 }
 0x516   :  { %v3837_v34 = vmul.f32 %v12997_v55, %v3832_v31  ;;  %v3838_v32 = vmul.f32 %v13002_v7, %v3832_v31  ;;  %v2962_v27 = vadd.f32 %v2961_v23, %v2920_v36  ;;  %v3839_v17 = vmul.f32 %v13009_v12, %v3832_v31 }
 0x517   :  { %v3882_v51 = vperm.slane %v3833_v38, 0  ;;  %v3883_v41 = vperm.slane %v3834_v10, 0  ;;  %v3884_v30 = vperm.slane %v3835_v4, 0  ;;  %v3885_v1 = vperm.slane %v3836_v40, 0 }
 0x518   :  { %v3886_v19 = vperm.slane %v3837_v34, 0  ;;  %v3887_v57 = vperm.slane %v3838_v32, 0  ;;  %v4379_v43 = vsub.f32 %v13038_v25, %v4340_v6  ;;  %v4380_v49 = vsub.f32 %v13040_v14, %v4340_v6 }
 0x519   :  { %v3931_v62 = vmul.f32 %v3882_v51, %v16651_v28  ;;  %v3932_v29 = vmul.f32 %v3883_v41, %v16652_v11  ;;  %v3933_v55 = vmul.f32 %v3884_v30, %v16653_v59  ;;  %v3934_v7 = vmul.f32 %v3885_v1, %v16654_v52  ;;  %v16670_v41 = vld [vmem:[#allocation52_spill] sm:$0xff]  ;;  %v16671_v30 = vld [vmem:[#allocation75_spill] sm:$0xff] }
 0x51a   :  { %v4381_v3 = vsub.f32 %v13044_v46, %v4340_v6  ;;  %v4382_v44 = vsub.f32 %v13050_v20, %v4340_v6  ;;  %v4383_v12 = vsub.f32 %v4142_v39, %v4340_v6  ;;  %v4384_v54 = vsub.f32 %v4148_v21, %v4340_v6 }
 0x51b   :  { %v3974_v5 = vadd.f32 %v3932_v29, %v3931_v62  ;;  %v4385_v53 = vsub.f32 %v4154_v26, %v4340_v6  ;;  %v4442_v48 = vmul.f32 1.442695, %v4379_v43  ;;  %v4444_v31 = vmul.f32 1.442695, %v4380_v49  ;;  %v16672_v43 = vld [vmem:[#allocation94_spill] sm:$0xff] }
 0x51c   :  { %v4446_v45 = vmul.f32 1.442695, %v4381_v3  ;;  %v4448_v38 = vmul.f32 1.442695, %v4382_v44  ;;  %v2921_v10 = vmul.f32 %v2872_v50, %v16650_v61  ;;  %v3888_v4 = vperm.slane %v3839_v17, 0  ;;  %v16673_v49 = vld [vmem:[#allocation102_spill] sm:$0xff] }
 0x51d   :  { %v3975_v23 = vadd.f32 %v3974_v5, %v3933_v55  ;;  %9908 = vpow2.f32 %v4442_v48  ;;  %v4450_v25 = vmul.f32 1.442695, %v4383_v12  ;;  %v3935_v40 = vmul.f32 %v3886_v19, %v16655_v16 }
 0x51e   :  { %9910 = vpow2.f32 %v4444_v31  ;;  %v4452_v46 = vmul.f32 1.442695, %v4384_v54  ;;  %v4454_v20 = vmul.f32 1.442695, %v4385_v53  ;;  %v2963_v39 = vadd.f32 %v2962_v27, %v2921_v10 }
 0x51f   :  { %v3976_v14 = vadd.f32 %v3975_v23, %v3934_v7  ;;  %9912 = vpow2.f32 %v4446_v45  ;;  %v3936_v21 = vmul.f32 %v3887_v57, %v12899_v42  ;;  %v2922_v36 = vmul.f32 %v2873_v15, %v12973_v2  ;;  %v16674_v23 = vld [vmem:[#allocation107_spill] sm:$0xff] }
 0x520   :  { %9914 = vpow2.f32 %v4448_v38  ;;  %v3937_v34 = vmul.f32 %v3888_v4, %v12977_v63  ;;  %v1886_v1 = vadd.f32 %v16671_v30, %v16670_v41 }
 0x521   :  { %v3977_v26 = vadd.f32 %v3976_v14, %v3935_v40  ;;  %9916 = vpow2.f32 %v4450_v25  ;;  %v2964_v50 = vadd.f32 %v2963_v39, %v2922_v36  ;;  %v16675_v40 = vld [vmem:[#allocation117_spill] sm:$0xff] }
 0x522   :  { %9918 = vpow2.f32 %v4452_v46  ;;  %v5009_v5 = vmul.f32 %v1886_v1, %v16672_v43  ;;  %v5010_v3 = vmul.f32 %v1886_v1, %v16673_v49  ;;  %v5011_v31 = vmul.f32 %v16674_v23, %v1886_v1 }
 0x523   :  { %v3978_v32 = vadd.f32 %v3977_v26, %v3936_v21  ;;  %v13083_v22 = vpop.eup %9908  ;;  %9920 = vpow2.f32 %v4454_v20  ;;  %v5012_v14 = vmul.f32 %v16675_v40, %v1886_v1 }
 0x524   :  { %v13085_v51 = vpop.eup %9910  ;;  %v5128_v4 = vrot.slane %v5009_v5, 4  ;;  %v5134_v25 = vrot.slane %v5010_v3, 4  ;;  %v5140_v20 = vrot.slane %v5011_v31, 4 }
 0x525   :  { %v3979_v27 = vadd.f32 %v3978_v32, %v3937_v34  ;;  %v13089_v6 = vpop.eup %9912  ;;  %v4585_v17 = vrot.slane %v13085_v51, 7  ;;  %v5146_v36 = vrot.slane %v5012_v14, 4 }
 0x526   :  { %v13092_v19 = vpop.eup %9914  ;;  %v4587_v62 = vrot.slane %v13089_v6, 6  ;;  %v5129_v21 = vadd.f32 %v5128_v4, %v5009_v5  ;;  %v5135_v26 = vadd.f32 %v5134_v25, %v5010_v3  ;;  %v5141_v32 = vadd.f32 %v5140_v20, %v5011_v31  ;;  %v16677_v5 = vld [vmem:[#allocation132_spill] sm:$0xff]  ;;  %v16678_v4 = vld [vmem:[#allocation74_spill] sm:$0xff] }
 0x527   :  { %v6050_v15 = vpack.c.bf16 %v3979_v27, %v2964_v50  ;;  %v13095_v29 = vpop.eup %9916  ;;  %v4586_v57 = vsel %vm2525_vm9, %v4585_v17, %v13083_v22  ;;  %v4589_v55 = vrot.slane %v13092_v19, 5  ;;  %v5147_v27 = vadd.f32 %v5146_v36, %v5012_v14 }
 0x528   :  { %v13100_v7 = vpop.eup %9918  ;;  %v4588_v44 = vsel %vm2528_vm10, %v4587_v62, %v4586_v57  ;;  %v4591_v12 = vrot.slane %v13095_v29, 4  ;;  %v5130_v41 = vrot.slane %v5129_v21, 2  ;;  %v5136_v50 = vrot.slane %v5135_v26, 2 }
 0x529   :  { %6302 = vmatpush.bf16.msrb.mxu0 %v6050_v15  ;;  %v13106_v54 = vpop.eup %9920  ;;  %v4590_v53 = vsel %vm2531_vm11, %v4589_v55, %v4588_v44  ;;  %v4593_v48 = vrot.slane %v13100_v7, 3  ;;  %v5142_v15 = vrot.slane %v5141_v32, 2  ;;  %v5148_v55 = vrot.slane %v5147_v27, 2  ;;  %v16676_v44 = vld [vmem:[#allocation125_spill] sm:$0xff] }
 0x52a   :  { %v4592_v45 = vsel %vm2534_vm12, %v4591_v12, %v4590_v53  ;;  %v4595_v38 = vrot.slane %v13106_v54, 2  ;;  %v5131_v62 = vadd.f32 %v5130_v41, %v5129_v21  ;;  %v5137_v57 = vadd.f32 %v5136_v50, %v5135_v26 }
 0x52b   :  { %v4594_v10 = vsel %vm2537_vm13, %v4593_v48, %v4592_v45  ;;  %v5013_v12 = vmul.f32 %v16676_v44, %v1886_v1  ;;  %v5143_v48 = vadd.f32 %v5142_v15, %v5141_v32  ;;  %v5014_v3 = vmul.f32 %v16677_v5, %v1886_v1 }
 0x52c   :  { %v4596_v46 = vsel %vm2540_vm14, %v4595_v38, %v4594_v10  ;;  %v5132_v45 = vrot.slane %v5131_v62, 1  ;;  %v5138_v38 = vrot.slane %v5137_v57, 1  ;;  %v5149_v10 = vadd.f32 %v5148_v55, %v5147_v27 }
 0x52d   :  { %v4666_v39 = vsel %vm2621_vm15, %v4596_v46, 0.0  ;;  %v5015_v25 = vmul.f32 %v16678_v4, %v1886_v1  ;;  %v5152_v31 = vrot.slane %v5013_v12, 4  ;;  %v5144_v20 = vrot.slane %v5143_v48, 1 }
 0x52e   :  { %v4667_v34 = vrot.slane %v4666_v39, 4  ;;  %v5133_v21 = vadd.f32 %v5132_v45, %v5131_v62  ;;  %v5139_v26 = vadd.f32 %v5138_v38, %v5137_v57 }
 0x52f   :  { %v5153_v14 = vadd.f32 %v5152_v31, %v5013_v12  ;;  %v5164_v36 = vrot.slane %v5015_v25, 4  ;;  %v5145_v15 = vadd.f32 %v5144_v20, %v5143_v48 }
 0x530   :  { %v4668_v17 = vadd.f32 %v4667_v34, %v4666_v39  ;;  %v5158_v39 = vrot.slane %v5014_v3, 4  ;;  %v5150_v34 = vrot.slane %v5149_v10, 1  ;;  %v5350_v52 = vmax.f32 %v5133_v21, %v5139_v26 }
 0x531   :  { %v5154_v41 = vrot.slane %v5153_v14, 2  ;;  %v5165_v63 = vadd.f32 %v5164_v36, %v5015_v25 }
 0x532   :  { %v4669_v53 = vrot.slane %v4668_v17, 2  ;;  %v5159_v50 = vadd.f32 %v5158_v39, %v5014_v3  ;;  %v5151_v55 = vadd.f32 %v5150_v34, %v5149_v10  ;;  %v5351_v12 = vmax.f32 %v5350_v52, %v5145_v15 }
 0x533   :  { %v5155_v42 = vadd.f32 %v5154_v41, %v5153_v14  ;;  %v5166_v16 = vrot.slane %v5165_v63, 2 }
 0x534   :  { %v4670_v46 = vadd.f32 %v4669_v53, %v4668_v17  ;;  %v5160_v27 = vrot.slane %v5159_v50, 2  ;;  %v5352_v57 = vmax.f32 %v5351_v12, %v5151_v55 }
 0x535   :  { %v5156_v1 = vrot.slane %v5155_v42, 1  ;;  %v5167_v53 = vadd.f32 %v5166_v16, %v5165_v63 }
 0x536   :  { %v4671_v32 = vrot.slane %v4670_v46, 1  ;;  %v5161_v59 = vadd.f32 %v5160_v27, %v5159_v50 }
 0x537   :  { %v5157_v31 = vadd.f32 %v5156_v1, %v5155_v42  ;;  %v5168_v62 = vrot.slane %v5167_v53, 1 }
 0x538   :  { %v4672_v17 = vadd.f32 %v4671_v32, %v4670_v46  ;;  %v5162_v11 = vrot.slane %v5161_v59, 1 }
 0x539   :  { %v5169_v3 = vadd.f32 %v5168_v62, %v5167_v53  ;;  %v5353_v25 = vmax.f32 %v5352_v57, %v5157_v31 }
 0x53a   :  { %v5163_v45 = vadd.f32 %v5162_v11, %v5161_v59  ;;  %v4703_v38 = vperm.slane %v4672_v17, 0 }
 0x53c   :  { %v5354_v39 = vmax.f32 %v5353_v25, %v5163_v45  ;;  %9922 = vrcp.f32 %v4703_v38  ;;  %vm4755_vm1 = vweird.f32 %v4703_v38 }
 0x53e   :  { %v5355_v48 = vmax.f32 %v5354_v39, %v5169_v3 }
 0x540   :  { %v5394_v20 = vsub.f32 %v5133_v21, %v5355_v48  ;;  %v5395_v10 = vsub.f32 %v5139_v26, %v5355_v48  ;;  %v5396_v14 = vsub.f32 %v5145_v15, %v5355_v48  ;;  %v5397_v36 = vsub.f32 %v5151_v55, %v5355_v48 }
 0x541   :  { %v5398_v34 = vsub.f32 %v5157_v31, %v5355_v48  ;;  %v5399_v46 = vsub.f32 %v5163_v45, %v5355_v48  ;;  %v5400_v16 = vsub.f32 %v5169_v3, %v5355_v48 }
 0x542   :  { %v9923_v41 = vpop.eup %9922  ;;  %v5457_v52 = vmul.f32 1.442695, %v5394_v20  ;;  %v5459_v42 = vmul.f32 1.442695, %v5395_v10  ;;  %v5461_v63 = vmul.f32 1.442695, %v5396_v14 }
 0x543   :  { %v5463_v50 = vmul.f32 1.442695, %v5397_v36  ;;  %v5465_v11 = vmul.f32 1.442695, %v5398_v34  ;;  %v4751_v59 = vmul.f32 %v9923_v41, %v4703_v38  ;;  %v5467_v32 = vmul.f32 1.442695, %v5399_v46 }
 0x544   :  { %9924 = vpow2.f32 %v5457_v52  ;;  %v5469_v27 = vmul.f32 1.442695, %v5400_v16  ;;  %vm4756_vm0 = vweird.f32 %v9923_v41  ;;  %v4761_v34 = vand.u32 2147483648, %v4703_v38 }
 0x545   :  { %9926 = vpow2.f32 %v5459_v42  ;;  %v4752_v21 = vsub.f32 1.0, %v4751_v59  ;;  %v4759_v16 = vand.u32 2147483647, %v4703_v38  ;;  %v16679_v42 = vld [vmem:[#allocation68_spill] sm:$0xff]  ;;  %vm4757_vm2 = vmor %vm4755_vm1, %vm4756_vm0 }
 0x546   :  { %9928 = vpow2.f32 %v5461_v63  ;;  %v1921_v63 = vadd.f32 %v16662_v24, %v16679_v42  ;;  %v16680_v42 = vld [vmem:[#allocation105_spill] sm:$0xff] }
 0x547   :  { %9930 = vpow2.f32 %v5463_v50  ;;  %v4753_v53 = vmul.f32 %v9923_v41, %v4752_v21  ;;  %vm4760_vm3 = vcmp.eq.f32.partialorder %v4759_v16, 8.507059e+37 }
 0x548   :  { %9932 = vpow2.f32 %v5465_v11  ;;  %v4015_v21 = vmul.f32 %v1921_v63, %v16663_v8 }
 0x549   :  { %9934 = vpow2.f32 %v5467_v32  ;;  %v4754_v10 = vadd.f32 %v9923_v41, %v4753_v53  ;;  %v4762_v32 = vor.u32 1.1754944e-38, %v4761_v34 }
 0x54a   :  { %v13120_v26 = vpop.eup %9924  ;;  %9936 = vpow2.f32 %v5469_v27 }
 0x54b   :  { %v13122_v15 = vpop.eup %9926  ;;  %v4758_v11 = vsel %vm4757_vm2, %v9923_v41, %v4754_v10 }
 0x54c   :  { %v13124_v55 = vpop.eup %9928  ;;  %v5600_v1 = vrot.slane %v13122_v15, 7  ;;  %v13152_v53 = vsel %vm4760_vm3, %v4762_v32, %v4758_v11  ;;  %v16681_v32 = vld [vmem:[#allocation124_spill] sm:$0xff] }
 0x54d   :  { %v13127_v17 = vpop.eup %9930  ;;  %v5602_v12 = vrot.slane %v13124_v55, 6 }
 0x54e   :  { %v13130_v31 = vpop.eup %9932  ;;  %v5601_v62 = vsel %vm2525_vm9, %v5600_v1, %v13120_v26  ;;  %v5604_v57 = vrot.slane %v13127_v17, 5  ;;  %v4016_v1 = vmul.f32 %v1921_v63, %v16664_v0 }
 0x54f   :  { %v13135_v45 = vpop.eup %9934  ;;  %v5603_v3 = vsel %vm2528_vm10, %v5602_v12, %v5601_v62  ;;  %v5606_v25 = vrot.slane %v13130_v31, 4  ;;  %v4764_v12 = vmul.f32 %v13083_v22, %v13152_v53  ;;  %v4765_v62 = vmul.f32 %v13085_v51, %v13152_v53 }
 0x550   :  { %v13139_v39 = vpop.eup %9936  ;;  %v5605_v48 = vsel %vm2531_vm11, %v5604_v57, %v5603_v3  ;;  %v5608_v20 = vrot.slane %v13135_v45, 3  ;;  %v4239_v3 = vrot.slane %v4015_v21, 4  ;;  %v4245_v41 = vrot.slane %v4016_v1, 4 }
 0x551   :  { %v5607_v14 = vsel %vm2534_vm12, %v5606_v25, %v5605_v48  ;;  %v5610_v36 = vrot.slane %v13139_v39, 2  ;;  %v4017_v25 = vmul.f32 %v1921_v63, %v16665_v9  ;;  %v4870_v10 = vperm.slane %v4765_v62, 0 }
 0x552   :  { %v5609_v46 = vsel %vm2537_vm13, %v5608_v20, %v5607_v14  ;;  %v4869_v20 = vperm.slane %v4764_v12, 0  ;;  %v4246_v34 = vadd.f32 %v4245_v41, %v4016_v1  ;;  %v4766_v22 = vmul.f32 %v13089_v6, %v13152_v53 }
 0x553   :  { %v5611_v52 = vsel %vm2540_vm14, %v5610_v36, %v5609_v46  ;;  %v4240_v36 = vadd.f32 %v4239_v3, %v4015_v21  ;;  %v4018_v46 = vmul.f32 %v1921_v63, %v16666_v37  ;;  %v4251_v16 = vrot.slane %v4017_v25, 4 }
 0x554   :  { %v5681_v50 = vsel %vm2621_vm15, %v5611_v52, 0.0  ;;  %v4918_v51 = vmul.f32 %v4869_v20, %v16597_v47  ;;  %v4767_v21 = vmul.f32 %v13092_v19, %v13152_v53  ;;  %v13169_v1 = vmul.f32 %v13095_v29, %v13152_v53 }
 0x555   :  { %v5682_v59 = vrot.slane %v5681_v50, 4  ;;  %v4241_v11 = vrot.slane %v4240_v36, 2  ;;  %v4257_v12 = vrot.slane %v4018_v46, 4  ;;  %v13173_v6 = vmul.f32 %v13100_v7, %v13152_v53 }
 0x556   :  { %v4871_v62 = vperm.slane %v4766_v22, 0  ;;  %v4020_v3 = vmul.f32 %v16668_v56, %v1921_v63  ;;  %v4021_v41 = vmul.f32 %v16669_v33, %v1921_v63 }
 0x557   :  { %v5683_v27 = vadd.f32 %v5682_v59, %v5681_v50  ;;  %v4919_v50 = vmul.f32 %v4870_v10, %v16680_v42  ;;  %v4247_v59 = vrot.slane %v4246_v34, 2  ;;  %v4258_v19 = vadd.f32 %v4257_v12, %v4018_v46 }
 0x558   :  { %v4269_v22 = vrot.slane %v4020_v3, 4 }
 0x559   :  { %v5684_v38 = vrot.slane %v5683_v27, 2  ;;  %v4259_v7 = vrot.slane %v4258_v19, 2 }
 0x55b   :  { %v5685_v57 = vadd.f32 %v5684_v38, %v5683_v27  ;;  %v4019_v27 = vmul.f32 %v1921_v63, %v16681_v32  ;;  %v4252_v38 = vadd.f32 %v4251_v16, %v4017_v25  ;;  %v4248_v25 = vadd.f32 %v4247_v59, %v4246_v34 }
 0x55c   :  { %v4275_v63 = vrot.slane %v4021_v41, 4  ;;  %v4260_v34 = vadd.f32 %v4259_v7, %v4258_v19  ;;  %v4270_v59 = vadd.f32 %v4269_v22, %v4020_v3 }
 0x55d   :  { %v5686_v48 = vrot.slane %v5685_v57, 1  ;;  %v4263_v16 = vrot.slane %v4019_v27, 4  ;;  %v4249_v61 = vrot.slane %v4248_v25, 1 }
 0x55e   :  { %v4276_v12 = vadd.f32 %v4275_v63, %v4021_v41 }
 0x55f   :  { %v5687_v14 = vadd.f32 %v5686_v48, %v5685_v57  ;;  %v4965_v57 = vadd.f32 %v4919_v50, %v4918_v51  ;;  %v4242_v48 = vadd.f32 %v4241_v11, %v4240_v36  ;;  %v4264_v58 = vadd.f32 %v4263_v16, %v4019_v27 }
 0x560   :  { %v13179_v56 = vadd.f32 %v4249_v61, %v4248_v25  ;;  %v4261_v27 = vrot.slane %v4260_v34, 1  ;;  %v4872_v25 = vperm.slane %v4767_v21, 0 }
 0x561   :  { %v5718_v52 = vperm.slane %v5687_v14, 0  ;;  %v4253_v14 = vrot.slane %v4252_v38, 2  ;;  %v4243_v2 = vrot.slane %v4242_v48, 1  ;;  %v4265_v11 = vrot.slane %v4264_v58, 2 }
 0x562   :  { %v4262_v41 = vadd.f32 %v4261_v27, %v4260_v34 }
 0x563   :  { %9938 = vrcp.f32 %v5718_v52  ;;  %v5774_v10 = vand.u32 2147483647, %v5718_v52  ;;  %v5776_v29 = vand.u32 2147483648, %v5718_v52  ;;  %v4254_v18 = vadd.f32 %v4253_v14, %v4252_v38  ;;  %v16682_v38 = vld [vmem:[#allocation113_spill] sm:$0xff] }
 0x564   :  { %v13177_v50 = vadd.f32 %v4243_v2, %v4242_v48  ;;  %v4920_v14 = vmul.f32 %v4871_v62, %v16682_v38  ;;  %v4266_v16 = vadd.f32 %v4265_v11, %v4264_v58  ;;  %vm5770_vm5 = vweird.f32 %v5718_v52 }
 0x565   :  { %v4255_v36 = vrot.slane %v4254_v18, 1  ;;  %v4277_v48 = vrot.slane %v4276_v12, 2  ;;  %v5777_v3 = vor.u32 1.1754944e-38, %v5776_v29  ;;  %vm5775_vm7 = vcmp.eq.f32.partialorder %v5774_v10, 8.507059e+37  ;;  %v16683_v10 = vld [vmem:[#allocation55_spill] sm:$0xff] }
 0x566   :  { %v4353_v33 = vmax.f32 %v13177_v50, %v13179_v56  ;;  %v4966_v19 = vadd.f32 %v4965_v57, %v4920_v14  ;;  %v4267_v62 = vrot.slane %v4266_v16, 1  ;;  %v4770_v57 = vmul.f32 %v13106_v54, %v13152_v53 }
 0x567   :  { %v13184_v61 = vadd.f32 %v4255_v36, %v4254_v18  ;;  %v4278_v58 = vadd.f32 %v4277_v48, %v4276_v12  ;;  %v4921_v29 = vmul.f32 %v4872_v25, %v16683_v10 }
 0x568   :  { %v4268_v12 = vadd.f32 %v4267_v62, %v4266_v16 }
 0x569   :  { %v9939_v20 = vpop.eup %9938 }
 0x56a   :  { %v5766_v28 = vmul.f32 %v9939_v20, %v5718_v52  ;;  %vm5771_vm4 = vweird.f32 %v9939_v20 }
 0x56b   :  { %vm5772_vm6 = vmor %vm5770_vm5, %vm5771_vm4 }
 0x56c   :  { %v5767_v51 = vsub.f32 1.0, %v5766_v28  ;;  %v4271_v28 = vrot.slane %v4270_v59, 2 }
 0x56e   :  { %v5768_v46 = vmul.f32 %v9939_v20, %v5767_v51  ;;  %v4272_v7 = vadd.f32 %v4271_v28, %v4270_v59  ;;  %v4354_v51 = vmax.f32 %v4353_v33, %v13184_v61  ;;  %v16685_v28 = vld [vmem:[#allocation106_spill] sm:$0xff] }
 0x570   :  { %v5769_v2 = vadd.f32 %v9939_v20, %v5768_v46  ;;  %v4273_v60 = vrot.slane %v4272_v7, 1  ;;  %v4355_v46 = vmax.f32 %v4354_v51, %v4262_v41 }
 0x572   :  { %v5773_v22 = vsel %vm5772_vm6, %v9939_v20, %v5769_v2  ;;  %v4873_v20 = vperm.slane %v13169_v1, 0  ;;  %v4274_v53 = vadd.f32 %v4273_v60, %v4272_v7  ;;  %v4874_v1 = vperm.slane %v13173_v6, 0  ;;  %v16686_v2 = vld [vmem:[#allocation62_spill] sm:$0xff]  ;;  %v16689_v60 = vld [vmem:[#allocation109_spill] sm:$0xff] }
 0x573   :  { %v5778_v63 = vsel %vm5775_vm7, %v5777_v3, %v5773_v22  ;;  %v16687_v3 = vld [vmem:[#allocation116_spill] sm:$0xff] }
 0x574   :  { %v5779_v11 = vmul.f32 %v13120_v26, %v5778_v63  ;;  %v5780_v18 = vmul.f32 %v13122_v15, %v5778_v63  ;;  %v5781_v52 = vmul.f32 %v13124_v55, %v5778_v63  ;;  %v5782_v21 = vmul.f32 %v13127_v17, %v5778_v63  ;;  %v16684_v17 = vld [vmem:[#allocation100_spill] sm:$0xff] }
 0x575   :  { %v5783_v33 = vmul.f32 %v13130_v31, %v5778_v63  ;;  %v4967_v26 = vadd.f32 %v4966_v19, %v4921_v29  ;;  %v5784_v15 = vmul.f32 %v13135_v45, %v5778_v63  ;;  %v4279_v55 = vrot.slane %v4278_v58, 1 }
 0x576   :  { %v5884_v36 = vperm.slane %v5779_v11, 0  ;;  %v5885_v34 = vperm.slane %v5780_v18, 0  ;;  %v5886_v59 = vperm.slane %v5781_v52, 0  ;;  %v5887_v14 = vperm.slane %v5782_v21, 0  ;;  %v16688_v11 = vld [vmem:[#allocation56_spill] sm:$0xff] }
 0x577   :  { %v4922_v48 = vmul.f32 %v4873_v20, %v16686_v2  ;;  %v5785_v31 = vmul.f32 %v13139_v39, %v5778_v63  ;;  %v5888_v25 = vperm.slane %v5783_v33, 0  ;;  %v4280_v51 = vadd.f32 %v4279_v55, %v4278_v58  ;;  %v16691_v33 = vld [vmem:[#allocation142_spill] sm:$0xff] }
 0x578   :  { %v5933_v27 = vmul.f32 %v5884_v36, %v16684_v17  ;;  %v5934_v54 = vmul.f32 %v5885_v34, %v16685_v28  ;;  %v5935_v22 = vmul.f32 %v5886_v59, %v16687_v3  ;;  %v4356_v45 = vmax.f32 %v4355_v46, %v4268_v12  ;;  %v16690_v36 = vld [vmem:[#allocation63_spill] sm:$0xff] }
 0x579   :  { %v4968_v16 = vadd.f32 %v4967_v26, %v4922_v48  ;;  %v5889_v62 = vperm.slane %v5784_v15, 0  ;;  %v5936_v18 = vmul.f32 %v5887_v14, %v16688_v11  ;;  %v4875_v29 = vperm.slane %v4770_v57, 0  ;;  %v16692_v15 = vld [vmem:[#allocation119_spill] sm:$0xff] }
 0x57a   :  { %v5980_v19 = vadd.f32 %v5934_v54, %v5933_v27  ;;  %v4357_v21 = vmax.f32 %v4356_v45, %v4274_v53  ;;  %v4923_v7 = vmul.f32 %v4874_v1, %v16689_v60  ;;  %v5890_v6 = vperm.slane %v5785_v31, 0  ;;  %v16693_v57 = vld [vmem:[#allocation131_spill] sm:$0xff] }
 0x57b   :  { %v5937_v20 = vmul.f32 %v5888_v25, %v16690_v36  ;;  %v5938_v59 = vmul.f32 %v5889_v62, %v16691_v33  ;;  %v4924_v55 = vmul.f32 %v4875_v29, %v16692_v15 }
 0x57c   :  { %v5981_v52 = vadd.f32 %v5980_v19, %v5935_v22  ;;  %v4358_v39 = vmax.f32 %v4357_v21, %v4280_v51  ;;  %v4969_v63 = vadd.f32 %v4968_v16, %v4923_v7  ;;  %v5939_v14 = vmul.f32 %v5890_v6, %v16693_v57 }
 0x57e   :  { %v5982_v34 = vadd.f32 %v5981_v52, %v5936_v18  ;;  %v4400_v58 = vsub.f32 %v13177_v50, %v4358_v39  ;;  %v4401_v46 = vsub.f32 %v13179_v56, %v4358_v39  ;;  %v4402_v26 = vsub.f32 %v13184_v61, %v4358_v39 }
 0x57f   :  { %v4403_v54 = vsub.f32 %v4262_v41, %v4358_v39  ;;  %v4404_v1 = vsub.f32 %v4268_v12, %v4358_v39  ;;  %v4405_v19 = vsub.f32 %v4274_v53, %v4358_v39  ;;  %v4970_v16 = vadd.f32 %v4969_v63, %v4924_v55  ;;  %v16696_v63 = vld [vmem:[#allocation69_spill] sm:$0xff] }
 0x580   :  { %v5983_v27 = vadd.f32 %v5982_v34, %v5937_v20  ;;  %v4484_v31 = vmul.f32 1.442695, %v4400_v58  ;;  %v4486_v25 = vmul.f32 1.442695, %v4401_v46  ;;  %v4488_v22 = vmul.f32 1.442695, %v4402_v26 }
 0x581   :  { %v4490_v45 = vmul.f32 1.442695, %v4403_v54  ;;  %v4492_v50 = vmul.f32 1.442695, %v4404_v1  ;;  %v4406_v18 = vsub.f32 %v4280_v51, %v4358_v39  ;;  %v4494_v61 = vmul.f32 1.442695, %v4405_v19 }
 0x582   :  { %v5984_v48 = vadd.f32 %v5983_v27, %v5938_v59  ;;  %9940 = vpow2.f32 %v4484_v31  ;;  %v16695_v39 = vld [vmem:[#allocation70_spill] sm:$0xff] }
 0x583   :  { %9942 = vpow2.f32 %v4486_v25  ;;  %v4496_v12 = vmul.f32 1.442695, %v4406_v18  ;;  %v1747_v59 = vadd.f32 %v16696_v63, %v16695_v39  ;;  %v16699_v18 = vld [vmem:[#allocation45_spill] sm:$0xff] }
 0x584   :  { %v5985_v62 = vadd.f32 %v5984_v48, %v5939_v14  ;;  %9944 = vpow2.f32 %v4488_v22 }
 0x585   :  { %9946 = vpow2.f32 %v4490_v45  ;;  %v1922_v14 = vadd.f32 %v16671_v30, %v1747_v59 }
 0x586   :  { %v6043_v56 = vpack.c.bf16 %v5985_v62, %v4970_v16  ;;  %9948 = vpow2.f32 %v4492_v50 }
 0x587   :  { %9950 = vpow2.f32 %v4494_v61  ;;  %v5030_v31 = vmul.f32 %v1922_v14, %v16672_v43  ;;  %v5031_v25 = vmul.f32 %v1922_v14, %v16673_v49  ;;  %v5032_v16 = vmul.f32 %v1922_v14, %v16674_v23  ;;  %v16700_v61 = vld [vmem:[#allocation78_spill] sm:$0xff] }
 0x588   :  { %6222 = vmatpush.bf16.msrb.mxu3 %v6043_v56  ;;  %v13212_v41 = vpop.eup %9940  ;;  %9952 = vpow2.f32 %v4496_v12  ;;  %v13248_v12 = vadd.f32 %v16700_v61, %v16699_v18  ;;  %v5035_v39 = vmul.f32 %v16677_v5, %v1922_v14  ;;  %v5036_v63 = vmul.f32 %v16678_v4, %v1922_v14 }
 0x589   :  { %v13214_v52 = vpop.eup %9942  ;;  %v5254_v19 = vrot.slane %v5030_v31, 4  ;;  %v5260_v62 = vrot.slane %v5031_v25, 4 }
 0x58a   :  { %v13216_v53 = vpop.eup %9944  ;;  %v4621_v21 = vrot.slane %v13214_v52, 7  ;;  %16701 = vst [vmem:[#allocation141_spill] sm:$0xff] %v13248_v12  ;;  %v5290_v18 = vrot.slane %v5036_v63, 4 }
 0x58b   :  { %v13219_v29 = vpop.eup %9946  ;;  %v4623_v7 = vrot.slane %v13216_v53, 6  ;;  %v5255_v56 = vadd.f32 %v5254_v19, %v5030_v31  ;;  %v5284_v19 = vrot.slane %v5035_v39, 4 }
 0x58c   :  { %v13222_v51 = vpop.eup %9948  ;;  %v4622_v6 = vsel %vm2525_vm9, %v4621_v21, %v13212_v41  ;;  %v4625_v20 = vrot.slane %v13219_v29, 5  ;;  %v5261_v21 = vadd.f32 %v5260_v62, %v5031_v25  ;;  %v5291_v15 = vadd.f32 %v5290_v18, %v5036_v63 }
 0x58d   :  { %16694 = vst [vmem:[#allocation98_spill] sm:$0xff] %v13222_v51  ;;  %v4624_v34 = vsel %vm2528_vm10, %v4623_v7, %v4622_v6  ;;  %v13231_v58 = vpop.eup %9950  ;;  %v4627_v46 = vrot.slane %v13222_v51, 4  ;;  %v5266_v7 = vrot.slane %v5032_v16, 4  ;;  %v5033_v6 = vmul.f32 %v1922_v14, %v16675_v40 }
 0x58e   :  { %v4626_v27 = vsel %vm2531_vm11, %v4625_v20, %v4624_v34  ;;  %16697 = vst [vmem:[#allocation108_spill] sm:$0xff] %v13231_v58  ;;  %v13235_v55 = vpop.eup %9952  ;;  %v4629_v54 = vrot.slane %v13231_v58, 3  ;;  %v5034_v34 = vmul.f32 %v1922_v14, %v16676_v44  ;;  %v5256_v59 = vrot.slane %v5255_v56, 2  ;;  %v16706_v44 = vld [vmem:[#allocation77_spill] sm:$0xff] }
 0x58f   :  { %v4628_v26 = vsel %vm2534_vm12, %v4627_v46, %v4626_v27  ;;  %16698 = vst [vmem:[#allocation140_spill] sm:$0xff] %v13235_v55  ;;  %v4631_v48 = vrot.slane %v13235_v55, 2  ;;  %v16702_v27 = vld [vmem:[#allocation82_spill] sm:$0xff]  ;;  %v5272_v25 = vrot.slane %v5033_v6, 4  ;;  %v5285_v13 = vadd.f32 %v5284_v19, %v5035_v39 }
 0x590   :  { %v4630_v1 = vsel %vm2537_vm13, %v4629_v54, %v4628_v26  ;;  %v1950_v46 = vmul.f32 %v13248_v12, %v16702_v27  ;;  %v16703_v26 = vld [vmem:[#allocation47_spill] sm:$0xff]  ;;  %v5257_v31 = vadd.f32 %v5256_v59, %v5255_v56  ;;  %v13262_v32 = vadd.f32 %v16706_v44, %v16705_v35  ;;  %v16708_v56 = vld [vmem:[#allocation48_spill] sm:$0xff] }
 0x591   :  { %v4632_v22 = vsel %vm2540_vm14, %v4631_v48, %v4630_v1  ;;  %v13258_v54 = vadd.f32 %v16662_v24, %v16703_v26  ;;  %v5262_v1 = vrot.slane %v5261_v21, 2  ;;  %v5267_v48 = vadd.f32 %v5266_v7, %v5032_v16  ;;  %v16710_v35 = vld [vmem:[#allocation84_spill] sm:$0xff] }
 0x592   :  { %v4687_v45 = vsel %vm2621_vm15, %v4632_v22, 0.0  ;;  %v5278_v22 = vrot.slane %v5034_v34, 4  ;;  %v5258_v5 = vrot.slane %v5257_v31, 1  ;;  %v5273_v14 = vadd.f32 %v5272_v25, %v5033_v6  ;;  %16707 = vst [vmem:[#allocation137_spill] sm:$0xff] %v13262_v32 }
 0x593   :  { %v4688_v50 = vrot.slane %v4687_v45, 4  ;;  %16704 = vst [vmem:[#allocation136_spill] sm:$0xff] %v13258_v54  ;;  %v5263_v62 = vadd.f32 %v5262_v1, %v5261_v21  ;;  %v3987_v16 = vmul.f32 %v13258_v54, %v16663_v8  ;;  %v13268_v7 = vadd.f32 %v16671_v30, %v16708_v56 }
 0x594   :  { %v5279_v4 = vadd.f32 %v5278_v22, %v5034_v34  ;;  %v13270_v21 = vadd.f32 %v5258_v5, %v5257_v31  ;;  %v5274_v59 = vrot.slane %v5273_v14, 2  ;;  %v5286_v1 = vrot.slane %v5285_v13, 2 }
 0x595   :  { %v4689_v20 = vadd.f32 %v4688_v50, %v4687_v45  ;;  %v5268_v50 = vrot.slane %v5267_v48, 2  ;;  %v5264_v26 = vrot.slane %v5263_v62, 1  ;;  %16709 = vst [vmem:[#allocation135_spill] sm:$0xff] %v13268_v7  ;;  %v1951_v25 = vmul.f32 %v16710_v35, %v13248_v12 }
 0x596   :  { %v5280_v39 = vrot.slane %v5279_v4, 2  ;;  %v5275_v63 = vadd.f32 %v5274_v59, %v5273_v14  ;;  %v5292_v22 = vrot.slane %v5291_v15, 2  ;;  %v5287_v18 = vadd.f32 %v5286_v1, %v5285_v13  ;;  %v16712_v13 = vld [vmem:[#allocation101_spill] sm:$0xff] }
 0x597   :  { %v4690_v45 = vrot.slane %v4689_v20, 2  ;;  %v5269_v57 = vadd.f32 %v5268_v50, %v5267_v48  ;;  %v13272_v6 = vadd.f32 %v5264_v26, %v5263_v62  ;;  %v2034_v5 = vrot.slane %v1950_v46, 4  ;;  %v16711_v62 = vld [vmem:[#allocation93_spill] sm:$0xff] }
 0x598   :  { %v5281_v50 = vadd.f32 %v5280_v39, %v5279_v4  ;;  %v5276_v31 = vrot.slane %v5275_v63, 1  ;;  %v5293_v33 = vadd.f32 %v5292_v22, %v5291_v15  ;;  %v2972_v26 = vmul.f32 %v13262_v32, %v16711_v62 }
 0x599   :  { %v5270_v34 = vrot.slane %v5269_v57, 1  ;;  %v4691_v48 = vadd.f32 %v4690_v45, %v4689_v20  ;;  %v5368_v56 = vmax.f32 %v13270_v21, %v13272_v6  ;;  %v5288_v11 = vrot.slane %v5287_v18, 1 }
 0x59a   :  { %v5282_v36 = vrot.slane %v5281_v50, 1  ;;  %v4071_v60 = vrot.slane %v3987_v16, 4  ;;  %v5002_v20 = vmul.f32 %v13268_v7, %v16672_v43  ;;  %v2040_v4 = vrot.slane %v1951_v25, 4 }
 0x59b   :  { %v5271_v19 = vadd.f32 %v5270_v34, %v5269_v57  ;;  %v4692_v45 = vrot.slane %v4691_v48, 1  ;;  %v5277_v57 = vadd.f32 %v5276_v31, %v5275_v63  ;;  %v2973_v14 = vmul.f32 %v16712_v13, %v13262_v32  ;;  %v16713_v34 = vld [vmem:[#allocation49_spill] sm:$0xff] }
 0x59c   :  { %v5294_v59 = vrot.slane %v5293_v33, 1  ;;  %v3988_v15 = vmul.f32 %v16664_v0, %v13258_v54  ;;  %v13288_v39 = vadd.f32 %v16700_v61, %v16713_v34  ;;  %v13290_v22 = vadd.f32 %v2034_v5, %v1950_v46 }
 0x59d   :  { %v5369_v3 = vmax.f32 %v5368_v56, %v5271_v19  ;;  %v5283_v56 = vadd.f32 %v5282_v36, %v5281_v50  ;;  %v5289_v28 = vadd.f32 %v5288_v11, %v5287_v18  ;;  %v3056_v17 = vrot.slane %v2972_v26, 4 }
 0x59e   :  { %16714 = vst [vmem:[#allocation138_spill] sm:$0xff] %v13290_v22  ;;  %v13292_v2 = vadd.f32 %v4071_v60, %v3987_v16  ;;  %v5086_v63 = vrot.slane %v5002_v20, 4  ;;  %v4693_v31 = vadd.f32 %v4692_v45, %v4691_v48  ;;  %v13294_v10 = vadd.f32 %v2040_v4, %v1951_v25  ;;  %v16718_v16 = vld [vmem:[#allocation50_spill] sm:$0xff] }
 0x59f   :  { %v5370_v1 = vmax.f32 %v5369_v3, %v5277_v57  ;;  %v3062_v55 = vrot.slane %v2973_v14, 4  ;;  %v5295_v58 = vadd.f32 %v5294_v59, %v5293_v33  ;;  %v4077_v51 = vrot.slane %v3988_v15, 4 }
 0x5a0   :  { %16715 = vst [vmem:[#allocation71_spill] sm:$0xff] %v13292_v2  ;;  %v1957_v34 = vmul.f32 %v13288_v39, %v16702_v27  ;;  %v1958_v3 = vmul.f32 %v13288_v39, %v16710_v35  ;;  %v13301_v46 = vadd.f32 %v3056_v17, %v2972_v26  ;;  %v13306_v25 = vadd.f32 %v16706_v44, %v16718_v16 }
 0x5a1   :  { %16716 = vst [vmem:[#allocation143_spill] sm:$0xff] %v13294_v10  ;;  %v5371_v38 = vmax.f32 %v5370_v1, %v5283_v56  ;;  %v13308_v33 = vperm.slane %v4693_v31, 0  ;;  %v13310_v48 = vadd.f32 %v5086_v63, %v5002_v20  ;;  %v13313_v18 = vadd.f32 %v3062_v55, %v2973_v14 }
 0x5a2   :  { %16717 = vst [vmem:[#allocation126_spill] sm:$0xff] %v13301_v46  ;;  %v13315_v45 = vadd.f32 %v4077_v51, %v3988_v15  ;;  %v2076_v17 = vrot.slane %v1957_v34, 4  ;;  %v2082_v26 = vrot.slane %v1958_v3, 4  ;;  %v2979_v20 = vmul.f32 %v13306_v25, %v16711_v62 }
 0x5a3   :  { %v5372_v11 = vmax.f32 %v5371_v38, %v5289_v28  ;;  %16719 = vst [vmem:[#allocation133_spill] sm:$0xff] %v13310_v48  ;;  %v5003_v38 = vmul.f32 %v16673_v49, %v13268_v7  ;;  %9954 = vrcp.f32 %v13308_v33  ;;  %v2980_v16 = vmul.f32 %v13306_v25, %v16712_v13  ;;  %v16738_v48 = vld [vmem:[#allocation58_spill] sm:$0xff] }
 0x5a4   :  { %16720 = vst [vmem:[#allocation120_spill] sm:$0xff] %v13313_v18  ;;  %vm4818_vm1 = vweird.f32 %v13308_v33 }
 0x5a5   :  { %v5373_v5 = vmax.f32 %v5372_v11, %v5295_v58  ;;  %16721 = vst [vmem:[#allocation121_spill] sm:$0xff] %v13315_v45  ;;  %v5092_v36 = vrot.slane %v5003_v38, 4  ;;  %v13412_v45 = vmul.f32 %v16666_v37, %v13258_v54 }
 0x5a7   :  { %v5415_v4 = vsub.f32 %v13270_v21, %v5373_v5  ;;  %v5416_v59 = vsub.f32 %v13272_v6, %v5373_v5  ;;  %v5417_v1 = vsub.f32 %v5271_v19, %v5373_v5  ;;  %v5418_v31 = vsub.f32 %v5277_v57, %v5373_v5  ;;  %v16722_v21 = vld [vmem:[#allocation88_spill] sm:$0xff]  ;;  %16736 = vst [vmem:[#allocation70_spill] sm:$0xff] %v13412_v45 }
 0x5a8   :  { %v5419_v55 = vsub.f32 %v5283_v56, %v5373_v5  ;;  %v5420_v14 = vsub.f32 %v5289_v28, %v5373_v5  ;;  %v5421_v51 = vsub.f32 %v5295_v58, %v5373_v5  ;;  %v1952_v50 = vmul.f32 %v16722_v21, %v13248_v12 }
 0x5a9   :  { %v5499_v15 = vmul.f32 1.442695, %v5415_v4  ;;  %v5501_v63 = vmul.f32 1.442695, %v5416_v59  ;;  %v5503_v11 = vmul.f32 1.442695, %v5417_v1  ;;  %v1959_v6 = vmul.f32 %v16722_v21, %v13288_v39  ;;  %v13337_v60 = vpop.eup %9954 }
 0x5aa   :  { %v5505_v19 = vmul.f32 1.442695, %v5418_v31  ;;  %v5507_v56 = vmul.f32 1.442695, %v5419_v55  ;;  %v13331_v28 = vadd.f32 %v2076_v17, %v1957_v34  ;;  %v3989_v58 = vmul.f32 %v16665_v9, %v13258_v54  ;;  %v16724_v34 = vld [vmem:[#allocation110_spill] sm:$0xff]  ;;  %v16726_v55 = vld [vmem:[#allocation57_spill] sm:$0xff] }
 0x5ab   :  { %9956 = vpow2.f32 %v5499_v15  ;;  %v5509_v5 = vmul.f32 1.442695, %v5420_v14  ;;  %v13335_v4 = vadd.f32 %v2082_v26, %v1958_v3  ;;  %v3098_v59 = vrot.slane %v2979_v20, 4  ;;  %v16740_v54 = vld [vmem:[#allocation122_spill] sm:$0xff] }
 0x5ac   :  { %9958 = vpow2.f32 %v5501_v63  ;;  %v5511_v1 = vmul.f32 1.442695, %v5421_v51  ;;  %v3104_v31 = vrot.slane %v2980_v16, 4  ;;  %v2046_v18 = vrot.slane %v1952_v50, 4  ;;  %v16733_v63 = vld [vmem:[#allocation114_spill] sm:$0xff] }
 0x5ad   :  { %9960 = vpow2.f32 %v5503_v11  ;;  %v2088_v57 = vrot.slane %v1959_v6, 4  ;;  %v13339_v15 = vadd.f32 %v5092_v36, %v5003_v38  ;;  %v13343_v17 = vmul.f32 %v16724_v34, %v13262_v32 }
 0x5ae   :  { %9962 = vpow2.f32 %v5505_v19  ;;  %v13347_v14 = vadd.f32 %v16700_v61, %v16726_v55  ;;  %v13351_v3 = vmul.f32 %v16724_v34, %v13306_v25  ;;  %v4083_v26 = vrot.slane %v3989_v58, 4 }
 0x5af   :  { %16723 = vst [vmem:[#allocation127_spill] sm:$0xff] %v13339_v15  ;;  %9964 = vpow2.f32 %v5507_v56  ;;  %v13355_v51 = vmul.f32 %v16674_v23, %v13268_v7  ;;  %v13361_v11 = vadd.f32 %v3098_v59, %v2979_v20  ;;  %v13365_v56 = vadd.f32 %v3104_v31, %v2980_v16 }
 0x5b0   :  { %16725 = vst [vmem:[#allocation90_spill] sm:$0xff] %v13343_v17  ;;  %9966 = vpow2.f32 %v5509_v5  ;;  %v13367_v55 = vadd.f32 %v2046_v18, %v1952_v50  ;;  %v13369_v46 = vadd.f32 %v2088_v57, %v1959_v6  ;;  %v4814_v5 = vmul.f32 %v13337_v60, %v13308_v33 }
 0x5b1   :  { %16727 = vst [vmem:[#allocation91_spill] sm:$0xff] %v13347_v14  ;;  %v13357_v36 = vpop.eup %9956  ;;  %9968 = vpow2.f32 %v5511_v1  ;;  %v13378_v20 = vmul.f32 %v16733_v63, %v13248_v12  ;;  %v1971_v59 = vmul.f32 %v13347_v14, %v16702_v27  ;;  %v13386_v6 = vadd.f32 %v4083_v26, %v3989_v58 }
 0x5b2   :  { %16728 = vst [vmem:[#allocation97_spill] sm:$0xff] %v13351_v3  ;;  %v13363_v19 = vpop.eup %9958  ;;  %v1972_v38 = vmul.f32 %v13347_v14, %v16710_v35  ;;  %v1973_v17 = vmul.f32 %v13347_v14, %v16722_v21  ;;  %v1960_v58 = vmul.f32 %v16733_v63, %v13288_v39  ;;  %v4815_v26 = vsub.f32 1.0, %v4814_v5  ;;  %v16743_v21 = vld [vmem:[#allocation59_spill] sm:$0xff] }
 0x5b3   :  { %16729 = vst [vmem:[#allocation118_spill] sm:$0xff] %v13355_v51  ;;  %v13373_v10 = vpop.eup %9960  ;;  %v5636_v16 = vrot.slane %v13363_v19, 7  ;;  %v2160_v2 = vrot.slane %v1971_v59, 4  ;;  %v13416_v5 = vmul.f32 %v13347_v14, %v16733_v63  ;;  %vm4819_vm0 = vweird.f32 %v13337_v60 }
 0x5b4   :  { %16730 = vst [vmem:[#allocation80_spill] sm:$0xff] %v13361_v11  ;;  %v13383_v50 = vpop.eup %9962  ;;  %v5638_v1 = vrot.slane %v13373_v10, 6  ;;  %v2172_v3 = vrot.slane %v1973_v17, 4  ;;  %v13427_v11 = vmul.f32 %v16740_v54, %v13262_v32  ;;  %v4816_v63 = vmul.f32 %v13337_v60, %v4815_v26  ;;  %v16746_v26 = vld [vmem:[#allocation123_spill] sm:$0xff]  ;;  %vm4820_vm2 = vmor %vm4818_vm1, %vm4819_vm0 }
 0x5b5   :  { %16731 = vst [vmem:[#allocation92_spill] sm:$0xff] %v13365_v56  ;;  %v13390_v31 = vpop.eup %9964  ;;  %v5640_v22 = vrot.slane %v13383_v50, 5  ;;  %v2166_v56 = vrot.slane %v1972_v38, 4  ;;  %v13445_v32 = vmul.f32 %v16675_v40, %v13268_v7 }
 0x5b6   :  { %16732 = vst [vmem:[#allocation51_spill] sm:$0xff] %v13367_v55  ;;  %v5637_v55 = vsel %vm2525_vm9, %v5636_v16, %v13357_v36  ;;  %v13399_v18 = vpop.eup %9966 }
 0x5b7   :  { %16734 = vst [vmem:[#allocation52_spill] sm:$0xff] %v13378_v20  ;;  %v5639_v57 = vsel %vm2528_vm10, %v5638_v1, %v5637_v55  ;;  %v13405_v51 = vpop.eup %9968  ;;  %v5644_v16 = vrot.slane %v13399_v18, 3  ;;  %v13422_v20 = vadd.f32 %v16706_v44, %v16738_v48  ;;  %v13439_v48 = vadd.f32 %v16662_v24, %v16743_v21 }
 0x5b8   :  { %16735 = vst [vmem:[#allocation68_spill] sm:$0xff] %v13386_v6  ;;  %v5642_v6 = vrot.slane %v13390_v31, 4  ;;  %v5641_v15 = vsel %vm2531_vm11, %v5640_v22, %v5639_v57  ;;  %v5646_v1 = vrot.slane %v13405_v51, 2  ;;  %v2094_v57 = vrot.slane %v1960_v58, 4 }
 0x5b9   :  { %16737 = vst [vmem:[#allocation69_spill] sm:$0xff] %v13416_v5  ;;  %v2993_v21 = vmul.f32 %v13422_v20, %v16711_v62  ;;  %v4009_v7 = vmul.f32 %v13439_v48, %v16664_v0 }
 0x5ba   :  { %v5643_v55 = vsel %vm2534_vm12, %v5642_v6, %v5641_v15  ;;  %16739 = vst [vmem:[#allocation45_spill] sm:$0xff] %v13422_v20  ;;  %v13433_v15 = vmul.f32 %v16740_v54, %v13306_v25  ;;  %v13435_v6 = vadd.f32 %v2160_v2, %v1971_v59  ;;  %v13451_v2 = vadd.f32 %v2172_v3, %v1973_v17 }
 0x5bb   :  { %v5645_v22 = vsel %vm2537_vm13, %v5644_v16, %v5643_v55  ;;  %16741 = vst [vmem:[#allocation47_spill] sm:$0xff] %v13427_v11  ;;  %v13449_v11 = vadd.f32 %v2166_v56, %v1972_v38  ;;  %v4817_v55 = vadd.f32 %v13337_v60, %v4816_v63  ;;  %v13463_v38 = vmul.f32 %v13422_v20, %v16724_v34 }
 0x5bc   :  { %v5647_v14 = vsel %vm2540_vm14, %v5646_v1, %v5645_v22  ;;  %16742 = vst [vmem:[#allocation46_spill] sm:$0xff] %v13435_v6  ;;  %v1961_v1 = vmul.f32 %v16746_v26, %v13288_v39  ;;  %v4008_v17 = vmul.f32 %v13439_v48, %v16663_v8  ;;  %v4824_v3 = vand.u32 2147483648, %v13308_v33 }
 0x5bd   :  { %16744 = vst [vmem:[#allocation48_spill] sm:$0xff] %v13439_v48  ;;  %v5702_v16 = vsel %vm2621_vm15, %v5647_v14, 0.0  ;;  %v2994_v14 = vmul.f32 %v13422_v20, %v16712_v13  ;;  %v4822_v56 = vand.u32 2147483647, %v13308_v33  ;;  %v4821_v5 = vsel %vm4820_vm2, %v13337_v60, %v4817_v55 }
 0x5be   :  { %16745 = vst [vmem:[#allocation49_spill] sm:$0xff] %v13445_v32  ;;  %v5703_v22 = vrot.slane %v5702_v16, 4  ;;  %v2100_v63 = vrot.slane %v1961_v1, 4  ;;  %v2095_v45 = vadd.f32 %v2094_v57, %v1960_v58  ;;  %v4010_v32 = vmul.f32 %v13439_v48, %v16665_v9 }
 0x5bf   :  { %16747 = vst [vmem:[#allocation50_spill] sm:$0xff] %v13449_v11  ;;  %v3188_v8 = vrot.slane %v2994_v14, 4  ;;  %v2090_v11 = vrot.slane %v13369_v46, 2  ;;  %vm4823_vm3 = vcmp.eq.f32.partialorder %v4822_v56, 8.507059e+37  ;;  %v4203_v34 = vrot.slane %v4009_v7, 4 }
 0x5c0   :  { %16748 = vst [vmem:[#allocation57_spill] sm:$0xff] %v13451_v2  ;;  %v5704_v24 = vadd.f32 %v5703_v22, %v5702_v16  ;;  %v13473_v16 = vmul.f32 %v13422_v20, %v16740_v54  ;;  %v3182_v22 = vrot.slane %v2993_v21, 4  ;;  %v4825_v2 = vor.u32 1.1754944e-38, %v4824_v3 }
 0x5c1   :  { %16749 = vst [vmem:[#allocation58_spill] sm:$0xff] %v13463_v38  ;;  %v4197_v20 = vrot.slane %v4008_v17, 4  ;;  %v2101_v54 = vadd.f32 %v2100_v63, %v1961_v1  ;;  %v16751_v60 = vrot.slane %v13331_v28, 2  ;;  %v16752_v58 = vrot.slane %v13335_v4, 2 }
 0x5c2   :  { %v5705_v59 = vrot.slane %v5704_v24, 2  ;;  %16750 = vst [vmem:[#allocation59_spill] sm:$0xff] %v13473_v16  ;;  %v13482_v0 = vsel %vm4823_vm3, %v4825_v2, %v4821_v5  ;;  %v13492_v55 = vmul.f32 %v13439_v48, %v16666_v37  ;;  %v2096_v56 = vrot.slane %v2095_v45, 2 }
 0x5c3   :  { %v2085_v57 = vadd.f32 %v16752_v58, %v13335_v4  ;;  %v13498_v5 = vadd.f32 %v3182_v22, %v2993_v21  ;;  %v13500_v2 = vadd.f32 %v3188_v8, %v2994_v14  ;;  %v4209_v63 = vrot.slane %v4010_v32, 4 }
 0x5c4   :  { %v5706_v6 = vadd.f32 %v5705_v59, %v5704_v24  ;;  %v2079_v24 = vadd.f32 %v16751_v60, %v13331_v28  ;;  %16753 = vst [vmem:[#allocation144_spill] sm:$0xff] %v13492_v55  ;;  %v16754_v59 = vld [vmem:[#allocation60_spill] sm:$0xff]  ;;  %v2091_v28 = vadd.f32 %v2090_v11, %v13369_v46  ;;  %v4827_v4 = vmul.f32 %v13212_v41, %v13482_v0 }
 0x5c5   :  { %v13496_v3 = vadd.f32 %v16671_v30, %v16754_v59  ;;  %16756 = vst [vmem:[#allocation145_spill] sm:$0xff] %v13498_v5  ;;  %v4828_v60 = vmul.f32 %v13214_v52, %v13482_v0  ;;  %v2102_v33 = vrot.slane %v2101_v54, 2  ;;  %v13509_v59 = vadd.f32 %v4197_v20, %v4008_v17  ;;  %v16765_v30 = vld [vmem:[#allocation65_spill] sm:$0xff] }
 0x5c6   :  { %v5707_v16 = vrot.slane %v5706_v6, 1  ;;  %16757 = vst [vmem:[#allocation146_spill] sm:$0xff] %v13500_v2  ;;  %v2080_v21 = vrot.slane %v2079_v24, 1  ;;  %v2097_v41 = vadd.f32 %v2096_v56, %v2095_v45  ;;  %v13519_v11 = vadd.f32 %v4209_v63, %v4010_v32  ;;  %v16816_v2 = vld [vmem:[#allocation138_spill] sm:$0xff] }
 0x5c7   :  { %16755 = vst [vmem:[#allocation60_spill] sm:$0xff] %v13496_v3  ;;  %v13516_v46 = vmul.f32 %v13496_v3, %v16672_v43  ;;  %v13523_v52 = vmul.f32 %v13496_v3, %v16673_v49  ;;  %v2092_v20 = vrot.slane %v2091_v28, 1  ;;  %v13529_v14 = vmul.f32 %v13496_v3, %v16674_v23 }
 0x5c8   :  { %v5708_v1 = vadd.f32 %v5707_v16, %v5706_v6  ;;  %16758 = vst [vmem:[#allocation147_spill] sm:$0xff] %v13509_v59  ;;  %v13511_v6 = vadd.f32 %v4203_v34, %v4009_v7  ;;  %v2086_v16 = vrot.slane %v2085_v57, 1  ;;  %v16761_v7 = vld [vmem:[#allocation129_spill] sm:$0xff]  ;;  %v4890_v17 = vperm.slane %v4827_v4, 0 }
 0x5c9   :  { %16760 = vst [vmem:[#allocation149_spill] sm:$0xff] %v13519_v11  ;;  %v1962_v34 = vmul.f32 %v16761_v7, %v13288_v39  ;;  %v4891_v22 = vperm.slane %v4828_v60, 0  ;;  %v13533_v45 = vadd.f32 %v2080_v21, %v2079_v24  ;;  %v13539_v63 = vmul.f32 %v13496_v3, %v16675_v40 }
 0x5ca   :  { %v13507_v58 = vperm.slane %v5708_v1, 0  ;;  %16759 = vst [vmem:[#allocation148_spill] sm:$0xff] %v13511_v6  ;;  %v2103_v1 = vadd.f32 %v2102_v33, %v2101_v54  ;;  %v13535_v56 = vadd.f32 %v2086_v16, %v2085_v57  ;;  %v4829_v23 = vmul.f32 %v13216_v53, %v13482_v0  ;;  %v16764_v33 = vld [vmem:[#allocation81_spill] sm:$0xff] }
 0x5cb   :  { %16762 = vst [vmem:[#allocation150_spill] sm:$0xff] %v13529_v14  ;;  %v2098_v4 = vrot.slane %v2097_v41, 1  ;;  %v1963_v60 = vmul.f32 %v16764_v33, %v13288_v39  ;;  %v13547_v32 = vadd.f32 %v2092_v20, %v2091_v28  ;;  %v2106_v24 = vrot.slane %v1962_v34, 4 }
 0x5cc   :  { %9970 = vrcp.f32 %v13507_v58  ;;  %16763 = vst [vmem:[#allocation151_spill] sm:$0xff] %v13539_v63  ;;  %v4939_v16 = vmul.f32 %v4890_v17, %v16597_v47  ;;  %v4940_v8 = vmul.f32 %v4891_v22, %v16680_v42  ;;  %v2104_v43 = vrot.slane %v2103_v1, 1  ;;  %v16833_v63 = vld [vmem:[#allocation51_spill] sm:$0xff] }
 0x5cd   :  { %v2107_v53 = vadd.f32 %v2106_v24, %v1962_v34  ;;  %v2112_v49 = vrot.slane %v1963_v60, 4  ;;  %v2298_v54 = vmax.f32 %v13533_v45, %v13535_v56  ;;  %v13557_v39 = vadd.f32 %v16700_v61, %v16765_v30 }
 0x5ce   :  { %v4830_v28 = vmul.f32 %v13219_v29, %v13482_v0  ;;  %v4892_v20 = vperm.slane %v4829_v23, 0  ;;  %v13561_v21 = vadd.f32 %v2098_v4, %v2097_v41  ;;  %v4983_v34 = vadd.f32 %v4940_v8, %v4939_v16  ;;  %v16766_v23 = vld [vmem:[#allocation98_spill] sm:$0xff] }
 0x5cf   :  { %v2108_v22 = vrot.slane %v2107_v53, 2  ;;  %v2113_v37 = vadd.f32 %v2112_v49, %v1963_v60  ;;  %v2299_v9 = vmax.f32 %v2298_v54, %v13547_v32  ;;  %v5837_v24 = vand.u32 2147483647, %v13507_v58 }
 0x5d0   :  { %v5839_v42 = vand.u32 2147483648, %v13507_v58  ;;  %v13566_v47 = vadd.f32 %v2104_v43, %v2103_v1  ;;  %v4831_v29 = vmul.f32 %v16766_v23, %v13482_v0  ;;  %v4893_v41 = vperm.slane %v4830_v28, 0  ;;  %v16768_v43 = vld [vmem:[#allocation108_spill] sm:$0xff]  ;;  %v16770_v23 = vld [vmem:[#allocation55_spill] sm:$0xff] }
 0x5d1   :  { %v2109_v61 = vadd.f32 %v2108_v22, %v2107_v53  ;;  %v2114_v38 = vrot.slane %v2113_v37, 2  ;;  %v2300_v49 = vmax.f32 %v2299_v9, %v13561_v21  ;;  %vm5833_vm5 = vweird.f32 %v13507_v58  ;;  %v16769_v22 = vld [vmem:[#allocation140_spill] sm:$0xff] }
 0x5d2   :  { %v9971_v57 = vpop.eup %9970  ;;  %v4832_v1 = vmul.f32 %v16768_v43, %v13482_v0  ;;  %v5840_v53 = vor.u32 1.1754944e-38, %v5839_v42  ;;  %v13578_v28 = vmul.f32 %v16769_v22, %v13482_v0  ;;  %vm5838_vm7 = vcmp.eq.f32.partialorder %v5837_v24, 8.507059e+37  ;;  %v16776_v22 = vld [vmem:[#allocation109_spill] sm:$0xff] }
 0x5d3   :  { %v5829_v40 = vmul.f32 %v9971_v57, %v13507_v58  ;;  %vm5834_vm4 = vweird.f32 %v9971_v57  ;;  %v2110_v8 = vrot.slane %v2109_v61, 1  ;;  %v2115_v60 = vadd.f32 %v2114_v38, %v2113_v37 }
 0x5d4   :  { %vm5835_vm6 = vmor %vm5833_vm5, %vm5834_vm4  ;;  %v4942_v58 = vmul.f32 %v4893_v41, %v16770_v23  ;;  %v2048_v14 = vrot.slane %v16833_v63, 2 }
 0x5d5   :  { %v5830_v17 = vsub.f32 1.0, %v5829_v40  ;;  %v16767_v40 = vld [vmem:[#allocation113_spill] sm:$0xff]  ;;  %v2116_v9 = vrot.slane %v2115_v60, 1  ;;  %v2111_v37 = vadd.f32 %v2110_v8, %v2109_v61  ;;  %v16771_v61 = vrot.slane %v13516_v46, 4 }
 0x5d6   :  { %v4941_v4 = vmul.f32 %v4892_v20, %v16767_v40 }
 0x5d7   :  { %v5831_v30 = vmul.f32 %v9971_v57, %v5830_v17  ;;  %v2301_v17 = vmax.f32 %v2300_v49, %v13566_v47  ;;  %v4895_v49 = vperm.slane %v4832_v1, 0  ;;  %v16774_v1 = vld [vmem:[#allocation100_spill] sm:$0xff] }
 0x5d8   :  { %v4984_v16 = vadd.f32 %v4983_v34, %v4941_v4 }
 0x5d9   :  { %v5832_v54 = vadd.f32 %v9971_v57, %v5831_v30  ;;  %v4894_v30 = vperm.slane %v4831_v29, 0  ;;  %v2302_v8 = vmax.f32 %v2301_v17, %v2111_v37 }
 0x5da   :  { %v4985_v43 = vadd.f32 %v4984_v16, %v4942_v58  ;;  %v16775_v16 = vld [vmem:[#allocation106_spill] sm:$0xff] }
 0x5db   :  { %v5836_v20 = vsel %vm5835_vm6, %v9971_v57, %v5832_v54  ;;  %v2117_v57 = vadd.f32 %v2116_v9, %v2115_v60 }
 0x5dc   :  { %v5841_v40 = vsel %vm5838_vm7, %v5840_v53, %v5836_v20  ;;  %v4944_v20 = vmul.f32 %v4895_v49, %v16776_v22  ;;  %v16815_v22 = vld [vmem:[#allocation64_spill] sm:$0xff] }
 0x5dd   :  { %v5842_v38 = vmul.f32 %v13357_v36, %v5841_v40  ;;  %v5843_v34 = vmul.f32 %v13363_v19, %v5841_v40  ;;  %v5844_v42 = vmul.f32 %v13373_v10, %v5841_v40  ;;  %v5845_v4 = vmul.f32 %v13383_v50, %v5841_v40  ;;  %v16773_v19 = vld [vmem:[#allocation62_spill] sm:$0xff] }
 0x5de   :  { %v5846_v0 = vmul.f32 %v13390_v31, %v5841_v40  ;;  %v5847_v24 = vmul.f32 %v13399_v18, %v5841_v40  ;;  %v13590_v36 = vadd.f32 %v16771_v61, %v13516_v46  ;;  %v13594_v10 = vmul.f32 %v13557_v39, %v16702_v27 }
 0x5df   :  { %v5905_v29 = vperm.slane %v5842_v38, 0  ;;  %v5906_v54 = vperm.slane %v5843_v34, 0  ;;  %v5907_v41 = vperm.slane %v5844_v42, 0  ;;  %v4943_v50 = vmul.f32 %v4894_v30, %v16773_v19  ;;  %v16777_v42 = vld [vmem:[#allocation116_spill] sm:$0xff] }
 0x5e0   :  { %16772 = vst [vmem:[#allocation65_spill] sm:$0xff] %v13590_v36  ;;  %v4896_v31 = vperm.slane %v13578_v28, 0  ;;  %v5908_v60 = vperm.slane %v5845_v4, 0  ;;  %v5848_v46 = vmul.f32 %v13405_v51, %v5841_v40  ;;  %v2303_v58 = vmax.f32 %v2302_v8, %v2117_v57  ;;  %v16779_v8 = vld [vmem:[#allocation63_spill] sm:$0xff]  ;;  %v16834_v36 = vld [vmem:[#allocation70_spill] sm:$0xff] }
 0x5e1   :  { %v5954_v18 = vmul.f32 %v5905_v29, %v16774_v1  ;;  %v5955_v53 = vmul.f32 %v5906_v54, %v16775_v16  ;;  %v4986_v9 = vadd.f32 %v4985_v43, %v4943_v50  ;;  %v5909_v38 = vperm.slane %v5846_v0, 0  ;;  %v16778_v29 = vld [vmem:[#allocation56_spill] sm:$0xff] }
 0x5e2   :  { %v5910_v34 = vperm.slane %v5847_v24, 0  ;;  %v5956_v61 = vmul.f32 %v5907_v41, %v16777_v42  ;;  %v2342_v17 = vsub.f32 %v13533_v45, %v2303_v58  ;;  %v2343_v28 = vsub.f32 %v13535_v56, %v2303_v58  ;;  %v16810_v42 = vld [vmem:[#allocation128_spill] sm:$0xff] }
 0x5e3   :  { %v5998_v27 = vadd.f32 %v5955_v53, %v5954_v18  ;;  %v2344_v30 = vsub.f32 %v13547_v32, %v2303_v58  ;;  %v2345_v4 = vsub.f32 %v13561_v21, %v2303_v58  ;;  %v5957_v54 = vmul.f32 %v5908_v60, %v16778_v29  ;;  %v16780_v60 = vld [vmem:[#allocation142_spill] sm:$0xff] }
 0x5e4   :  { %v2346_v43 = vsub.f32 %v13566_v47, %v2303_v58  ;;  %v2347_v51 = vsub.f32 %v2111_v37, %v2303_v58  ;;  %v2348_v40 = vsub.f32 %v2117_v57, %v2303_v58  ;;  %v2405_v0 = vmul.f32 1.442695, %v2342_v17 }
 0x5e5   :  { %v5999_v49 = vadd.f32 %v5998_v27, %v5956_v61  ;;  %v2407_v24 = vmul.f32 1.442695, %v2343_v28  ;;  %v2409_v50 = vmul.f32 1.442695, %v2344_v30  ;;  %v5911_v41 = vperm.slane %v5848_v46, 0 }
 0x5e6   :  { %v5958_v18 = vmul.f32 %v5909_v38, %v16779_v8  ;;  %v2411_v53 = vmul.f32 1.442695, %v2345_v4  ;;  %v1979_v32 = vmul.f32 %v13557_v39, %v16710_v35  ;;  %v4987_v56 = vadd.f32 %v4986_v9, %v4944_v20  ;;  %v16784_v38 = vld [vmem:[#allocation119_spill] sm:$0xff] }
 0x5e7   :  { %v6000_v45 = vadd.f32 %v5999_v49, %v5957_v54  ;;  %9972 = vpow2.f32 %v2405_v0  ;;  %v2413_v21 = vmul.f32 1.442695, %v2346_v43  ;;  %v5959_v27 = vmul.f32 %v5910_v34, %v16780_v60  ;;  %v16785_v9 = vld [vmem:[#allocation131_spill] sm:$0xff]  ;;  %v16786_v34 = vld [vmem:[#allocation88_spill] sm:$0xff] }
 0x5e8   :  { %9974 = vpow2.f32 %v2407_v24  ;;  %v2415_v47 = vmul.f32 1.442695, %v2347_v51  ;;  %v16781_v37 = vrot.slane %v13523_v52, 4  ;;  %v13620_v46 = vmul.f32 %v16746_v26, %v13248_v12  ;;  %v16787_v43 = vld [vmem:[#allocation80_spill] sm:$0xff]  ;;  %v16791_v24 = vld [vmem:[#allocation114_spill] sm:$0xff] }
 0x5e9   :  { %v6001_v61 = vadd.f32 %v6000_v45, %v5958_v18  ;;  %9976 = vpow2.f32 %v2409_v50  ;;  %v2417_v58 = vmul.f32 1.442695, %v2348_v40  ;;  %v4945_v20 = vmul.f32 %v4896_v31, %v16784_v38  ;;  %v16789_v40 = vld [vmem:[#allocation91_spill] sm:$0xff] }
 0x5ea   :  { %v13616_v57 = vadd.f32 %v16781_v37, %v13523_v52  ;;  %16783 = vst [vmem:[#allocation108_spill] sm:$0xff] %v13620_v46  ;;  %v5960_v17 = vmul.f32 %v5911_v41, %v16785_v9  ;;  %9978 = vpow2.f32 %v2411_v53  ;;  %v1980_v30 = vmul.f32 %v13557_v39, %v16786_v34  ;;  %v16792_v41 = vld [vmem:[#allocation97_spill] sm:$0xff] }
 0x5eb   :  { %v6002_v28 = vadd.f32 %v6001_v61, %v5959_v27  ;;  %v2202_v4 = vrot.slane %v13594_v10, 4  ;;  %v2208_v54 = vrot.slane %v1979_v32, 4  ;;  %9980 = vpow2.f32 %v2413_v21  ;;  %v16796_v21 = vld [vmem:[#allocation124_spill] sm:$0xff]  ;;  %v16798_v61 = vld [vmem:[#allocation67_spill] sm:$0xff] }
 0x5ec   :  { %16782 = vst [vmem:[#allocation98_spill] sm:$0xff] %v13616_v57  ;;  %v4988_v52 = vadd.f32 %v4987_v56, %v4945_v20  ;;  %9982 = vpow2.f32 %v2415_v47  ;;  %v3100_v51 = vrot.slane %v16787_v43, 2  ;;  %v13632_v31 = vmul.f32 %v16746_v26, %v16789_v40  ;;  %v16795_v56 = vld [vmem:[#allocation136_spill] sm:$0xff]  ;;  %v16799_v47 = vld [vmem:[#allocation66_spill] sm:$0xff] }
 0x5ed   :  { %v6003_v49 = vadd.f32 %v6002_v28, %v5960_v17  ;;  %v13628_v0 = vpop.eup %9972  ;;  %v13636_v50 = vmul.f32 %v13557_v39, %v16791_v24  ;;  %9984 = vpow2.f32 %v2417_v58  ;;  %v16793_v18 = vrot.slane %v16792_v41, 4  ;;  %v16800_v17 = vld [vmem:[#allocation92_spill] sm:$0xff] }
 0x5ee   :  { %16788 = vst [vmem:[#allocation140_spill] sm:$0xff] %v13628_v0  ;;  %v13641_v53 = vpop.eup %9974  ;;  %v13645_v27 = vmul.f32 %v16796_v21, %v16795_v56  ;;  %v1742_v37 = vadd.f32 %v16799_v47, %v16798_v61  ;;  %v3106_v28 = vrot.slane %v16800_v17, 2  ;;  %v13654_v58 = vmul.f32 %v16796_v21, %v13439_v48  ;;  %v16818_v48 = vld [vmem:[#allocation143_spill] sm:$0xff]  ;;  %v16820_v56 = vld [vmem:[#allocation122_spill] sm:$0xff] }
 0x5ef   :  { %16790 = vst [vmem:[#allocation80_spill] sm:$0xff] %v13632_v31  ;;  %v3111_v45 = vadd.f32 %v16793_v18, %v16792_v41  ;;  %v6049_v20 = vpack.c.bf16 %v6003_v49, %v4988_v52  ;;  %v13650_v34 = vpop.eup %9976  ;;  %v13657_v41 = vadd.f32 %v2202_v4, %v13594_v10  ;;  %v2214_v18 = vrot.slane %v1980_v30, 4 }
 0x5f0   :  { %16794 = vst [vmem:[#allocation97_spill] sm:$0xff] %v13641_v53  ;;  %v2554_v24 = vrot.slane %v13641_v53, 7  ;;  %v13660_v35 = vpop.eup %9978  ;;  %v13664_v61 = vmul.f32 %v13557_v39, %v16746_v26  ;;  %v13666_v52 = vadd.f32 %v2208_v54, %v1979_v32  ;;  %v2556_v49 = vrot.slane %v13650_v34, 6 }
 0x5f1   :  { %16797 = vst [vmem:[#allocation152_spill] sm:$0xff] %v13645_v27  ;;  %6303 = vmatpush.bf16.msrb.mxu0 %v6049_v20  ;;  %v3101_v47 = vadd.f32 %v3100_v51, %v16787_v43  ;;  %v13670_v21 = vpop.eup %9980  ;;  %v2558_v9 = vrot.slane %v13660_v35, 5  ;;  %v3112_v60 = vrot.slane %v3111_v45, 2  ;;  %v13679_v32 = vadd.f32 %v16706_v44, %v1742_v37 }
 0x5f2   :  { %16801 = vst [vmem:[#allocation67_spill] sm:$0xff] %v13650_v34  ;;  %v2555_v4 = vsel %vm2525_vm9, %v2554_v24, %v13628_v0  ;;  %v13676_v8 = vpop.eup %9982  ;;  %v2560_v20 = vrot.slane %v13670_v21, 4  ;;  %v3107_v43 = vadd.f32 %v3106_v28, %v16800_v17  ;;  %v13687_v26 = vadd.f32 %v2214_v18, %v1980_v30  ;;  %v16807_v28 = vld [vmem:[#allocation121_spill] sm:$0xff]  ;;  %v16809_v30 = vld [vmem:[#allocation127_spill] sm:$0xff] }
 0x5f3   :  { %16802 = vst [vmem:[#allocation66_spill] sm:$0xff] %v13654_v58  ;;  %v2557_v54 = vsel %vm2528_vm10, %v2556_v49, %v2555_v4  ;;  %v13684_v51 = vpop.eup %9984  ;;  %v2562_v29 = vrot.slane %v13676_v8, 3  ;;  %v3102_v4 = vrot.slane %v3101_v47, 1  ;;  %v3113_v17 = vadd.f32 %v3112_v60, %v3111_v45  ;;  %v16811_v60 = vld [vmem:[#allocation71_spill] sm:$0xff] }
 0x5f4   :  { %16803 = vst [vmem:[#allocation92_spill] sm:$0xff] %v13660_v35  ;;  %v2559_v24 = vsel %vm2531_vm11, %v2558_v9, %v2557_v54  ;;  %v2564_v49 = vrot.slane %v13684_v51, 2  ;;  %v16808_v16 = vrot.slane %v16807_v28, 2  ;;  %v5094_v18 = vrot.slane %v16809_v30, 2  ;;  %v16831_v35 = vld [vmem:[#allocation68_spill] sm:$0xff] }
 0x5f5   :  { %16804 = vst [vmem:[#allocation153_spill] sm:$0xff] %v13670_v21  ;;  %v2561_v37 = vsel %vm2534_vm12, %v2560_v20, %v2559_v24  ;;  %v3000_v9 = vmul.f32 %v13679_v32, %v16711_v62  ;;  %v2983_v20 = vmul.f32 %v16810_v42, %v13306_v25  ;;  %v3108_v24 = vrot.slane %v3107_v43, 1  ;;  %v16814_v62 = vld [vmem:[#allocation110_spill] sm:$0xff] }
 0x5f6   :  { %16805 = vst [vmem:[#allocation154_spill] sm:$0xff] %v13676_v8  ;;  %v2563_v44 = vsel %vm2537_vm13, %v2562_v29, %v2561_v37  ;;  %v4080_v10 = vadd.f32 %v16808_v16, %v16807_v28  ;;  %v3116_v29 = vrot.slane %v13433_v15, 4  ;;  %v16812_v45 = vrot.slane %v16811_v60, 2  ;;  %v16813_v16 = vld [vmem:[#allocation133_spill] sm:$0xff]  ;;  %v16827_v21 = vld [vmem:[#allocation118_spill] sm:$0xff] }
 0x5f7   :  { %16806 = vst [vmem:[#allocation155_spill] sm:$0xff] %v13684_v51  ;;  %v2565_v54 = vsel %vm2540_vm14, %v2564_v49, %v2563_v44  ;;  %v5088_v28 = vrot.slane %v16813_v16, 2  ;;  %v13712_v38 = vmul.f32 %v13679_v32, %v16712_v13  ;;  %v13716_v44 = vmul.f32 %v13679_v32, %v16814_v62  ;;  %v16826_v8 = vld [vmem:[#allocation49_spill] sm:$0xff] }
 0x5f8   :  { %v2636_v1 = vsel %vm2621_vm15, %v2565_v54, 0.0  ;;  %v4074_v37 = vadd.f32 %v16812_v45, %v16811_v60  ;;  %v2984_v54 = vmul.f32 %v16815_v22, %v13306_v25  ;;  %v13720_v19 = vadd.f32 %v3102_v4, %v3101_v47 }
 0x5f9   :  { %v2637_v49 = vrot.slane %v2636_v1, 4  ;;  %v3114_v23 = vrot.slane %v3113_v17, 1  ;;  %v4081_v40 = vrot.slane %v4080_v10, 1  ;;  %v5095_v60 = vadd.f32 %v5094_v18, %v16809_v30  ;;  %v16823_v18 = vld [vmem:[#allocation126_spill] sm:$0xff] }
 0x5fa   :  { %v13723_v45 = vadd.f32 %v3108_v24, %v3107_v43  ;;  %v3122_v12 = vrot.slane %v2983_v20, 4  ;;  %v16817_v13 = vrot.slane %v16816_v2, 2  ;;  %v16819_v62 = vrot.slane %v16818_v48, 2 }
 0x5fb   :  { %v13733_v46 = vmul.f32 %v13679_v32, %v16820_v56  ;;  %v3117_v47 = vadd.f32 %v3116_v29, %v13433_v15  ;;  %v4075_v4 = vrot.slane %v4074_v37, 1  ;;  %v5089_v30 = vadd.f32 %v5088_v28, %v16813_v16 }
 0x5fc   :  { %v2037_v5 = vadd.f32 %v16817_v13, %v16816_v2  ;;  %v2043_v31 = vadd.f32 %v16819_v62, %v16818_v48  ;;  %v3224_v43 = vrot.slane %v3000_v9, 4  ;;  %v2638_v24 = vadd.f32 %v2637_v49, %v2636_v1 }
 0x5fd   :  { %v3128_v3 = vrot.slane %v2984_v54, 4  ;;  %v13739_v2 = vadd.f32 %v3114_v23, %v3113_v17  ;;  %v13741_v58 = vadd.f32 %v4081_v40, %v4080_v10  ;;  %v5096_v62 = vrot.slane %v5095_v60, 1  ;;  %v16824_v17 = vld [vmem:[#allocation120_spill] sm:$0xff] }
 0x5fe   :  { %v3123_v48 = vadd.f32 %v3122_v12, %v2983_v20  ;;  %v3320_v56 = vmax.f32 %v13720_v19, %v13723_v45  ;;  %v2038_v15 = vrot.slane %v2037_v5, 1  ;;  %v2044_v29 = vrot.slane %v2043_v31, 1 }
 0x5ff   :  { %16821 = vst [vmem:[#allocation121_spill] sm:$0xff] %v13741_v58  ;;  %v3118_v51 = vrot.slane %v3117_v47, 2  ;;  %v13745_v16 = vadd.f32 %v4075_v4, %v4074_v37  ;;  %v5090_v28 = vrot.slane %v5089_v30, 1  ;;  %v3058_v1 = vrot.slane %v16823_v18, 2 }
 0x600   :  { %v13748_v49 = vadd.f32 %v3224_v43, %v3000_v9  ;;  %v2639_v13 = vrot.slane %v2638_v24, 2  ;;  %v3129_v23 = vadd.f32 %v3128_v3, %v2984_v54  ;;  %v3064_v40 = vrot.slane %v16824_v17, 2 }
 0x601   :  { %16822 = vst [vmem:[#allocation127_spill] sm:$0xff] %v13745_v16  ;;  %v13752_v10 = vmax.f32 %v3320_v56, %v13739_v2  ;;  %v13756_v20 = vadd.f32 %v5096_v62, %v5095_v60  ;;  %v5104_v37 = vrot.slane %v16826_v8, 4  ;;  %v3124_v4 = vrot.slane %v3123_v48, 2 }
 0x602   :  { %v16828_v27 = vrot.slane %v16827_v21, 4  ;;  %v13762_v43 = vadd.f32 %v2038_v15, %v2037_v5  ;;  %v13764_v3 = vadd.f32 %v2044_v29, %v2043_v31  ;;  %v3119_v54 = vadd.f32 %v3118_v51, %v3117_v47  ;;  %v16836_v51 = vld [vmem:[#allocation90_spill] sm:$0xff] }
 0x603   :  { %16825 = vst [vmem:[#allocation71_spill] sm:$0xff] %v13756_v20  ;;  %v4085_v56 = vrot.slane %v16831_v35, 2  ;;  %v13767_v34 = vadd.f32 %v5090_v28, %v5089_v30  ;;  %v3059_v12 = vadd.f32 %v3058_v1, %v16823_v18  ;;  %v2640_v60 = vadd.f32 %v2639_v13, %v2638_v24  ;;  %v16838_v13 = vld [vmem:[#allocation52_spill] sm:$0xff]  ;;  %v16841_v28 = vld [vmem:[#allocation47_spill] sm:$0xff] }
 0x604   :  { %v5099_v9 = vadd.f32 %v16828_v27, %v16827_v21  ;;  %16829 = vst [vmem:[#allocation133_spill] sm:$0xff] %v13762_v43  ;;  %v3130_v62 = vrot.slane %v3129_v23, 2  ;;  %v3065_v57 = vadd.f32 %v3064_v40, %v16824_v17  ;;  %v16835_v21 = vrot.slane %v16834_v36, 4 }
 0x605   :  { %16830 = vst [vmem:[#allocation138_spill] sm:$0xff] %v13764_v3  ;;  %v5105_v31 = vadd.f32 %v5104_v37, %v16826_v8  ;;  %v16837_v47 = vrot.slane %v16836_v51, 4  ;;  %v3125_v18 = vadd.f32 %v3124_v4, %v3123_v48  ;;  %v16839_v15 = vrot.slane %v16838_v13, 4 }
 0x606   :  { %16832 = vst [vmem:[#allocation143_spill] sm:$0xff] %v13767_v34  ;;  %v4090_v5 = vadd.f32 %v16835_v21, %v16834_v36  ;;  %v5100_v24 = vrot.slane %v5099_v9, 2  ;;  %v16840_v36 = vld [vmem:[#allocation76_spill] sm:$0xff]  ;;  %v3120_v8 = vrot.slane %v3119_v54, 1  ;;  %v4086_v17 = vadd.f32 %v4085_v56, %v16831_v35 }
 0x607   :  { %v3069_v30 = vadd.f32 %v16837_v47, %v16836_v51  ;;  %v2053_v29 = vadd.f32 %v16839_v15, %v16838_v13  ;;  %v2985_v1 = vmul.f32 %v16840_v36, %v13306_v25  ;;  %v3060_v40 = vrot.slane %v3059_v12, 1 }
 0x608   :  { %v2641_v37 = vrot.slane %v2640_v60, 1  ;;  %v3131_v21 = vadd.f32 %v3130_v62, %v3129_v23  ;;  %v2049_v51 = vadd.f32 %v2048_v14, %v16833_v63  ;;  %v3066_v48 = vrot.slane %v3065_v57, 1 }
 0x609   :  { %v3134_v4 = vrot.slane %v2985_v1, 4  ;;  %v4091_v47 = vrot.slane %v4090_v5, 2  ;;  %v5106_v27 = vrot.slane %v5105_v31, 2  ;;  %v3070_v33 = vrot.slane %v3069_v30, 2 }
 0x60a   :  { %v3126_v13 = vrot.slane %v3125_v18, 1  ;;  %v5101_v15 = vadd.f32 %v5100_v24, %v5099_v9  ;;  %v2054_v53 = vrot.slane %v2053_v29, 2  ;;  %v3074_v0 = vrot.slane %v16841_v28, 4 }
 0x60b   :  { %v13791_v6 = vadd.f32 %v3120_v8, %v3119_v54  ;;  %v3135_v25 = vadd.f32 %v3134_v4, %v2985_v1  ;;  %v4087_v36 = vrot.slane %v4086_v17, 1  ;;  %v13793_v35 = vadd.f32 %v3060_v40, %v3059_v12 }
 0x60c   :  { %v2642_v56 = vadd.f32 %v2641_v37, %v2640_v60  ;;  %v3132_v23 = vrot.slane %v3131_v21, 1  ;;  %v2050_v62 = vrot.slane %v2049_v51, 1  ;;  %v13795_v14 = vadd.f32 %v3066_v48, %v3065_v57 }
 0x60d   :  { %16842 = vst [vmem:[#allocation126_spill] sm:$0xff] %v13793_v35  ;;  %v3136_v63 = vrot.slane %v3135_v25, 2  ;;  %v4092_v59 = vadd.f32 %v4091_v47, %v4090_v5  ;;  %v5107_v11 = vadd.f32 %v5106_v27, %v5105_v31  ;;  %v3071_v22 = vadd.f32 %v3070_v33, %v3069_v30 }
 0x60e   :  { %16843 = vst [vmem:[#allocation120_spill] sm:$0xff] %v13795_v14  ;;  %v13797_v55 = vadd.f32 %v3126_v13, %v3125_v18  ;;  %v5102_v9 = vrot.slane %v5101_v15, 1  ;;  %v2055_v24 = vadd.f32 %v2054_v53, %v2053_v29  ;;  %v3075_v54 = vadd.f32 %v3074_v0, %v16841_v28 }
 0x60f   :  { %v3137_v8 = vadd.f32 %v3136_v63, %v3135_v25  ;;  %v3322_v12 = vmax.f32 %v13752_v10, %v13791_v6  ;;  %v2226_v60 = vrot.slane %v13664_v61, 4  ;;  %v13803_v1 = vadd.f32 %v4087_v36, %v4086_v17 }
 0x610   :  { %v13805_v57 = vperm.slane %v2642_v56, 0  ;;  %v13807_v40 = vadd.f32 %v3132_v23, %v3131_v21  ;;  %v16845_v33 = vrot.slane %v13636_v50, 4  ;;  %v13812_v31 = vadd.f32 %v2050_v62, %v2049_v51 }
 0x611   :  { %16844 = vst [vmem:[#allocation49_spill] sm:$0xff] %v13803_v1  ;;  %v3138_v53 = vrot.slane %v3137_v8, 1  ;;  %v4093_v0 = vrot.slane %v4092_v59, 1  ;;  %v5108_v27 = vrot.slane %v5107_v11, 1  ;;  %v3072_v30 = vrot.slane %v3071_v22, 1 }
 0x612   :  { %v2221_v5 = vadd.f32 %v16845_v33, %v13636_v50  ;;  %16846 = vst [vmem:[#allocation118_spill] sm:$0xff] %v13812_v31  ;;  %v3323_v10 = vmax.f32 %v3322_v12, %v13797_v55  ;;  %v13815_v18 = vadd.f32 %v5102_v9, %v5101_v15  ;;  %v2056_v29 = vrot.slane %v2055_v24, 1 }
 0x613   :  { %v3076_v28 = vrot.slane %v3075_v54, 2  ;;  %v13817_v36 = vadd.f32 %v3138_v53, %v3137_v8  ;;  %v16848_v17 = vrot.slane %v13657_v41, 2  ;;  %v16849_v50 = vrot.slane %v13666_v52, 2 }
 0x614   :  { %16847 = vst [vmem:[#allocation68_spill] sm:$0xff] %v13815_v18  ;;  %v2227_v51 = vadd.f32 %v2226_v60, %v13664_v61  ;;  %9986 = vrcp.f32 %v13805_v57  ;;  %v3324_v48 = vmax.f32 %v3323_v10, %v13807_v40  ;;  %v2216_v4 = vrot.slane %v13687_v26, 2 }
 0x615   :  { %v2205_v37 = vadd.f32 %v16848_v17, %v13657_v41  ;;  %v2211_v21 = vadd.f32 %v16849_v50, %v13666_v52  ;;  %v2222_v47 = vrot.slane %v2221_v5, 2  ;;  %v13829_v13 = vadd.f32 %v4093_v0, %v4092_v59 }
 0x616   :  { %v13831_v15 = vadd.f32 %v5108_v27, %v5107_v11  ;;  %v13833_v25 = vadd.f32 %v3072_v30, %v3071_v22  ;;  %v3314_v41 = vmax.f32 %v13793_v35, %v13795_v14  ;;  %v3325_v52 = vmax.f32 %v3324_v48, %v13817_v36 }
 0x617   :  { %16850 = vst [vmem:[#allocation51_spill] sm:$0xff] %v13829_v13  ;;  %v16853_v61 = vmax.f32 %v13745_v16, %v13741_v58  ;;  %v13844_v23 = vadd.f32 %v2056_v29, %v2055_v24  ;;  %v3077_v62 = vadd.f32 %v3076_v28, %v3075_v54  ;;  %v2206_v59 = vrot.slane %v2205_v37, 1 }
 0x618   :  { %16851 = vst [vmem:[#allocation70_spill] sm:$0xff] %v13831_v15  ;;  %v2212_v63 = vrot.slane %v2211_v21, 1  ;;  %v2228_v11 = vrot.slane %v2227_v51, 2  ;;  %v16855_v22 = vmax.f32 %v13767_v34, %v13756_v20  ;;  %v2217_v8 = vadd.f32 %v2216_v4, %v13687_v26 }
 0x619   :  { %16852 = vst [vmem:[#allocation90_spill] sm:$0xff] %v13833_v25  ;;  %v13842_v56 = vmax.f32 %v16853_v61, %v13803_v1  ;;  %v2223_v12 = vadd.f32 %v2222_v47, %v2221_v5  ;;  %v3004_v60 = vmul.f32 %v13679_v32, %v16810_v42  ;;  %v16856_v24 = vmax.f32 %v13762_v43, %v13764_v3 }
 0x61a   :  { %16854 = vst [vmem:[#allocation52_spill] sm:$0xff] %v13844_v23  ;;  %v13850_v9 = vmax.f32 %v16855_v22, %v13815_v18  ;;  %v16858_v33 = vrot.slane %v13712_v38, 4  ;;  %v13869_v5 = vmax.f32 %v3314_v41, %v13833_v25  ;;  %v13871_v27 = vpop.eup %9986  ;;  %v3364_v30 = vsub.f32 %v13720_v19, %v3325_v52  ;;  %v16890_v23 = vld [vmem:[#allocation152_spill] sm:$0xff] }
 0x61b   :  { %v13859_v54 = vmax.f32 %v16856_v24, %v13812_v31  ;;  %v3365_v10 = vsub.f32 %v13723_v45, %v3325_v52  ;;  %v3078_v28 = vrot.slane %v3077_v62, 1  ;;  %v13879_v17 = vadd.f32 %v2212_v63, %v2211_v21 }
 0x61c   :  { %v3231_v53 = vadd.f32 %v16858_v33, %v13712_v38  ;;  %16859 = vst [vmem:[#allocation156_spill] sm:$0xff] %v13869_v5  ;;  %v13877_v38 = vadd.f32 %v2206_v59, %v2205_v37  ;;  %v2229_v50 = vadd.f32 %v2228_v11, %v2227_v51  ;;  %v3242_v48 = vrot.slane %v13733_v46, 4 }
 0x61d   :  { %16857 = vst [vmem:[#allocation47_spill] sm:$0xff] %v13859_v54  ;;  %v3366_v4 = vsub.f32 %v13739_v2, %v3325_v52  ;;  %v2218_v47 = vrot.slane %v2217_v8, 1  ;;  %v2224_v41 = vrot.slane %v2223_v12, 1  ;;  %v3248_v61 = vrot.slane %v3004_v60, 4 }
 0x61e   :  { %v2721_v19 = vmul.f32 %v13871_v27, %v13805_v57  ;;  %v3367_v45 = vsub.f32 %v13791_v6, %v3325_v52  ;;  %v3368_v22 = vsub.f32 %v13797_v55, %v3325_v52  ;;  %v3369_v37 = vsub.f32 %v13807_v40, %v3325_v52 }
 0x61f   :  { %v3370_v21 = vsub.f32 %v13817_v36, %v3325_v52  ;;  %v3427_v59 = vmul.f32 1.442695, %v3364_v30  ;;  %v3429_v51 = vmul.f32 1.442695, %v3365_v10  ;;  %v3431_v63 = vmul.f32 1.442695, %v3366_v4 }
 0x620   :  { %v3433_v11 = vmul.f32 1.442695, %v3367_v45  ;;  %v2316_v2 = vmax.f32 %v13877_v38, %v13879_v17  ;;  %v16860_v24 = vrot.slane %v13716_v44, 4  ;;  %v3243_v29 = vadd.f32 %v3242_v48, %v13733_v46 }
 0x621   :  { %9988 = vpow2.f32 %v3427_v59  ;;  %v3435_v6 = vmul.f32 1.442695, %v3368_v22  ;;  %v3226_v55 = vrot.slane %v13748_v49, 2  ;;  %v3232_v40 = vrot.slane %v3231_v53, 2 }
 0x622   :  { %v3237_v33 = vadd.f32 %v16860_v24, %v13716_v44  ;;  %9990 = vpow2.f32 %v3429_v51  ;;  %v3437_v36 = vmul.f32 1.442695, %v3369_v37  ;;  %v2230_v52 = vrot.slane %v2229_v50, 1  ;;  %v16865_v51 = vld [vmem:[#allocation149_spill] sm:$0xff] }
 0x623   :  { %v3249_v30 = vadd.f32 %v3248_v61, %v3004_v60  ;;  %v2722_v10 = vsub.f32 1.0, %v2721_v19  ;;  %9992 = vpow2.f32 %v3431_v63  ;;  %v3439_v4 = vmul.f32 1.442695, %v3370_v21 }
 0x624   :  { %v13896_v45 = vadd.f32 %v2218_v47, %v2217_v8  ;;  %9994 = vpow2.f32 %v3433_v11  ;;  %v3238_v26 = vrot.slane %v3237_v33, 2  ;;  %v3244_v0 = vrot.slane %v3243_v29, 2 }
 0x625   :  { %v13898_v44 = vadd.f32 %v3078_v28, %v3077_v62  ;;  %9996 = vpow2.f32 %v3435_v6  ;;  %v3227_v48 = vadd.f32 %v3226_v55, %v13748_v49  ;;  %v3233_v22 = vadd.f32 %v3232_v40, %v3231_v53  ;;  %v16862_v28 = vld [vmem:[#allocation144_spill] sm:$0xff] }
 0x626   :  { %v13901_v46 = vmax.f32 %v2316_v2, %v13896_v45  ;;  %9998 = vpow2.f32 %v3437_v36  ;;  %v1983_v60 = vmul.f32 %v16761_v7, %v13557_v39  ;;  %v13906_v61 = vadd.f32 %v2224_v41, %v2223_v12  ;;  %v16864_v53 = vld [vmem:[#allocation64_spill] sm:$0xff] }
 0x627   :  { %16861 = vst [vmem:[#allocation157_spill] sm:$0xff] %v13898_v44  ;;  %v3250_v8 = vrot.slane %v3249_v30, 2  ;;  %v13908_v47 = vpop.eup %9988  ;;  %v2723_v19 = vmul.f32 %v13871_v27, %v2722_v10  ;;  %10000 = vpow2.f32 %v3439_v4  ;;  %v13911_v62 = vadd.f32 %v2230_v52, %v2229_v50  ;;  %v16866_v10 = vld [vmem:[#allocation147_spill] sm:$0xff] }
 0x628   :  { %v16863_v37 = vrot.slane %v16862_v28, 4  ;;  %v13918_v49 = vpop.eup %9990  ;;  %v3005_v59 = vmul.f32 %v16864_v53, %v13679_v32  ;;  %v3239_v12 = vadd.f32 %v3238_v26, %v3237_v33  ;;  %v3245_v41 = vadd.f32 %v3244_v0, %v3243_v29 }
 0x629   :  { %v4211_v63 = vrot.slane %v16865_v51, 2  ;;  %v13923_v11 = vpop.eup %9992  ;;  %v3570_v2 = vrot.slane %v13918_v49, 7  ;;  %v2318_v50 = vmax.f32 %v13901_v46, %v13906_v61  ;;  %v3228_v24 = vrot.slane %v3227_v48, 1 }
 0x62a   :  { %v13916_v21 = vadd.f32 %v16863_v37, %v16862_v28  ;;  %v3234_v6 = vrot.slane %v3233_v22, 1  ;;  %v13928_v55 = vpop.eup %9994  ;;  %v3572_v40 = vrot.slane %v13923_v11, 6  ;;  %v2232_v36 = vrot.slane %v1983_v60, 4 }
 0x62b   :  { %v3251_v52 = vadd.f32 %v3250_v8, %v3249_v30  ;;  %v16867_v0 = vrot.slane %v16866_v10, 2  ;;  %v13934_v29 = vpop.eup %9996  ;;  %v2724_v33 = vadd.f32 %v13871_v27, %v2723_v19  ;;  %vm2726_vm0 = vweird.f32 %v13871_v27 }
 0x62c   :  { %v3571_v4 = vsel %vm2525_vm9, %v3570_v2, %v13908_v47  ;;  %v3574_v46 = vrot.slane %v13928_v55, 5  ;;  %v13941_v28 = vpop.eup %9998  ;;  %v2731_v37 = vand.u32 2147483648, %v13805_v57  ;;  %v3576_v8 = vrot.slane %v13934_v29, 4 }
 0x62d   :  { %v4200_v26 = vadd.f32 %v16867_v0, %v16866_v10  ;;  %v3573_v30 = vsel %vm2528_vm10, %v3572_v40, %v3571_v4  ;;  %v3254_v10 = vrot.slane %v3005_v59, 4  ;;  %v13946_v0 = vpop.eup %10000  ;;  %vm2725_vm1 = vweird.f32 %v13805_v57 }
 0x62e   :  { %v2729_v19 = vand.u32 2147483647, %v13805_v57  ;;  %v3575_v25 = vsel %vm2531_vm11, %v3574_v46, %v3573_v30  ;;  %v3578_v2 = vrot.slane %v13941_v28, 3  ;;  %vm13952_vm2 = vmor %vm2725_vm1, %vm2726_vm0  ;;  %v3580_v40 = vrot.slane %v13946_v0, 2 }
 0x62f   :  { %v3577_v35 = vsel %vm2534_vm12, %v3576_v8, %v3575_v25  ;;  %v13958_v4 = vadd.f32 %v3228_v24, %v3227_v48  ;;  %v13960_v43 = vadd.f32 %v3234_v6, %v3233_v22  ;;  %v2728_v57 = vsel %vm13952_vm2, %v13871_v27, %v2724_v33 }
 0x630   :  { %v3579_v46 = vsel %vm2537_vm13, %v3578_v2, %v3577_v35  ;;  %v2233_v30 = vadd.f32 %v2232_v36, %v1983_v60  ;;  %v3240_v31 = vrot.slane %v3239_v12, 1  ;;  %v2732_v3 = vor.u32 1.1754944e-38, %v2731_v37  ;;  %v16870_v36 = vld [vmem:[#allocation148_spill] sm:$0xff] }
 0x631   :  { %v3581_v18 = vsel %vm2540_vm14, %v3580_v40, %v3579_v46  ;;  %v3246_v20 = vrot.slane %v3245_v41, 1  ;;  %v3255_v34 = vadd.f32 %v3254_v10, %v3005_v59  ;;  %vm2730_vm3 = vcmp.eq.f32.partialorder %v2729_v19, 8.507059e+37  ;;  %v16872_v19 = vld [vmem:[#allocation140_spill] sm:$0xff]  ;;  %v16874_v46 = vld [vmem:[#allocation97_spill] sm:$0xff] }
 0x632   :  { %v3651_v25 = vsel %vm2621_vm15, %v3581_v18, 0.0  ;;  %v3252_v48 = vrot.slane %v3251_v52, 1  ;;  %v4201_v24 = vrot.slane %v4200_v26, 1  ;;  %v13968_v22 = vsel %vm2730_vm3, %v2732_v3, %v2728_v57 }
 0x633   :  { %v3652_v6 = vrot.slane %v3651_v25, 4  ;;  %v3338_v14 = vmax.f32 %v13958_v4, %v13960_v43  ;;  %v2234_v27 = vrot.slane %v2233_v30, 2  ;;  %v13975_v60 = vmax.f32 %v2318_v50, %v13911_v62 }
 0x634   :  { %v16871_v59 = vrot.slane %v16870_v36, 2  ;;  %v4212_v18 = vadd.f32 %v4211_v63, %v16865_v51  ;;  %v13981_v3 = vadd.f32 %v3240_v31, %v3239_v12  ;;  %v13983_v8 = vadd.f32 %v3246_v20, %v3245_v41  ;;  %v16875_v51 = vld [vmem:[#allocation81_spill] sm:$0xff] }
 0x635   :  { %v3653_v37 = vadd.f32 %v3652_v6, %v3651_v25  ;;  %v3256_v10 = vrot.slane %v3255_v34, 2  ;;  %v2734_v2 = vmul.f32 %v16872_v19, %v13968_v22  ;;  %v13987_v40 = vadd.f32 %v3252_v48, %v3251_v52  ;;  %v16876_v25 = vld [vmem:[#allocation65_spill] sm:$0xff] }
 0x636   :  { %v4206_v33 = vadd.f32 %v16871_v59, %v16870_v36  ;;  %v13989_v57 = vadd.f32 %v4201_v24, %v4200_v26  ;;  %v4217_v50 = vrot.slane %v13916_v21, 2  ;;  %v2735_v36 = vmul.f32 %v16874_v46, %v13968_v22  ;;  %v16877_v24 = vld [vmem:[#allocation98_spill] sm:$0xff] }
 0x637   :  { %v3654_v59 = vrot.slane %v3653_v37, 2  ;;  %v1984_v31 = vmul.f32 %v16875_v51, %v13557_v39  ;;  %v3339_v20 = vmax.f32 %v3338_v14, %v13981_v3  ;;  %v2235_v12 = vadd.f32 %v2234_v27, %v2233_v30  ;;  %v16878_v46 = vld [vmem:[#allocation150_spill] sm:$0xff]  ;;  %v16880_v39 = vld [vmem:[#allocation151_spill] sm:$0xff] }
 0x638   :  { %16873 = vst [vmem:[#allocation144_spill] sm:$0xff] %v13989_v57  ;;  %v4207_v41 = vrot.slane %v4206_v33, 1  ;;  %v4213_v63 = vrot.slane %v4212_v18, 1  ;;  %v5214_v6 = vrot.slane %v16876_v25, 2  ;;  %v3257_v26 = vadd.f32 %v3256_v10, %v3255_v34  ;;  %v16882_v34 = vld [vmem:[#allocation125_spill] sm:$0xff] }
 0x639   :  { %v3655_v52 = vadd.f32 %v3654_v59, %v3653_v37  ;;  %v2238_v48 = vrot.slane %v1984_v31, 4  ;;  %v5220_v19 = vrot.slane %v16877_v24, 2  ;;  %v2839_v35 = vperm.slane %v2734_v2, 0  ;;  %v16881_v59 = vld [vmem:[#allocation135_spill] sm:$0xff] }
 0x63a   :  { %v4218_v53 = vadd.f32 %v4217_v50, %v13916_v21  ;;  %v16879_v7 = vrot.slane %v16878_v46, 4  ;;  %v2840_v30 = vperm.slane %v2735_v36, 0  ;;  %v3340_v58 = vmax.f32 %v3339_v20, %v13983_v8  ;;  %v16885_v21 = vld [vmem:[#allocation67_spill] sm:$0xff]  ;;  %v16886_v36 = vld [vmem:[#allocation92_spill] sm:$0xff] }
 0x63b   :  { %v3656_v27 = vrot.slane %v3655_v52, 1  ;;  %v2239_v51 = vadd.f32 %v2238_v48, %v1984_v31  ;;  %v2236_v37 = vrot.slane %v2235_v12, 1  ;;  %v5006_v10 = vmul.f32 %v16882_v34, %v16881_v59  ;;  %v16887_v31 = vld [vmem:[#allocation95_spill] sm:$0xff] }
 0x63c   :  { %v14003_v1 = vadd.f32 %v16879_v7, %v16878_v46  ;;  %v14009_v16 = vadd.f32 %v4207_v41, %v4206_v33  ;;  %v14011_v2 = vadd.f32 %v4213_v63, %v4212_v18  ;;  %v2736_v50 = vmul.f32 %v16885_v21, %v13968_v22  ;;  %v16888_v59 = vld [vmem:[#allocation103_spill] sm:$0xff]  ;;  %v16889_v63 = vld [vmem:[#allocation76_spill] sm:$0xff] }
 0x63d   :  { %v3657_v7 = vadd.f32 %v3656_v27, %v3655_v52  ;;  %v2240_v46 = vrot.slane %v2239_v51, 2  ;;  %v3258_v44 = vrot.slane %v3257_v26, 1  ;;  %v2737_v14 = vmul.f32 %v16886_v36, %v13968_v22 }
 0x63e   :  { %16883 = vst [vmem:[#allocation149_spill] sm:$0xff] %v14009_v16  ;;  %v2888_v48 = vmul.f32 %v2839_v35, %v16887_v31  ;;  %v4219_v20 = vrot.slane %v4218_v53, 1  ;;  %v14019_v5 = vadd.f32 %v5214_v6, %v16876_v25  ;;  %v2889_v33 = vmul.f32 %v2840_v30, %v16888_v59 }
 0x63f   :  { %16884 = vst [vmem:[#allocation147_spill] sm:$0xff] %v14011_v2  ;;  %v14022_v41 = vperm.slane %v3657_v7, 0  ;;  %v2241_v18 = vadd.f32 %v2240_v46, %v2239_v51  ;;  %v3006_v21 = vmul.f32 %v16889_v63, %v13679_v32  ;;  %v2237_v52 = vadd.f32 %v2236_v37, %v2235_v12  ;;  %v16891_v51 = vld [vmem:[#allocation153_spill] sm:$0xff]  ;;  %v16892_v32 = vld [vmem:[#allocation154_spill] sm:$0xff]  ;;  %v16893_v7 = vld [vmem:[#allocation155_spill] sm:$0xff] }
 0x640   :  { %v14027_v27 = vmax.f32 %v3340_v58, %v13987_v40  ;;  %v4095_v36 = vrot.slane %v16890_v23, 4  ;;  %v14031_v35 = vadd.f32 %v5220_v19, %v16877_v24  ;;  %v2841_v31 = vperm.slane %v2736_v50, 0 }
 0x641   :  { %10002 = vrcp.f32 %v14022_v41  ;;  %v14034_v25 = vadd.f32 %v3258_v44, %v3257_v26  ;;  %v5110_v6 = vrot.slane %v5006_v10, 4  ;;  %v2738_v30 = vmul.f32 %v16891_v51, %v13968_v22  ;;  %v16895_v51 = vld [vmem:[#allocation111_spill] sm:$0xff] }
 0x642   :  { %v2739_v12 = vmul.f32 %v16892_v32, %v13968_v22  ;;  %v2242_v37 = vrot.slane %v2241_v18, 1  ;;  %v3260_v58 = vrot.slane %v3006_v21, 4  ;;  %v2740_v46 = vmul.f32 %v16893_v7, %v13968_v22 }
 0x643   :  { %v2842_v63 = vperm.slane %v2737_v14, 0  ;;  %v2935_v24 = vadd.f32 %v2889_v33, %v2888_v48  ;;  %v14042_v19 = vadd.f32 %v4219_v20, %v4218_v53  ;;  %v2320_v44 = vmax.f32 %v13975_v60, %v2237_v52 }
 0x644   :  { %v2243_v50 = vadd.f32 %v2242_v37, %v2241_v18  ;;  %v3261_v26 = vadd.f32 %v3260_v58, %v3006_v21  ;;  %v2890_v54 = vmul.f32 %v2841_v31, %v16895_v51  ;;  %v14049_v32 = vadd.f32 %v4095_v36, %v16890_v23  ;;  %v16896_v18 = vld [vmem:[#allocation53_spill] sm:$0xff] }
 0x645   :  { %16894 = vst [vmem:[#allocation148_spill] sm:$0xff] %v14042_v19  ;;  %v14051_v15 = vadd.f32 %v5110_v6, %v5006_v10  ;;  %v2843_v14 = vperm.slane %v2738_v30, 0  ;;  %v2844_v48 = vperm.slane %v2739_v12, 0  ;;  %v2845_v33 = vperm.slane %v2740_v46, 0  ;;  %v16897_v51 = vld [vmem:[#allocation61_spill] sm:$0xff] }
 0x646   :  { %v2321_v53 = vmax.f32 %v2320_v44, %v2243_v50  ;;  %v2891_v21 = vmul.f32 %v2842_v63, %v16896_v18  ;;  %v2936_v37 = vadd.f32 %v2935_v24, %v2890_v54  ;;  %v3262_v58 = vrot.slane %v3261_v26, 2 }
 0x647   :  { %v10003_v60 = vpop.eup %10002  ;;  %v3744_v23 = vand.u32 2147483647, %v14022_v41  ;;  %v3746_v63 = vand.u32 2147483648, %v14022_v41  ;;  %vm3740_vm5 = vweird.f32 %v14022_v41 }
 0x648   :  { %v3736_v31 = vmul.f32 %v10003_v60, %v14022_v41  ;;  %v2363_v10 = vsub.f32 %v13877_v38, %v2321_v53  ;;  %v2364_v36 = vsub.f32 %v13879_v17, %v2321_v53  ;;  %v2365_v6 = vsub.f32 %v13896_v45, %v2321_v53 }
 0x649   :  { %v2366_v30 = vsub.f32 %v13906_v61, %v2321_v53  ;;  %v2367_v12 = vsub.f32 %v13911_v62, %v2321_v53  ;;  %v2368_v7 = vsub.f32 %v2237_v52, %v2321_v53  ;;  %v2369_v44 = vsub.f32 %v2243_v50, %v2321_v53  ;;  %v16899_v53 = vld [vmem:[#allocation86_spill] sm:$0xff] }
 0x64a   :  { %v3737_v46 = vsub.f32 1.0, %v3736_v31  ;;  %v2447_v54 = vmul.f32 1.442695, %v2363_v10  ;;  %v2449_v24 = vmul.f32 1.442695, %v2364_v36  ;;  %v3263_v20 = vadd.f32 %v3262_v58, %v3261_v26  ;;  %v16898_v31 = vld [vmem:[#allocation87_spill] sm:$0xff] }
 0x64b   :  { %v2451_v22 = vmul.f32 1.442695, %v2365_v6  ;;  %v2453_v59 = vmul.f32 1.442695, %v2366_v30  ;;  %vm3741_vm4 = vweird.f32 %v10003_v60  ;;  %v2455_v38 = vmul.f32 1.442695, %v2367_v12 }
 0x64c   :  { %v3738_v18 = vmul.f32 %v10003_v60, %v3737_v46  ;;  %10004 = vpow2.f32 %v2447_v54  ;;  %v2937_v17 = vadd.f32 %v2936_v37, %v2891_v21  ;;  %v2457_v45 = vmul.f32 1.442695, %v2368_v7  ;;  %vm3742_vm6 = vmor %vm3740_vm5, %vm3741_vm4 }
 0x64d   :  { %10006 = vpow2.f32 %v2449_v24  ;;  %v3264_v61 = vrot.slane %v3263_v20, 1  ;;  %v2892_v62 = vmul.f32 %v2843_v14, %v16897_v51  ;;  %v2893_v10 = vmul.f32 %v2844_v48, %v16898_v31  ;;  %v16901_v24 = vld [vmem:[#allocation96_spill] sm:$0xff] }
 0x64e   :  { %v3739_v52 = vadd.f32 %v10003_v60, %v3738_v18  ;;  %10008 = vpow2.f32 %v2451_v22  ;;  %v3747_v50 = vor.u32 1.1754944e-38, %v3746_v63  ;;  %v2459_v26 = vmul.f32 1.442695, %v2369_v44 }
 0x64f   :  { %10010 = vpow2.f32 %v2453_v59  ;;  %v14069_v58 = vmul.f32 %v2845_v33, %v16899_v53  ;;  %vm3745_vm7 = vcmp.eq.f32.partialorder %v3744_v23, 8.507059e+37  ;;  %v2938_v21 = vadd.f32 %v2937_v17, %v2892_v62  ;;  %v16927_v53 = vld [vmem:[#allocation130_spill] sm:$0xff] }
 0x650   :  { %v3743_v36 = vsel %vm3742_vm6, %v10003_v60, %v3739_v52  ;;  %10012 = vpow2.f32 %v2455_v38  ;;  %v14071_v14 = vadd.f32 %v3264_v61, %v3263_v20  ;;  %v16902_v38 = vld [vmem:[#allocation104_spill] sm:$0xff]  ;;  %v16904_v52 = vld [vmem:[#allocation54_spill] sm:$0xff] }
 0x651   :  { %v3748_v37 = vsel %vm3745_vm7, %v3747_v50, %v3743_v36  ;;  %10014 = vpow2.f32 %v2457_v45  ;;  %v16903_v61 = vld [vmem:[#allocation112_spill] sm:$0xff] }
 0x652   :  { %v14073_v18 = vpop.eup %10004  ;;  %v3749_v41 = vmul.f32 %v13908_v47, %v3748_v37  ;;  %v3750_v22 = vmul.f32 %v13918_v49, %v3748_v37  ;;  %v3751_v59 = vmul.f32 %v13923_v11, %v3748_v37  ;;  %v3752_v48 = vmul.f32 %v13928_v55, %v3748_v37  ;;  %v16905_v50 = vld [vmem:[#allocation72_spill] sm:$0xff] }
 0x653   :  { %v14079_v33 = vpop.eup %10006  ;;  %v3753_v60 = vmul.f32 %v13934_v29, %v3748_v37  ;;  %v3754_v23 = vmul.f32 %v13941_v28, %v3748_v37  ;;  %v3755_v6 = vmul.f32 %v13946_v0, %v3748_v37  ;;  %10016 = vpow2.f32 %v2459_v26 }
 0x654   :  { %v14084_v20 = vpop.eup %10008  ;;  %v3854_v30 = vperm.slane %v3749_v41, 0  ;;  %v3855_v12 = vperm.slane %v3750_v22, 0  ;;  %v3856_v47 = vperm.slane %v3751_v59, 0  ;;  %v3857_v7 = vperm.slane %v3752_v48, 0 }
 0x655   :  { %v14086_v49 = vpop.eup %10010  ;;  %v2939_v11 = vadd.f32 %v2938_v21, %v2893_v10  ;;  %v3858_v46 = vperm.slane %v3753_v60, 0  ;;  %v2590_v55 = vrot.slane %v14079_v33, 7  ;;  %v16900_v29 = vmax.f32 %v14027_v27, %v14034_v25 }
 0x656   :  { %v14093_v63 = vpop.eup %10012  ;;  %v3859_v0 = vperm.slane %v3754_v23, 0  ;;  %v3860_v54 = vperm.slane %v3755_v6, 0  ;;  %v3903_v44 = vmul.f32 %v3854_v30, %v16901_v24  ;;  %v3904_v17 = vmul.f32 %v3855_v12, %v16902_v38 }
 0x657   :  { %v3343_v28 = vmax.f32 %v16900_v29, %v14071_v14  ;;  %v14097_v45 = vpop.eup %10014  ;;  %v3905_v62 = vmul.f32 %v3856_v47, %v16903_v61  ;;  %v3906_v10 = vmul.f32 %v3857_v7, %v16904_v52  ;;  %v3907_v26 = vmul.f32 %v3858_v46, %v16905_v50 }
 0x658   :  { %v2591_v27 = vsel %vm2525_vm9, %v2590_v55, %v14073_v18  ;;  %v3950_v36 = vadd.f32 %v3904_v17, %v3903_v44  ;;  %v2592_v21 = vrot.slane %v14084_v20, 6  ;;  %v2594_v37 = vrot.slane %v14086_v49, 5  ;;  %v16906_v17 = vld [vmem:[#allocation134_spill] sm:$0xff] }
 0x659   :  { %v2596_v41 = vrot.slane %v14093_v63, 4  ;;  %v14107_v22 = vpop.eup %10016  ;;  %v2598_v59 = vrot.slane %v14097_v45, 3  ;;  %v3385_v48 = vsub.f32 %v13958_v4, %v3343_v28  ;;  %v3386_v60 = vsub.f32 %v13960_v43, %v3343_v28 }
 0x65a   :  { %v3387_v23 = vsub.f32 %v13981_v3, %v3343_v28  ;;  %v3951_v6 = vadd.f32 %v3950_v36, %v3905_v62  ;;  %v2593_v30 = vsel %vm2528_vm10, %v2592_v21, %v2591_v27  ;;  %v2600_v12 = vrot.slane %v14107_v22, 2 }
 0x65b   :  { %v3388_v47 = vsub.f32 %v13983_v8, %v3343_v28  ;;  %v2595_v7 = vsel %vm2531_vm11, %v2594_v37, %v2593_v30  ;;  %v3389_v46 = vsub.f32 %v13987_v40, %v3343_v28  ;;  %v3390_v55 = vsub.f32 %v14034_v25, %v3343_v28  ;;  %v16907_v30 = vld [vmem:[#allocation139_spill] sm:$0xff] }
 0x65c   :  { %v3391_v29 = vsub.f32 %v14071_v14, %v3343_v28  ;;  %v3952_v4 = vadd.f32 %v3951_v6, %v3906_v10  ;;  %v2597_v43 = vsel %vm2534_vm12, %v2596_v41, %v2595_v7  ;;  %v3469_v44 = vmul.f32 1.442695, %v3385_v48 }
 0x65d   :  { %v3471_v3 = vmul.f32 1.442695, %v3386_v60  ;;  %v3908_v62 = vmul.f32 %v3859_v0, %v16906_v17  ;;  %v2599_v27 = vsel %vm2537_vm13, %v2598_v59, %v2597_v43  ;;  %v3473_v36 = vmul.f32 1.442695, %v3387_v23  ;;  %v16908_v0 = vld [vmem:[#allocation66_spill] sm:$0xff]  ;;  %v16909_v60 = vld [vmem:[#allocation60_spill] sm:$0xff] }
 0x65e   :  { %v3475_v21 = vmul.f32 1.442695, %v3388_v47  ;;  %v3953_v8 = vadd.f32 %v3952_v4, %v3907_v26  ;;  %v2601_v37 = vsel %vm2540_vm14, %v2600_v12, %v2599_v27  ;;  %10018 = vpow2.f32 %v3469_v44 }
 0x65f   :  { %v3477_v40 = vmul.f32 1.442695, %v3389_v46  ;;  %v3909_v25 = vmul.f32 %v3860_v54, %v16907_v30  ;;  %v2657_v14 = vsel %vm2621_vm15, %v2601_v37, 0.0  ;;  %10020 = vpow2.f32 %v3471_v3  ;;  %v16925_v30 = vld [vmem:[#allocation57_spill] sm:$0xff] }
 0x660   :  { %v3479_v28 = vmul.f32 1.442695, %v3390_v55  ;;  %v3954_v10 = vadd.f32 %v3953_v8, %v3908_v62  ;;  %v2658_v41 = vrot.slane %v2657_v14, 4  ;;  %10022 = vpow2.f32 %v3473_v36 }
 0x661   :  { %v3481_v48 = vmul.f32 1.442695, %v3391_v29  ;;  %10024 = vpow2.f32 %v3475_v21  ;;  %v4221_v59 = vrot.slane %v16908_v0, 4  ;;  %v5027_v26 = vmul.f32 %v16882_v34, %v16909_v60 }
 0x662   :  { %v5226_v23 = vrot.slane %v14003_v1, 2  ;;  %v2940_v6 = vadd.f32 %v2939_v11, %v14069_v58  ;;  %v3955_v12 = vadd.f32 %v3954_v10, %v3909_v25  ;;  %v2659_v54 = vadd.f32 %v2658_v41, %v2657_v14  ;;  %v16914_v25 = vld [vmem:[#allocation108_spill] sm:$0xff] }
 0x663   :  { %10026 = vpow2.f32 %v3477_v40  ;;  %v4097_v47 = vrot.slane %v14049_v32, 2  ;;  %v5112_v7 = vrot.slane %v14051_v15, 2  ;;  %v16910_v46 = vrot.slane %v16880_v39, 4 }
 0x664   :  { %10028 = vpow2.f32 %v3479_v28  ;;  %v14136_v29 = vpop.eup %10018  ;;  %v6042_v4 = vpack.c.bf16 %v3955_v12, %v2940_v6  ;;  %v2660_v43 = vrot.slane %v2659_v54, 2  ;;  %v5222_v44 = vrot.slane %v14031_v35, 1 }
 0x665   :  { %v5231_v55 = vadd.f32 %v16910_v46, %v16880_v39  ;;  %10030 = vpow2.f32 %v3481_v48  ;;  %v14139_v58 = vpop.eup %10020  ;;  %v4222_v11 = vadd.f32 %v4221_v59, %v16908_v0  ;;  %v16911_v3 = vmax.f32 %v13989_v57, %v14009_v16 }
 0x666   :  { %v16912_v39 = vrot.slane %v14019_v5, 1  ;;  %v5236_v36 = vrot.slane %v5027_v26, 4  ;;  %v14153_v21 = vpop.eup %10022  ;;  %6223 = vmatpush.bf16.msrb.mxu3 %v6042_v4  ;;  %v2661_v8 = vadd.f32 %v2660_v43, %v2659_v54  ;;  %v3606_v37 = vrot.slane %v14139_v58, 7 }
 0x667   :  { %v14146_v62 = vmax.f32 %v16911_v3, %v14011_v2  ;;  %v5227_v40 = vadd.f32 %v5226_v23, %v14003_v1  ;;  %v2058_v14 = vrot.slane %v16914_v25, 4  ;;  %v14158_v28 = vpop.eup %10024  ;;  %v3608_v10 = vrot.slane %v14153_v21, 6  ;;  %v16915_v1 = vld [vmem:[#allocation137_spill] sm:$0xff] }
 0x668   :  { %v14151_v27 = vadd.f32 %v16912_v39, %v14019_v5  ;;  %v4098_v41 = vadd.f32 %v4097_v47, %v14049_v32  ;;  %v5113_v5 = vadd.f32 %v5112_v7, %v14051_v15  ;;  %v5232_v48 = vrot.slane %v5231_v55, 2 }
 0x669   :  { %v14163_v0 = vpop.eup %10026  ;;  %v2662_v59 = vrot.slane %v2661_v8, 1  ;;  %v3607_v6 = vsel %vm2525_vm9, %v3606_v37, %v14136_v29  ;;  %v3610_v12 = vrot.slane %v14158_v28, 5  ;;  %v2976_v23 = vmul.f32 %v16810_v42, %v16915_v1 }
 0x66a   :  { %16913 = vst [vmem:[#allocation140_spill] sm:$0xff] %v14151_v27  ;;  %v14170_v54 = vpop.eup %10028  ;;  %v3609_v46 = vsel %vm2528_vm10, %v3608_v10, %v3607_v6  ;;  %v3612_v32 = vrot.slane %v14163_v0, 4  ;;  %v4223_v47 = vrot.slane %v4222_v11, 2  ;;  %v5237_v15 = vadd.f32 %v5236_v36, %v5027_v26 }
 0x66b   :  { %v14174_v7 = vpop.eup %10030  ;;  %v2663_v4 = vadd.f32 %v2662_v59, %v2661_v8  ;;  %v3611_v43 = vsel %vm2531_vm11, %v3610_v12, %v3609_v46  ;;  %v3614_v3 = vrot.slane %v14170_v54, 3  ;;  %v2059_v39 = vadd.f32 %v2058_v14, %v16914_v25 }
 0x66c   :  { %v3613_v37 = vsel %vm2534_vm12, %v3612_v32, %v3611_v43  ;;  %v3616_v34 = vrot.slane %v14174_v7, 2  ;;  %v4099_v2 = vrot.slane %v4098_v41, 1  ;;  %v14182_v10 = vadd.f32 %v5222_v44, %v14031_v35  ;;  %v16920_v43 = vld [vmem:[#allocation69_spill] sm:$0xff] }
 0x66d   :  { %v14184_v6 = vperm.slane %v2663_v4, 0  ;;  %v3615_v26 = vsel %vm2537_vm13, %v3614_v3, %v3613_v37  ;;  %v5233_v36 = vadd.f32 %v5232_v48, %v5231_v55  ;;  %v3080_v8 = vrot.slane %v2976_v23, 4  ;;  %v16918_v4 = vld [vmem:[#allocation46_spill] sm:$0xff] }
 0x66e   :  { %16916 = vst [vmem:[#allocation97_spill] sm:$0xff] %v14182_v10  ;;  %v3617_v59 = vsel %vm2540_vm14, %v3616_v34, %v3615_v26  ;;  %v5114_v12 = vrot.slane %v5113_v5, 1  ;;  %v5228_v46 = vrot.slane %v5227_v40, 1  ;;  %v5238_v16 = vrot.slane %v5237_v15, 2 }
 0x66f   :  { %10032 = vrcp.f32 %v14184_v6  ;;  %v4224_v25 = vadd.f32 %v4223_v47, %v4222_v11  ;;  %v4349_v14 = vmax.f32 %v14146_v62, %v14042_v19  ;;  %v2060_v32 = vrot.slane %v2059_v39, 2  ;;  %v16922_v11 = vld [vmem:[#allocation50_spill] sm:$0xff] }
 0x670   :  { %v3672_v35 = vsel %vm2621_vm15, %v3617_v59, 0.0  ;;  %v14192_v44 = vadd.f32 %v4099_v2, %v4098_v41  ;;  %v16919_v55 = vrot.slane %v16918_v4, 2  ;;  %v16921_v34 = vrot.slane %v16920_v43, 4 }
 0x671   :  { %v3673_v37 = vrot.slane %v3672_v35, 4  ;;  %v5234_v26 = vrot.slane %v5233_v36, 1  ;;  %v3081_v57 = vadd.f32 %v3080_v8, %v2976_v23  ;;  %v16923_v47 = vrot.slane %v16922_v11, 2 }
 0x672   :  { %16917 = vst [vmem:[#allocation65_spill] sm:$0xff] %v14192_v44  ;;  %v2163_v48 = vadd.f32 %v16919_v55, %v16918_v4  ;;  %v2179_v3 = vadd.f32 %v16921_v34, %v16920_v43  ;;  %v14203_v19 = vadd.f32 %v5114_v12, %v5113_v5  ;;  %v14205_v59 = vadd.f32 %v5228_v46, %v5227_v40  ;;  %v16926_v34 = vld [vmem:[#allocation136_spill] sm:$0xff] }
 0x673   :  { %v2169_v62 = vadd.f32 %v16923_v47, %v16922_v11  ;;  %v5239_v2 = vadd.f32 %v5238_v16, %v5237_v15  ;;  %v5362_v41 = vmax.f32 %v14151_v27, %v14182_v10  ;;  %v3674_v4 = vadd.f32 %v3673_v37, %v3672_v35 }
 0x674   :  { %16924 = vst [vmem:[#allocation98_spill] sm:$0xff] %v14203_v19  ;;  %v4225_v55 = vrot.slane %v4224_v25, 1  ;;  %v2061_v42 = vadd.f32 %v2060_v32, %v2059_v39  ;;  %v2174_v43 = vrot.slane %v16925_v30, 2  ;;  %v3992_v23 = vmul.f32 %v16927_v53, %v16926_v34  ;;  %v16929_v32 = vld [vmem:[#allocation70_spill] sm:$0xff] }
 0x675   :  { %v16928_v8 = vmax.f32 %v13842_v56, %v13829_v13  ;;  %v2164_v40 = vrot.slane %v2163_v48, 1  ;;  %v2180_v12 = vrot.slane %v2179_v3, 2  ;;  %v10033_v16 = vpop.eup %10032  ;;  %v3675_v15 = vrot.slane %v3674_v4, 2 }
 0x676   :  { %v14218_v46 = vadd.f32 %v5234_v26, %v5233_v36  ;;  %v3082_v35 = vrot.slane %v3081_v57, 2  ;;  %v2170_v37 = vrot.slane %v2169_v62, 1  ;;  %v2784_v39 = vmul.f32 %v10033_v16, %v14184_v6 }
 0x677   :  { %v14216_v5 = vmax.f32 %v16928_v8, %v14192_v44  ;;  %v16930_v11 = vmax.f32 %v13850_v9, %v16929_v32  ;;  %v5240_v10 = vrot.slane %v5239_v2, 1  ;;  %v5363_v56 = vmax.f32 %v5362_v41, %v14205_v59 }
 0x678   :  { %v3676_v8 = vadd.f32 %v3675_v15, %v3674_v4  ;;  %v14228_v27 = vadd.f32 %v4225_v55, %v4224_v25  ;;  %v2062_v1 = vrot.slane %v2061_v42, 1  ;;  %v2175_v36 = vadd.f32 %v2174_v43, %v16925_v30 }
 0x679   :  { %v14225_v47 = vmax.f32 %v16930_v11, %v14203_v19  ;;  %v2785_v26 = vsub.f32 1.0, %v2784_v39  ;;  %v4101_v17 = vrot.slane %v3992_v23, 4  ;;  %v14231_v50 = vadd.f32 %v2164_v40, %v2163_v48  ;;  %v16938_v39 = vld [vmem:[#allocation52_spill] sm:$0xff] }
 0x67a   :  { %v2181_v31 = vadd.f32 %v2180_v12, %v2179_v3  ;;  %v2794_v44 = vand.u32 2147483648, %v14184_v6  ;;  %v3677_v13 = vrot.slane %v3676_v8, 1  ;;  %v3083_v9 = vadd.f32 %v3082_v35, %v3081_v57 }
 0x67b   :  { %16931 = vst [vmem:[#allocation150_spill] sm:$0xff] %v14231_v50  ;;  %v14234_v11 = vadd.f32 %v2170_v37, %v2169_v62  ;;  %v2786_v19 = vmul.f32 %v10033_v16, %v2785_v26  ;;  %vm2789_vm0 = vweird.f32 %v10033_v16  ;;  %v2792_v41 = vand.u32 2147483647, %v14184_v6  ;;  %v16937_v37 = vld [vmem:[#allocation47_spill] sm:$0xff] }
 0x67c   :  { %v14237_v25 = vadd.f32 %v5240_v10, %v5239_v2  ;;  %v3678_v4 = vadd.f32 %v3677_v13, %v3676_v8  ;;  %v14240_v30 = vmax.f32 %v4349_v14, %v14228_v27  ;;  %v5364_v48 = vmax.f32 %v5363_v56, %v14218_v46 }
 0x67d   :  { %16932 = vst [vmem:[#allocation151_spill] sm:$0xff] %v14234_v11  ;;  %v2176_v55 = vrot.slane %v2175_v36, 1  ;;  %v2787_v3 = vadd.f32 %v10033_v16, %v2786_v19  ;;  %vm2788_vm1 = vweird.f32 %v14184_v6  ;;  %v4102_v43 = vadd.f32 %v4101_v17, %v3992_v23  ;;  %v16935_v17 = vld [vmem:[#allocation80_spill] sm:$0xff] }
 0x67e   :  { %v14244_v57 = vadd.f32 %v2062_v1, %v2061_v42  ;;  %vm2790_vm2 = vmor %vm2788_vm1, %vm2789_vm0  ;;  %v2795_v62 = vor.u32 1.1754944e-38, %v2794_v44  ;;  %v14246_v40 = vperm.slane %v3678_v4, 0  ;;  %v3084_v12 = vrot.slane %v3083_v9, 1 }
 0x67f   :  { %v2310_v13 = vmax.f32 %v14231_v50, %v14234_v11  ;;  %v2791_v10 = vsel %vm2790_vm2, %v10033_v16, %v2787_v3  ;;  %vm2793_vm3 = vcmp.eq.f32.partialorder %v2792_v41, 8.507059e+37  ;;  %v14251_v14 = vmax.f32 %v5364_v48, %v14237_v25  ;;  %v16936_v16 = vld [vmem:[#allocation48_spill] sm:$0xff]  ;;  %v16941_v41 = vld [vmem:[#allocation79_spill] sm:$0xff]  ;;  %v16942_v48 = vld [vmem:[#allocation145_spill] sm:$0xff] }
 0x680   :  { %16933 = vst [vmem:[#allocation67_spill] sm:$0xff] %v14244_v57  ;;  %v2182_v2 = vrot.slane %v2181_v31, 1  ;;  %v14253_v19 = vsel %vm2793_vm3, %v2795_v62, %v2791_v10  ;;  %10034 = vrcp.f32 %v14246_v40  ;;  %v14256_v42 = vadd.f32 %v2176_v55, %v2175_v36  ;;  %v16944_v62 = vld [vmem:[#allocation146_spill] sm:$0xff] }
 0x681   :  { %v2184_v1 = vrot.slane %v16935_v17, 4  ;;  %v2797_v6 = vmul.f32 %v14073_v18, %v14253_v19  ;;  %v2798_v44 = vmul.f32 %v14079_v33, %v14253_v19  ;;  %v4103_v23 = vrot.slane %v4102_v43, 2 }
 0x682   :  { %16934 = vst [vmem:[#allocation92_spill] sm:$0xff] %v14256_v42  ;;  %v4013_v15 = vmul.f32 %v16927_v53, %v16936_v16  ;;  %v2799_v35 = vmul.f32 %v14084_v20, %v14253_v19  ;;  %v16939_v56 = vmax.f32 %v16937_v37, %v16938_v39  ;;  %v14273_v36 = vadd.f32 %v3084_v12, %v3083_v9  ;;  %v16945_v37 = vld [vmem:[#allocation58_spill] sm:$0xff]  ;;  %v16956_v39 = vld [vmem:[#allocation132_spill] sm:$0xff] }
 0x683   :  { %v14276_v18 = vmax.f32 %v2310_v13, %v14256_v42  ;;  %v2860_v26 = vperm.slane %v2797_v6, 0  ;;  %v2861_v33 = vperm.slane %v2798_v44, 0  ;;  %v3993_v4 = vmul.f32 %v16941_v41, %v16926_v34  ;;  %v16947_v13 = vld [vmem:[#allocation95_spill] sm:$0xff] }
 0x684   :  { %v14271_v8 = vmax.f32 %v16939_v56, %v14244_v57  ;;  %16940 = vst [vmem:[#allocation152_spill] sm:$0xff] %v14273_v36  ;;  %v3184_v55 = vrot.slane %v16942_v48, 2  ;;  %v14281_v3 = vadd.f32 %v2182_v2, %v2181_v31  ;;  %v14284_v20 = vadd.f32 %v2184_v1, %v16935_v17  ;;  %v16948_v44 = vld [vmem:[#allocation103_spill] sm:$0xff]  ;;  %v16949_v17 = vld [vmem:[#allocation156_spill] sm:$0xff]  ;;  %v16950_v1 = vld [vmem:[#allocation157_spill] sm:$0xff] }
 0x685   :  { %v3190_v10 = vrot.slane %v16944_v62, 2  ;;  %v16946_v9 = vrot.slane %v16945_v37, 4  ;;  %v2909_v6 = vmul.f32 %v2860_v26, %v16947_v13  ;;  %v2910_v56 = vmul.f32 %v2861_v33, %v16948_v44 }
 0x686   :  { %16943 = vst [vmem:[#allocation153_spill] sm:$0xff] %v14281_v3  ;;  %v4104_v53 = vadd.f32 %v4103_v23, %v4102_v43  ;;  %v4227_v34 = vrot.slane %v4013_v15, 4  ;;  %v10035_v42 = vpop.eup %10034  ;;  %v2800_v31 = vmul.f32 %v14086_v49, %v14253_v19  ;;  %v2862_v2 = vperm.slane %v2799_v35, 0  ;;  %v16952_v23 = vld [vmem:[#allocation59_spill] sm:$0xff] }
 0x687   :  { %v14290_v12 = vadd.f32 %v16946_v9, %v16945_v37  ;;  %v16951_v11 = vmax.f32 %v16949_v17, %v16950_v1  ;;  %v3799_v26 = vmul.f32 %v10035_v42, %v14246_v40  ;;  %v4107_v9 = vrot.slane %v3993_v4, 4 }
 0x688   :  { %v14306_v43 = vadd.f32 %v3184_v55, %v16942_v48  ;;  %v3200_v33 = vrot.slane %v16952_v23, 4  ;;  %v2953_v44 = vadd.f32 %v2910_v56, %v2909_v6  ;;  %v14311_v35 = vadd.f32 %v3190_v10, %v16944_v62  ;;  %v16953_v55 = vld [vmem:[#allocation111_spill] sm:$0xff] }
 0x689   :  { %v14300_v50 = vmax.f32 %v16951_v11, %v14273_v36  ;;  %v3800_v17 = vsub.f32 1.0, %v3799_v26  ;;  %v4105_v13 = vrot.slane %v4104_v53, 1  ;;  %v4108_v36 = vadd.f32 %v4107_v9, %v3993_v4  ;;  %v16954_v9 = vld [vmem:[#allocation53_spill] sm:$0xff] }
 0x68a   :  { %v14314_v37 = vadd.f32 %v4227_v34, %v4013_v15  ;;  %v2801_v1 = vmul.f32 %v14093_v63, %v14253_v19  ;;  %v2863_v48 = vperm.slane %v2800_v31, 0  ;;  %v2911_v57 = vmul.f32 %v2862_v2, %v16953_v55  ;;  %v16955_v55 = vld [vmem:[#allocation135_spill] sm:$0xff] }
 0x68b   :  { %v3809_v6 = vand.u32 2147483648, %v14246_v40  ;;  %v3801_v56 = vmul.f32 %v10035_v42, %v3800_v17  ;;  %vm3804_vm4 = vweird.f32 %v10035_v42  ;;  %v3807_v62 = vand.u32 2147483647, %v14246_v40 }
 0x68c   :  { %v4109_v10 = vrot.slane %v4108_v36, 2  ;;  %v2954_v49 = vadd.f32 %v2953_v44, %v2911_v57  ;;  %v14324_v15 = vadd.f32 %v3200_v33, %v16952_v23  ;;  %vm3803_vm5 = vweird.f32 %v14246_v40  ;;  %v16962_v23 = vld [vmem:[#allocation87_spill] sm:$0xff] }
 0x68d   :  { %v3802_v34 = vadd.f32 %v10035_v42, %v3801_v56  ;;  %v4106_v63 = vadd.f32 %v4105_v13, %v4104_v53  ;;  %v2864_v2 = vperm.slane %v2801_v1, 0  ;;  %v2912_v17 = vmul.f32 %v2863_v48, %v16954_v9  ;;  %vm3805_vm6 = vmor %vm3803_vm5, %vm3804_vm4 }
 0x68e   :  { %v4110_v31 = vadd.f32 %v4109_v10, %v4108_v36  ;;  %v3810_v11 = vor.u32 1.1754944e-38, %v3809_v6  ;;  %v14330_v57 = vmul.f32 %v16956_v39, %v16955_v55  ;;  %vm3808_vm7 = vcmp.eq.f32.partialorder %v3807_v62, 8.507059e+37 }
 0x68f   :  { %v3806_v44 = vsel %vm3805_vm6, %v10035_v42, %v3802_v34  ;;  %v2802_v33 = vmul.f32 %v14097_v45, %v14253_v19  ;;  %v2955_v40 = vadd.f32 %v2954_v49, %v2912_v17  ;;  %v14337_v36 = vmul.f32 %v16956_v39, %v16909_v60 }
 0x690   :  { %v4111_v4 = vrot.slane %v4110_v31, 1  ;;  %v3811_v53 = vsel %vm3808_vm7, %v3810_v11, %v3806_v44  ;;  %v4333_v42 = vmax.f32 %v14216_v5, %v4106_v63  ;;  %v2913_v6 = vmul.f32 %v2864_v2, %v16897_v51 }
 0x691   :  { %v3812_v13 = vmul.f32 %v14136_v29, %v3811_v53  ;;  %v3813_v1 = vmul.f32 %v14139_v58, %v3811_v53  ;;  %v3814_v48 = vmul.f32 %v14153_v21, %v3811_v53  ;;  %v3815_v56 = vmul.f32 %v14158_v28, %v3811_v53 }
 0x692   :  { %v3816_v45 = vmul.f32 %v14163_v0, %v3811_v53  ;;  %v3817_v49 = vmul.f32 %v14170_v54, %v3811_v53  ;;  %v4112_v34 = vadd.f32 %v4111_v4, %v4110_v31  ;;  %v2803_v29 = vmul.f32 %v14107_v22, %v14253_v19  ;;  %v16957_v31 = vld [vmem:[#allocation127_spill] sm:$0xff]  ;;  %v16958_v22 = vld [vmem:[#allocation121_spill] sm:$0xff] }
 0x693   :  { %v3875_v11 = vperm.slane %v3812_v13, 0  ;;  %v3876_v62 = vperm.slane %v3813_v1, 0  ;;  %v3877_v10 = vperm.slane %v3814_v48, 0  ;;  %v2865_v58 = vperm.slane %v2802_v33, 0  ;;  %v16959_v33 = vld [vmem:[#allocation49_spill] sm:$0xff]  ;;  %v16960_v48 = vld [vmem:[#allocation51_spill] sm:$0xff] }
 0x694   :  { %v2956_v17 = vadd.f32 %v2955_v40, %v2913_v6  ;;  %v3878_v21 = vperm.slane %v3815_v56, 0  ;;  %v3818_v5 = vmul.f32 %v14174_v7, %v3811_v53  ;;  %v4334_v44 = vmax.f32 %v4333_v42, %v4112_v34  ;;  %v16961_v53 = vld [vmem:[#allocation65_spill] sm:$0xff] }
 0x695   :  { %v3924_v2 = vmul.f32 %v3875_v11, %v16901_v24  ;;  %v3925_v28 = vmul.f32 %v3876_v62, %v16902_v38  ;;  %v3879_v0 = vperm.slane %v3816_v45, 0  ;;  %v3880_v26 = vperm.slane %v3817_v49, 0  ;;  %v16990_v38 = vld [vmem:[#allocation148_spill] sm:$0xff] }
 0x696   :  { %v3926_v54 = vmul.f32 %v3877_v10, %v16903_v61  ;;  %v3927_v13 = vmul.f32 %v3878_v21, %v16904_v52  ;;  %v4372_v1 = vsub.f32 %v16957_v31, %v4334_v44  ;;  %v4373_v19 = vsub.f32 %v16958_v22, %v4334_v44  ;;  %v16963_v31 = vld [vmem:[#allocation72_spill] sm:$0xff] }
 0x697   :  { %v3968_v4 = vadd.f32 %v3925_v28, %v3924_v2  ;;  %v4374_v40 = vsub.f32 %v16959_v33, %v4334_v44  ;;  %v4375_v7 = vsub.f32 %v16960_v48, %v4334_v44  ;;  %v4376_v6 = vsub.f32 %v16961_v53, %v4334_v44 }
 0x698   :  { %v4377_v56 = vsub.f32 %v4106_v63, %v4334_v44  ;;  %v4378_v11 = vsub.f32 %v4112_v34, %v4334_v44  ;;  %v4428_v45 = vmul.f32 1.442695, %v4372_v1  ;;  %v4430_v49 = vmul.f32 1.442695, %v4373_v19  ;;  %v16964_v34 = vld [vmem:[#allocation134_spill] sm:$0xff] }
 0x699   :  { %v3969_v42 = vadd.f32 %v3968_v4, %v3926_v54  ;;  %v4432_v62 = vmul.f32 1.442695, %v4374_v40  ;;  %v2866_v10 = vperm.slane %v2803_v29, 0  ;;  %v2914_v21 = vmul.f32 %v2865_v58, %v16962_v23  ;;  %v16965_v58 = vld [vmem:[#allocation141_spill] sm:$0xff]  ;;  %v16969_v40 = vld [vmem:[#allocation86_spill] sm:$0xff] }
 0x69a   :  { %v3881_v2 = vperm.slane %v3818_v5, 0  ;;  %v4434_v28 = vmul.f32 1.442695, %v4375_v7  ;;  %v3928_v39 = vmul.f32 %v3879_v0, %v16963_v31  ;;  %10036 = vpow2.f32 %v4428_v45  ;;  %v16966_v5 = vld [vmem:[#allocation129_spill] sm:$0xff]  ;;  %v16970_v7 = vld [vmem:[#allocation139_spill] sm:$0xff] }
 0x69b   :  { %v3970_v22 = vadd.f32 %v3969_v42, %v3927_v13  ;;  %v4436_v33 = vmul.f32 1.442695, %v4376_v6  ;;  %v2957_v52 = vadd.f32 %v2956_v17, %v2914_v21  ;;  %10038 = vpow2.f32 %v4430_v49  ;;  %v16967_v0 = vld [vmem:[#allocation137_spill] sm:$0xff]  ;;  %v16968_v13 = vld [vmem:[#allocation64_spill] sm:$0xff] }
 0x69c   :  { %v4438_v48 = vmul.f32 1.442695, %v4377_v56  ;;  %v5116_v63 = vrot.slane %v14330_v57, 4  ;;  %v3929_v44 = vmul.f32 %v3880_v26, %v16964_v34  ;;  %10040 = vpow2.f32 %v4432_v62  ;;  %v16979_v23 = vld [vmem:[#allocation81_spill] sm:$0xff] }
 0x69d   :  { %v3971_v54 = vadd.f32 %v3970_v22, %v3928_v39  ;;  %v4440_v4 = vmul.f32 1.442695, %v4378_v11  ;;  %10042 = vpow2.f32 %v4434_v28  ;;  %v5242_v29 = vrot.slane %v14337_v36, 4 }
 0x69e   :  { %v1955_v1 = vmul.f32 %v16966_v5, %v16965_v58  ;;  %v2977_v19 = vmul.f32 %v16968_v13, %v16967_v0  ;;  %v2915_v17 = vmul.f32 %v2866_v10, %v16969_v40  ;;  %v3930_v53 = vmul.f32 %v3881_v2, %v16970_v7 }
 0x69f   :  { %v3972_v6 = vadd.f32 %v3971_v54, %v3929_v44  ;;  %10044 = vpow2.f32 %v4436_v33  ;;  %v16971_v39 = vrot.slane %v14314_v37, 2  ;;  %v16972_v56 = vrot.slane %v14284_v20, 2 }
 0x6a0   :  { %10046 = vpow2.f32 %v4438_v48  ;;  %v16973_v42 = vrot.slane %v14290_v12, 2  ;;  %v14379_v49 = vpop.eup %10036  ;;  %v2958_v62 = vadd.f32 %v2957_v52, %v2915_v17  ;;  %v5117_v21 = vadd.f32 %v5116_v63, %v14330_v57 }
 0x6a1   :  { %v4230_v26 = vadd.f32 %v16971_v39, %v14314_v37  ;;  %v2187_v11 = vadd.f32 %v16972_v56, %v14284_v20  ;;  %v3973_v10 = vadd.f32 %v3972_v6, %v3930_v53  ;;  %10048 = vpow2.f32 %v4440_v4  ;;  %v14382_v2 = vpop.eup %10038 }
 0x6a2   :  { %v3197_v45 = vadd.f32 %v16973_v42, %v14290_v12  ;;  %v5243_v28 = vadd.f32 %v5242_v29, %v14337_v36  ;;  %v16974_v37 = vrot.slane %v14306_v43, 1  ;;  %v16976_v20 = vrot.slane %v14311_v35, 1  ;;  %v14396_v33 = vpop.eup %10040 }
 0x6a3   :  { %v3202_v52 = vrot.slane %v14324_v15, 2  ;;  %v6048_v48 = vpack.c.bf16 %v3973_v10, %v2958_v62  ;;  %v4573_v57 = vrot.slane %v14382_v2, 7  ;;  %v2064_v63 = vrot.slane %v1955_v1, 4  ;;  %v14399_v36 = vpop.eup %10042 }
 0x6a4   :  { %v14388_v22 = vadd.f32 %v16974_v37, %v14306_v43  ;;  %v14393_v12 = vadd.f32 %v16976_v20, %v14311_v35  ;;  %v3086_v44 = vrot.slane %v2977_v19, 4  ;;  %v4575_v54 = vrot.slane %v14396_v33, 6 }
 0x6a5   :  { %v4014_v43 = vmul.f32 %v16941_v41, %v16936_v16  ;;  %v2188_v4 = vrot.slane %v2187_v11, 1  ;;  %v3198_v29 = vrot.slane %v3197_v45, 1  ;;  %v14404_v35 = vpop.eup %10044  ;;  %6304 = vmatpush.bf16.msrb.mxu0 %v6048_v48  ;;  %v4574_v17 = vsel %vm2525_vm9, %v4573_v57, %v14379_v49 }
 0x6a6   :  { %16975 = vst [vmem:[#allocation154_spill] sm:$0xff] %v14388_v22  ;;  %v4577_v53 = vrot.slane %v14399_v36, 5  ;;  %v5118_v6 = vrot.slane %v5117_v21, 2  ;;  %v4231_v39 = vrot.slane %v4230_v26, 1  ;;  %v14409_v56 = vpop.eup %10046  ;;  %v4576_v42 = vsel %vm2528_vm10, %v4575_v54, %v4574_v17 }
 0x6a7   :  { %16977 = vst [vmem:[#allocation155_spill] sm:$0xff] %v14393_v12  ;;  %v4579_v62 = vrot.slane %v14404_v35, 4  ;;  %v4233_v10 = vrot.slane %v4014_v43, 4  ;;  %v5244_v16 = vrot.slane %v5243_v28, 2  ;;  %v14413_v37 = vpop.eup %10048  ;;  %v4581_v48 = vrot.slane %v14409_v56, 3 }
 0x6a8   :  { %v4578_v20 = vsel %vm2531_vm11, %v4577_v53, %v4576_v42  ;;  %v2065_v41 = vadd.f32 %v2064_v63, %v1955_v1  ;;  %v3087_v57 = vadd.f32 %v3086_v44, %v2977_v19  ;;  %v4583_v40 = vrot.slane %v14413_v37, 2 }
 0x6a9   :  { %v4580_v7 = vsel %vm2534_vm12, %v4579_v62, %v4578_v20  ;;  %v4234_v34 = vadd.f32 %v4233_v10, %v4014_v43  ;;  %v14420_v31 = vadd.f32 %v3202_v52, %v14324_v15  ;;  %v5119_v17 = vadd.f32 %v5118_v6, %v5117_v21 }
 0x6aa   :  { %v4582_v54 = vsel %vm2537_vm13, %v4581_v48, %v4580_v7  ;;  %v1956_v61 = vmul.f32 %v16979_v23, %v16965_v58  ;;  %v14425_v51 = vadd.f32 %v2188_v4, %v2187_v11  ;;  %v5245_v19 = vadd.f32 %v5244_v16, %v5243_v28  ;;  %v16982_v7 = vld [vmem:[#allocation74_spill] sm:$0xff]  ;;  %v16983_v4 = vld [vmem:[#allocation45_spill] sm:$0xff]  ;;  %v16984_v28 = vld [vmem:[#allocation128_spill] sm:$0xff] }
 0x6ab   :  { %16978 = vst [vmem:[#allocation66_spill] sm:$0xff] %v14420_v31  ;;  %v4584_v53 = vsel %vm2540_vm14, %v4583_v40, %v4582_v54  ;;  %v4235_v1 = vrot.slane %v4234_v34, 2  ;;  %v14428_v63 = vadd.f32 %v3198_v29, %v3197_v45  ;;  %v14431_v43 = vadd.f32 %v4231_v39, %v4230_v26 }
 0x6ac   :  { %16980 = vst [vmem:[#allocation60_spill] sm:$0xff] %v14425_v51  ;;  %v4659_v44 = vsel %vm2621_vm15, %v4584_v53, 0.0  ;;  %v2066_v15 = vrot.slane %v2065_v41, 2  ;;  %v3088_v52 = vrot.slane %v3087_v57, 2  ;;  %v5008_v21 = vmul.f32 %v16982_v7, %v16955_v55  ;;  %v16985_v55 = vld [vmem:[#allocation91_spill] sm:$0xff] }
 0x6ad   :  { %16981 = vst [vmem:[#allocation108_spill] sm:$0xff] %v14428_v63  ;;  %v4660_v42 = vrot.slane %v4659_v44, 4  ;;  %v4236_v6 = vadd.f32 %v4235_v1, %v4234_v34  ;;  %v5029_v58 = vmul.f32 %v16982_v7, %v16909_v60  ;;  %v5120_v11 = vrot.slane %v5119_v17, 1 }
 0x6ae   :  { %v2070_v40 = vrot.slane %v1956_v61, 4  ;;  %v2997_v45 = vmul.f32 %v16984_v28, %v16983_v4  ;;  %v5122_v39 = vrot.slane %v5008_v21, 4  ;;  %v5246_v10 = vrot.slane %v5245_v19, 1 }
 0x6af   :  { %v4661_v26 = vadd.f32 %v4660_v42, %v4659_v44  ;;  %v4237_v62 = vrot.slane %v4236_v6, 1  ;;  %v5248_v16 = vrot.slane %v5029_v58, 4  ;;  %v2067_v20 = vadd.f32 %v2066_v15, %v2065_v41 }
 0x6b0   :  { %v3089_v48 = vadd.f32 %v3088_v52, %v3087_v57  ;;  %v1976_v34 = vmul.f32 %v16966_v5, %v16985_v55  ;;  %v5123_v60 = vadd.f32 %v5122_v39, %v5008_v21  ;;  %v4351_v1 = vmax.f32 %v14240_v30, %v14431_v43 }
 0x6b1   :  { %v4662_v54 = vrot.slane %v4661_v26, 2  ;;  %v4238_v53 = vadd.f32 %v4237_v62, %v4236_v6  ;;  %v5249_v28 = vadd.f32 %v5248_v16, %v5029_v58  ;;  %v2071_v7 = vadd.f32 %v2070_v40, %v1956_v61  ;;  %v16987_v61 = vld [vmem:[#allocation144_spill] sm:$0xff]  ;;  %v16988_v62 = vld [vmem:[#allocation149_spill] sm:$0xff] }
 0x6b2   :  { %v16986_v44 = vmax.f32 %v14276_v18, %v14281_v3  ;;  %v3206_v29 = vrot.slane %v2997_v45, 4  ;;  %v14451_v57 = vadd.f32 %v5120_v11, %v5119_v17  ;;  %v5124_v15 = vrot.slane %v5123_v60, 2  ;;  %v16989_v18 = vld [vmem:[#allocation147_spill] sm:$0xff] }
 0x6b3   :  { %v4663_v41 = vadd.f32 %v4662_v54, %v4661_v26  ;;  %v4352_v52 = vmax.f32 %v4351_v1, %v4238_v53  ;;  %v14453_v5 = vadd.f32 %v5246_v10, %v5245_v19  ;;  %v2068_v21 = vrot.slane %v2067_v20, 1 }
 0x6b4   :  { %v14449_v42 = vmax.f32 %v16986_v44, %v14425_v51  ;;  %v3090_v6 = vrot.slane %v3089_v48, 1  ;;  %v2190_v39 = vrot.slane %v1976_v34, 4  ;;  %v5125_v58 = vadd.f32 %v5124_v15, %v5123_v60 }
 0x6b5   :  { %v4664_v30 = vrot.slane %v4663_v41, 1  ;;  %v4393_v40 = vsub.f32 %v16987_v61, %v4352_v52  ;;  %v4394_v16 = vsub.f32 %v16988_v62, %v4352_v52  ;;  %v4395_v44 = vsub.f32 %v16989_v18, %v4352_v52 }
 0x6b6   :  { %v4396_v24 = vsub.f32 %v16990_v38, %v4352_v52  ;;  %v5250_v26 = vrot.slane %v5249_v28, 2  ;;  %v2072_v17 = vrot.slane %v2071_v7, 2  ;;  %v5126_v54 = vrot.slane %v5125_v58, 1 }
 0x6b7   :  { %v4665_v11 = vadd.f32 %v4664_v30, %v4663_v41  ;;  %v4397_v19 = vsub.f32 %v14228_v27, %v4352_v52  ;;  %v4470_v10 = vmul.f32 1.442695, %v4393_v40  ;;  %v4398_v1 = vsub.f32 %v14431_v43, %v4352_v52 }
 0x6b8   :  { %v4399_v9 = vsub.f32 %v4238_v53, %v4352_v52  ;;  %v4472_v12 = vmul.f32 1.442695, %v4394_v16  ;;  %v4474_v60 = vmul.f32 1.442695, %v4395_v44  ;;  %v5127_v61 = vadd.f32 %v5126_v54, %v5125_v58  ;;  %v16994_v16 = vld [vmem:[#allocation68_spill] sm:$0xff] }
 0x6b9   :  { %v14461_v15 = vperm.slane %v4665_v11, 0  ;;  %10050 = vpow2.f32 %v4470_v10  ;;  %v4476_v62 = vmul.f32 1.442695, %v4396_v24  ;;  %v5348_v38 = vmax.f32 %v14225_v47, %v14451_v57 }
 0x6ba   :  { %10052 = vpow2.f32 %v4472_v12  ;;  %v5251_v18 = vadd.f32 %v5250_v26, %v5249_v28  ;;  %v14465_v41 = vadd.f32 %v3206_v29, %v2997_v45  ;;  %v4478_v27 = vmul.f32 1.442695, %v4397_v19  ;;  %v16992_v28 = vld [vmem:[#allocation143_spill] sm:$0xff] }
 0x6bb   :  { %10054 = vrcp.f32 %v14461_v15  ;;  %v5366_v43 = vmax.f32 %v14251_v14, %v14453_v5  ;;  %v14470_v53 = vadd.f32 %v2190_v39, %v1976_v34  ;;  %v5349_v52 = vmax.f32 %v5348_v38, %v5127_v61  ;;  %v16993_v29 = vld [vmem:[#allocation71_spill] sm:$0xff]  ;;  %v16995_v39 = vld [vmem:[#allocation98_spill] sm:$0xff] }
 0x6bc   :  { %16991 = vst [vmem:[#allocation46_spill] sm:$0xff] %v14465_v41  ;;  %10056 = vpow2.f32 %v4474_v60  ;;  %v4480_v30 = vmul.f32 1.442695, %v4398_v1  ;;  %v14472_v58 = vadd.f32 %v2068_v21, %v2067_v20  ;;  %v4482_v24 = vmul.f32 1.442695, %v4399_v9 }
 0x6bd   :  { %10058 = vpow2.f32 %v4476_v62  ;;  %v2073_v47 = vadd.f32 %v2072_v17, %v2071_v7  ;;  %v14474_v12 = vadd.f32 %v3090_v6, %v3089_v48  ;;  %v5387_v45 = vsub.f32 %v16992_v28, %v5349_v52 }
 0x6be   :  { %v5388_v40 = vsub.f32 %v16993_v29, %v5349_v52  ;;  %v5389_v44 = vsub.f32 %v16994_v16, %v5349_v52  ;;  %v5252_v26 = vrot.slane %v5251_v18, 1  ;;  %v5390_v34 = vsub.f32 %v16929_v32, %v5349_v52 }
 0x6bf   :  { %v14479_v14 = vpop.eup %10050  ;;  %v5391_v11 = vsub.f32 %v16995_v39, %v5349_v52  ;;  %10060 = vpow2.f32 %v4478_v27  ;;  %v2192_v20 = vrot.slane %v14470_v53, 2  ;;  %v5392_v7 = vsub.f32 %v14451_v57, %v5349_v52 }
 0x6c0   :  { %v14484_v9 = vpop.eup %10052  ;;  %v5445_v48 = vmul.f32 1.442695, %v5388_v40  ;;  %v5447_v21 = vmul.f32 1.442695, %v5389_v44  ;;  %10062 = vpow2.f32 %v4480_v30  ;;  %v4738_v17 = vand.u32 2147483647, %v14461_v15 }
 0x6c1   :  { %v10055_v6 = vpop.eup %10054  ;;  %v4740_v54 = vand.u32 2147483648, %v14461_v15  ;;  %v5443_v19 = vmul.f32 1.442695, %v5387_v45  ;;  %v2074_v10 = vrot.slane %v2073_v47, 1  ;;  %v5393_v60 = vsub.f32 %v5127_v61, %v5349_v52 }
 0x6c2   :  { %v14489_v32 = vpop.eup %10056  ;;  %v4730_v1 = vmul.f32 %v10055_v6, %v14461_v15  ;;  %10064 = vpow2.f32 %v4482_v24  ;;  %v14492_v62 = vadd.f32 %v5252_v26, %v5251_v18  ;;  %v5449_v57 = vmul.f32 1.442695, %v5390_v34 }
 0x6c3   :  { %v14494_v38 = vpop.eup %10058  ;;  %10066 = vpow2.f32 %v5445_v48  ;;  %v4609_v27 = vrot.slane %v14484_v9, 7  ;;  %v4611_v30 = vrot.slane %v14489_v32, 6  ;;  %v5451_v45 = vmul.f32 1.442695, %v5391_v11 }
 0x6c4   :  { %v4731_v28 = vsub.f32 1.0, %v4730_v1  ;;  %10068 = vpow2.f32 %v5447_v21  ;;  %v5453_v29 = vmul.f32 1.442695, %v5392_v7  ;;  %vm4735_vm0 = vweird.f32 %v10055_v6 }
 0x6c5   :  { %v14498_v40 = vpop.eup %10060  ;;  %10070 = vpow2.f32 %v5443_v19  ;;  %v4610_v61 = vsel %vm2525_vm9, %v4609_v27, %v14479_v14  ;;  %v4613_v18 = vrot.slane %v14494_v38, 5  ;;  %v5455_v16 = vmul.f32 1.442695, %v5393_v60 }
 0x6c6   :  { %v14503_v52 = vpop.eup %10062  ;;  %v4732_v24 = vmul.f32 %v10055_v6, %v4731_v28  ;;  %v4612_v44 = vsel %vm2528_vm10, %v4611_v30, %v4610_v61  ;;  %v4615_v26 = vrot.slane %v14498_v40, 4  ;;  %vm4734_vm1 = vweird.f32 %v14461_v15 }
 0x6c7   :  { %10072 = vpow2.f32 %v5449_v57  ;;  %v4614_v34 = vsel %vm2531_vm11, %v4613_v18, %v4612_v44  ;;  %v14510_v39 = vmax.f32 %v5366_v43, %v14492_v62  ;;  %v4617_v21 = vrot.slane %v14503_v52, 3  ;;  %vm4736_vm2 = vmor %vm4734_vm1, %vm4735_vm0 }
 0x6c8   :  { %v14512_v11 = vpop.eup %10064  ;;  %v4733_v7 = vadd.f32 %v10055_v6, %v4732_v24  ;;  %10074 = vpow2.f32 %v5451_v45  ;;  %v4616_v48 = vsel %vm2534_vm12, %v4615_v26, %v4614_v34  ;;  %vm4739_vm3 = vcmp.eq.f32.partialorder %v4738_v17, 8.507059e+37  ;;  %v16997_v34 = vld [vmem:[#allocation97_spill] sm:$0xff] }
 0x6c9   :  { %v14516_v19 = vpop.eup %10066  ;;  %v4741_v15 = vor.u32 1.1754944e-38, %v4740_v54  ;;  %10076 = vpow2.f32 %v5453_v29  ;;  %v14519_v1 = vadd.f32 %v2074_v10, %v2073_v47  ;;  %v4618_v27 = vsel %vm2537_vm13, %v4617_v21, %v4616_v48  ;;  %v16996_v29 = vld [vmem:[#allocation140_spill] sm:$0xff] }
 0x6ca   :  { %v14521_v60 = vpop.eup %10068  ;;  %v4737_v43 = vsel %vm4736_vm2, %v10055_v6, %v4733_v7  ;;  %10078 = vpow2.f32 %v5455_v16  ;;  %v5588_v57 = vrot.slane %v14516_v19, 7  ;;  %v4619_v45 = vrot.slane %v14512_v11, 2 }
 0x6cb   :  { %v14525_v30 = vpop.eup %10070  ;;  %v14527_v28 = vsel %vm4739_vm3, %v4741_v15, %v4737_v43  ;;  %v2296_v17 = vmax.f32 %v14271_v8, %v14472_v58  ;;  %v5590_v10 = vrot.slane %v14521_v60, 6  ;;  %v5408_v61 = vsub.f32 %v16996_v29, %v14510_v39  ;;  %v16999_v29 = vld [vmem:[#allocation105_spill] sm:$0xff] }
 0x6cc   :  { %v4743_v54 = vmul.f32 %v14379_v49, %v14527_v28  ;;  %v4744_v6 = vmul.f32 %v14382_v2, %v14527_v28  ;;  %v5589_v24 = vsel %vm2525_vm9, %v5588_v57, %v14525_v30  ;;  %v4620_v8 = vsel %vm2540_vm14, %v4619_v45, %v4618_v27 }
 0x6cd   :  { %v14540_v18 = vpop.eup %10072  ;;  %v14550_v49 = vadd.f32 %v2192_v20, %v14470_v53  ;;  %v5409_v7 = vsub.f32 %v16997_v34, %v14510_v39  ;;  %v14557_v48 = vmax.f32 %v2296_v17, %v14519_v1  ;;  %v5410_v15 = vsub.f32 %v14205_v59, %v14510_v39 }
 0x6ce   :  { %v14552_v2 = vpop.eup %10074  ;;  %v4862_v44 = vperm.slane %v4743_v54, 0  ;;  %v4863_v26 = vperm.slane %v4744_v6, 0  ;;  %v5411_v43 = vsub.f32 %v14218_v46, %v14510_v39  ;;  %v5412_v53 = vsub.f32 %v14237_v25, %v14510_v39  ;;  %v16998_v6 = vld [vmem:[#allocation99_spill] sm:$0xff] }
 0x6cf   :  { %v14559_v21 = vpop.eup %10076  ;;  %v5413_v20 = vsub.f32 %v14453_v5, %v14510_v39  ;;  %v5591_v27 = vsel %vm2528_vm10, %v5590_v10, %v5589_v24  ;;  %v4680_v45 = vsel %vm2621_vm15, %v4620_v8, 0.0  ;;  %v5414_v17 = vsub.f32 %v14492_v62, %v14510_v39 }
 0x6d0   :  { %v14569_v57 = vpop.eup %10078  ;;  %v5485_v54 = vmul.f32 1.442695, %v5408_v61  ;;  %v4745_v59 = vmul.f32 %v14396_v33, %v14527_v28  ;;  %v14579_v46 = vmul.f32 %v14399_v36, %v14527_v28  ;;  %v14583_v25 = vmul.f32 %v14404_v35, %v14527_v28 }
 0x6d1   :  { %v5592_v5 = vrot.slane %v14540_v18, 5  ;;  %v4911_v10 = vmul.f32 %v4862_v44, %v16998_v6  ;;  %v4912_v24 = vmul.f32 %v4863_v26, %v16999_v29  ;;  %v5594_v62 = vrot.slane %v14552_v2, 4 }
 0x6d2   :  { %v5596_v39 = vrot.slane %v14559_v21, 3  ;;  %v5598_v61 = vrot.slane %v14569_v57, 2  ;;  %v4681_v36 = vrot.slane %v4680_v45, 4  ;;  %v5487_v8 = vmul.f32 1.442695, %v5409_v7 }
 0x6d3   :  { %v5593_v33 = vsel %vm2531_vm11, %v5592_v5, %v5591_v27  ;;  %10080 = vpow2.f32 %v5485_v54  ;;  %v5489_v35 = vmul.f32 1.442695, %v5410_v15  ;;  %v5491_v47 = vmul.f32 1.442695, %v5411_v43 }
 0x6d4   :  { %v5595_v34 = vsel %vm2534_vm12, %v5594_v62, %v5593_v33  ;;  %v4682_v44 = vadd.f32 %v4681_v36, %v4680_v45  ;;  %10082 = vpow2.f32 %v5487_v8  ;;  %v5493_v26 = vmul.f32 1.442695, %v5412_v53  ;;  %v17000_v53 = vld [vmem:[#allocation138_spill] sm:$0xff]  ;;  %v17003_v33 = vld [vmem:[#allocation133_spill] sm:$0xff] }
 0x6d5   :  { %v5597_v16 = vsel %vm2537_vm13, %v5596_v39, %v5595_v34  ;;  %v4864_v22 = vperm.slane %v4745_v59, 0  ;;  %10084 = vpow2.f32 %v5489_v35  ;;  %v5495_v31 = vmul.f32 1.442695, %v5413_v20 }
 0x6d6   :  { %v5599_v63 = vsel %vm2540_vm14, %v5598_v61, %v5597_v16  ;;  %v4683_v5 = vrot.slane %v4682_v44, 2  ;;  %10086 = vpow2.f32 %v5491_v47  ;;  %v5497_v7 = vmul.f32 1.442695, %v5414_v17  ;;  %v17001_v16 = vld [vmem:[#allocation118_spill] sm:$0xff]  ;;  %v17002_v47 = vld [vmem:[#allocation113_spill] sm:$0xff] }
 0x6d7   :  { %v5674_v27 = vsel %vm2621_vm15, %v5599_v63, 0.0  ;;  %v4959_v41 = vadd.f32 %v4912_v24, %v4911_v10  ;;  %10088 = vpow2.f32 %v5493_v26  ;;  %v14598_v15 = vmul.f32 %v16968_v13, %v16983_v4 }
 0x6d8   :  { %v5675_v62 = vrot.slane %v5674_v27, 4  ;;  %v4684_v43 = vadd.f32 %v4683_v5, %v4682_v44  ;;  %10090 = vpow2.f32 %v5495_v31  ;;  %v2336_v45 = vsub.f32 %v17000_v53, %v14557_v48  ;;  %v17005_v53 = vld [vmem:[#allocation67_spill] sm:$0xff] }
 0x6d9   :  { %v2337_v20 = vsub.f32 %v17001_v16, %v14557_v48  ;;  %v14604_v54 = vpop.eup %10080  ;;  %v14608_v63 = vmul.f32 %v14409_v56, %v14527_v28  ;;  %v4913_v17 = vmul.f32 %v4864_v22, %v17002_v47  ;;  %10092 = vpow2.f32 %v5497_v7  ;;  %v17004_v22 = vld [vmem:[#allocation52_spill] sm:$0xff] }
 0x6da   :  { %v5676_v59 = vadd.f32 %v5675_v62, %v5674_v27  ;;  %v14611_v10 = vpop.eup %10082  ;;  %v4865_v31 = vperm.slane %v14579_v46, 0  ;;  %v4866_v24 = vperm.slane %v14583_v25, 0  ;;  %v4685_v39 = vrot.slane %v4684_v43, 1 }
 0x6db   :  { %v2335_v61 = vsub.f32 %v17003_v33, %v14557_v48  ;;  %v14617_v36 = vpop.eup %10084  ;;  %v4960_v8 = vadd.f32 %v4959_v41, %v4913_v17  ;;  %v5624_v56 = vrot.slane %v14611_v10, 7  ;;  %v2338_v35 = vsub.f32 %v17004_v22, %v14557_v48 }
 0x6dc   :  { %v5677_v34 = vrot.slane %v5676_v59, 2  ;;  %v14622_v44 = vpop.eup %10086  ;;  %v4686_v26 = vadd.f32 %v4685_v39, %v4684_v43  ;;  %v5626_v46 = vrot.slane %v14617_v36, 6  ;;  %v2393_v27 = vmul.f32 1.442695, %v2336_v45 }
 0x6dd   :  { %v2395_v25 = vmul.f32 1.442695, %v2337_v20  ;;  %v14625_v5 = vpop.eup %10088  ;;  %v5625_v62 = vsel %vm2525_vm9, %v5624_v56, %v14604_v54  ;;  %v5628_v41 = vrot.slane %v14622_v44, 5  ;;  %v2339_v16 = vsub.f32 %v17005_v53, %v14557_v48  ;;  %v17007_v56 = vld [vmem:[#allocation55_spill] sm:$0xff] }
 0x6de   :  { %v5678_v7 = vadd.f32 %v5677_v34, %v5676_v59  ;;  %v14632_v17 = vpop.eup %10090  ;;  %v14634_v33 = vperm.slane %v4686_v26, 0  ;;  %v5627_v43 = vsel %vm2528_vm10, %v5626_v46, %v5625_v62  ;;  %v2391_v39 = vmul.f32 1.442695, %v2335_v61 }
 0x6df   :  { %10094 = vpow2.f32 %v2393_v27  ;;  %v14637_v45 = vpop.eup %10092  ;;  %v5629_v59 = vsel %vm2531_vm11, %v5628_v41, %v5627_v43  ;;  %v5630_v34 = vrot.slane %v14625_v5, 4  ;;  %v4914_v22 = vmul.f32 %v4865_v31, %v17007_v56 }
 0x6e0   :  { %17006 = vst [vmem:[#allocation69_spill] sm:$0xff] %v14637_v45  ;;  %v5679_v20 = vrot.slane %v5678_v7, 1  ;;  %10096 = vpow2.f32 %v2395_v25  ;;  %v5632_v53 = vrot.slane %v14632_v17, 3  ;;  %v2340_v26 = vsub.f32 %v14472_v58, %v14557_v48 }
 0x6e1   :  { %10098 = vrcp.f32 %v14634_v33  ;;  %v5631_v61 = vsel %vm2534_vm12, %v5630_v34, %v5629_v59  ;;  %v5634_v27 = vrot.slane %v14637_v45, 2  ;;  %v2397_v62 = vmul.f32 1.442695, %v2338_v35 }
 0x6e2   :  { %v5680_v46 = vadd.f32 %v5679_v20, %v5678_v7  ;;  %v4961_v13 = vadd.f32 %v4960_v8, %v4914_v22  ;;  %v5633_v41 = vsel %vm2537_vm13, %v5632_v53, %v5631_v61  ;;  %10100 = vpow2.f32 %v2391_v39  ;;  %v17009_v7 = vld [vmem:[#allocation62_spill] sm:$0xff]  ;;  %v17011_v39 = vld [vmem:[#allocation76_spill] sm:$0xff] }
 0x6e3   :  { %v2194_v25 = vrot.slane %v14550_v49, 1  ;;  %v4867_v31 = vperm.slane %v14608_v63, 0  ;;  %v5635_v51 = vsel %vm2540_vm14, %v5634_v27, %v5633_v41  ;;  %v2399_v3 = vmul.f32 1.442695, %v2339_v16 }
 0x6e4   :  { %v14651_v43 = vperm.slane %v5680_v46, 0  ;;  %v4915_v20 = vmul.f32 %v4866_v24, %v17009_v7  ;;  %v5695_v59 = vsel %vm2621_vm15, %v5635_v51, 0.0  ;;  %v2341_v8 = vsub.f32 %v14519_v1, %v14557_v48  ;;  %v17012_v1 = vld [vmem:[#allocation109_spill] sm:$0xff] }
 0x6e5   :  { %v14654_v58 = vpop.eup %10094  ;;  %10102 = vpow2.f32 %v2397_v62  ;;  %v2401_v63 = vmul.f32 1.442695, %v2340_v26  ;;  %v2978_v34 = vmul.f32 %v17011_v39, %v16967_v0  ;;  %v3212_v16 = vrot.slane %v14598_v15, 4 }
 0x6e6   :  { %17008 = vst [vmem:[#allocation50_spill] sm:$0xff] %v14654_v58  ;;  %v14660_v35 = vpop.eup %10096  ;;  %10104 = vrcp.f32 %v14651_v43  ;;  %v4749_v24 = vmul.f32 %v14413_v37, %v14527_v28  ;;  %v4962_v53 = vadd.f32 %v4961_v13, %v4915_v20  ;;  %v5696_v51 = vrot.slane %v5695_v59, 4 }
 0x6e7   :  { %17010 = vst [vmem:[#allocation57_spill] sm:$0xff] %v14660_v35  ;;  %v10099_v22 = vpop.eup %10098  ;;  %v2542_v46 = vrot.slane %v14654_v58, 7  ;;  %v4916_v48 = vmul.f32 %v4867_v31, %v17012_v1  ;;  %10106 = vpow2.f32 %v2399_v3  ;;  %v14672_v26 = vadd.f32 %v2194_v25, %v14550_v49 }
 0x6e8   :  { %v4793_v61 = vmul.f32 %v10099_v22, %v14634_v33  ;;  %v14674_v27 = vpop.eup %10100  ;;  %v4801_v0 = vand.u32 2147483647, %v14634_v33  ;;  %v5697_v62 = vadd.f32 %v5696_v51, %v5695_v59  ;;  %v2403_v41 = vmul.f32 1.442695, %v2341_v8 }
 0x6e9   :  { %v2544_v37 = vrot.slane %v14660_v35, 6  ;;  %10108 = vpow2.f32 %v2401_v63  ;;  %v2543_v28 = vsel %vm2525_vm9, %v2542_v46, %v14674_v27  ;;  %v3092_v31 = vrot.slane %v2978_v34, 4 }
 0x6ea   :  { %v4794_v13 = vsub.f32 1.0, %v4793_v61  ;;  %v4868_v3 = vperm.slane %v4749_v24, 0  ;;  %v4963_v58 = vadd.f32 %v4962_v53, %v4916_v48  ;;  %v4803_v49 = vand.u32 2147483648, %v14634_v33 }
 0x6eb   :  { %v14680_v20 = vpop.eup %10102  ;;  %v14684_v25 = vadd.f32 %v3212_v16, %v14598_v15  ;;  %vm4798_vm4 = vweird.f32 %v10099_v22  ;;  %v5698_v8 = vrot.slane %v5697_v62, 2  ;;  %v1977_v63 = vmul.f32 %v16979_v23, %v16985_v55 }
 0x6ec   :  { %17013 = vst [vmem:[#allocation136_spill] sm:$0xff] %v14680_v20  ;;  %v10105_v45 = vpop.eup %10104  ;;  %v4795_v59 = vmul.f32 %v10099_v22, %v4794_v13  ;;  %vm4797_vm5 = vweird.f32 %v14634_v33  ;;  %10110 = vpow2.f32 %v2403_v41  ;;  %v2545_v24 = vsel %vm2528_vm10, %v2544_v37, %v2543_v28 }
 0x6ed   :  { %v5745_v51 = vmul.f32 %v10105_v45, %v14651_v43  ;;  %v14691_v53 = vpop.eup %10106  ;;  %vm4802_vm6 = vcmp.eq.f32.partialorder %v4801_v0, 8.507059e+37  ;;  %v2546_v15 = vrot.slane %v14680_v20, 5  ;;  %v3093_v16 = vadd.f32 %v3092_v31, %v2978_v34  ;;  %vm4799_vm7 = vmor %vm4797_vm5, %vm4798_vm4  ;;  %v17014_v31 = vld [vmem:[#allocation119_spill] sm:$0xff] }
 0x6ee   :  { %v4796_v46 = vadd.f32 %v10099_v22, %v4795_v59  ;;  %v5753_v61 = vand.u32 2147483647, %v14651_v43  ;;  %v5755_v13 = vand.u32 2147483648, %v14651_v43  ;;  %v4804_v55 = vor.u32 1.1754944e-38, %v4803_v49 }
 0x6ef   :  { %v5746_v48 = vsub.f32 1.0, %v5745_v51  ;;  %v14697_v23 = vpop.eup %10108  ;;  %v5699_v41 = vadd.f32 %v5698_v8, %v5697_v62  ;;  %v2547_v37 = vsel %vm2531_vm11, %v2546_v15, %v2545_v24  ;;  %v2196_v28 = vrot.slane %v1977_v63, 4 }
 0x6f0   :  { %v4800_v33 = vsel %vm4799_vm7, %v10099_v22, %v4796_v46  ;;  %vm5750_vm0 = vweird.f32 %v10105_v45  ;;  %v2548_v34 = vrot.slane %v14691_v53, 4  ;;  %v4917_v51 = vmul.f32 %v4868_v3, %v17014_v31 }
 0x6f1   :  { %v5747_v59 = vmul.f32 %v10105_v45, %v5746_v48  ;;  %v4805_v0 = vsel %vm4802_vm6, %v4804_v55, %v4800_v33  ;;  %vm5749_vm1 = vweird.f32 %v14651_v43  ;;  %v3094_v20 = vrot.slane %v3093_v16, 2  ;;  %v17018_v33 = vld [vmem:[#allocation56_spill] sm:$0xff] }
 0x6f2   :  { %v14705_v35 = vpop.eup %10110  ;;  %v5756_v62 = vor.u32 1.1754944e-38, %v5755_v13  ;;  %v2549_v8 = vsel %vm2534_vm12, %v2548_v34, %v2547_v37  ;;  %v2550_v24 = vrot.slane %v14697_v23, 3  ;;  %vm5751_vm2 = vmor %vm5749_vm1, %vm5750_vm0  ;;  %v4806_v46 = vmul.f32 %v14479_v14, %v4805_v0 }
 0x6f3   :  { %v5748_v22 = vadd.f32 %v10105_v45, %v5747_v59  ;;  %v4807_v15 = vmul.f32 %v14484_v9, %v4805_v0  ;;  %v5700_v3 = vrot.slane %v5699_v41, 1  ;;  %v2197_v48 = vadd.f32 %v2196_v28, %v1977_v63 }
 0x6f4   :  { %v14711_v43 = vadd.f32 %v4963_v58, %v4917_v51  ;;  %vm5754_vm3 = vcmp.eq.f32.partialorder %v5753_v61, 8.507059e+37  ;;  %v2551_v13 = vsel %vm2537_vm13, %v2550_v24, %v2549_v8  ;;  %v2552_v37 = vrot.slane %v14705_v35, 2 }
 0x6f5   :  { %v5752_v55 = vsel %vm5751_vm2, %v10105_v45, %v5748_v22  ;;  %v3095_v59 = vadd.f32 %v3094_v20, %v3093_v16  ;;  %v4883_v58 = vperm.slane %v4806_v46, 0  ;;  %v4884_v28 = vperm.slane %v4807_v15, 0  ;;  %v17015_v16 = vld [vmem:[#allocation100_spill] sm:$0xff] }
 0x6f6   :  { %v5757_v49 = vsel %vm5754_vm3, %v5756_v62, %v5752_v55  ;;  %v5701_v45 = vadd.f32 %v5700_v3, %v5699_v41  ;;  %v2198_v61 = vrot.slane %v2197_v48, 2  ;;  %v4808_v24 = vmul.f32 %v14489_v32, %v4805_v0  ;;  %v17016_v41 = vld [vmem:[#allocation106_spill] sm:$0xff] }
 0x6f7   :  { %v5758_v34 = vmul.f32 %v14525_v30, %v5757_v49  ;;  %v5759_v14 = vmul.f32 %v14516_v19, %v5757_v49  ;;  %v5760_v9 = vmul.f32 %v14521_v60, %v5757_v49  ;;  %v5761_v63 = vmul.f32 %v14540_v18, %v5757_v49 }
 0x6f8   :  { %v5762_v51 = vmul.f32 %v14552_v2, %v5757_v49  ;;  %v4809_v20 = vmul.f32 %v14494_v38, %v4805_v0  ;;  %v4810_v30 = vmul.f32 %v14498_v40, %v4805_v0  ;;  %v4811_v19 = vmul.f32 %v14503_v52, %v4805_v0 }
 0x6f9   :  { %v5877_v22 = vperm.slane %v5758_v34, 0  ;;  %v5878_v62 = vperm.slane %v5759_v14, 0  ;;  %v5879_v8 = vperm.slane %v5760_v9, 0  ;;  %v5763_v60 = vmul.f32 %v14559_v21, %v5757_v49  ;;  %v17017_v34 = vld [vmem:[#allocation116_spill] sm:$0xff] }
 0x6fa   :  { %v5880_v18 = vperm.slane %v5761_v63, 0  ;;  %v5764_v2 = vmul.f32 %v14569_v57, %v5757_v49  ;;  %v4812_v3 = vmul.f32 %v14512_v11, %v4805_v0  ;;  %v4932_v55 = vmul.f32 %v4883_v58, %v16998_v6 }
 0x6fb   :  { %v5926_v46 = vmul.f32 %v5877_v22, %v17015_v16  ;;  %v5927_v15 = vmul.f32 %v5878_v62, %v17016_v41  ;;  %v4933_v32 = vmul.f32 %v4884_v28, %v16999_v29  ;;  %v5881_v38 = vperm.slane %v5762_v51, 0 }
 0x6fc   :  { %v5928_v40 = vmul.f32 %v5879_v8, %v17017_v34  ;;  %v14733_v52 = vperm.slane %v5701_v45, 0  ;;  %v4885_v21 = vperm.slane %v4808_v24, 0  ;;  %v4886_v9 = vperm.slane %v4809_v20, 0  ;;  %v17019_v45 = vld [vmem:[#allocation63_spill] sm:$0xff] }
 0x6fd   :  { %v5974_v14 = vadd.f32 %v5927_v15, %v5926_v46  ;;  %v2553_v63 = vsel %vm2540_vm14, %v2552_v37, %v2551_v13  ;;  %v3096_v22 = vrot.slane %v3095_v59, 1  ;;  %v5882_v62 = vperm.slane %v5763_v60, 0 }
 0x6fe   :  { %v5929_v57 = vmul.f32 %v5880_v18, %v17018_v33  ;;  %10112 = vrcp.f32 %v14733_v52  ;;  %v4887_v11 = vperm.slane %v4810_v30, 0  ;;  %v4977_v0 = vadd.f32 %v4933_v32, %v4932_v55  ;;  %v17021_v30 = vld [vmem:[#allocation142_spill] sm:$0xff] }
 0x6ff   :  { %v5975_v49 = vadd.f32 %v5974_v14, %v5928_v40  ;;  %v2629_v58 = vsel %vm2621_vm15, %v2553_v63, 0.0  ;;  %v14739_v28 = vadd.f32 %v3096_v22, %v3095_v59  ;;  %v5883_v51 = vperm.slane %v5764_v2, 0  ;;  %v17022_v14 = vld [vmem:[#allocation126_spill] sm:$0xff]  ;;  %v17023_v63 = vld [vmem:[#allocation131_spill] sm:$0xff] }
 0x700   :  { %v5930_v8 = vmul.f32 %v5881_v38, %v17019_v45  ;;  %v2630_v20 = vrot.slane %v2629_v58, 4  ;;  %v4888_v46 = vperm.slane %v4811_v19, 0  ;;  %v4889_v13 = vperm.slane %v4812_v3, 0 }
 0x701   :  { %v5976_v24 = vadd.f32 %v5975_v49, %v5929_v57  ;;  %v4934_v37 = vmul.f32 %v4885_v21, %v17002_v47  ;;  %v17020_v60 = vmax.f32 %v14300_v50, %v14474_v12  ;;  %v5931_v15 = vmul.f32 %v5882_v62, %v17021_v30  ;;  %v17024_v49 = vld [vmem:[#allocation120_spill] sm:$0xff] }
 0x702   :  { %v2631_v32 = vadd.f32 %v2630_v20, %v2629_v58  ;;  %v2199_v59 = vadd.f32 %v2198_v61, %v2197_v48  ;;  %v4935_v2 = vmul.f32 %v4886_v9, %v17007_v56  ;;  %v4936_v38 = vmul.f32 %v4887_v11, %v17009_v7  ;;  %v17025_v61 = vld [vmem:[#allocation90_spill] sm:$0xff] }
 0x703   :  { %v3319_v18 = vmax.f32 %v17020_v60, %v14739_v28  ;;  %v5977_v55 = vadd.f32 %v5976_v24, %v5930_v8  ;;  %v4978_v40 = vadd.f32 %v4977_v0, %v4934_v37  ;;  %v5932_v21 = vmul.f32 %v5883_v51, %v17023_v63  ;;  %v17026_v0 = vld [vmem:[#allocation157_spill] sm:$0xff] }
 0x704   :  { %v10113_v3 = vpop.eup %10112  ;;  %v2632_v57 = vrot.slane %v2631_v32, 2  ;;  %v4937_v60 = vmul.f32 %v4888_v46, %v17012_v1  ;;  %v5816_v48 = vand.u32 2147483647, %v14733_v52  ;;  %v2200_v24 = vrot.slane %v2199_v59, 1  ;;  %v17027_v46 = vld [vmem:[#allocation152_spill] sm:$0xff] }
 0x705   :  { %v3357_v19 = vsub.f32 %v17022_v14, %v3319_v18  ;;  %v5978_v22 = vadd.f32 %v5977_v55, %v5931_v15  ;;  %v3358_v50 = vsub.f32 %v17024_v49, %v3319_v18  ;;  %v5808_v62 = vmul.f32 %v10113_v3, %v14733_v52 }
 0x706   :  { %v3359_v9 = vsub.f32 %v17025_v61, %v3319_v18  ;;  %v2633_v11 = vadd.f32 %v2632_v57, %v2631_v32  ;;  %v3360_v8 = vsub.f32 %v17026_v0, %v3319_v18  ;;  %v4979_v20 = vadd.f32 %v4978_v40, %v4935_v2 }
 0x707   :  { %v5979_v58 = vadd.f32 %v5978_v22, %v5932_v21  ;;  %v5809_v37 = vsub.f32 1.0, %v5808_v62  ;;  %v5818_v51 = vand.u32 2147483648, %v14733_v52  ;;  %v3413_v15 = vmul.f32 1.442695, %v3357_v19 }
 0x708   :  { %v2634_v14 = vrot.slane %v2633_v11, 1  ;;  %v3361_v49 = vsub.f32 %v17027_v46, %v3319_v18  ;;  %v3415_v1 = vmul.f32 1.442695, %v3358_v50  ;;  %vm5813_vm4 = vweird.f32 %v10113_v3  ;;  %v17032_v46 = vld [vmem:[#allocation92_spill] sm:$0xff] }
 0x709   :  { %v6041_v55 = vpack.c.bf16 %v5979_v58, %v14711_v43  ;;  %v5810_v7 = vmul.f32 %v10113_v3, %v5809_v37  ;;  %v3362_v61 = vsub.f32 %v14474_v12, %v3319_v18  ;;  %v3417_v21 = vmul.f32 1.442695, %v3359_v9 }
 0x70a   :  { %v14763_v32 = vmul.f32 %v4889_v13, %v17014_v31  ;;  %v2635_v2 = vadd.f32 %v2634_v14, %v2633_v11  ;;  %v3419_v40 = vmul.f32 1.442695, %v3360_v8  ;;  %v14765_v22 = vadd.f32 %v2200_v24, %v2199_v59 }
 0x70b   :  { %6224 = vmatpush.bf16.msrb.mxu3 %v6041_v55  ;;  %v5811_v19 = vadd.f32 %v10113_v3, %v5810_v7  ;;  %vm5812_vm5 = vweird.f32 %v14733_v52  ;;  %vm5817_vm6 = vcmp.eq.f32.partialorder %v5816_v48, 8.507059e+37  ;;  %10114 = vpow2.f32 %v3413_v15 }
 0x70c   :  { %vm5814_vm7 = vmor %vm5812_vm5, %vm5813_vm4  ;;  %v5819_v43 = vor.u32 1.1754944e-38, %v5818_v51  ;;  %v3363_v57 = vsub.f32 %v14739_v28, %v3319_v18  ;;  %10116 = vpow2.f32 %v3415_v1  ;;  %v3421_v12 = vmul.f32 1.442695, %v3361_v49 }
 0x70d   :  { %v4980_v50 = vadd.f32 %v4979_v20, %v4936_v38  ;;  %v5815_v62 = vsel %vm5814_vm7, %v10113_v3, %v5811_v19  ;;  %10118 = vpow2.f32 %v3417_v21  ;;  %v3423_v13 = vmul.f32 1.442695, %v3362_v61  ;;  %v17033_v61 = vld [vmem:[#allocation153_spill] sm:$0xff]  ;;  %v17034_v19 = vld [vmem:[#allocation60_spill] sm:$0xff] }
 0x70e   :  { %v5820_v9 = vsel %vm5817_vm6, %v5819_v43, %v5815_v62  ;;  %v14769_v58 = vperm.slane %v2635_v2, 0  ;;  %10120 = vpow2.f32 %v3419_v40  ;;  %v17028_v7 = vmax.f32 %v14449_v42, %v14672_v26 }
 0x70f   :  { %v5821_v59 = vmul.f32 %v14604_v54, %v5820_v9  ;;  %v5822_v28 = vmul.f32 %v14611_v10, %v5820_v9  ;;  %v5823_v1 = vmul.f32 %v14617_v36, %v5820_v9  ;;  %v5824_v18 = vmul.f32 %v14622_v44, %v5820_v9  ;;  %v17029_v44 = vld [vmem:[#allocation150_spill] sm:$0xff] }
 0x710   :  { %v14775_v52 = vmax.f32 %v17028_v7, %v14765_v22  ;;  %v5825_v38 = vmul.f32 %v14625_v5, %v5820_v9  ;;  %10122 = vpow2.f32 %v3421_v12  ;;  %v3425_v3 = vmul.f32 1.442695, %v3363_v57 }
 0x711   :  { %v14784_v48 = vmul.f32 %v17011_v39, %v16983_v4  ;;  %v14786_v11 = vpop.eup %10114  ;;  %v5898_v42 = vperm.slane %v5821_v59, 0  ;;  %v5899_v0 = vperm.slane %v5822_v28, 0  ;;  %v5900_v8 = vperm.slane %v5823_v1, 0  ;;  %v17030_v4 = vld [vmem:[#allocation69_spill] sm:$0xff] }
 0x712   :  { %10124 = vpow2.f32 %v3423_v13  ;;  %v14788_v54 = vpop.eup %10116  ;;  %v4981_v10 = vadd.f32 %v4980_v50, %v4937_v60  ;;  %v5826_v36 = vmul.f32 %v14632_v17, %v5820_v9  ;;  %v2356_v5 = vsub.f32 %v17029_v44, %v14775_v52  ;;  %v17031_v60 = vld [vmem:[#allocation151_spill] sm:$0xff] }
 0x713   :  { %10126 = vrcp.f32 %v14769_v58  ;;  %v14794_v24 = vpop.eup %10118  ;;  %v5827_v20 = vmul.f32 %v17030_v4, %v5820_v9  ;;  %v5901_v37 = vperm.slane %v5824_v18, 0  ;;  %v5947_v51 = vmul.f32 %v5898_v42, %v17015_v16  ;;  %v17069_v16 = vld [vmem:[#allocation139_spill] sm:$0xff] }
 0x714   :  { %v5948_v15 = vmul.f32 %v5899_v0, %v17016_v41  ;;  %v14799_v55 = vpop.eup %10120  ;;  %v5902_v14 = vperm.slane %v5825_v38, 0  ;;  %v2357_v17 = vsub.f32 %v17031_v60, %v14775_v52  ;;  %v2358_v49 = vsub.f32 %v17032_v46, %v14775_v52 }
 0x715   :  { %v2359_v21 = vsub.f32 %v17033_v61, %v14775_v52  ;;  %v5949_v2 = vmul.f32 %v5900_v8, %v17017_v34  ;;  %10128 = vpow2.f32 %v3425_v3  ;;  %v2360_v43 = vsub.f32 %v17034_v19, %v14775_v52  ;;  %v17035_v19 = vld [vmem:[#allocation46_spill] sm:$0xff] }
 0x716   :  { %v5992_v40 = vadd.f32 %v5948_v15, %v5947_v51  ;;  %v14810_v57 = vpop.eup %10122  ;;  %v5903_v12 = vperm.slane %v5826_v36, 0  ;;  %v3558_v50 = vrot.slane %v14788_v54, 7  ;;  %v3560_v62 = vrot.slane %v14794_v24, 6 }
 0x717   :  { %v2361_v13 = vsub.f32 %v14672_v26, %v14775_v52  ;;  %v5904_v7 = vperm.slane %v5827_v20, 0  ;;  %v5950_v59 = vmul.f32 %v5901_v37, %v17018_v33  ;;  %v2433_v1 = vmul.f32 1.442695, %v2356_v5 }
 0x718   :  { %v14816_v9 = vpop.eup %10124  ;;  %v5993_v28 = vadd.f32 %v5992_v40, %v5949_v2  ;;  %v5951_v38 = vmul.f32 %v5902_v14, %v17019_v45  ;;  %v3559_v3 = vsel %vm2525_vm9, %v3558_v50, %v14786_v11  ;;  %v3562_v42 = vrot.slane %v14799_v55, 5 }
 0x719   :  { %v14819_v18 = vpop.eup %10126  ;;  %v2435_v0 = vmul.f32 1.442695, %v2357_v17  ;;  %v3561_v26 = vsel %vm2528_vm10, %v3560_v62, %v3559_v3  ;;  %v3564_v36 = vrot.slane %v14810_v57, 4  ;;  %v2437_v44 = vmul.f32 1.442695, %v2358_v49 }
 0x71a   :  { %v5994_v8 = vadd.f32 %v5993_v28, %v5950_v59  ;;  %v5952_v4 = vmul.f32 %v5903_v12, %v17021_v30  ;;  %v3563_v5 = vsel %vm2531_vm11, %v3562_v42, %v3561_v26  ;;  %v3566_v20 = vrot.slane %v14816_v9, 3  ;;  %v17038_v28 = vld [vmem:[#allocation66_spill] sm:$0xff]  ;;  %v17039_v26 = vld [vmem:[#allocation108_spill] sm:$0xff]  ;;  %v17058_v30 = vld [vmem:[#allocation61_spill] sm:$0xff] }
 0x71b   :  { %v2439_v37 = vmul.f32 1.442695, %v2359_v21  ;;  %v14830_v51 = vpop.eup %10128  ;;  %v3565_v14 = vsel %vm2534_vm12, %v3564_v36, %v3563_v5  ;;  %10130 = vpow2.f32 %v2433_v1  ;;  %v2441_v60 = vmul.f32 1.442695, %v2360_v43 }
 0x71c   :  { %v5995_v15 = vadd.f32 %v5994_v8, %v5951_v38  ;;  %v2700_v17 = vmul.f32 %v14819_v18, %v14769_v58  ;;  %v2362_v46 = vsub.f32 %v14765_v22, %v14775_v52  ;;  %10132 = vpow2.f32 %v2435_v0 }
 0x71d   :  { %v2443_v49 = vmul.f32 1.442695, %v2361_v13  ;;  %v5953_v61 = vmul.f32 %v5904_v7, %v17023_v63  ;;  %v3567_v21 = vsel %vm2537_vm13, %v3566_v20, %v3565_v14  ;;  %10134 = vpow2.f32 %v2437_v44  ;;  %v17057_v63 = vld [vmem:[#allocation104_spill] sm:$0xff] }
 0x71e   :  { %v5996_v2 = vadd.f32 %v5995_v15, %v5952_v4  ;;  %v3568_v40 = vrot.slane %v14830_v51, 2  ;;  %10136 = vpow2.f32 %v2439_v37  ;;  %v17036_v43 = vrot.slane %v17035_v19, 2 }
 0x71f   :  { %v17037_v50 = vrot.slane %v14684_v25, 2  ;;  %v4982_v22 = vadd.f32 %v4981_v10, %v14763_v32  ;;  %10138 = vpow2.f32 %v2441_v60  ;;  %v3218_v13 = vrot.slane %v14784_v48, 4  ;;  %v17040_v32 = vld [vmem:[#allocation154_spill] sm:$0xff]  ;;  %v17041_v10 = vld [vmem:[#allocation155_spill] sm:$0xff] }
 0x720   :  { %v3209_v12 = vadd.f32 %v17036_v43, %v17035_v19  ;;  %v5997_v52 = vadd.f32 %v5996_v2, %v5953_v61  ;;  %v2701_v7 = vsub.f32 1.0, %v2700_v17  ;;  %v3569_v59 = vsel %vm2540_vm14, %v3568_v40, %v3567_v21 }
 0x721   :  { %v3215_v62 = vadd.f32 %v17037_v50, %v14684_v25  ;;  %10140 = vpow2.f32 %v2443_v49  ;;  %v3204_v1 = vrot.slane %v17038_v28, 1  ;;  %v14850_v38 = vpop.eup %10130  ;;  %v2445_v42 = vmul.f32 1.442695, %v2362_v46 }
 0x722   :  { %v6047_v3 = vpack.c.bf16 %v5997_v52, %v4982_v22  ;;  %v14852_v0 = vpop.eup %10132  ;;  %v3210_v8 = vrot.slane %v3209_v12, 1  ;;  %v17042_v36 = vmax.f32 %v17040_v32, %v17041_v10  ;;  %v3644_v5 = vsel %vm2621_vm15, %v3569_v59, 0.0 }
 0x723   :  { %v3216_v25 = vrot.slane %v3215_v62, 1  ;;  %v14858_v4 = vpop.eup %10134  ;;  %v3219_v20 = vadd.f32 %v3218_v13, %v14784_v48  ;;  %v2702_v15 = vmul.f32 %v14819_v18, %v2701_v7  ;;  %v14866_v14 = vadd.f32 %v3204_v1, %v17038_v28 }
 0x724   :  { %v3333_v44 = vmax.f32 %v17042_v36, %v17039_v26  ;;  %6305 = vmatpush.bf16.msrb.mxu0 %v6047_v3  ;;  %v14862_v37 = vpop.eup %10136  ;;  %v3645_v17 = vrot.slane %v3644_v5, 4  ;;  %10142 = vpow2.f32 %v2445_v42  ;;  %v2578_v46 = vrot.slane %v14852_v0, 7 }
 0x725   :  { %v14868_v60 = vpop.eup %10138  ;;  %v2580_v61 = vrot.slane %v14858_v4, 6  ;;  %v14874_v2 = vadd.f32 %v3210_v8, %v3209_v12  ;;  %v14876_v48 = vadd.f32 %v3216_v25, %v3215_v62  ;;  %v2582_v43 = vrot.slane %v14862_v37, 5 }
 0x726   :  { %v3334_v21 = vmax.f32 %v3333_v44, %v14866_v14  ;;  %v3646_v40 = vadd.f32 %v3645_v17, %v3644_v5  ;;  %v2579_v19 = vsel %vm2525_vm9, %v2578_v46, %v14850_v38  ;;  %v3220_v50 = vrot.slane %v3219_v20, 2 }
 0x727   :  { %v14871_v49 = vpop.eup %10140  ;;  %v2703_v22 = vadd.f32 %v14819_v18, %v2702_v15  ;;  %vm2705_vm0 = vweird.f32 %v14819_v18  ;;  %v2581_v52 = vsel %vm2528_vm10, %v2580_v61, %v2579_v19  ;;  %v2584_v12 = vrot.slane %v14868_v60, 4  ;;  %v17043_v61 = vld [vmem:[#allocation43_spill] sm:$0xff] }
 0x728   :  { %v3647_v13 = vrot.slane %v3646_v40, 2  ;;  %v2583_v62 = vsel %vm2531_vm11, %v2582_v43, %v2581_v52  ;;  %v2586_v7 = vrot.slane %v14871_v49, 3  ;;  %v3221_v59 = vadd.f32 %v3220_v50, %v3219_v20 }
 0x729   :  { %vm2704_vm1 = vweird.f32 %v14769_v58  ;;  %v2710_v28 = vand.u32 2147483648, %v14769_v58  ;;  %v2585_v1 = vsel %vm2534_vm12, %v2584_v12, %v2583_v62  ;;  %v3335_v3 = vmax.f32 %v3334_v21, %v14874_v2  ;;  %v17044_v21 = vld [vmem:[#allocation73_spill] sm:$0xff] }
 0x72a   :  { %v14892_v42 = vpop.eup %10142  ;;  %v2708_v8 = vand.u32 2147483647, %v14769_v58  ;;  %v3648_v25 = vadd.f32 %v3647_v13, %v3646_v40  ;;  %v2587_v36 = vsel %vm2537_vm13, %v2586_v7, %v2585_v1  ;;  %v3222_v44 = vrot.slane %v3221_v59, 1  ;;  %vm2706_vm2 = vmor %vm2704_vm1, %vm2705_vm0 }
 0x72b   :  { %v2588_v5 = vrot.slane %v14892_v42, 2  ;;  %v2707_v20 = vsel %vm2706_vm2, %v14819_v18, %v2703_v22  ;;  %v3336_v46 = vmax.f32 %v3335_v3, %v14876_v48  ;;  %v14903_v19 = vadd.f32 %v17044_v21, %v17043_v61  ;;  %v17045_v18 = vld [vmem:[#allocation85_spill] sm:$0xff] }
 0x72c   :  { %v3649_v15 = vrot.slane %v3648_v25, 1  ;;  %v3223_v17 = vadd.f32 %v3222_v44, %v3221_v59  ;;  %v2711_v58 = vor.u32 1.1754944e-38, %v2710_v28  ;;  %vm2709_vm3 = vcmp.eq.f32.partialorder %v2708_v8, 8.507059e+37  ;;  %v17046_v8 = vld [vmem:[#allocation50_spill] sm:$0xff] }
 0x72d   :  { %v2589_v40 = vsel %vm2540_vm14, %v2588_v5, %v2587_v36  ;;  %v3981_v22 = vmul.f32 %v17045_v18, %v14903_v19 }
 0x72e   :  { %v3650_v43 = vadd.f32 %v3649_v15, %v3648_v25  ;;  %v2650_v50 = vsel %vm2621_vm15, %v2589_v40, 0.0  ;;  %v3337_v52 = vmax.f32 %v3336_v46, %v3223_v17  ;;  %v14907_v12 = vsel %vm2709_vm3, %v2711_v58, %v2707_v20  ;;  %v17047_v20 = vld [vmem:[#allocation83_spill] sm:$0xff] }
 0x72f   :  { %v2651_v13 = vrot.slane %v2650_v50, 4  ;;  %v2713_v3 = vmul.f32 %v14674_v27, %v14907_v12  ;;  %v2714_v25 = vmul.f32 %v17046_v8, %v14907_v12 }
 0x730   :  { %v14911_v62 = vperm.slane %v3650_v43, 0  ;;  %v3379_v7 = vsub.f32 %v17041_v10, %v3337_v52  ;;  %v3380_v59 = vsub.f32 %v17039_v26, %v3337_v52  ;;  %v3378_v1 = vsub.f32 %v17040_v32, %v3337_v52  ;;  %v17048_v32 = vld [vmem:[#allocation89_spill] sm:$0xff] }
 0x731   :  { %v2652_v28 = vadd.f32 %v2651_v13, %v2650_v50  ;;  %v3381_v44 = vsub.f32 %v14866_v14, %v3337_v52  ;;  %v14924_v10 = vmul.f32 %v17047_v20, %v14903_v19  ;;  %v4035_v26 = vrot.slane %v3981_v22, 4 }
 0x732   :  { %10144 = vrcp.f32 %v14911_v62  ;;  %v3457_v5 = vmul.f32 1.442695, %v3379_v7  ;;  %v3459_v15 = vmul.f32 1.442695, %v3380_v59  ;;  %v14928_v46 = vmul.f32 %v17048_v32, %v14903_v19  ;;  %v17049_v59 = vld [vmem:[#allocation57_spill] sm:$0xff]  ;;  %v17052_v32 = vld [vmem:[#allocation136_spill] sm:$0xff] }
 0x733   :  { %v2653_v36 = vrot.slane %v2652_v28, 2  ;;  %v3382_v61 = vsub.f32 %v14874_v2, %v3337_v52  ;;  %v3455_v21 = vmul.f32 1.442695, %v3378_v1  ;;  %v2832_v58 = vperm.slane %v2713_v3, 0  ;;  %v17050_v3 = vld [vmem:[#allocation95_spill] sm:$0xff] }
 0x734   :  { %v2833_v40 = vperm.slane %v2714_v25, 0  ;;  %v3383_v43 = vsub.f32 %v14876_v48, %v3337_v52  ;;  %10146 = vpow2.f32 %v3457_v5  ;;  %v3384_v50 = vsub.f32 %v3223_v17, %v3337_v52  ;;  %v17051_v25 = vld [vmem:[#allocation103_spill] sm:$0xff] }
 0x735   :  { %v2654_v27 = vadd.f32 %v2653_v36, %v2652_v28  ;;  %10148 = vpow2.f32 %v3459_v15  ;;  %v3461_v13 = vmul.f32 1.442695, %v3381_v44  ;;  %v2715_v8 = vmul.f32 %v17049_v59, %v14907_v12 }
 0x736   :  { %10150 = vpow2.f32 %v3455_v21  ;;  %v3463_v2 = vmul.f32 1.442695, %v3382_v61  ;;  %v14936_v1 = vadd.f32 %v4035_v26, %v3981_v22  ;;  %v2881_v48 = vmul.f32 %v2832_v58, %v17050_v3 }
 0x737   :  { %v2655_v14 = vrot.slane %v2654_v27, 1  ;;  %v2882_v5 = vmul.f32 %v2833_v40, %v17051_v25  ;;  %v3465_v17 = vmul.f32 1.442695, %v3383_v43  ;;  %10152 = vpow2.f32 %v3461_v13 }
 0x738   :  { %v10145_v18 = vpop.eup %10144  ;;  %v3467_v20 = vmul.f32 1.442695, %v3384_v50  ;;  %v2716_v59 = vmul.f32 %v17052_v32, %v14907_v12  ;;  %v3723_v61 = vand.u32 2147483647, %v14911_v62  ;;  %v3725_v22 = vand.u32 2147483648, %v14911_v62 }
 0x739   :  { %v3715_v28 = vmul.f32 %v10145_v18, %v14911_v62  ;;  %v2656_v36 = vadd.f32 %v2655_v14, %v2654_v27  ;;  %v2834_v27 = vperm.slane %v2715_v8, 0  ;;  %vm3720_vm4 = vweird.f32 %v10145_v18 }
 0x73a   :  { %v14941_v15 = vpop.eup %10146  ;;  %10154 = vpow2.f32 %v3463_v2  ;;  %v2929_v40 = vadd.f32 %v2882_v5, %v2881_v48  ;;  %v2717_v13 = vmul.f32 %v14691_v53, %v14907_v12  ;;  %vm3719_vm5 = vweird.f32 %v14911_v62 }
 0x73b   :  { %v3716_v44 = vsub.f32 1.0, %v3715_v28  ;;  %v14947_v26 = vpop.eup %10148  ;;  %v14949_v58 = vperm.slane %v2656_v36, 0  ;;  %10156 = vpow2.f32 %v3465_v17  ;;  %v3594_v43 = vrot.slane %v14941_v15, 7  ;;  %vm3721_vm6 = vmor %vm3719_vm5, %vm3720_vm4  ;;  %v17054_v17 = vld [vmem:[#allocation115_spill] sm:$0xff] }
 0x73c   :  { %v3596_v14 = vrot.slane %v14947_v26, 6  ;;  %v14953_v50 = vpop.eup %10150  ;;  %10158 = vpow2.f32 %v3467_v20  ;;  %v2835_v28 = vperm.slane %v2716_v59, 0  ;;  %v3726_v2 = vor.u32 1.1754944e-38, %v3725_v22 }
 0x73d   :  { %v3717_v21 = vmul.f32 %v10145_v18, %v3716_v44  ;;  %v17053_v44 = vld [vmem:[#allocation111_spill] sm:$0xff]  ;;  %v3595_v48 = vsel %vm2525_vm9, %v3594_v43, %v14953_v50  ;;  %v14961_v5 = vpop.eup %10152  ;;  %v14965_v32 = vmul.f32 %v17054_v17, %v14903_v19  ;;  %vm3724_vm7 = vcmp.eq.f32.partialorder %v3723_v61, 8.507059e+37 }
 0x73e   :  { %v2883_v36 = vmul.f32 %v2834_v27, %v17053_v44  ;;  %10160 = vrcp.f32 %v14949_v58  ;;  %v2718_v53 = vmul.f32 %v14697_v23, %v14907_v12  ;;  %v3597_v59 = vsel %vm2528_vm10, %v3596_v14, %v3595_v48 }
 0x73f   :  { %v3718_v8 = vadd.f32 %v10145_v18, %v3717_v21  ;;  %v2836_v23 = vperm.slane %v2717_v13, 0  ;;  %v3598_v14 = vrot.slane %v14961_v5, 5  ;;  %v17056_v13 = vld [vmem:[#allocation96_spill] sm:$0xff]  ;;  %vm2767_vm1 = vweird.f32 %v14949_v58 }
 0x740   :  { %v2930_v62 = vadd.f32 %v2929_v40, %v2883_v36  ;;  %v14971_v27 = vpop.eup %10154  ;;  %v17055_v40 = vld [vmem:[#allocation53_spill] sm:$0xff] }
 0x741   :  { %v3722_v52 = vsel %vm3721_vm6, %v10145_v18, %v3718_v8  ;;  %v14977_v61 = vpop.eup %10156  ;;  %v2719_v8 = vmul.f32 %v14705_v35, %v14907_v12  ;;  %v3600_v7 = vrot.slane %v14971_v27, 4 }
 0x742   :  { %v3727_v20 = vsel %vm3724_vm7, %v3726_v2, %v3722_v52  ;;  %v2884_v52 = vmul.f32 %v2835_v28, %v17055_v40  ;;  %v14983_v36 = vpop.eup %10158 }
 0x743   :  { %v3728_v22 = vmul.f32 %v14786_v11, %v3727_v20  ;;  %v3729_v21 = vmul.f32 %v14788_v54, %v3727_v20  ;;  %v3730_v43 = vmul.f32 %v14794_v24, %v3727_v20  ;;  %v3731_v18 = vmul.f32 %v14799_v55, %v3727_v20 }
 0x744   :  { %v3732_v11 = vmul.f32 %v14810_v57, %v3727_v20  ;;  %v2837_v24 = vperm.slane %v2718_v53, 0  ;;  %v2931_v17 = vadd.f32 %v2930_v62, %v2884_v52  ;;  %v3599_v55 = vsel %vm2531_vm11, %v3598_v14, %v3597_v59  ;;  %v14988_v39 = vpop.eup %10160 }
 0x745   :  { %v3847_v2 = vperm.slane %v3728_v22, 0  ;;  %v3848_v54 = vperm.slane %v3729_v21, 0  ;;  %v3849_v48 = vperm.slane %v3730_v43, 0  ;;  %v3733_v35 = vmul.f32 %v14816_v9, %v3727_v20  ;;  %v17059_v21 = vld [vmem:[#allocation112_spill] sm:$0xff] }
 0x746   :  { %v3850_v12 = vperm.slane %v3731_v18, 0  ;;  %v2885_v57 = vmul.f32 %v2836_v23, %v17058_v30  ;;  %v3734_v22 = vmul.f32 %v14830_v51, %v3727_v20  ;;  %v3602_v53 = vrot.slane %v14977_v61, 3  ;;  %v17060_v9 = vld [vmem:[#allocation124_spill] sm:$0xff]  ;;  %v17061_v20 = vld [vmem:[#allocation54_spill] sm:$0xff] }
 0x747   :  { %v3896_v28 = vmul.f32 %v3847_v2, %v17056_v13  ;;  %v3897_v31 = vmul.f32 %v3848_v54, %v17057_v63  ;;  %v3604_v62 = vrot.slane %v14983_v36, 2  ;;  %v3851_v59 = vperm.slane %v3732_v11, 0 }
 0x748   :  { %v3898_v43 = vmul.f32 %v3849_v48, %v17059_v21  ;;  %v3601_v14 = vsel %vm2534_vm12, %v3600_v7, %v3599_v55  ;;  %v3984_v18 = vmul.f32 %v17060_v9, %v14903_v19  ;;  %v2932_v2 = vadd.f32 %v2931_v17, %v2885_v57  ;;  %v17063_v55 = vld [vmem:[#allocation130_spill] sm:$0xff]  ;;  %v17064_v57 = vld [vmem:[#allocation72_spill] sm:$0xff] }
 0x749   :  { %v3944_v52 = vadd.f32 %v3897_v31, %v3896_v28  ;;  %v2763_v54 = vmul.f32 %v14988_v39, %v14949_v58  ;;  %v3603_v23 = vsel %vm2537_vm13, %v3602_v53, %v3601_v14  ;;  %v3852_v51 = vperm.slane %v3733_v35, 0  ;;  %v17062_v28 = vld [vmem:[#allocation87_spill] sm:$0xff] }
 0x74a   :  { %v3899_v45 = vmul.f32 %v3850_v12, %v17061_v20  ;;  %v3605_v11 = vsel %vm2540_vm14, %v3604_v62, %v3603_v23  ;;  %v4047_v48 = vrot.slane %v14965_v32, 4  ;;  %v2838_v31 = vperm.slane %v2719_v8, 0 }
 0x74b   :  { %v3945_v33 = vadd.f32 %v3944_v52, %v3898_v43  ;;  %v2886_v7 = vmul.f32 %v2837_v24, %v17062_v28  ;;  %v3985_v9 = vmul.f32 %v17063_v55, %v14903_v19  ;;  %v3853_v17 = vperm.slane %v3734_v22, 0  ;;  %v17067_v24 = vld [vmem:[#allocation134_spill] sm:$0xff] }
 0x74c   :  { %v3900_v34 = vmul.f32 %v3851_v59, %v17064_v57  ;;  %v3665_v53 = vsel %vm2621_vm15, %v3605_v11, 0.0  ;;  %v17065_v35 = vrot.slane %v14924_v10, 4  ;;  %v17066_v62 = vrot.slane %v14928_v46, 4 }
 0x74d   :  { %v3946_v41 = vadd.f32 %v3945_v33, %v3899_v45  ;;  %v2764_v8 = vsub.f32 1.0, %v2763_v54  ;;  %v2933_v52 = vadd.f32 %v2932_v2, %v2886_v7  ;;  %v3901_v14 = vmul.f32 %v3852_v51, %v17067_v24  ;;  %v17068_v45 = vld [vmem:[#allocation86_spill] sm:$0xff] }
 0x74e   :  { %v4030_v12 = vadd.f32 %v17065_v35, %v14924_v10  ;;  %v4042_v43 = vadd.f32 %v17066_v62, %v14928_v46  ;;  %v4053_v55 = vrot.slane %v3984_v18, 4  ;;  %v4037_v22 = vrot.slane %v14936_v1, 2 }
 0x74f   :  { %v3947_v23 = vadd.f32 %v3946_v41, %v3900_v34  ;;  %v3666_v59 = vrot.slane %v3665_v53, 4  ;;  %v4048_v33 = vadd.f32 %v4047_v48, %v14965_v32  ;;  %v2887_v11 = vmul.f32 %v2838_v31, %v17068_v45 }
 0x750   :  { %v3902_v56 = vmul.f32 %v3853_v17, %v17069_v16  ;;  %v4059_v35 = vrot.slane %v3985_v9, 4  ;;  %v4031_v47 = vrot.slane %v4030_v12, 2  ;;  %v2765_v46 = vmul.f32 %v14988_v39, %v2764_v8 }
 0x751   :  { %v3948_v10 = vadd.f32 %v3947_v23, %v3901_v14  ;;  %v2934_v54 = vadd.f32 %v2933_v52, %v2887_v11  ;;  %v4043_v7 = vrot.slane %v4042_v43, 2  ;;  %v4054_v51 = vadd.f32 %v4053_v55, %v3984_v18 }
 0x752   :  { %v3667_v41 = vadd.f32 %v3666_v59, %v3665_v53  ;;  %v4038_v34 = vadd.f32 %v4037_v22, %v14936_v1  ;;  %v4049_v29 = vrot.slane %v4048_v33, 2  ;;  %v4060_v6 = vadd.f32 %v4059_v35, %v3985_v9 }
 0x753   :  { %v3949_v2 = vadd.f32 %v3948_v10, %v3902_v56  ;;  %v2766_v32 = vadd.f32 %v14988_v39, %v2765_v46  ;;  %vm2768_vm0 = vweird.f32 %v14988_v39  ;;  %v2773_v31 = vand.u32 2147483648, %v14949_v58  ;;  %v17070_v10 = vld [vmem:[#allocation79_spill] sm:$0xff] }
 0x754   :  { %v3668_v48 = vrot.slane %v3667_v41, 2  ;;  %v4032_v17 = vadd.f32 %v4031_v47, %v4030_v12  ;;  %v4044_v8 = vadd.f32 %v4043_v7, %v4042_v43  ;;  %v4055_v52 = vrot.slane %v4054_v51, 2  ;;  %vm2769_vm2 = vmor %vm2767_vm1, %vm2768_vm0 }
 0x755   :  { %v6040_v62 = vpack.c.bf16 %v3949_v2, %v2934_v54  ;;  %v2771_v56 = vand.u32 2147483647, %v14949_v58  ;;  %v4039_v1 = vrot.slane %v4038_v34, 1  ;;  %v4050_v53 = vadd.f32 %v4049_v29, %v4048_v33 }
 0x756   :  { %v3669_v18 = vadd.f32 %v3668_v48, %v3667_v41  ;;  %v4061_v9 = vrot.slane %v4060_v6, 2  ;;  %v2770_v14 = vsel %vm2769_vm2, %v14988_v39, %v2766_v32  ;;  %v2774_v55 = vor.u32 1.1754944e-38, %v2773_v31 }
 0x757   :  { %6225 = vmatpush.bf16.msrb.mxu3 %v6040_v62  ;;  %v4033_v22 = vrot.slane %v4032_v17, 1  ;;  %v4045_v59 = vrot.slane %v4044_v8, 1  ;;  %v4056_v11 = vadd.f32 %v4055_v52, %v4054_v51  ;;  %vm2772_vm3 = vcmp.eq.f32.partialorder %v2771_v56, 8.507059e+37 }
 0x758   :  { %v3670_v23 = vrot.slane %v3669_v18, 1  ;;  %v15031_v12 = vadd.f32 %v4039_v1, %v4038_v34  ;;  %v2775_v43 = vsel %vm2772_vm3, %v2774_v55, %v2770_v14  ;;  %v3986_v58 = vmul.f32 %v17070_v10, %v14903_v19 }
 0x759   :  { %v4051_v35 = vrot.slane %v4050_v53, 1  ;;  %v4062_v46 = vadd.f32 %v4061_v9, %v4060_v6  ;;  %v15035_v29 = vadd.f32 %v4033_v22, %v4032_v17  ;;  %v15037_v33 = vadd.f32 %v4045_v59, %v4044_v8 }
 0x75a   :  { %v3671_v47 = vadd.f32 %v3670_v23, %v3669_v18  ;;  %v4057_v39 = vrot.slane %v4056_v11, 1  ;;  %v2776_v2 = vmul.f32 %v14850_v38, %v2775_v43  ;;  %v2777_v7 = vmul.f32 %v14852_v0, %v2775_v43 }
 0x75b   :  { %v15041_v51 = vadd.f32 %v4051_v35, %v4050_v53  ;;  %v4063_v41 = vrot.slane %v4062_v46, 1  ;;  %v4065_v34 = vrot.slane %v3986_v58, 4  ;;  %v4323_v19 = vmax.f32 %v15035_v29, %v15031_v12 }
 0x75c   :  { %v3690_v54 = vperm.slane %v3671_v47, 0  ;;  %v15045_v62 = vadd.f32 %v4057_v39, %v4056_v11  ;;  %v2853_v48 = vperm.slane %v2776_v2, 0  ;;  %v2854_v31 = vperm.slane %v2777_v7, 0  ;;  %v17071_v7 = vld [vmem:[#allocation44_spill] sm:$0xff] }
 0x75d   :  { %v4066_v6 = vadd.f32 %v4065_v34, %v3986_v58  ;;  %v4324_v32 = vmax.f32 %v4323_v19, %v15037_v33  ;;  %v15048_v17 = vadd.f32 %v4063_v41, %v4062_v46  ;;  %v2778_v52 = vmul.f32 %v14858_v4, %v2775_v43  ;;  %v17072_v41 = vld [vmem:[#allocation75_spill] sm:$0xff] }
 0x75e   :  { %10162 = vrcp.f32 %v3690_v54  ;;  %v2902_v53 = vmul.f32 %v2853_v48, %v17050_v3  ;;  %v2903_v9 = vmul.f32 %v2854_v31, %v17051_v25  ;;  %v2779_v22 = vmul.f32 %v14862_v37, %v2775_v43 }
 0x75f   :  { %v4067_v38 = vrot.slane %v4066_v6, 2  ;;  %v4325_v0 = vmax.f32 %v4324_v32, %v15041_v51  ;;  %v2780_v59 = vmul.f32 %v14868_v60, %v2775_v43  ;;  %v2855_v11 = vperm.slane %v2778_v52, 0 }
 0x760   :  { %v3788_v47 = vand.u32 2147483648, %v3690_v54  ;;  %v3786_v4 = vand.u32 2147483647, %v3690_v54  ;;  %v2781_v35 = vmul.f32 %v14871_v49, %v2775_v43  ;;  %v2947_v46 = vadd.f32 %v2903_v9, %v2902_v53 }
 0x761   :  { %v4068_v18 = vadd.f32 %v4067_v38, %v4066_v6  ;;  %v4326_v1 = vmax.f32 %v4325_v0, %v15045_v62  ;;  %vm3782_vm5 = vweird.f32 %v3690_v54  ;;  %v15066_v37 = vadd.f32 %v17072_v41, %v17071_v7 }
 0x762   :  { %v2856_v60 = vperm.slane %v2779_v22, 0  ;;  %v2904_v34 = vmul.f32 %v2855_v11, %v17053_v44  ;;  %v3789_v19 = vor.u32 1.1754944e-38, %v3788_v47  ;;  %v15070_v6 = vmul.f32 %v14892_v42, %v2775_v43 }
 0x763   :  { %v4069_v23 = vrot.slane %v4068_v18, 1  ;;  %v4327_v55 = vmax.f32 %v4326_v1, %v15048_v17  ;;  %v2857_v32 = vperm.slane %v2780_v59, 0  ;;  %vm3787_vm7 = vcmp.eq.f32.partialorder %v3786_v4, 8.507059e+37 }
 0x764   :  { %v10163_v8 = vpop.eup %10162  ;;  %v2858_v48 = vperm.slane %v2781_v35, 0  ;;  %v2905_v42 = vmul.f32 %v2856_v60, %v17055_v40  ;;  %v2859_v7 = vperm.slane %v15070_v6, 0 }
 0x765   :  { %v3778_v56 = vmul.f32 %v10163_v8, %v3690_v54  ;;  %vm3783_vm4 = vweird.f32 %v10163_v8  ;;  %v15058_v58 = vadd.f32 %v4069_v23, %v4068_v18  ;;  %v2948_v54 = vadd.f32 %v2947_v46, %v2904_v34 }
 0x766   :  { %vm3784_vm6 = vmor %vm3782_vm5, %vm3783_vm4  ;;  %v2907_v41 = vmul.f32 %v2858_v48, %v17062_v28  ;;  %v17074_v48 = vld [vmem:[#allocation94_spill] sm:$0xff] }
 0x767   :  { %v3779_v14 = vsub.f32 1.0, %v3778_v56  ;;  %v15062_v2 = vmax.f32 %v4327_v55, %v15058_v58 }
 0x769   :  { %v3780_v10 = vmul.f32 %v10163_v8, %v3779_v14  ;;  %v4365_v38 = vsub.f32 %v15035_v29, %v15062_v2  ;;  %v4367_v1 = vsub.f32 %v15037_v33, %v15062_v2 }
 0x76b   :  { %v3781_v39 = vadd.f32 %v10163_v8, %v3780_v10  ;;  %v4414_v14 = vmul.f32 1.442695, %v4365_v38  ;;  %v4418_v10 = vmul.f32 1.442695, %v4367_v1 }
 0x76d   :  { %v3785_v49 = vsel %vm3784_vm6, %v10163_v8, %v3781_v39  ;;  %v4366_v8 = vsub.f32 %v15031_v12, %v15062_v2  ;;  %10164 = vpow2.f32 %v4414_v14 }
 0x76e   :  { %v3790_v31 = vsel %vm3787_vm7, %v3789_v19, %v3785_v49 }
 0x76f   :  { %v3791_v0 = vmul.f32 %v14953_v50, %v3790_v31  ;;  %v3792_v52 = vmul.f32 %v14941_v15, %v3790_v31  ;;  %v3793_v56 = vmul.f32 %v14947_v26, %v3790_v31  ;;  %v3794_v18 = vmul.f32 %v14961_v5, %v3790_v31 }
 0x770   :  { %v3795_v43 = vmul.f32 %v14971_v27, %v3790_v31  ;;  %v4368_v15 = vsub.f32 %v15041_v51, %v15062_v2  ;;  %v2906_v26 = vmul.f32 %v2857_v32, %v17058_v30  ;;  %v2949_v50 = vadd.f32 %v2948_v54, %v2905_v42 }
 0x771   :  { %v3868_v53 = vperm.slane %v3791_v0, 0  ;;  %v3869_v29 = vperm.slane %v3792_v52, 0  ;;  %v3870_v9 = vperm.slane %v3793_v56, 0  ;;  %v4369_v5 = vsub.f32 %v15045_v62, %v15062_v2 }
 0x772   :  { %v3796_v27 = vmul.f32 %v14977_v61, %v3790_v31  ;;  %v3871_v23 = vperm.slane %v3794_v18, 0  ;;  %v3797_v55 = vmul.f32 %v14983_v36, %v3790_v31  ;;  %v3872_v22 = vperm.slane %v3795_v43, 0 }
 0x773   :  { %v3917_v12 = vmul.f32 %v3868_v53, %v17056_v13  ;;  %v3918_v33 = vmul.f32 %v3869_v29, %v17057_v63  ;;  %v3919_v59 = vmul.f32 %v3870_v9, %v17059_v21  ;;  %v4370_v51 = vsub.f32 %v15048_v17, %v15062_v2  ;;  %v15105_v38 = vpop.eup %10164 }
 0x774   :  { %v4416_v47 = vmul.f32 1.442695, %v4366_v8  ;;  %v4420_v62 = vmul.f32 1.442695, %v4368_v15  ;;  %v2950_v4 = vadd.f32 %v2949_v50, %v2906_v26  ;;  %v4371_v61 = vsub.f32 %v15058_v58, %v15062_v2  ;;  %v17073_v58 = vld [vmem:[#allocation102_spill] sm:$0xff]  ;;  %v17075_v8 = vld [vmem:[#allocation107_spill] sm:$0xff] }
 0x775   :  { %v3962_v11 = vadd.f32 %v3918_v33, %v3917_v12  ;;  %v4422_v35 = vmul.f32 1.442695, %v4369_v5  ;;  %v3873_v46 = vperm.slane %v3796_v27, 0  ;;  %v3920_v39 = vmul.f32 %v3871_v23, %v17061_v20  ;;  %v17076_v5 = vld [vmem:[#allocation117_spill] sm:$0xff] }
 0x776   :  { %10166 = vpow2.f32 %v4416_v47  ;;  %v4424_v17 = vmul.f32 1.442695, %v4370_v51  ;;  %v3874_v60 = vperm.slane %v3797_v55, 0  ;;  %v3921_v34 = vmul.f32 %v3872_v22, %v17064_v57  ;;  %v17077_v47 = vld [vmem:[#allocation125_spill] sm:$0xff] }
 0x777   :  { %v3963_v36 = vadd.f32 %v3962_v11, %v3919_v59  ;;  %10168 = vpow2.f32 %v4418_v10  ;;  %v4996_v2 = vmul.f32 %v17073_v58, %v15066_v37  ;;  %v2951_v32 = vadd.f32 %v2950_v4, %v2907_v41 }
 0x778   :  { %10170 = vpow2.f32 %v4420_v62  ;;  %v3922_v49 = vmul.f32 %v3873_v46, %v17067_v24  ;;  %v4426_v31 = vmul.f32 1.442695, %v4371_v61  ;;  %v4995_v0 = vmul.f32 %v17074_v48, %v15066_v37  ;;  %v17078_v61 = vld [vmem:[#allocation132_spill] sm:$0xff] }
 0x779   :  { %v3964_v19 = vadd.f32 %v3963_v36, %v3920_v39  ;;  %10172 = vpow2.f32 %v4422_v35  ;;  %v2908_v52 = vmul.f32 %v2859_v7, %v17068_v45  ;;  %v3923_v56 = vmul.f32 %v3874_v60, %v17069_v16 }
 0x77a   :  { %10174 = vpow2.f32 %v4424_v17  ;;  %v5050_v43 = vrot.slane %v4996_v2, 4  ;;  %v4997_v1 = vmul.f32 %v17075_v8, %v15066_v37  ;;  %v4998_v14 = vmul.f32 %v17076_v5, %v15066_v37  ;;  %v17079_v5 = vld [vmem:[#allocation74_spill] sm:$0xff] }
 0x77b   :  { %v3965_v54 = vadd.f32 %v3964_v19, %v3921_v34  ;;  %v2952_v9 = vadd.f32 %v2951_v32, %v2908_v52  ;;  %10176 = vpow2.f32 %v4426_v31  ;;  %v5044_v12 = vrot.slane %v4995_v0, 4 }
 0x77c   :  { %v15107_v6 = vpop.eup %10166  ;;  %v5056_v59 = vrot.slane %v4997_v1, 4  ;;  %v4999_v10 = vmul.f32 %v17077_v47, %v15066_v37  ;;  %v5051_v62 = vadd.f32 %v5050_v43, %v4996_v2  ;;  %v5000_v35 = vmul.f32 %v17078_v61, %v15066_v37 }
 0x77d   :  { %v3966_v18 = vadd.f32 %v3965_v54, %v3922_v49  ;;  %v15113_v42 = vpop.eup %10168  ;;  %v4561_v53 = vrot.slane %v15107_v6, 7  ;;  %v5062_v46 = vrot.slane %v4998_v14, 4  ;;  %v5045_v36 = vadd.f32 %v5044_v12, %v4995_v0 }
 0x77e   :  { %v15118_v29 = vpop.eup %10170  ;;  %v4563_v26 = vrot.slane %v15113_v42, 6  ;;  %v5057_v41 = vadd.f32 %v5056_v59, %v4997_v1  ;;  %v5068_v17 = vrot.slane %v4999_v10, 4  ;;  %v5052_v34 = vrot.slane %v5051_v62, 2 }
 0x77f   :  { %v3967_v15 = vadd.f32 %v3966_v18, %v3923_v56  ;;  %v15121_v50 = vpop.eup %10172  ;;  %v4562_v27 = vsel %vm2525_vm9, %v4561_v53, %v15105_v38  ;;  %v4565_v23 = vrot.slane %v15118_v29, 5  ;;  %v5063_v58 = vadd.f32 %v5062_v46, %v4998_v14 }
 0x780   :  { %v4564_v55 = vsel %vm2528_vm10, %v4563_v26, %v4562_v27  ;;  %v15129_v22 = vpop.eup %10174  ;;  %v4567_v11 = vrot.slane %v15121_v50, 4  ;;  %v5074_v2 = vrot.slane %v5000_v35, 4  ;;  %v5046_v32 = vrot.slane %v5045_v36, 2 }
 0x781   :  { %v6046_v33 = vpack.c.bf16 %v3967_v15, %v2952_v9  ;;  %v4566_v51 = vsel %vm2531_vm11, %v4565_v23, %v4564_v55  ;;  %v15138_v39 = vpop.eup %10176  ;;  %v4569_v7 = vrot.slane %v15129_v22, 3  ;;  %v5058_v54 = vrot.slane %v5057_v41, 2 }
 0x782   :  { %v4568_v4 = vsel %vm2534_vm12, %v4567_v11, %v4566_v51  ;;  %v4571_v19 = vrot.slane %v15138_v39, 2  ;;  %v5069_v31 = vadd.f32 %v5068_v17, %v4999_v10  ;;  %v5053_v48 = vadd.f32 %v5052_v34, %v5051_v62 }
 0x783   :  { %6306 = vmatpush.bf16.msrb.mxu0 %v6046_v33  ;;  %v4570_v60 = vsel %vm2537_vm13, %v4569_v7, %v4568_v4  ;;  %v5064_v52 = vrot.slane %v5063_v58, 2  ;;  %v5075_v56 = vadd.f32 %v5074_v2, %v5000_v35  ;;  %v5047_v18 = vadd.f32 %v5046_v32, %v5045_v36 }
 0x784   :  { %v4572_v49 = vsel %vm2540_vm14, %v4571_v19, %v4570_v60  ;;  %v5059_v43 = vadd.f32 %v5058_v54, %v5057_v41  ;;  %v5070_v8 = vrot.slane %v5069_v31, 2  ;;  %v5054_v1 = vrot.slane %v5053_v48, 1 }
 0x785   :  { %v4652_v0 = vsel %vm2621_vm15, %v4572_v49, 0.0  ;;  %v5065_v9 = vadd.f32 %v5064_v52, %v5063_v58  ;;  %v5076_v15 = vrot.slane %v5075_v56, 2  ;;  %v5048_v26 = vrot.slane %v5047_v18, 1 }
 0x786   :  { %v4653_v53 = vrot.slane %v4652_v0, 4  ;;  %v5001_v14 = vmul.f32 %v17079_v5, %v15066_v37  ;;  %v5060_v27 = vrot.slane %v5059_v43, 1  ;;  %v5071_v23 = vadd.f32 %v5070_v8, %v5069_v31 }
 0x787   :  { %v5055_v12 = vadd.f32 %v5054_v1, %v5053_v48  ;;  %v5066_v55 = vrot.slane %v5065_v9, 1  ;;  %v5077_v59 = vadd.f32 %v5076_v15, %v5075_v56  ;;  %v5049_v51 = vadd.f32 %v5048_v26, %v5047_v18 }
 0x788   :  { %v4654_v33 = vadd.f32 %v4653_v53, %v4652_v0  ;;  %v5061_v11 = vadd.f32 %v5060_v27, %v5059_v43  ;;  %v5072_v47 = vrot.slane %v5071_v23, 1  ;;  %v5080_v10 = vrot.slane %v5001_v14, 4  ;;  %v17080_v27 = vld [vmem:[#allocation41_spill] sm:$0xff] }
 0x789   :  { %v5338_v62 = vmax.f32 %v5049_v51, %v5055_v12  ;;  %v5067_v61 = vadd.f32 %v5066_v55, %v5065_v9  ;;  %v5078_v35 = vrot.slane %v5077_v59, 1  ;;  %v17082_v55 = vld [vmem:[#allocation84_spill] sm:$0xff] }
 0x78a   :  { %v4655_v4 = vrot.slane %v4654_v33, 2  ;;  %v5081_v46 = vadd.f32 %v5080_v10, %v5001_v14  ;;  %v5073_v36 = vadd.f32 %v5072_v47, %v5071_v23  ;;  %v17081_v23 = vld [vmem:[#allocation78_spill] sm:$0xff] }
 0x78b   :  { %v5339_v41 = vmax.f32 %v5338_v62, %v5061_v11  ;;  %v5079_v37 = vadd.f32 %v5078_v35, %v5077_v59  ;;  %v17083_v47 = vld [vmem:[#allocation82_spill] sm:$0xff]  ;;  %v17084_v62 = vld [vmem:[#allocation88_spill] sm:$0xff] }
 0x78c   :  { %v5082_v7 = vrot.slane %v5081_v46, 2  ;;  %v4656_v17 = vadd.f32 %v4655_v4, %v4654_v33  ;;  %v15152_v33 = vadd.f32 %v17081_v23, %v17080_v27 }
 0x78d   :  { %v5340_v34 = vmax.f32 %v5339_v41, %v5067_v61 }
 0x78e   :  { %v5083_v60 = vadd.f32 %v5082_v7, %v5081_v46  ;;  %v4657_v2 = vrot.slane %v4656_v17, 1  ;;  %v1944_v59 = vmul.f32 %v17082_v55, %v15152_v33  ;;  %v1943_v10 = vmul.f32 %v17083_v47, %v15152_v33 }
 0x78f   :  { %v5341_v58 = vmax.f32 %v5340_v34, %v5073_v36  ;;  %v1945_v4 = vmul.f32 %v17084_v62, %v15152_v33 }
 0x790   :  { %v5084_v19 = vrot.slane %v5083_v60, 1  ;;  %v4658_v31 = vadd.f32 %v4657_v2, %v4656_v17  ;;  %v1998_v46 = vrot.slane %v1944_v59, 4 }
 0x791   :  { %v5342_v49 = vmax.f32 %v5341_v58, %v5079_v37  ;;  %v2004_v58 = vrot.slane %v1945_v4, 4 }
 0x792   :  { %v5085_v32 = vadd.f32 %v5084_v19, %v5083_v60  ;;  %v15147_v52 = vperm.slane %v4658_v31, 0  ;;  %v1992_v19 = vrot.slane %v1943_v10, 4 }
 0x793   :  { %v2005_v27 = vadd.f32 %v2004_v58, %v1945_v4 }
 0x794   :  { %v5343_v54 = vmax.f32 %v5342_v49, %v5085_v32  ;;  %10178 = vrcp.f32 %v15147_v52  ;;  %vm4713_vm1 = vweird.f32 %v15147_v52 }
 0x796   :  { %v5380_v48 = vsub.f32 %v5049_v51, %v5343_v54  ;;  %v5381_v56 = vsub.f32 %v5055_v12, %v5343_v54  ;;  %v5382_v0 = vsub.f32 %v5061_v11, %v5343_v54  ;;  %v5383_v18 = vsub.f32 %v5067_v61, %v5343_v54 }
 0x797   :  { %v5384_v43 = vsub.f32 %v5073_v36, %v5343_v54  ;;  %v5385_v1 = vsub.f32 %v5079_v37, %v5343_v54  ;;  %v5386_v53 = vsub.f32 %v5085_v32, %v5343_v54  ;;  %v17085_v36 = vld [vmem:[#allocation114_spill] sm:$0xff]  ;;  %v17086_v54 = vld [vmem:[#allocation123_spill] sm:$0xff] }
 0x798   :  { %v5429_v8 = vmul.f32 1.442695, %v5380_v48  ;;  %v5431_v9 = vmul.f32 1.442695, %v5381_v56  ;;  %v5433_v15 = vmul.f32 1.442695, %v5382_v0  ;;  %v1946_v7 = vmul.f32 %v17085_v36, %v15152_v33 }
 0x799   :  { %v5435_v26 = vmul.f32 1.442695, %v5383_v18  ;;  %v5437_v5 = vmul.f32 1.442695, %v5384_v43  ;;  %v5439_v14 = vmul.f32 1.442695, %v5385_v1  ;;  %v1947_v31 = vmul.f32 %v17086_v54, %v15152_v33 }
 0x79a   :  { %10180 = vpow2.f32 %v5429_v8  ;;  %v5441_v12 = vmul.f32 1.442695, %v5386_v53  ;;  %v15156_v51 = vpop.eup %10178  ;;  %v1999_v18 = vadd.f32 %v1998_v46, %v1944_v59  ;;  %v2010_v43 = vrot.slane %v1946_v7, 4 }
 0x79b   :  { %10182 = vpow2.f32 %v5431_v9  ;;  %v4709_v37 = vmul.f32 %v15156_v51, %v15147_v52  ;;  %v2016_v55 = vrot.slane %v1947_v31, 4  ;;  %vm4714_vm0 = vweird.f32 %v15156_v51 }
 0x79c   :  { %10184 = vpow2.f32 %v5433_v15  ;;  %v2000_v59 = vrot.slane %v1999_v18, 2  ;;  %v2011_v62 = vadd.f32 %v2010_v43, %v1946_v7  ;;  %v4717_v43 = vand.u32 2147483647, %v15147_v52  ;;  %vm4715_vm2 = vmor %vm4713_vm1, %vm4714_vm0 }
 0x79d   :  { %10186 = vpow2.f32 %v5435_v26  ;;  %v4710_v53 = vsub.f32 1.0, %v4709_v37  ;;  %v17087_v26 = vld [vmem:[#allocation129_spill] sm:$0xff] }
 0x79e   :  { %10188 = vpow2.f32 %v5437_v5  ;;  %v1948_v5 = vmul.f32 %v17087_v26, %v15152_v33  ;;  %v2001_v54 = vadd.f32 %v2000_v59, %v1999_v18  ;;  %vm4718_vm3 = vcmp.eq.f32.partialorder %v4717_v43, 8.507059e+37 }
 0x79f   :  { %10190 = vpow2.f32 %v5439_v14  ;;  %v1993_v14 = vadd.f32 %v1992_v19, %v1943_v10  ;;  %v4711_v46 = vmul.f32 %v15156_v51, %v4710_v53  ;;  %v2012_v10 = vrot.slane %v2011_v62, 2 }
 0x7a0   :  { %v15158_v11 = vpop.eup %10180  ;;  %10192 = vpow2.f32 %v5441_v12 }
 0x7a1   :  { %v15164_v61 = vpop.eup %10182  ;;  %v1994_v37 = vrot.slane %v1993_v14, 2  ;;  %v4712_v4 = vadd.f32 %v15156_v51, %v4711_v46 }
 0x7a2   :  { %v15166_v35 = vpop.eup %10184  ;;  %v5576_v41 = vrot.slane %v15164_v61, 7 }
 0x7a3   :  { %v15171_v17 = vpop.eup %10186  ;;  %v5578_v60 = vrot.slane %v15166_v35, 6  ;;  %v4716_v18 = vsel %vm4715_vm2, %v15156_v51, %v4712_v4 }
 0x7a4   :  { %v15176_v34 = vpop.eup %10188  ;;  %v5577_v2 = vsel %vm2525_vm9, %v5576_v41, %v15158_v11  ;;  %v5580_v32 = vrot.slane %v15171_v17, 5  ;;  %v2022_v41 = vrot.slane %v1948_v5, 4 }
 0x7a5   :  { %v15181_v49 = vpop.eup %10190  ;;  %v5579_v48 = vsel %vm2528_vm10, %v5578_v60, %v5577_v2  ;;  %v5582_v56 = vrot.slane %v15176_v34, 4  ;;  %v2006_v60 = vrot.slane %v2005_v27, 2 }
 0x7a6   :  { %v15187_v0 = vpop.eup %10192  ;;  %v5581_v8 = vsel %vm2531_vm11, %v5580_v32, %v5579_v48  ;;  %v5584_v1 = vrot.slane %v15181_v49, 3  ;;  %v2017_v32 = vadd.f32 %v2016_v55, %v1947_v31  ;;  %v2023_v58 = vadd.f32 %v2022_v41, %v1948_v5  ;;  %v17088_v55 = vld [vmem:[#allocation81_spill] sm:$0xff] }
 0x7a7   :  { %v5583_v9 = vsel %vm2534_vm12, %v5582_v56, %v5581_v8  ;;  %v5586_v15 = vrot.slane %v15187_v0, 2  ;;  %v4719_v48 = vand.u32 2147483648, %v15147_v52  ;;  %v1995_v56 = vadd.f32 %v1994_v37, %v1993_v14 }
 0x7a8   :  { %v5585_v23 = vsel %vm2537_vm13, %v5584_v1, %v5583_v9  ;;  %v2007_v7 = vadd.f32 %v2006_v60, %v2005_v27  ;;  %v2018_v1 = vrot.slane %v2017_v32, 2  ;;  %v2002_v31 = vrot.slane %v2001_v54, 1 }
 0x7a9   :  { %v5587_v12 = vsel %vm2540_vm14, %v5586_v15, %v5585_v23  ;;  %v2013_v9 = vadd.f32 %v2012_v10, %v2011_v62  ;;  %v2024_v15 = vrot.slane %v2023_v58, 2  ;;  %v4720_v26 = vor.u32 1.1754944e-38, %v4719_v48 }
 0x7aa   :  { %v5667_v47 = vsel %vm2621_vm15, %v5587_v12, 0.0  ;;  %v1996_v23 = vrot.slane %v1995_v56, 1  ;;  %v2008_v5 = vrot.slane %v2007_v7, 1  ;;  %v2019_v14 = vadd.f32 %v2018_v1, %v2017_v32 }
 0x7ab   :  { %v5668_v36 = vrot.slane %v5667_v47, 4  ;;  %v4721_v27 = vsel %vm4718_vm3, %v4720_v26, %v4716_v18  ;;  %v1949_v59 = vmul.f32 %v17088_v55, %v15152_v33  ;;  %v2014_v46 = vrot.slane %v2013_v9, 1 }
 0x7ac   :  { %v15209_v41 = vadd.f32 %v1996_v23, %v1995_v56  ;;  %v15211_v51 = vadd.f32 %v2008_v5, %v2007_v7  ;;  %v4722_v62 = vmul.f32 %v15105_v38, %v4721_v27  ;;  %v4723_v37 = vmul.f32 %v15107_v6, %v4721_v27 }
 0x7ad   :  { %v5669_v2 = vadd.f32 %v5668_v36, %v5667_v47  ;;  %v15207_v47 = vadd.f32 %v2002_v31, %v2001_v54  ;;  %v2025_v36 = vadd.f32 %v2024_v15, %v2023_v58  ;;  %v2020_v60 = vrot.slane %v2019_v14, 1  ;;  %v17089_v31 = vld [vmem:[#allocation99_spill] sm:$0xff] }
 0x7ae   :  { %v15215_v32 = vadd.f32 %v2014_v46, %v2013_v9  ;;  %v4855_v4 = vperm.slane %v4722_v62, 0  ;;  %v4724_v6 = vmul.f32 %v15113_v42, %v4721_v27  ;;  %v4725_v5 = vmul.f32 %v15118_v29, %v4721_v27 }
 0x7af   :  { %v5670_v19 = vrot.slane %v5669_v2, 2  ;;  %v2026_v10 = vrot.slane %v2025_v36, 1  ;;  %v2286_v33 = vmax.f32 %v15209_v41, %v15207_v47  ;;  %v15219_v58 = vadd.f32 %v2020_v60, %v2019_v14 }
 0x7b0   :  { %v4904_v18 = vmul.f32 %v4855_v4, %v17089_v31  ;;  %v4728_v4 = vmul.f32 %v15138_v39, %v4721_v27  ;;  %v17092_v31 = vld [vmem:[#allocation55_spill] sm:$0xff] }
 0x7b1   :  { %v5671_v8 = vadd.f32 %v5670_v19, %v5669_v2  ;;  %v2028_v2 = vrot.slane %v1949_v59, 4  ;;  %v4856_v19 = vperm.slane %v4723_v37, 0  ;;  %v2287_v48 = vmax.f32 %v2286_v33, %v15211_v51 }
 0x7b2   :  { %v15223_v7 = vadd.f32 %v2026_v10, %v2025_v36  ;;  %v4726_v36 = vmul.f32 %v15121_v50, %v4721_v27  ;;  %v17091_v10 = vld [vmem:[#allocation113_spill] sm:$0xff] }
 0x7b3   :  { %v5672_v53 = vrot.slane %v5671_v8, 1  ;;  %v2029_v54 = vadd.f32 %v2028_v2, %v1949_v59  ;;  %v2288_v43 = vmax.f32 %v2287_v48, %v15215_v32  ;;  %v4858_v2 = vperm.slane %v4725_v5, 0 }
 0x7b4   :  { %v4859_v48 = vperm.slane %v4726_v36, 0 }
 0x7b5   :  { %v5673_v12 = vadd.f32 %v5672_v53, %v5671_v8  ;;  %v2030_v56 = vrot.slane %v2029_v54, 2  ;;  %v17090_v53 = vld [vmem:[#allocation105_spill] sm:$0xff]  ;;  %v2289_v15 = vmax.f32 %v2288_v43, %v15219_v58 }
 0x7b6   :  { %v4905_v9 = vmul.f32 %v4856_v19, %v17090_v53 }
 0x7b7   :  { %v5716_v52 = vperm.slane %v5673_v12, 0  ;;  %v2031_v1 = vadd.f32 %v2030_v56, %v2029_v54  ;;  %v4857_v12 = vperm.slane %v4724_v6, 0  ;;  %v2290_v42 = vmax.f32 %v2289_v15, %v15223_v7 }
 0x7b8   :  { %v4953_v62 = vadd.f32 %v4905_v9, %v4904_v18  ;;  %v4727_v54 = vmul.f32 %v15129_v22, %v4721_v27  ;;  %v4907_v22 = vmul.f32 %v4858_v2, %v17092_v31 }
 0x7b9   :  { %10194 = vrcp.f32 %v5716_v52  ;;  %v2032_v23 = vrot.slane %v2031_v1, 1  ;;  %v5734_v14 = vand.u32 2147483648, %v5716_v52  ;;  %v5732_v59 = vand.u32 2147483647, %v5716_v52 }
 0x7ba   :  { %vm5728_vm5 = vweird.f32 %v5716_v52  ;;  %v4906_v29 = vmul.f32 %v4857_v12, %v17091_v10 }
 0x7bb   :  { %v15231_v46 = vadd.f32 %v2032_v23, %v2031_v1  ;;  %v5735_v33 = vor.u32 1.1754944e-38, %v5734_v14  ;;  %vm5733_vm7 = vcmp.eq.f32.partialorder %v5732_v59, 8.507059e+37  ;;  %v17094_v23 = vld [vmem:[#allocation106_spill] sm:$0xff] }
 0x7bc   :  { %v4954_v56 = vadd.f32 %v4953_v62, %v4906_v29  ;;  %v17097_v29 = vld [vmem:[#allocation56_spill] sm:$0xff] }
 0x7bd   :  { %v15235_v60 = vmax.f32 %v2290_v42, %v15231_v46 }
 0x7bf   :  { %v10195_v38 = vpop.eup %10194  ;;  %v2329_v27 = vsub.f32 %v15207_v47, %v15235_v60  ;;  %v2332_v47 = vsub.f32 %v15219_v58, %v15235_v60  ;;  %v2333_v10 = vsub.f32 %v15223_v7, %v15235_v60 }
 0x7c0   :  { %v5724_v8 = vmul.f32 %v10195_v38, %v5716_v52  ;;  %vm5729_vm4 = vweird.f32 %v10195_v38  ;;  %v2328_v52 = vsub.f32 %v15209_v41, %v15235_v60 }
 0x7c1   :  { %vm5730_vm6 = vmor %vm5728_vm5, %vm5729_vm4  ;;  %v2379_v36 = vmul.f32 1.442695, %v2329_v27  ;;  %v17102_v27 = vld [vmem:[#allocation77_spill] sm:$0xff] }
 0x7c2   :  { %v5725_v26 = vsub.f32 1.0, %v5724_v8  ;;  %v2377_v9 = vmul.f32 1.442695, %v2328_v52  ;;  %v17099_v52 = vld [vmem:[#allocation63_spill] sm:$0xff] }
 0x7c4   :  { %v5726_v55 = vmul.f32 %v10195_v38, %v5725_v26  ;;  %v17093_v26 = vld [vmem:[#allocation100_spill] sm:$0xff]  ;;  %10196 = vpow2.f32 %v2377_v9 }
 0x7c5   :  { %10198 = vpow2.f32 %v2379_v36 }
 0x7c6   :  { %v5727_v37 = vadd.f32 %v10195_v38, %v5726_v55  ;;  %v17096_v55 = vld [vmem:[#allocation116_spill] sm:$0xff] }
 0x7c8   :  { %v5731_v19 = vsel %vm5730_vm6, %v10195_v38, %v5727_v37  ;;  %v2330_v38 = vsub.f32 %v15211_v51, %v15235_v60  ;;  %v17095_v51 = vld [vmem:[#allocation62_spill] sm:$0xff] }
 0x7c9   :  { %v5736_v50 = vsel %vm5733_vm7, %v5735_v33, %v5731_v19  ;;  %v4908_v12 = vmul.f32 %v4859_v48, %v17095_v51  ;;  %v4861_v19 = vperm.slane %v4728_v4, 0  ;;  %v17101_v4 = vld [vmem:[#allocation42_spill] sm:$0xff] }
 0x7ca   :  { %v5737_v6 = vmul.f32 %v15158_v11, %v5736_v50  ;;  %v5738_v43 = vmul.f32 %v15164_v61, %v5736_v50  ;;  %v5739_v8 = vmul.f32 %v15166_v35, %v5736_v50  ;;  %v5740_v1 = vmul.f32 %v15171_v17, %v5736_v50 }
 0x7cb   :  { %v5741_v39 = vmul.f32 %v15176_v34, %v5736_v50  ;;  %v2331_v11 = vsub.f32 %v15215_v32, %v15235_v60  ;;  %v4860_v61 = vperm.slane %v4727_v54, 0  ;;  %v4955_v35 = vadd.f32 %v4954_v56, %v4907_v22 }
 0x7cc   :  { %v5870_v18 = vperm.slane %v5737_v6, 0  ;;  %v5871_v41 = vperm.slane %v5738_v43, 0  ;;  %v5872_v53 = vperm.slane %v5739_v8, 0  ;;  %v5742_v17 = vmul.f32 %v15181_v49, %v5736_v50 }
 0x7cd   :  { %v5873_v15 = vperm.slane %v5740_v1, 0  ;;  %v5743_v14 = vmul.f32 %v15187_v0, %v5736_v50  ;;  %v5874_v42 = vperm.slane %v5741_v39, 0  ;;  %v2381_v62 = vmul.f32 1.442695, %v2330_v38  ;;  %v17098_v0 = vld [vmem:[#allocation109_spill] sm:$0xff]  ;;  %v17100_v1 = vld [vmem:[#allocation142_spill] sm:$0xff]  ;;  %v15270_v39 = vpop.eup %10196 }
 0x7ce   :  { %v5919_v34 = vmul.f32 %v5870_v18, %v17093_v26  ;;  %v5920_v5 = vmul.f32 %v5871_v41, %v17094_v23  ;;  %v5921_v32 = vmul.f32 %v5872_v53, %v17096_v55  ;;  %v2383_v49 = vmul.f32 1.442695, %v2331_v11  ;;  %v15274_v18 = vpop.eup %10198  ;;  %v17104_v41 = vld [vmem:[#allocation131_spill] sm:$0xff] }
 0x7cf   :  { %v4956_v37 = vadd.f32 %v4955_v35, %v4908_v12  ;;  %v5875_v2 = vperm.slane %v5742_v17, 0  ;;  %v5922_v33 = vmul.f32 %v5873_v15, %v17097_v29  ;;  %v2385_v54 = vmul.f32 1.442695, %v2332_v47  ;;  %v17105_v15 = vld [vmem:[#allocation101_spill] sm:$0xff]  ;;  %v17107_v12 = vld [vmem:[#allocation110_spill] sm:$0xff] }
 0x7d0   :  { %v5968_v59 = vadd.f32 %v5920_v5, %v5919_v34  ;;  %v4909_v48 = vmul.f32 %v4860_v61, %v17098_v0  ;;  %v2334_v56 = vsub.f32 %v15231_v46, %v15235_v60  ;;  %10200 = vpow2.f32 %v2381_v62  ;;  %v17103_v46 = vld [vmem:[#allocation119_spill] sm:$0xff]  ;;  %v17106_v47 = vld [vmem:[#allocation93_spill] sm:$0xff] }
 0x7d1   :  { %v5876_v50 = vperm.slane %v5743_v14, 0  ;;  %v5923_v6 = vmul.f32 %v5874_v42, %v17099_v52  ;;  %10202 = vpow2.f32 %v2383_v49  ;;  %v2387_v8 = vmul.f32 1.442695, %v2333_v10  ;;  %v17108_v49 = vld [vmem:[#allocation122_spill] sm:$0xff] }
 0x7d2   :  { %v5969_v58 = vadd.f32 %v5968_v59, %v5921_v32  ;;  %v4957_v7 = vadd.f32 %v4956_v37, %v4909_v48  ;;  %v5924_v31 = vmul.f32 %v5875_v2, %v17100_v1  ;;  %10204 = vpow2.f32 %v2385_v54  ;;  %v17109_v54 = vld [vmem:[#allocation128_spill] sm:$0xff] }
 0x7d3   :  { %v1860_v38 = vadd.f32 %v17102_v27, %v17101_v4  ;;  %v4910_v60 = vmul.f32 %v4861_v19, %v17103_v46  ;;  %v5925_v53 = vmul.f32 %v5876_v50, %v17104_v41  ;;  %v2389_v61 = vmul.f32 1.442695, %v2334_v56 }
 0x7d4   :  { %v5970_v43 = vadd.f32 %v5969_v58, %v5922_v33  ;;  %10206 = vpow2.f32 %v2387_v8  ;;  %v2524_v17 = vrot.slane %v15274_v18, 7 }
 0x7d5   :  { %v2966_v26 = vmul.f32 %v17105_v15, %v1860_v38  ;;  %v4958_v34 = vadd.f32 %v4957_v7, %v4910_v60  ;;  %v2965_v51 = vmul.f32 %v17106_v47, %v1860_v38  ;;  %v2967_v14 = vmul.f32 %v17107_v12, %v1860_v38 }
 0x7d6   :  { %v5971_v22 = vadd.f32 %v5970_v43, %v5923_v6  ;;  %v15278_v35 = vpop.eup %10200  ;;  %v2526_v42 = vsel %vm2525_vm9, %v2524_v17, %v15270_v39  ;;  %10208 = vpow2.f32 %v2389_v61  ;;  %v2968_v37 = vmul.f32 %v17108_v49, %v1860_v38 }
 0x7d7   :  { %v15281_v9 = vpop.eup %10202  ;;  %v2527_v5 = vrot.slane %v15278_v35, 6  ;;  %v3020_v62 = vrot.slane %v2966_v26, 4  ;;  %v3014_v33 = vrot.slane %v2965_v51, 4  ;;  %v3026_v58 = vrot.slane %v2967_v14, 4 }
 0x7d8   :  { %v5972_v11 = vadd.f32 %v5971_v22, %v5924_v31  ;;  %v15289_v55 = vpop.eup %10204  ;;  %v2530_v36 = vrot.slane %v15281_v9, 5  ;;  %v2969_v19 = vmul.f32 %v17109_v54, %v1860_v38  ;;  %v3032_v52 = vrot.slane %v2968_v37, 4 }
 0x7d9   :  { %v2529_v59 = vsel %vm2528_vm10, %v2527_v5, %v2526_v42  ;;  %v2533_v29 = vrot.slane %v15289_v55, 4  ;;  %v3021_v56 = vadd.f32 %v3020_v62, %v2966_v26  ;;  %v3015_v6 = vadd.f32 %v3014_v33, %v2965_v51 }
 0x7da   :  { %v5973_v23 = vadd.f32 %v5972_v11, %v5925_v53  ;;  %v2532_v2 = vsel %vm2531_vm11, %v2530_v36, %v2529_v59  ;;  %v15295_v10 = vpop.eup %10206  ;;  %v3027_v8 = vadd.f32 %v3026_v58, %v2967_v14  ;;  %v3038_v7 = vrot.slane %v2969_v19, 4 }
 0x7db   :  { %v2535_v0 = vsel %vm2534_vm12, %v2533_v29, %v2532_v2  ;;  %v2536_v50 = vrot.slane %v15295_v10, 3  ;;  %v3022_v31 = vrot.slane %v3021_v56, 2  ;;  %v3033_v22 = vadd.f32 %v3032_v52, %v2968_v37 }
 0x7dc   :  { %v6039_v32 = vpack.c.bf16 %v5973_v23, %v4958_v34  ;;  %v15300_v48 = vpop.eup %10208  ;;  %v3016_v27 = vrot.slane %v3015_v6, 2  ;;  %v3028_v46 = vrot.slane %v3027_v8, 2  ;;  %v3039_v60 = vadd.f32 %v3038_v7, %v2969_v19  ;;  %v17110_v34 = vld [vmem:[#allocation64_spill] sm:$0xff] }
 0x7dd   :  { %v2538_v43 = vsel %vm2537_vm13, %v2536_v50, %v2535_v0  ;;  %v2539_v1 = vrot.slane %v15300_v48, 2  ;;  %v3023_v53 = vadd.f32 %v3022_v31, %v3021_v56  ;;  %v3034_v11 = vrot.slane %v3033_v22, 2 }
 0x7de   :  { %6226 = vmatpush.bf16.msrb.mxu3 %v6039_v32  ;;  %v3017_v61 = vadd.f32 %v3016_v27, %v3015_v6  ;;  %v3029_v17 = vadd.f32 %v3028_v46, %v3027_v8  ;;  %v3040_v15 = vrot.slane %v3039_v60, 2  ;;  %v2970_v23 = vmul.f32 %v17110_v34, %v1860_v38  ;;  %v17111_v32 = vld [vmem:[#allocation76_spill] sm:$0xff] }
 0x7df   :  { %v2541_v4 = vsel %vm2540_vm14, %v2539_v1, %v2538_v43  ;;  %v3024_v5 = vrot.slane %v3023_v53, 1  ;;  %v3035_v47 = vadd.f32 %v3034_v11, %v3033_v22  ;;  %v2971_v59 = vmul.f32 %v17111_v32, %v1860_v38 }
 0x7e0   :  { %v2622_v41 = vsel %vm2621_vm15, %v2541_v4, 0.0  ;;  %v3018_v51 = vrot.slane %v3017_v61, 1  ;;  %v3030_v12 = vrot.slane %v3029_v17, 1  ;;  %v3041_v14 = vadd.f32 %v3040_v15, %v3039_v60 }
 0x7e1   :  { %v2623_v26 = vrot.slane %v2622_v41, 4  ;;  %v3044_v36 = vrot.slane %v2970_v23, 4  ;;  %v3025_v62 = vadd.f32 %v3024_v5, %v3023_v53  ;;  %v3036_v49 = vrot.slane %v3035_v47, 1 }
 0x7e2   :  { %v3050_v2 = vrot.slane %v2971_v59, 4  ;;  %v3019_v29 = vadd.f32 %v3018_v51, %v3017_v61  ;;  %v3031_v33 = vadd.f32 %v3030_v12, %v3029_v17  ;;  %v3042_v58 = vrot.slane %v3041_v14, 1 }
 0x7e3   :  { %v2624_v42 = vadd.f32 %v2623_v26, %v2622_v41  ;;  %v3045_v37 = vadd.f32 %v3044_v36, %v2970_v23  ;;  %v3037_v56 = vadd.f32 %v3036_v49, %v3035_v47 }
 0x7e4   :  { %v3051_v0 = vadd.f32 %v3050_v2, %v2971_v59  ;;  %v3308_v50 = vmax.f32 %v3019_v29, %v3025_v62  ;;  %v3043_v43 = vadd.f32 %v3042_v58, %v3041_v14 }
 0x7e5   :  { %v2625_v54 = vrot.slane %v2624_v42, 2  ;;  %v3046_v19 = vrot.slane %v3045_v37, 2 }
 0x7e6   :  { %v3052_v6 = vrot.slane %v3051_v0, 2  ;;  %v3309_v8 = vmax.f32 %v3308_v50, %v3031_v33 }
 0x7e7   :  { %v3047_v52 = vadd.f32 %v3046_v19, %v3045_v37  ;;  %v2626_v7 = vadd.f32 %v2625_v54, %v2624_v42 }
 0x7e8   :  { %v3053_v38 = vadd.f32 %v3052_v6, %v3051_v0  ;;  %v3310_v31 = vmax.f32 %v3309_v8, %v3037_v56 }
 0x7e9   :  { %v3048_v1 = vrot.slane %v3047_v52, 1  ;;  %v2627_v46 = vrot.slane %v2626_v7, 1 }
 0x7ea   :  { %v3054_v4 = vrot.slane %v3053_v38, 1  ;;  %v3311_v27 = vmax.f32 %v3310_v31, %v3043_v43 }
 0x7eb   :  { %v3049_v22 = vadd.f32 %v3048_v1, %v3047_v52  ;;  %v2628_v11 = vadd.f32 %v2627_v46, %v2626_v7 }
 0x7ec   :  { %v3055_v60 = vadd.f32 %v3054_v4, %v3053_v38 }
 0x7ed   :  { %v3312_v41 = vmax.f32 %v3311_v27, %v3049_v22  ;;  %v2671_v15 = vperm.slane %v2628_v11, 0 }
 0x7ef   :  { %v3313_v53 = vmax.f32 %v3312_v41, %v3055_v60  ;;  %10210 = vrcp.f32 %v2671_v15 }
 0x7f1   :  { %v3350_v61 = vsub.f32 %v3019_v29, %v3313_v53  ;;  %v3351_v17 = vsub.f32 %v3025_v62, %v3313_v53  ;;  %v3352_v26 = vsub.f32 %v3031_v33, %v3313_v53  ;;  %v3353_v34 = vsub.f32 %v3037_v56, %v3313_v53 }
 0x7f2   :  { %v3354_v23 = vsub.f32 %v3043_v43, %v3313_v53  ;;  %v3355_v5 = vsub.f32 %v3049_v22, %v3313_v53  ;;  %v3356_v47 = vsub.f32 %v3055_v60, %v3313_v53 }
 0x7f3   :  { %v3399_v51 = vmul.f32 1.442695, %v3350_v61  ;;  %v3401_v12 = vmul.f32 1.442695, %v3351_v17  ;;  %v3403_v14 = vmul.f32 1.442695, %v3352_v26 }
 0x7f4   :  { %v3405_v42 = vmul.f32 1.442695, %v3353_v34  ;;  %v3407_v32 = vmul.f32 1.442695, %v3354_v23  ;;  %v3409_v59 = vmul.f32 1.442695, %v3355_v5 }
 0x7f5   :  { %10212 = vpow2.f32 %v3399_v51  ;;  %v3411_v36 = vmul.f32 1.442695, %v3356_v47  ;;  %v10211_v62 = vpop.eup %10210  ;;  %v2689_v61 = vand.u32 2147483648, %v2671_v15  ;;  %v2687_v17 = vand.u32 2147483647, %v2671_v15 }
 0x7f6   :  { %10214 = vpow2.f32 %v3401_v12  ;;  %v2679_v58 = vmul.f32 %v10211_v62, %v2671_v15 }
 0x7f7   :  { %10216 = vpow2.f32 %v3403_v14  ;;  %v2690_v5 = vor.u32 1.1754944e-38, %v2689_v61 }
 0x7f8   :  { %10218 = vpow2.f32 %v3405_v42  ;;  %v2680_v1 = vsub.f32 1.0, %v2679_v58 }
 0x7f9   :  { %10220 = vpow2.f32 %v3407_v32 }
 0x7fa   :  { %10222 = vpow2.f32 %v3409_v59  ;;  %v2681_v46 = vmul.f32 %v10211_v62, %v2680_v1 }
 0x7fb   :  { %v15309_v49 = vpop.eup %10212  ;;  %10224 = vpow2.f32 %v3411_v36  ;;  %v9596_v36 = vld [vmem:[#allocation2 + $0x4] sm:$0xf] }
 0x7fc   :  { %v15311_v37 = vpop.eup %10214  ;;  %v2682_v53 = vadd.f32 %v10211_v62, %v2681_v46 }
 0x7fd   :  { %v15313_v2 = vpop.eup %10216  ;;  %v3546_v29 = vrot.slane %v15311_v37, 7 }
 0x7fe   :  { %v15316_v33 = vpop.eup %10218  ;;  %v3548_v54 = vrot.slane %v15313_v2, 6 }
 0x7ff   :  { %v15319_v19 = vpop.eup %10220  ;;  %v3547_v0 = vsel %vm2525_vm9, %v3546_v29, %v15309_v49  ;;  %v3550_v56 = vrot.slane %v15316_v33, 5  ;;  %vm2684_vm9 = vweird.f32 %v10211_v62  ;;  %v8899_v29 = vld [vmem:[#allocation2 + $0x8] sm:$0xf0] }
 0x800   :  { %v15324_v50 = vpop.eup %10222  ;;  %v3549_v52 = vsel %vm2528_vm10, %v3548_v54, %v3547_v0  ;;  %v3552_v6 = vrot.slane %v15319_v19, 4  ;;  %vm2683_vm10 = vweird.f32 %v2671_v15  ;;  %v8902_v54 = vor.u32 %v9596_v36, %v8899_v29 }
 0x801   :  { %v15328_v43 = vpop.eup %10224  ;;  %v3551_v8 = vsel %vm2531_vm11, %v3550_v56, %v3549_v52  ;;  %v3554_v7 = vrot.slane %v15324_v50, 3  ;;  %vm2685_vm11 = vmor %vm2683_vm10, %vm2684_vm9 }
 0x802   :  { %v3553_v38 = vsel %vm2534_vm12, %v3552_v6, %v3551_v8  ;;  %v3556_v31 = vrot.slane %v15328_v43, 2  ;;  %v2686_v34 = vsel %vm2685_vm11, %v10211_v62, %v2682_v53  ;;  %vm2688_vm12 = vcmp.eq.f32.partialorder %v2687_v17, 8.507059e+37  ;;  %9007 = vmatmul.msk.bf16.vlgmr.msrb.gmra.mxu0 %vm1234_vm8, %v8902_v54  ;;  %v9598_v53 = vld [vmem:[#allocation2 + $0x14] sm:$0xf] }
 0x803   :  { %v3555_v22 = vsel %vm2537_vm13, %v3554_v7, %v3553_v38  ;;  %v2691_v51 = vsel %vm2688_vm12, %v2690_v5, %v2686_v34 }
 0x804   :  { %v3557_v4 = vsel %vm2540_vm14, %v3556_v31, %v3555_v22  ;;  %v2692_v14 = vmul.f32 %v15270_v39, %v2691_v51  ;;  %v2693_v42 = vmul.f32 %v15274_v18, %v2691_v51  ;;  %v2694_v15 = vmul.f32 %v15278_v35, %v2691_v51 }
 0x805   :  { %v3637_v27 = vsel %vm2621_vm15, %v3557_v4, 0.0  ;;  %v2695_v39 = vmul.f32 %v15281_v9, %v2691_v51  ;;  %v2696_v35 = vmul.f32 %v15289_v55, %v2691_v51  ;;  %v2697_v55 = vmul.f32 %v15295_v10, %v2691_v51 }
 0x806   :  { %v3638_v60 = vrot.slane %v3637_v27, 4  ;;  %v2825_v32 = vperm.slane %v2692_v14, 0  ;;  %v2826_v59 = vperm.slane %v2693_v42, 0  ;;  %v2827_v18 = vperm.slane %v2694_v15, 0 }
 0x807   :  { %v2828_v31 = vperm.slane %v2695_v39, 0  ;;  %v2829_v61 = vperm.slane %v2696_v35, 0  ;;  %v2830_v10 = vperm.slane %v2697_v55, 0  ;;  %v9600_v39 = vld [vmem:[#allocation2 + $0x24] sm:$0xf] }
 0x808   :  { %v3639_v41 = vadd.f32 %v3638_v60, %v3637_v27  ;;  %v2874_v0 = vmul.f32 %v2825_v32, %v17050_v3  ;;  %v2875_v56 = vmul.f32 %v2826_v59, %v17051_v25  ;;  %v2876_v3 = vmul.f32 %v2827_v18, %v17053_v44  ;;  %v8915_v18 = vld [vmem:[#allocation2 + $0x28] sm:$0xf0]  ;;  %v9601_v35 = vld [vmem:[#allocation2 + $0x24] sm:$0xf0]  ;;  %v9608_v55 = vld [vmem:[#allocation2 + $0x64] sm:$0xf] }
 0x809   :  { %v2877_v44 = vmul.f32 %v2828_v31, %v17055_v40  ;;  %v2878_v14 = vmul.f32 %v2829_v61, %v17058_v30  ;;  %v9604_v31 = vld [vmem:[#allocation2 + $0x44] sm:$0xf]  ;;  %v8947_v61 = vld [vmem:[#allocation2 + $0x68] sm:$0xf0] }
 0x80a   :  { %v3640_v11 = vrot.slane %v3639_v41, 2  ;;  %v2923_v1 = vadd.f32 %v2875_v56, %v2874_v0  ;;  %v8897_v0 = vld [vmem:[#allocation2] sm:$0xf] }
 0x80c   :  { %v3641_v26 = vadd.f32 %v3640_v11, %v3639_v41  ;;  %v2924_v4 = vadd.f32 %v2923_v1, %v2876_v3  ;;  %v8907_v11 = vld [vmem:[#allocation2 + $0x18] sm:$0xf0]  ;;  %v8931_v3 = vld [vmem:[#allocation2 + $0x48] sm:$0xf0] }
 0x80e   :  { %v3642_v23 = vrot.slane %v3641_v26, 1  ;;  %v2925_v5 = vadd.f32 %v2924_v4, %v2877_v44  ;;  %v8921_v4 = vld [vmem:[#allocation2 + $0x30] sm:$0xf] }
 0x810   :  { %v3643_v47 = vadd.f32 %v3642_v23, %v3641_v26  ;;  %v2926_v59 = vadd.f32 %v2925_v5, %v2878_v14  ;;  %v8955_v5 = vld [vmem:[#allocation2 + $0x78] sm:$0xf0] }
 0x812   :  { %v3686_v12 = vperm.slane %v3643_v47, 0 }
 0x814   :  { %10226 = vrcp.f32 %v3686_v12  ;;  %v3704_v6 = vand.u32 2147483648, %v3686_v12  ;;  %v3702_v7 = vand.u32 2147483647, %v3686_v12  ;;  %vm3698_vm14 = vweird.f32 %v3686_v12 }
 0x816   :  { %v3705_v25 = vor.u32 1.1754944e-38, %v3704_v6  ;;  %vm3703_vm0 = vcmp.eq.f32.partialorder %v3702_v7, 8.507059e+37  ;;  %v9602_v7 = vld [vmem:[#allocation2 + $0x34] sm:$0xf] }
 0x81a   :  { %v10227_v58 = vpop.eup %10226 }
 0x81b   :  { %v3694_v62 = vmul.f32 %v10227_v58, %v3686_v12  ;;  %vm3699_vm13 = vweird.f32 %v10227_v58  ;;  %v2698_v12 = vmul.f32 %v15300_v48, %v2691_v51 }
 0x81c   :  { %vm3700_vm15 = vmor %vm3698_vm14, %vm3699_vm13 }
 0x81d   :  { %v3695_v52 = vsub.f32 1.0, %v3694_v62  ;;  %v2831_v29 = vperm.slane %v2698_v12, 0  ;;  %v8963_v12 = vld [vmem:[#allocation2 + $0x88] sm:$0xf0] }
 0x81f   :  { %v3696_v8 = vmul.f32 %v10227_v58, %v3695_v52  ;;  %v9597_v52 = vld [vmem:[#allocation2 + $0x4] sm:$0xf0] }
 0x820   :  { %v8898_v6 = vor.u32 %v9597_v52, %v8897_v0  ;;  %v8979_v52 = vld [vmem:[#allocation2 + $0xa8] sm:$0xf0] }
 0x821   :  { %v3697_v38 = vadd.f32 %v10227_v58, %v3696_v8  ;;  %v8918_v8 = vor.u32 %v9600_v39, %v8915_v18  ;;  %v8977_v18 = vld [vmem:[#allocation2 + $0xa0] sm:$0xf] }
 0x823   :  { %v3701_v22 = vsel %vm3700_vm15, %v10227_v58, %v3697_v38  ;;  %v8913_v38 = vld [vmem:[#allocation2 + $0x20] sm:$0xf] }
 0x824   :  { %v3706_v27 = vsel %vm3703_vm0, %v3705_v25, %v3701_v22  ;;  %v8914_v25 = vor.u32 %v9601_v35, %v8913_v38  ;;  %v8934_v22 = vor.u32 %v9604_v31, %v8931_v3  ;;  %v8985_v35 = vld [vmem:[#allocation2 + $0xb0] sm:$0xf]  ;;  %v9619_v31 = vld [vmem:[#allocation2 + $0xb4] sm:$0xf0] }
 0x825   :  { %v3707_v9 = vmul.f32 %v15309_v49, %v3706_v27  ;;  %v3708_v46 = vmul.f32 %v15311_v37, %v3706_v27  ;;  %v3709_v60 = vmul.f32 %v15313_v2, %v3706_v27  ;;  %v3710_v41 = vmul.f32 %v15316_v33, %v3706_v27 }
 0x826   :  { %v3711_v17 = vmul.f32 %v15319_v19, %v3706_v27  ;;  %v8910_v49 = vor.u32 %v9598_v53, %v8907_v11  ;;  %v3712_v37 = vmul.f32 %v15324_v50, %v3706_v27  ;;  %v3713_v40 = vmul.f32 %v15328_v43, %v3706_v27  ;;  %v9603_v27 = vld [vmem:[#allocation2 + $0x34] sm:$0xf0]  ;;  %v8929_v53 = vld [vmem:[#allocation2 + $0x40] sm:$0xf]  ;;  %v9605_v11 = vld [vmem:[#allocation2 + $0x44] sm:$0xf0] }
 0x827   :  { %v3840_v26 = vperm.slane %v3707_v9, 0  ;;  %v3841_v34 = vperm.slane %v3708_v46, 0  ;;  %v3842_v23 = vperm.slane %v3709_v60, 0  ;;  %v3843_v47 = vperm.slane %v3710_v41, 0  ;;  %v9606_v9 = vld [vmem:[#allocation2 + $0x54] sm:$0xf] }
 0x828   :  { %v3844_v19 = vperm.slane %v3711_v17, 0  ;;  %9008 = vmatmul.msk.bf16.gmra.mxu0 %vm1234_vm8, %v8910_v49  ;;  %v3845_v50 = vperm.slane %v3712_v37, 0  ;;  %v3846_v48 = vperm.slane %v3713_v40, 0  ;;  %v8939_v46 = vld [vmem:[#allocation2 + $0x58] sm:$0xf0]  ;;  %v8922_v60 = vor.u32 %v9603_v27, %v8921_v4  ;;  %v17112_v4 = vld [vmem:[#allocation29_spill] sm:$0xff] }
 0x829   :  { %v3889_v2 = vmul.f32 %v3840_v26, %v17056_v13  ;;  %v3890_v33 = vmul.f32 %v3841_v34, %v17057_v63  ;;  %v3891_v42 = vmul.f32 %v3842_v23, %v17059_v21  ;;  %v3892_v36 = vmul.f32 %v3843_v47, %v17061_v20  ;;  %v8937_v26 = vld [vmem:[#allocation2 + $0x50] sm:$0xf]  ;;  %v9607_v34 = vld [vmem:[#allocation2 + $0x54] sm:$0xf0]  ;;  %v9610_v23 = vld [vmem:[#allocation2 + $0x74] sm:$0xf] }
 0x82a   :  { %v2879_v63 = vmul.f32 %v2830_v10, %v17062_v28  ;;  %v3893_v51 = vmul.f32 %v3844_v19, %v17064_v57  ;;  %v3894_v43 = vmul.f32 %v3845_v50, %v17067_v24  ;;  %v2880_v21 = vmul.f32 %v2831_v29, %v17068_v45  ;;  %v8905_v57 = vld [vmem:[#allocation2 + $0x10] sm:$0xf]  ;;  %v9599_v24 = vld [vmem:[#allocation2 + $0x14] sm:$0xf0]  ;;  %v8923_v45 = vld [vmem:[#allocation2 + $0x38] sm:$0xf0] }
 0x82b   :  { %v3938_v32 = vadd.f32 %v3890_v33, %v3889_v2  ;;  %v3895_v54 = vmul.f32 %v3846_v48, %v17069_v16  ;;  %v8906_v1 = vor.u32 %v9599_v24, %v8905_v57  ;;  %v8926_v16 = vor.u32 %v9602_v7, %v8923_v45  ;;  %v8945_v47 = vld [vmem:[#allocation2 + $0x60] sm:$0xf]  ;;  %v9609_v2 = vld [vmem:[#allocation2 + $0x64] sm:$0xf0]  ;;  %v9612_v33 = vld [vmem:[#allocation2 + $0x84] sm:$0xf] }
 0x82c   :  { %v2927_v58 = vadd.f32 %v2926_v59, %v2879_v63  ;;  %v8942_v41 = vor.u32 %v9606_v9, %v8939_v46  ;;  %v8930_v44 = vor.u32 %v9605_v11, %v8929_v53  ;;  %v8950_v17 = vor.u32 %v9608_v55, %v8947_v61  ;;  %v8953_v40 = vld [vmem:[#allocation2 + $0x70] sm:$0xf]  ;;  %v9611_v19 = vld [vmem:[#allocation2 + $0x74] sm:$0xf0]  ;;  %v8971_v59 = vld [vmem:[#allocation2 + $0x98] sm:$0xf0]  ;;  %v15394_v61 = vpop.permute.xlu2 %6408 }
 0x82d   :  { %v3939_v13 = vadd.f32 %v3938_v32, %v3891_v42  ;;  %v8938_v49 = vor.u32 %v9607_v34, %v8937_v26  ;;  %v8958_v37 = vor.u32 %v9610_v23, %v8955_v5  ;;  %v8946_v10 = vor.u32 %v9609_v2, %v8945_v47  ;;  %v9614_v32 = vld [vmem:[#allocation2 + $0x94] sm:$0xf]  ;;  %v9613_v29 = vld [vmem:[#allocation2 + $0x84] sm:$0xf0]  ;;  %v8987_v7 = vld [vmem:[#allocation2 + $0xb8] sm:$0xf0]  ;;  %v15398_v34 = vpop.permute.xlu1 %6418 }
 0x82e   :  { %v2928_v56 = vadd.f32 %v2927_v58, %v2880_v21  ;;  %v8966_v14 = vor.u32 %v9612_v33, %v8963_v12  ;;  %v8954_v42 = vor.u32 %v9611_v19, %v8953_v40  ;;  %v8974_v50 = vor.u32 %v9614_v32, %v8971_v59  ;;  %v9618_v24 = vld [vmem:[#allocation2 + $0xb4] sm:$0xf]  ;;  %v17113_v46 = vld [vmem:[#allocation24_spill] sm:$0xff] }
 0x82f   :  { %v3940_v30 = vadd.f32 %v3939_v13, %v3892_v36  ;;  %v8961_v13 = vld [vmem:[#allocation2 + $0x80] sm:$0xf] }
 0x830   :  { %v8962_v63 = vor.u32 %v9613_v29, %v8961_v13  ;;  %v17115_v33 = vld [vmem:[#allocation36_spill] sm:$0xff]  ;;  %v17116_v13 = vld [vmem:[#allocation26_spill] sm:$0xff] }
 0x831   :  { %v3941_v15 = vadd.f32 %v3940_v30, %v3893_v51 }
 0x833   :  { %v3942_v62 = vadd.f32 %v3941_v15, %v3894_v43  ;;  %v8969_v43 = vld [vmem:[#allocation2 + $0x90] sm:$0xf]  ;;  %v9615_v15 = vld [vmem:[#allocation2 + $0x94] sm:$0xf0] }
 0x835   :  { %v3943_v20 = vadd.f32 %v3942_v62, %v3895_v54  ;;  %v8970_v54 = vor.u32 %v9615_v15, %v8969_v43 }
 0x837   :  { %v6038_v28 = vpack.c.bf16 %v3943_v20, %v2928_v56  ;;  %v9616_v20 = vld [vmem:[#allocation2 + $0xa4] sm:$0xf] }
 0x838   :  { %9009 = vmatmul.msk.bf16.gmra.mxu0 %vm1234_vm8, %v8918_v8  ;;  %v8982_v39 = vor.u32 %v9616_v20, %v8979_v52 }
 0x839   :  { %6227 = vmatpush.bf16.msrb.mxu3 %v6038_v28  ;;  %v9617_v28 = vld [vmem:[#allocation2 + $0xa4] sm:$0xf0] }
 0x83a   :  { %v8978_v8 = vor.u32 %v9617_v28, %v8977_v18 }
 0x83c   :  { %6228 = vmatmul.bf16.vlgmr.msrb.gmra.mxu3 %v8898_v6 }
 0x848   :  { %9010 = vmatmul.msk.bf16.gmra.mxu0 %vm1234_vm8, %v8926_v16 }
 0x84c   :  { %6233 = vmatmul.bf16.gmra.mxu3 %v8906_v1  ;;  %v8990_v1 = vor.u32 %v9618_v24, %v8987_v7  ;;  %v9620_v24 = vld [vmem:[#allocation2 + $0xc4] sm:$0xf]  ;;  %v8995_v7 = vld [vmem:[#allocation2 + $0xc8] sm:$0xf0] }
 0x858   :  { %9011 = vmatmul.msk.bf16.gmra.mxu0 %vm1234_vm8, %v8934_v22  ;;  %v8986_v22 = vor.u32 %v9619_v31, %v8985_v35 }
 0x85c   :  { %6238 = vmatmul.bf16.gmra.mxu3 %v8914_v25 }
 0x868   :  { %9012 = vmatmul.msk.bf16.gmra.mxu0 %vm1234_vm8, %v8942_v41  ;;  %v15391_v41 = vpop.permute.xlu0 %6413 }
 0x86c   :  { %6243 = vmatmul.bf16.gmra.mxu3 %v8922_v60 }
 0x878   :  { %9013 = vmatmul.msk.bf16.gmra.mxu0 %vm1234_vm8, %v8950_v17  ;;  %v17114_v17 = vld [vmem:[#allocation33_spill] sm:$0xff] }
 0x87c   :  { %6248 = vmatmul.bf16.gmra.mxu3 %v8930_v44 }
 0x87f   :  { %v6308_v36 = vpop.f32.mrf.mxu0 }
 0x887   :  { %v15375_v48 = vpop.f32.mrf.mxu0 }
 0x888   :  { %9014 = vmatmul.msk.bf16.gmra.mxu0 %vm1234_vm8, %v8958_v37 }
 0x88c   :  { %6253 = vmatmul.bf16.gmra.mxu3 %v8938_v49 }
 0x898   :  { %9015 = vmatmul.msk.bf16.gmra.mxu0 %vm1234_vm8, %v8966_v14 }
 0x89c   :  { %6258 = vmatmul.bf16.gmra.mxu3 %v8946_v10  ;;  %v15402_v10 = vpop.permute.xlu2 %6423 }
 0x8a5   :  { %v6313_v58 = vpop.f32.mrf.mxu0 }
 0x8a8   :  { %9016 = vmatmul.msk.bf16.gmra.mxu0 %vm1234_vm8, %v8974_v50 }
 0x8ac   :  { %6263 = vmatmul.bf16.gmra.mxu3 %v8954_v42 }
 0x8ad   :  { %v15381_v0 = vpop.f32.mrf.mxu0 }
 0x8b5   :  { %v6318_v57 = vpop.f32.mrf.mxu0 }
 0x8b8   :  { %9017 = vmatmul.msk.bf16.gmra.mxu0 %vm1234_vm8, %v8982_v39 }
 0x8bc   :  { %6268 = vmatmul.bf16.gmra.mxu3 %v8962_v63 }
 0x8bd   :  { %v6320_v38 = vpop.f32.mrf.mxu0 }
 0x8bf   :  { %v6229_v51 = vpop.f32.mrf.mxu3 }
 0x8c0   :  { %v15377_v30 = vadd.f32 %v6308_v36, %v6229_v51 }
 0x8c5   :  { %v6323_v9 = vpop.f32.mrf.mxu0 }
 0x8c7   :  { %v15379_v21 = vpop.f32.mrf.mxu3 }
 0x8c8   :  { %9018 = vmatmul.msk.bf16.gmra.mxu0 %vm1234_vm8, %v8990_v1 }
 0x8cc   :  { %6273 = vmatmul.bf16.gmra.mxu3 %v8970_v54 }
 0x8cd   :  { %v6325_v37 = vpop.f32.mrf.mxu0 }
 0x8cf   :  { %v6234_v62 = vpop.f32.mrf.mxu3 }
 0x8d0   :  { %v15383_v56 = vadd.f32 %v6313_v58, %v6234_v62 }
 0x8d7   :  { %v15386_v6 = vpop.f32.mrf.mxu3 }
 0x8dc   :  { %6278 = vmatmul.bf16.gmra.mxu3 %v8978_v8 }
 0x8df   :  { %v6239_v45 = vpop.f32.mrf.mxu3 }
 0x8e0   :  { %v6319_v16 = vadd.f32 %v6318_v57, %v6239_v45  ;;  %v6328_v57 = vpop.f32.mrf.mxu0  ;;  %v8993_v45 = vld [vmem:[#allocation2 + $0xc0] sm:$0xf] }
 0x8e2   :  { %v6382_v60 = vadd.f32 %v6319_v16, %v17113_v46  ;;  %v8998_v16 = vor.u32 %v9620_v24, %v8995_v7  ;;  %v9622_v46 = vld [vmem:[#allocation2 + $0xd4] sm:$0xf] }
 0x8e3   :  { %v17118_v24 = vld [vmem:[#allocation22_spill] sm:$0xff] }
 0x8e4   :  { %v6430_v44 = vadd.f32 %v15394_v61, %v6382_v60  ;;  %9019 = vmatmul.msk.bf16.gmra.mxu0 %vm1234_vm8, %v8998_v16  ;;  %v9003_v60 = vld [vmem:[#allocation2 + $0xd8] sm:$0xf0]  ;;  %v17120_v16 = vld [vmem:[#allocation13_spill] sm:$0xff] }
 0x8e7   :  { %v6241_v3 = vpop.f32.mrf.mxu3 }
 0x8e8   :  { %v6321_v25 = vadd.f32 %v6320_v38, %v6241_v3  ;;  %v9621_v38 = vld [vmem:[#allocation2 + $0xc4] sm:$0xf0] }
 0x8e9   :  { %v8994_v3 = vor.u32 %v9621_v38, %v8993_v45  ;;  %v17119_v45 = vld [vmem:[#allocation30_spill] sm:$0xff] }
 0x8ea   :  { %v6383_v27 = vadd.f32 %v6321_v25, %v17112_v4 }
 0x8ec   :  { %6283 = vmatmul.bf16.gmra.mxu3 %v8986_v22  ;;  %v6431_v11 = vadd.f32 %v15391_v41, %v6383_v27 }
 0x8ee   :  { %v6463_v23 = vadd.f32 %v6431_v11, %v6430_v44 }
 0x8ef   :  { %v6244_v53 = vpop.f32.mrf.mxu3 }
 0x8f0   :  { %v6324_v55 = vadd.f32 %v6323_v9, %v6244_v53  ;;  %v9001_v53 = vld [vmem:[#allocation2 + $0xd0] sm:$0xf] }
 0x8f2   :  { %v6384_v26 = vadd.f32 %v6324_v55, %v17114_v17  ;;  %v9006_v55 = vor.u32 %v9622_v46, %v9003_v60 }
 0x8f4   :  { %v6432_v5 = vadd.f32 %v15398_v34, %v6384_v26  ;;  %9020 = vmatmul.msk.bf16.gmra.mxu0 %vm1234_vm8, %v9006_v55  ;;  %v17124_v55 = vld [vmem:[#allocation19_spill] sm:$0xff] }
 0x8f6   :  { %v6464_v49 = vadd.f32 %v6463_v23, %v6432_v5 }
 0x8f7   :  { %v6246_v47 = vpop.f32.mrf.mxu3 }
 0x8f8   :  { %v6326_v2 = vadd.f32 %v6325_v37, %v6246_v47 }
 0x8fa   :  { %v6385_v12 = vadd.f32 %v6326_v2, %v17115_v33 }
 0x8fc   :  { %v6433_v14 = vadd.f32 %v15402_v10, %v6385_v12  ;;  %6288 = vmatmul.bf16.gmra.mxu3 %v8994_v3  ;;  %v6330_v12 = vpop.f32.mrf.mxu0 }
 0x8fe   :  { %v6465_v40 = vadd.f32 %v6464_v49, %v6433_v14 }
 0x8ff   :  { %v6249_v1 = vpop.f32.mrf.mxu3 }
 0x900   :  { %v6466_v19 = vrot.slane %v6465_v40, 4  ;;  %v6329_v35 = vadd.f32 %v6328_v57, %v6249_v1 }
 0x902   :  { %v6467_v42 = vadd.f32 %v6466_v19, %v6465_v40 }
 0x904   :  { %v6468_v32 = vrot.slane %v6467_v42, 2  ;;  %v6333_v40 = vpop.f32.mrf.mxu0 }
 0x906   :  { %v6469_v59 = vadd.f32 %v6468_v32, %v6467_v42 }
 0x907   :  { %v6251_v33 = vpop.f32.mrf.mxu3 }
 0x908   :  { %v6470_v50 = vrot.slane %v6469_v59, 1 }
 0x90a   :  { %v6471_v36 = vadd.f32 %v6470_v50, %v6469_v59 }
 0x90c   :  { %v6518_v29 = vmul.f32 %v6471_v36, %v17116_v13  ;;  %v6335_v42 = vpop.f32.mrf.mxu0 }
 0x90e   :  { %v15406_v63 = vsub.f32 %v6430_v44, %v6518_v29  ;;  %v15408_v51 = vsub.f32 %v6431_v11, %v6518_v29  ;;  %v15410_v58 = vsub.f32 %v6432_v5, %v6518_v29  ;;  %v6531_v43 = vsub.f32 %v6433_v14, %v6518_v29  ;;  %v9623_v11 = vld [vmem:[#allocation2 + $0xd4] sm:$0xf0] }
 0x90f   :  { %v9002_v44 = vor.u32 %v9623_v11, %v9001_v53  ;;  %v6254_v14 = vpop.f32.mrf.mxu3 }
 0x910   :  { %v6556_v15 = vmul.f32 %v15406_v63, %v15406_v63  ;;  %v6557_v54 = vmul.f32 %v15408_v51, %v15408_v51  ;;  %v6558_v62 = vmul.f32 %v15410_v58, %v15410_v58  ;;  %v6559_v52 = vmul.f32 %v6531_v43, %v6531_v43 }
 0x911   :  { %6293 = vmatmul.bf16.gmra.mxu3 %v9002_v44  ;;  %v6334_v57 = vadd.f32 %v6333_v40, %v6254_v14 }
 0x912   :  { %v6589_v20 = vadd.f32 %v6557_v54, %v6556_v15 }
 0x914   :  { %v6590_v39 = vadd.f32 %v6589_v20, %v6558_v62  ;;  %v6338_v59 = vpop.f32.mrf.mxu0 }
 0x916   :  { %v6591_v18 = vadd.f32 %v6590_v39, %v6559_v52  ;;  %v6331_v39 = vadd.f32 %v6330_v12, %v6251_v33 }
 0x917   :  { %v6256_v19 = vpop.f32.mrf.mxu3 }
 0x918   :  { %v6592_v28 = vrot.slane %v6591_v18, 4  ;;  %v6387_v38 = vadd.f32 %v6331_v39, %v17120_v16 }
 0x91a   :  { %v6593_v8 = vadd.f32 %v6592_v28, %v6591_v18  ;;  %v6435_v11 = vadd.f32 %v15391_v41, %v6387_v38  ;;  %v17127_v38 = vld [vmem:[#allocation32_spill] sm:$0xff] }
 0x91c   :  { %v6594_v31 = vrot.slane %v6593_v8, 2  ;;  %v6340_v36 = vpop.f32.mrf.mxu0 }
 0x91e   :  { %v6595_v25 = vadd.f32 %v6594_v31, %v6593_v8  ;;  %v6336_v31 = vadd.f32 %v6335_v42, %v6256_v19 }
 0x91f   :  { %v6259_v32 = vpop.f32.mrf.mxu3 }
 0x920   :  { %v6596_v22 = vrot.slane %v6595_v25, 1  ;;  %v6339_v20 = vadd.f32 %v6338_v59, %v6259_v32  ;;  %v6389_v44 = vadd.f32 %v6336_v31, %v17124_v55 }
 0x922   :  { %v6597_v4 = vadd.f32 %v6596_v22, %v6595_v25  ;;  %v6390_v7 = vadd.f32 %v6339_v20, %v17118_v24  ;;  %v17121_v25 = vld [vmem:[#allocation34_spill] sm:$0xff] }
 0x924   :  { %v6644_v27 = vmul.f32 %v6597_v4, %v17116_v13  ;;  %v6343_v15 = vpop.f32.mrf.mxu0  ;;  %v17122_v4 = vld [vmem:[#allocation40_spill] sm:$0xff]  ;;  %v6438_v60 = vadd.f32 %v15394_v61, %v6390_v7 }
 0x926   :  { %v6651_v9 = vadd.f32 1e-05, %v6644_v27  ;;  %v6386_v27 = vadd.f32 %v6329_v35, %v17122_v4  ;;  %v6437_v35 = vadd.f32 %v15402_v10, %v6389_v44 }
 0x927   :  { %v6261_v50 = vpop.f32.mrf.mxu3 }
 0x928   :  { %10228 = vrsqrt.f32 %v6651_v9  ;;  %vm6673_vm2 = vweird.f32 %v6651_v9  ;;  %v6341_v54 = vadd.f32 %v6340_v36, %v6261_v50 }
 0x92c   :  { %v6345_v18 = vpop.f32.mrf.mxu0 }
 0x92e   :  { %v10229_v17 = vpop.eup %10228 }
 0x92f   :  { %v6668_v26 = vmul.f32 %v10229_v17, %v6651_v9  ;;  %vm6674_vm1 = vweird.f32 %v10229_v17  ;;  %v6264_v29 = vpop.f32.mrf.mxu3  ;;  %v17123_v9 = vld [vmem:[#allocation16_spill] sm:$0xff] }
 0x930   :  { %vm6675_vm3 = vmor %vm6673_vm2, %vm6674_vm1  ;;  %v6344_v52 = vadd.f32 %v6343_v15, %v6264_v29  ;;  %v6388_v46 = vadd.f32 %v6334_v57, %v17123_v9 }
 0x931   :  { %v6669_v23 = vmul.f32 %v10229_v17, %v6668_v26 }
 0x932   :  { %v6392_v1 = vadd.f32 %v6344_v52, %v17119_v45  ;;  %v17125_v52 = vld [vmem:[#allocation27_spill] sm:$0xff] }
 0x933   :  { %v6670_v5 = vmul.f32 0.5, %v6669_v23  ;;  %v6434_v23 = vadd.f32 %v15394_v61, %v6386_v27 }
 0x934   :  { %v6440_v53 = vadd.f32 %v15398_v34, %v6392_v1  ;;  %v6348_v14 = vpop.f32.mrf.mxu0 }
 0x935   :  { %v6671_v49 = vsub.f32 1.5, %v6670_v5  ;;  %v6436_v5 = vadd.f32 %v15398_v34, %v6388_v46 }
 0x937   :  { %v6672_v37 = vmul.f32 %v10229_v17, %v6671_v49  ;;  %v6266_v62 = vpop.f32.mrf.mxu3 }
 0x938   :  { %v6346_v8 = vadd.f32 %v6345_v18, %v6266_v62 }
 0x939   :  { %v15421_v47 = vsel %vm6675_vm3, %v10229_v17, %v6672_v37  ;;  %v6472_v37 = vadd.f32 %v6435_v11, %v6434_v23 }
 0x93a   :  { %v15424_v2 = vmul.f32 %v15421_v47, %v6531_v43  ;;  %v17117_v43 = vld [vmem:[#allocation25_spill] sm:$0xff]  ;;  %v6393_v22 = vadd.f32 %v6346_v8, %v17121_v25 }
 0x93b   :  { %v6391_v28 = vadd.f32 %v6341_v54, %v17117_v43  ;;  %v6473_v12 = vadd.f32 %v6472_v37, %v6436_v5  ;;  %v17126_v43 = vld [vmem:[#allocation37_spill] sm:$0xff]  ;;  %v17128_v37 = vld [vmem:[#allocation38_spill] sm:$0xff] }
 0x93c   :  { %v6441_v26 = vadd.f32 %v15402_v10, %v6393_v22  ;;  %v6350_v36 = vpop.f32.mrf.mxu0 }
 0x93d   :  { %v6439_v3 = vadd.f32 %v15391_v41, %v6391_v28  ;;  %v6474_v19 = vadd.f32 %v6473_v12, %v6437_v35 }
 0x93f   :  { %v6481_v17 = vadd.f32 %v6439_v3, %v6438_v60  ;;  %v6269_v40 = vpop.f32.mrf.mxu3  ;;  %v6475_v59 = vrot.slane %v6474_v19, 4 }
 0x940   :  { %v6349_v42 = vadd.f32 %v6348_v14, %v6269_v40 }
 0x941   :  { %v6482_v49 = vadd.f32 %v6481_v17, %v6440_v53  ;;  %v6476_v15 = vadd.f32 %v6475_v59, %v6474_v19 }
 0x942   :  { %v6394_v28 = vadd.f32 %v6349_v42, %v17126_v43 }
 0x943   :  { %v6483_v33 = vadd.f32 %v6482_v49, %v6441_v26  ;;  %v6477_v20 = vrot.slane %v6476_v15, 2 }
 0x944   :  { %v6353_v8 = vpop.f32.mrf.mxu0  ;;  %v6442_v16 = vadd.f32 %v15394_v61, %v6394_v28 }
 0x945   :  { %v6484_v32 = vrot.slane %v6483_v33, 4  ;;  %v6478_v24 = vadd.f32 %v6477_v20, %v6476_v15 }
 0x947   :  { %v6485_v50 = vadd.f32 %v6484_v32, %v6483_v33  ;;  %v6271_v29 = vpop.f32.mrf.mxu3  ;;  %v6479_v25 = vrot.slane %v6478_v24, 1 }
 0x948   :  { %v6351_v54 = vadd.f32 %v6350_v36, %v6271_v29 }
 0x949   :  { %v6486_v62 = vrot.slane %v6485_v50, 2  ;;  %v6480_v44 = vadd.f32 %v6479_v25, %v6478_v24 }
 0x94a   :  { %v6395_v39 = vadd.f32 %v6351_v54, %v17125_v52 }
 0x94b   :  { %v6487_v18 = vadd.f32 %v6486_v62, %v6485_v50  ;;  %v6519_v12 = vmul.f32 %v6480_v44, %v17116_v13  ;;  %v17130_v44 = vld [vmem:[#allocation12_spill] sm:$0xff] }
 0x94c   :  { %v6443_v7 = vadd.f32 %v15391_v41, %v6395_v39  ;;  %v6355_v46 = vpop.f32.mrf.mxu0 }
 0x94d   :  { %v6488_v1 = vrot.slane %v6487_v18, 1  ;;  %v15456_v32 = vsub.f32 %v6434_v23, %v6519_v12  ;;  %v15458_v59 = vsub.f32 %v6435_v11, %v6519_v12  ;;  %v15470_v11 = vsub.f32 %v6436_v5, %v6519_v12 }
 0x94e   :  { %v6490_v22 = vadd.f32 %v6443_v7, %v6442_v16  ;;  %v15476_v28 = vsub.f32 %v6437_v35, %v6519_v12 }
 0x94f   :  { %v6274_v57 = vpop.f32.mrf.mxu3  ;;  %v6489_v27 = vadd.f32 %v6488_v1, %v6487_v18 }
 0x950   :  { %v6354_v45 = vadd.f32 %v6353_v8, %v6274_v57  ;;  %v6562_v8 = vmul.f32 %v15470_v11, %v15470_v11 }
 0x951   :  { %v6520_v49 = vmul.f32 %v6489_v27, %v17116_v13 }
 0x952   :  { %v6396_v31 = vadd.f32 %v6354_v45, %v17127_v38  ;;  %v6563_v38 = vmul.f32 %v15476_v28, %v15476_v28 }
 0x953   :  { %v15452_v40 = vsub.f32 %v6438_v60, %v6520_v49  ;;  %v15454_v19 = vsub.f32 %v6439_v3, %v6520_v49  ;;  %v15464_v54 = vsub.f32 %v6440_v53, %v6520_v49  ;;  %v6560_v60 = vmul.f32 %v15456_v32, %v15456_v32 }
 0x954   :  { %v6444_v4 = vadd.f32 %v15398_v34, %v6396_v31  ;;  %v6561_v3 = vmul.f32 %v15458_v59, %v15458_v59  ;;  %v15472_v52 = vsub.f32 %v6441_v26, %v6520_v49  ;;  %v6311_v26 = vadd.f32 %v15375_v48, %v15379_v21  ;;  %v17129_v21 = vld [vmem:[#allocation15_spill] sm:$0xff]  ;;  %v17131_v49 = vld [vmem:[#allocation18_spill] sm:$0xff] }
 0x955   :  { %v6564_v36 = vmul.f32 %v15452_v40, %v15452_v40  ;;  %v6565_v29 = vmul.f32 %v15454_v19, %v15454_v19  ;;  %v6566_v39 = vmul.f32 %v15464_v54, %v15464_v54 }
 0x956   :  { %v6491_v9 = vadd.f32 %v6490_v22, %v6444_v4  ;;  %v6598_v18 = vadd.f32 %v6561_v3, %v6560_v60  ;;  %v6567_v24 = vmul.f32 %v15472_v52, %v15472_v52 }
 0x957   :  { %v6276_v55 = vpop.f32.mrf.mxu3  ;;  %v6607_v62 = vadd.f32 %v6565_v29, %v6564_v36 }
 0x958   :  { %v6356_v17 = vadd.f32 %v6355_v46, %v6276_v55  ;;  %v6599_v5 = vadd.f32 %v6598_v18, %v6562_v8  ;;  %v6379_v55 = vadd.f32 %v6311_v26, %v17129_v21 }
 0x959   :  { %v6608_v53 = vadd.f32 %v6607_v62, %v6566_v39 }
 0x95a   :  { %v6397_v33 = vadd.f32 %v6356_v17, %v17128_v37  ;;  %v6600_v22 = vadd.f32 %v6599_v5, %v6563_v38  ;;  %v6378_v17 = vadd.f32 %v15377_v30, %v17130_v44  ;;  %v6380_v37 = vadd.f32 %v15383_v56, %v17131_v49 }
 0x95b   :  { %v6609_v1 = vadd.f32 %v6608_v53, %v6567_v24 }
 0x95c   :  { %v6445_v14 = vadd.f32 %v15402_v10, %v6397_v33  ;;  %v6601_v33 = vrot.slane %v6600_v22, 4  ;;  %v15515_v29 = vadd.f32 %v15394_v61, %v6378_v17  ;;  %v15518_v30 = vadd.f32 %v15398_v34, %v6380_v37 }
 0x95d   :  { %v6610_v48 = vrot.slane %v6609_v1, 4 }
 0x95e   :  { %v6492_v42 = vadd.f32 %v6491_v9, %v6445_v14 }
 0x95f   :  { %v6279_v39 = vpop.f32.mrf.mxu3 }
 0x960   :  { %v6493_v50 = vrot.slane %v6492_v42, 4 }
 0x962   :  { %v6494_v15 = vadd.f32 %v6493_v50, %v6492_v42  ;;  %v6611_v42 = vadd.f32 %v6610_v48, %v6609_v1  ;;  %v15511_v50 = vadd.f32 %v15391_v41, %v6379_v55 }
 0x964   :  { %v6495_v23 = vrot.slane %v6494_v15, 2  ;;  %v6612_v60 = vrot.slane %v6611_v42, 2  ;;  %v6454_v3 = vadd.f32 %v15511_v50, %v15515_v29 }
 0x966   :  { %v6496_v20 = vadd.f32 %v6495_v23, %v6494_v15  ;;  %v6602_v15 = vadd.f32 %v6601_v33, %v6600_v22  ;;  %v6455_v18 = vadd.f32 %v6454_v3, %v15518_v30  ;;  %v6613_v8 = vadd.f32 %v6612_v60, %v6611_v42 }
 0x968   :  { %v6497_v43 = vrot.slane %v6496_v20, 1  ;;  %v6614_v26 = vrot.slane %v6613_v8, 1 }
 0x96a   :  { %v6498_v57 = vadd.f32 %v6497_v43, %v6496_v20  ;;  %v6358_v20 = vpop.f32.mrf.mxu0  ;;  %v6603_v43 = vrot.slane %v6602_v15, 2  ;;  %v6615_v21 = vadd.f32 %v6614_v26, %v6613_v8  ;;  %v17136_v26 = vld [vmem:[#allocation23_spill] sm:$0xff] }
 0x96c   :  { %v6521_v45 = vmul.f32 %v6498_v57, %v17116_v13  ;;  %v6604_v5 = vadd.f32 %v6603_v43, %v6602_v15 }
 0x96e   :  { %v15487_v31 = vsub.f32 %v6442_v16, %v6521_v45  ;;  %v15489_v35 = vsub.f32 %v6443_v7, %v6521_v45  ;;  %v15491_v25 = vsub.f32 %v6444_v4, %v6521_v45  ;;  %v15493_v27 = vsub.f32 %v6445_v14, %v6521_v45 }
 0x96f   :  { %v6316_v16 = vadd.f32 %v15381_v0, %v15386_v6  ;;  %v17132_v0 = vld [vmem:[#allocation21_spill] sm:$0xff] }
 0x970   :  { %v6568_v9 = vmul.f32 %v15487_v31, %v15487_v31  ;;  %v6569_v46 = vmul.f32 %v15489_v35, %v15489_v35  ;;  %v6570_v7 = vmul.f32 %v15491_v25, %v15491_v25  ;;  %v6571_v12 = vmul.f32 %v15493_v27, %v15493_v27 }
 0x971   :  { %v6381_v6 = vadd.f32 %v6316_v16, %v17132_v0  ;;  %v6359_v0 = vadd.f32 %v6358_v20, %v6279_v39 }
 0x972   :  { %v6616_v4 = vadd.f32 %v6569_v46, %v6568_v9  ;;  %v6360_v22 = vpop.f32.mrf.mxu0  ;;  %v6281_v9 = vpop.f32.mrf.mxu3  ;;  %v6605_v46 = vrot.slane %v6604_v5, 1 }
 0x973   :  { %v15523_v23 = vadd.f32 %v15402_v10, %v6381_v6  ;;  %v6361_v33 = vadd.f32 %v6360_v22, %v6281_v9 }
 0x974   :  { %v6617_v14 = vadd.f32 %v6616_v4, %v6570_v7  ;;  %v6606_v7 = vadd.f32 %v6605_v46, %v6604_v5  ;;  %v6646_v4 = vmul.f32 %v6615_v21, %v17116_v13 }
 0x975   :  { %v6456_v57 = vadd.f32 %v6455_v18, %v15523_v23  ;;  %v17134_v18 = vld [vmem:[#allocation14_spill] sm:$0xff] }
 0x976   :  { %v6618_v36 = vadd.f32 %v6617_v14, %v6571_v12  ;;  %v6645_v37 = vmul.f32 %v6606_v7, %v17116_v13  ;;  %v15530_v12 = vadd.f32 1e-05, %v6646_v4  ;;  %v6398_v43 = vadd.f32 %v6359_v0, %v17134_v18 }
 0x977   :  { %v6457_v1 = vrot.slane %v6456_v57, 4 }
 0x978   :  { %v6619_v56 = vrot.slane %v6618_v36, 4  ;;  %v15532_v15 = vadd.f32 1e-05, %v6645_v37  ;;  %v15544_v22 = vadd.f32 %v15394_v61, %v6398_v43  ;;  %vm6693_vm9 = vweird.f32 %v15530_v12 }
 0x979   :  { %v6458_v55 = vadd.f32 %v6457_v1, %v6456_v57 }
 0x97a   :  { %v6620_v62 = vadd.f32 %v6619_v56, %v6618_v36  ;;  %v6363_v17 = vpop.f32.mrf.mxu0  ;;  %v6284_v49 = vpop.f32.mrf.mxu3  ;;  %v17133_v56 = vld [vmem:[#allocation17_spill] sm:$0xff]  ;;  %vm6683_vm12 = vweird.f32 %v15532_v15 }
 0x97b   :  { %v6459_v44 = vrot.slane %v6458_v55, 2  ;;  %v6364_v6 = vadd.f32 %v6363_v17, %v6284_v49  ;;  %v6399_v60 = vadd.f32 %v6361_v33, %v17133_v56 }
 0x97c   :  { %v6621_v53 = vrot.slane %v6620_v62, 2 }
 0x97d   :  { %v6460_v42 = vadd.f32 %v6459_v44, %v6458_v55  ;;  %v15540_v20 = vadd.f32 %v15391_v41, %v6399_v60 }
 0x97e   :  { %v6622_v24 = vadd.f32 %v6621_v53, %v6620_v62  ;;  %v17135_v53 = vld [vmem:[#allocation20_spill] sm:$0xff] }
 0x97f   :  { %v6461_v62 = vrot.slane %v6460_v42, 1  ;;  %v6400_v8 = vadd.f32 %v6364_v6, %v17135_v53  ;;  %v6499_v21 = vadd.f32 %v15540_v20, %v15544_v22 }
 0x980   :  { %v6623_v45 = vrot.slane %v6622_v24, 1 }
 0x981   :  { %v15547_v9 = vadd.f32 %v15398_v34, %v6400_v8 }
 0x982   :  { %v6624_v38 = vadd.f32 %v6623_v45, %v6622_v24  ;;  %v6365_v57 = vpop.f32.mrf.mxu0  ;;  %v6286_v24 = vpop.f32.mrf.mxu3 }
 0x983   :  { %v6366_v45 = vadd.f32 %v6365_v57, %v6286_v24  ;;  %v15585_v24 = vpop.permute.xlu1 %6772 }
 0x984   :  { %v6647_v48 = vmul.f32 %v6624_v38, %v17116_v13  ;;  %v6462_v38 = vadd.f32 %v6461_v62, %v6460_v42 }
 0x985   :  { %v6401_v1 = vadd.f32 %v6366_v45, %v17136_v26 }
 0x986   :  { %v6654_v16 = vadd.f32 1e-05, %v6647_v48  ;;  %v6517_v44 = vmul.f32 %v6462_v38, %v17116_v13 }
 0x987   :  { %v15552_v55 = vadd.f32 %v15402_v10, %v6401_v1 }
 0x988   :  { %10230 = vrsqrt.f32 %v6654_v16  ;;  %vm6703_vm5 = vweird.f32 %v6654_v16  ;;  %v15566_v0 = vsub.f32 %v15515_v29, %v6517_v44  ;;  %v15572_v6 = vsub.f32 %v15518_v30, %v6517_v44 }
 0x989   :  { %10232 = vrsqrt.f32 %v15530_v12 }
 0x98a   :  { %10234 = vrsqrt.f32 %v15532_v15  ;;  %v6552_v56 = vmul.f32 %v15566_v0, %v15566_v0  ;;  %v6554_v18 = vmul.f32 %v15572_v6, %v15572_v6 }
 0x98e   :  { %v10231_v14 = vpop.eup %10230 }
 0x98f   :  { %v6698_v36 = vmul.f32 %v10231_v14, %v6654_v16  ;;  %vm6704_vm4 = vweird.f32 %v10231_v14  ;;  %v10233_v46 = vpop.eup %10232  ;;  %v6500_v16 = vadd.f32 %v6499_v21, %v15547_v9 }
 0x990   :  { %vm6705_vm6 = vmor %vm6703_vm5, %vm6704_vm4  ;;  %v10235_v4 = vpop.eup %10234  ;;  %v6688_v17 = vmul.f32 %v10233_v46, %v15530_v12  ;;  %vm6694_vm7 = vweird.f32 %v10233_v46 }
 0x991   :  { %v6699_v3 = vmul.f32 %v10231_v14, %v6698_v36  ;;  %v6501_v37 = vadd.f32 %v6500_v16, %v15552_v55  ;;  %v6678_v33 = vmul.f32 %v10235_v4, %v15532_v15  ;;  %v15575_v36 = vsub.f32 %v15523_v23, %v6517_v44  ;;  %vm6695_vm10 = vmor %vm6693_vm9, %vm6694_vm7 }
 0x992   :  { %v6689_v42 = vmul.f32 %v10233_v46, %v6688_v17  ;;  %vm6684_vm11 = vweird.f32 %v10235_v4 }
 0x993   :  { %v6700_v5 = vmul.f32 0.5, %v6699_v3  ;;  %v6679_v3 = vmul.f32 %v10235_v4, %v6678_v33  ;;  %v6555_v53 = vmul.f32 %v15575_v36, %v15575_v36  ;;  %v15590_v33 = vpop.permute.xlu2 %6815  ;;  %vm6685_vm13 = vmor %vm6683_vm12, %vm6684_vm11  ;;  %vm8445_vm11 = vcmask 261120  }
 0x994   :  { %v6690_v62 = vmul.f32 0.5, %v6689_v42 }
 0x995   :  { %v6701_v39 = vsub.f32 1.5, %v6700_v5  ;;  %v15587_v5 = vpop.permute.xlu0 %6767  ;;  %v6680_v45 = vmul.f32 0.5, %v6679_v3 }
 0x997   :  { %v6702_v48 = vmul.f32 %v10231_v14, %v6701_v39  ;;  %v6691_v39 = vsub.f32 1.5, %v6690_v62 }
 0x999   :  { %v15554_v7 = vsel %vm6705_vm6, %v10231_v14, %v6702_v48  ;;  %v15569_v14 = vsub.f32 %v15511_v50, %v6517_v44  ;;  %v6681_v48 = vsub.f32 1.5, %v6680_v45  ;;  %v6692_v21 = vmul.f32 %v10233_v46, %v6691_v39 }
 0x99a   :  { %v15560_v49 = vmul.f32 %v15554_v7, %v15493_v27  ;;  %v6502_v27 = vrot.slane %v6501_v37, 4 }
 0x99b   :  { %v6553_v60 = vmul.f32 %v15569_v14, %v15569_v14  ;;  %v6696_v42 = vsel %vm6695_vm10, %v10233_v46, %v6692_v21 }
 0x99c   :  { %v6503_v8 = vadd.f32 %v6502_v27, %v6501_v37  ;;  %v6682_v37 = vmul.f32 %v10235_v4, %v6681_v48  ;;  %v15592_v27 = vpop.permute.xlu1 %6757  ;;  %v6742_v62 = vmul.f32 %v6696_v42, %v15472_v52  ;;  %v6741_v46 = vmul.f32 %v6696_v42, %v15464_v54 }
 0x99d   :  { %v6580_v43 = vadd.f32 %v6553_v60, %v6552_v56  ;;  %v15594_v56 = vpop.permute.xlu0 %6820  ;;  %v6739_v39 = vmul.f32 %v6696_v42, %v15452_v40 }
 0x99e   :  { %v6504_v1 = vrot.slane %v6503_v8, 2  ;;  %v6686_v12 = vsel %vm6685_vm13, %v10235_v4, %v6682_v37  ;;  %v6790_v45 = vmul.f32 %v15585_v24, %v6742_v62  ;;  %v6789_v52 = vmul.f32 %v15587_v5, %v6741_v46 }
 0x99f   :  { %v6581_v57 = vadd.f32 %v6580_v43, %v6554_v18  ;;  %v6737_v15 = vmul.f32 %v6686_v12, %v15470_v11  ;;  %v6735_v37 = vmul.f32 %v6686_v12, %v15456_v32 }
 0x9a0   :  { %v6505_v17 = vadd.f32 %v6504_v1, %v6503_v8  ;;  %v6368_v8 = vpop.f32.mrf.mxu0  ;;  %v15604_v1 = vpop.permute.xlu2 %6762  ;;  %v6838_v4 = vadd.f32 %v15594_v56, %v6790_v45 }
 0x9a1   :  { %v6582_v26 = vadd.f32 %v6581_v57, %v6555_v53  ;;  %v6738_v53 = vmul.f32 %v6686_v12, %v15476_v28  ;;  %v6289_v57 = vpop.f32.mrf.mxu3  ;;  %v6787_v28 = vmul.f32 %v15592_v27, %v6739_v39  ;;  %v6785_v11 = vmul.f32 %v15587_v5, %v6737_v15 }
 0x9a2   :  { %v6506_v3 = vrot.slane %v6505_v17, 1  ;;  %v6783_v39 = vmul.f32 %v15592_v27, %v6735_v37 }
 0x9a3   :  { %v6583_v38 = vrot.slane %v6582_v26, 4  ;;  %v6833_v45 = vadd.f32 %v15590_v33, %v6785_v11 }
 0x9a4   :  { %v6507_v43 = vadd.f32 %v6506_v3, %v6505_v17  ;;  %v15611_v21 = vpop.permute.xlu1 %6810  ;;  %v6733_v3 = vmul.f32 %v15421_v47, %v15410_v58 }
 0x9a5   :  { %v6584_v44 = vadd.f32 %v6583_v38, %v6582_v26  ;;  %v6740_v26 = vmul.f32 %v6696_v42, %v15454_v19  ;;  %v15613_v40 = vpop.permute.xlu0 %6805  ;;  %v6837_v19 = vadd.f32 %v15590_v33, %v6789_v52 }
 0x9a6   :  { %v6522_v48 = vmul.f32 %v6507_v43, %v17116_v13  ;;  %v6835_v17 = vadd.f32 %v15613_v40, %v6787_v28  ;;  %v6781_v58 = vmul.f32 %v15587_v5, %v6733_v3 }
 0x9a7   :  { %v6585_v16 = vrot.slane %v6584_v44, 2  ;;  %v6788_v54 = vmul.f32 %v15604_v1, %v6740_v26  ;;  %v6914_v42 = vpack.c.bf16 %v6838_v4, %v6837_v19 }
 0x9a8   :  { %v15629_v43 = vsub.f32 %v15540_v20, %v6522_v48  ;;  %v6370_v46 = vpop.f32.mrf.mxu0  ;;  %v6829_v15 = vadd.f32 %v15590_v33, %v6781_v58 }
 0x9a9   :  { %v6586_v60 = vadd.f32 %v6585_v16, %v6584_v44  ;;  %v6786_v44 = vmul.f32 %v15585_v24, %v6738_v53  ;;  %v6836_v16 = vadd.f32 %v15611_v21, %v6788_v54  ;;  %v6782_v53 = vmul.f32 %v15585_v24, %v15424_v2  ;;  %7257 = vmatpush.bf16.msra.mxu3 %v6914_v42  ;;  %v6291_v32 = vpop.f32.mrf.mxu3 }
 0x9aa   :  { %v6732_v2 = vmul.f32 %v15421_v47, %v15408_v51 }
 0x9ab   :  { %v6587_v18 = vrot.slane %v6586_v60, 1  ;;  %v6830_v20 = vadd.f32 %v15594_v56, %v6782_v53 }
 0x9ad   :  { %v6588_v38 = vadd.f32 %v6587_v18, %v6586_v60  ;;  %v6736_v60 = vmul.f32 %v6686_v12, %v15458_v59  ;;  %v15626_v18 = vsub.f32 %v15544_v22, %v6522_v48  ;;  %v6834_v59 = vadd.f32 %v15594_v56, %v6786_v44 }
 0x9ae   :  { %v6731_v12 = vmul.f32 %v15421_v47, %v15406_v63  ;;  %v6913_v22 = vpack.c.bf16 %v6836_v16, %v6835_v17  ;;  %v6780_v63 = vmul.f32 %v15604_v1, %v6732_v2  ;;  %v6910_v54 = vpack.c.bf16 %v6830_v20, %v6829_v15 }
 0x9af   :  { %v6643_v62 = vmul.f32 %v6588_v38, %v17116_v13  ;;  %v6784_v26 = vmul.f32 %v15604_v1, %v6736_v60  ;;  %v6572_v28 = vmul.f32 %v15626_v18, %v15626_v18  ;;  %v6573_v38 = vmul.f32 %v15629_v43, %v15629_v43 }
 0x9b0   :  { %v6779_v52 = vmul.f32 %v15592_v27, %v6731_v12  ;;  %7258 = vmatpush.bf16.msra.mxu3 %v6913_v22  ;;  %v6828_v51 = vadd.f32 %v15611_v21, %v6780_v63  ;;  %v15653_v47 = vsub.f32 %v15547_v9, %v6522_v48  ;;  %v6912_v11 = vpack.c.bf16 %v6834_v59, %v6833_v45  ;;  %v6373_v3 = vpop.f32.mrf.mxu0  ;;  %v17137_v59 = vld [vmem:[#allocation31_spill] sm:$0xff] }
 0x9b1   :  { %v6650_v4 = vadd.f32 1e-05, %v6643_v62  ;;  %v6831_v44 = vadd.f32 %v15613_v40, %v6783_v39  ;;  %v6832_v17 = vadd.f32 %v15611_v21, %v6784_v26  ;;  %v6371_v16 = vadd.f32 %v6370_v46, %v6291_v32  ;;  %v6294_v62 = vpop.f32.mrf.mxu3  ;;  %v17138_v46 = vld [vmem:[#allocation28_spill] sm:$0xff] }
 0x9b2   :  { %v6827_v19 = vadd.f32 %v15613_v40, %v6779_v52  ;;  %v6625_v42 = vadd.f32 %v6573_v38, %v6572_v28  ;;  %v6369_v60 = vadd.f32 %v6368_v8, %v6289_v57  ;;  %v6374_v53 = vadd.f32 %v6373_v3, %v6294_v62  ;;  %v17139_v8 = vld [vmem:[#allocation35_spill] sm:$0xff] }
 0x9b3   :  { %10236 = vrsqrt.f32 %v6650_v4  ;;  %v15658_v12 = vsub.f32 %v15552_v55, %v6522_v48  ;;  %v6574_v9 = vmul.f32 %v15653_v47, %v15653_v47  ;;  %v6911_v45 = vpack.c.bf16 %v6832_v17, %v6831_v44  ;;  %v17140_v44 = vld [vmem:[#allocation39_spill] sm:$0xff] }
 0x9b4   :  { %v6909_v37 = vpack.c.bf16 %v6828_v51, %v6827_v19  ;;  %7259 = vmatpush.bf16.msra.mxu3 %v6912_v11  ;;  %v6403_v22 = vadd.f32 %v6371_v16, %v17137_v59  ;;  %v6402_v32 = vadd.f32 %v6369_v60, %v17138_v46  ;;  %v6404_v57 = vadd.f32 %v6374_v53, %v17139_v8 }
 0x9b5   :  { %v6626_v20 = vadd.f32 %v6625_v42, %v6574_v9  ;;  %v6575_v26 = vmul.f32 %v15658_v12, %v15658_v12  ;;  %vm6663_vm15 = vweird.f32 %v6650_v4 }
 0x9b6   :  { %v6451_v55 = vadd.f32 %v15391_v41, %v6403_v22  ;;  %v6450_v52 = vadd.f32 %v15394_v61, %v6402_v32  ;;  %v6452_v38 = vadd.f32 %v15398_v34, %v6404_v57 }
 0x9b7   :  { %v6627_v15 = vadd.f32 %v6626_v20, %v6575_v26 }
 0x9b8   :  { %7260 = vmatpush.bf16.msra.mxu3 %v6911_v45  ;;  %v6375_v28 = vpop.f32.mrf.mxu0  ;;  %v6508_v11 = vadd.f32 %v6451_v55, %v6450_v52 }
 0x9b9   :  { %v10237_v58 = vpop.eup %10236  ;;  %v6296_v63 = vpop.f32.mrf.mxu3  ;;  %v6628_v42 = vrot.slane %v6627_v15, 4 }
 0x9ba   :  { %v6658_v39 = vmul.f32 %v10237_v58, %v6650_v4  ;;  %v6376_v19 = vadd.f32 %v6375_v28, %v6296_v63  ;;  %vm6664_vm14 = vweird.f32 %v10237_v58  ;;  %v6509_v41 = vadd.f32 %v6508_v11, %v6452_v38 }
 0x9bb   :  { %vm6665_vm0 = vmor %vm6663_vm15, %vm6664_vm14  ;;  %v6629_v9 = vadd.f32 %v6628_v42, %v6627_v15 }
 0x9bc   :  { %v6659_v2 = vmul.f32 %v10237_v58, %v6658_v39  ;;  %7261 = vmatpush.bf16.msra.mxu3 %v6910_v54  ;;  %v6405_v17 = vadd.f32 %v6376_v19, %v17140_v44 }
 0x9bd   :  { %v6630_v22 = vrot.slane %v6629_v9, 2 }
 0x9be   :  { %v6660_v48 = vmul.f32 0.5, %v6659_v2  ;;  %v6453_v60 = vadd.f32 %v15402_v10, %v6405_v17 }
 0x9bf   :  { %v6631_v32 = vadd.f32 %v6630_v22, %v6629_v9  ;;  %v6745_v22 = vmul.f32 %v15554_v7, %v15491_v25 }
 0x9c0   :  { %v6661_v51 = vsub.f32 1.5, %v6660_v48  ;;  %7262 = vmatpush.bf16.msra.mxu3 %v6909_v37  ;;  %v6510_v53 = vadd.f32 %v6509_v41, %v6453_v60 }
 0x9c1   :  { %v6632_v26 = vrot.slane %v6631_v32, 1 }
 0x9c2   :  { %v6662_v16 = vmul.f32 %v10237_v58, %v6661_v51  ;;  %v6511_v59 = vrot.slane %v6510_v53, 4 }
 0x9c3   :  { %v6633_v19 = vadd.f32 %v6632_v26, %v6631_v32 }
 0x9c4   :  { %v6666_v61 = vsel %vm6665_vm0, %v10237_v58, %v6662_v16 }
 0x9c5   :  { %v6729_v54 = vmul.f32 %v6666_v61, %v15572_v6  ;;  %v6730_v3 = vmul.f32 %v6666_v61, %v15575_v36  ;;  %v6727_v34 = vmul.f32 %v6666_v61, %v15566_v0  ;;  %v6728_v62 = vmul.f32 %v6666_v61, %v15569_v14 }
 0x9c6   :  { %v6512_v36 = vadd.f32 %v6511_v59, %v6510_v53  ;;  %v6648_v42 = vmul.f32 %v6633_v19, %v17116_v13  ;;  %v9023_v59 = vld [vmem:[#allocation5] sm:$0xf] }
 0x9c7   :  { %v6777_v45 = vmul.f32 %v15587_v5, %v6729_v54  ;;  %v6778_v4 = vmul.f32 %v15585_v24, %v6730_v3  ;;  %v6775_v37 = vmul.f32 %v15592_v27, %v6727_v34  ;;  %v6776_v10 = vmul.f32 %v15604_v1, %v6728_v62 }
 0x9c8   :  { %v6513_v20 = vrot.slane %v6512_v36, 2 }
 0x9c9   :  { %v6825_v58 = vadd.f32 %v15590_v33, %v6777_v45  ;;  %v6826_v6 = vadd.f32 %v15594_v56, %v6778_v4  ;;  %v6823_v14 = vadd.f32 %v15613_v40, %v6775_v37  ;;  %v6824_v39 = vadd.f32 %v15611_v21, %v6776_v10  ;;  %v9625_v10 = vld [vmem:[#allocation5 + $0x4] sm:$0xf0] }
 0x9ca   :  { %v6514_v46 = vadd.f32 %v6513_v20, %v6512_v36  ;;  %v6793_v20 = vmul.f32 %v15587_v5, %v6745_v22  ;;  %v9039_v22 = vld [vmem:[#allocation5 + $0x20] sm:$0xf] }
 0x9cb   :  { %v6908_v0 = vpack.c.bf16 %v6826_v6, %v6825_v58  ;;  %v6907_v8 = vpack.c.bf16 %v6824_v39, %v6823_v14  ;;  %v9024_v58 = vor.u32 %v9625_v10, %v9023_v59 }
 0x9cc   :  { %v6515_v57 = vrot.slane %v6514_v46, 1 }
 0x9cd   :  { %7263 = vmatpush.bf16.msra.mxu3 %v6908_v0  ;;  %v6794_v0 = vmul.f32 %v15585_v24, %v15560_v49 }
 0x9ce   :  { %v6516_v2 = vadd.f32 %v6515_v57, %v6514_v46  ;;  %v6743_v57 = vmul.f32 %v15554_v7, %v15487_v31 }
 0x9cf   :  { %v15701_v46 = vadd.f32 %v15594_v56, %v6794_v0  ;;  %v9629_v0 = vld [vmem:[#allocation5 + $0x24] sm:$0xf0] }
 0x9d0   :  { %v6523_v48 = vmul.f32 %v6516_v2, %v17116_v13  ;;  %v6744_v2 = vmul.f32 %v15554_v7, %v15489_v35 }
 0x9d1   :  { %7264 = vmatpush.bf16.msra.mxu3 %v6907_v8  ;;  %v6841_v8 = vadd.f32 %v15590_v33, %v6793_v20 }
 0x9d2   :  { %v15685_v15 = vsub.f32 %v6450_v52, %v6523_v48  ;;  %v15687_v28 = vsub.f32 %v6451_v55, %v6523_v48  ;;  %v6550_v63 = vsub.f32 %v6452_v38, %v6523_v48  ;;  %v6551_v51 = vsub.f32 %v6453_v60, %v6523_v48 }
 0x9d3   :  { %v6655_v52 = vadd.f32 1e-05, %v6648_v42  ;;  %v6916_v49 = vpack.c.bf16 %v15701_v46, %v6841_v8  ;;  %v6791_v48 = vmul.f32 %v15592_v27, %v6743_v57  ;;  %v6792_v19 = vmul.f32 %v15604_v1, %v6744_v2  ;;  %v9031_v42 = vld [vmem:[#allocation5 + $0x10] sm:$0xf]  ;;  %v9633_v8 = vld [vmem:[#allocation5 + $0x44] sm:$0xf0] }
 0x9d4   :  { %v6576_v11 = vmul.f32 %v15685_v15, %v15685_v15  ;;  %v6577_v44 = vmul.f32 %v15687_v28, %v15687_v28  ;;  %v6578_v17 = vmul.f32 %v6550_v63, %v6550_v63  ;;  %v6579_v41 = vmul.f32 %v6551_v51, %v6551_v51  ;;  %7265 = vmatmul.bf16.vlgmr.msra.gmra.mxu3 %v9024_v58  ;;  %v9628_v2 = vld [vmem:[#allocation5 + $0x24] sm:$0xf] }
 0x9d5   :  { %10238 = vrsqrt.f32 %v6655_v52  ;;  %vm6713_vm3 = vweird.f32 %v6655_v52 }
 0x9d6   :  { %v6634_v16 = vadd.f32 %v6577_v44, %v6576_v11  ;;  %v6839_v44 = vadd.f32 %v15613_v40, %v6791_v48  ;;  %v9635_v48 = vld [vmem:[#allocation5 + $0x54] sm:$0xf0] }
 0x9d8   :  { %v6635_v61 = vadd.f32 %v6634_v16, %v6578_v17  ;;  %v6840_v17 = vadd.f32 %v15611_v21, %v6792_v19 }
 0x9da   :  { %v6636_v54 = vadd.f32 %v6635_v61, %v6579_v41  ;;  %v6915_v7 = vpack.c.bf16 %v6840_v17, %v6839_v44  ;;  %v9627_v41 = vld [vmem:[#allocation5 + $0x14] sm:$0xf0]  ;;  %v9049_v44 = vld [vmem:[#allocation5 + $0x38] sm:$0xf0] }
 0x9db   :  { %v10239_v62 = vpop.eup %10238 }
 0x9dc   :  { %v6637_v3 = vrot.slane %v6636_v54, 4  ;;  %v6708_v9 = vmul.f32 %v10239_v62, %v6655_v52  ;;  %vm6714_vm1 = vweird.f32 %v10239_v62 }
 0x9dd   :  { %vm6715_vm4 = vmor %vm6713_vm3, %vm6714_vm1 }
 0x9de   :  { %v6638_v55 = vadd.f32 %v6637_v3, %v6636_v54  ;;  %v6709_v37 = vmul.f32 %v10239_v62, %v6708_v9 }
 0x9e0   :  { %v6639_v38 = vrot.slane %v6638_v55, 2  ;;  %v6710_v6 = vmul.f32 0.5, %v6709_v37 }
 0x9e2   :  { %v6640_v34 = vadd.f32 %v6639_v38, %v6638_v55  ;;  %v6711_v39 = vsub.f32 1.5, %v6710_v6 }
 0x9e4   :  { %v6641_v60 = vrot.slane %v6640_v34, 1  ;;  %v6712_v26 = vmul.f32 %v10239_v62, %v6711_v39 }
 0x9e6   :  { %v6642_v53 = vadd.f32 %v6641_v60, %v6640_v34  ;;  %v6716_v35 = vsel %vm6715_vm4, %v10239_v62, %v6712_v26  ;;  %v9032_v34 = vor.u32 %v9627_v41, %v9031_v42  ;;  %v9057_v42 = vld [vmem:[#allocation5 + $0x48] sm:$0xf0] }
 0x9e7   :  { %v6750_v52 = vmul.f32 %v6716_v35, %v15658_v12  ;;  %v6749_v38 = vmul.f32 %v6716_v35, %v15653_v47  ;;  %v6747_v47 = vmul.f32 %v6716_v35, %v15626_v18  ;;  %v6748_v37 = vmul.f32 %v6716_v35, %v15629_v43  ;;  %v9637_v35 = vld [vmem:[#allocation5 + $0x64] sm:$0xf0] }
 0x9e8   :  { %v6649_v45 = vmul.f32 %v6642_v53, %v17116_v13  ;;  %7270 = vmatmul.bf16.gmra.mxu3 %v9032_v34  ;;  %v9040_v43 = vor.u32 %v9629_v0, %v9039_v22  ;;  %v9087_v34 = vld [vmem:[#allocation5 + $0x80] sm:$0xf] }
 0x9e9   :  { %v6798_v12 = vmul.f32 %v15585_v24, %v6750_v52  ;;  %v6795_v6 = vmul.f32 %v15592_v27, %v6747_v47  ;;  %v9065_v52 = vld [vmem:[#allocation5 + $0x58] sm:$0xf0]  ;;  %v9643_v47 = vld [vmem:[#allocation5 + $0x94] sm:$0xf0] }
 0x9ea   :  { %v6656_v4 = vadd.f32 1e-05, %v6649_v45 }
 0x9eb   :  { %v6846_v59 = vadd.f32 %v15594_v56, %v6798_v12  ;;  %v6843_v18 = vadd.f32 %v15613_v40, %v6795_v6  ;;  %v9095_v12 = vld [vmem:[#allocation5 + $0x90] sm:$0xf]  ;;  %v9645_v6 = vld [vmem:[#allocation5 + $0xa4] sm:$0xf0] }
 0x9ec   :  { %10240 = vrsqrt.f32 %v6656_v4  ;;  %vm6723_vm5 = vweird.f32 %v6656_v4 }
 0x9f2   :  { %v10241_v36 = vpop.eup %10240 }
 0x9f3   :  { %v6718_v14 = vmul.f32 %v10241_v36, %v6656_v4  ;;  %vm6724_vm2 = vweird.f32 %v10241_v36 }
 0x9f4   :  { %vm6725_vm6 = vmor %vm6723_vm5, %vm6724_vm2 }
 0x9f5   :  { %v6719_v32 = vmul.f32 %v10241_v36, %v6718_v14 }
 0x9f7   :  { %v6720_v25 = vmul.f32 0.5, %v6719_v32  ;;  %v9055_v32 = vld [vmem:[#allocation5 + $0x40] sm:$0xf] }
 0x9f8   :  { %7275 = vmatmul.bf16.gmra.mxu3 %v9040_v43  ;;  %v9056_v57 = vor.u32 %v9633_v8, %v9055_v32 }
 0x9f9   :  { %v6721_v11 = vsub.f32 1.5, %v6720_v25  ;;  %v9041_v25 = vld [vmem:[#allocation5 + $0x28] sm:$0xf0] }
 0x9fa   :  { %v9044_v26 = vor.u32 %v9628_v2, %v9041_v25  ;;  %v9119_v2 = vld [vmem:[#allocation5 + $0xc0] sm:$0xf]  ;;  %v9649_v25 = vld [vmem:[#allocation5 + $0xc4] sm:$0xf0] }
 0x9fb   :  { %v6722_v31 = vmul.f32 %v10241_v36, %v6721_v11  ;;  %v9630_v11 = vld [vmem:[#allocation5 + $0x34] sm:$0xf] }
 0x9fc   :  { %v9052_v17 = vor.u32 %v9630_v11, %v9049_v44  ;;  %v9644_v11 = vld [vmem:[#allocation5 + $0xa4] sm:$0xf]  ;;  %v9105_v44 = vld [vmem:[#allocation5 + $0xa8] sm:$0xf0] }
 0x9fd   :  { %v6726_v16 = vsel %vm6725_vm6, %v10241_v36, %v6722_v31  ;;  %v9071_v31 = vld [vmem:[#allocation5 + $0x60] sm:$0xf] }
 0x9fe   :  { %v6754_v61 = vmul.f32 %v6726_v16, %v6551_v51  ;;  %v6753_v54 = vmul.f32 %v6726_v16, %v6550_v63  ;;  %v6751_v3 = vmul.f32 %v6726_v16, %v15685_v15  ;;  %v6752_v55 = vmul.f32 %v6726_v16, %v15687_v28  ;;  %v9632_v16 = vld [vmem:[#allocation5 + $0x44] sm:$0xf] }
 0x9ff   :  { %v6797_v28 = vmul.f32 %v15587_v5, %v6749_v38  ;;  %v9060_v41 = vor.u32 %v9632_v16, %v9057_v42  ;;  %v9127_v16 = vld [vmem:[#allocation5 + $0xd0] sm:$0xf]  ;;  %v9651_v42 = vld [vmem:[#allocation5 + $0xd4] sm:$0xf0] }
 0xa00   :  { %v6801_v60 = vmul.f32 %v15587_v5, %v6753_v54  ;;  %v6802_v62 = vmul.f32 %v15585_v24, %v6754_v61  ;;  %v6799_v53 = vmul.f32 %v15592_v27, %v6751_v3  ;;  %v6800_v9 = vmul.f32 %v15604_v1, %v6752_v55  ;;  %v9047_v27 = vld [vmem:[#allocation5 + $0x30] sm:$0xf]  ;;  %v9639_v54 = vld [vmem:[#allocation5 + $0x74] sm:$0xf0]  ;;  %v9634_v55 = vld [vmem:[#allocation5 + $0x54] sm:$0xf] }
 0xa01   :  { %v6845_v58 = vadd.f32 %v15590_v33, %v6797_v28  ;;  %v6796_v5 = vmul.f32 %v15604_v1, %v6748_v37  ;;  %v9631_v1 = vld [vmem:[#allocation5 + $0x34] sm:$0xf0]  ;;  %v9079_v61 = vld [vmem:[#allocation5 + $0x70] sm:$0xf]  ;;  %v9068_v38 = vor.u32 %v9634_v55, %v9065_v52  ;;  %v9081_v37 = vld [vmem:[#allocation5 + $0x78] sm:$0xf0] }
 0xa02   :  { %v6849_v63 = vadd.f32 %v15590_v33, %v6801_v60  ;;  %v6850_v15 = vadd.f32 %v15594_v56, %v6802_v62  ;;  %v6847_v45 = vadd.f32 %v15613_v40, %v6799_v53  ;;  %v6848_v4 = vadd.f32 %v15611_v21, %v6800_v9  ;;  %v9624_v56 = vld [vmem:[#allocation5 + $0x4] sm:$0xf]  ;;  %v9025_v33 = vld [vmem:[#allocation5 + $0x8] sm:$0xf0]  ;;  %v9626_v40 = vld [vmem:[#allocation5 + $0x14] sm:$0xf] }
 0xa03   :  { %v6918_v24 = vpack.c.bf16 %v6846_v59, %v6845_v58  ;;  %v6844_v36 = vadd.f32 %v15611_v21, %v6796_v5  ;;  %v9028_v39 = vor.u32 %v9624_v56, %v9025_v33  ;;  %v9048_v20 = vor.u32 %v9631_v1, %v9047_v27  ;;  %v9033_v21 = vld [vmem:[#allocation5 + $0x18] sm:$0xf0]  ;;  %v9641_v60 = vld [vmem:[#allocation5 + $0x84] sm:$0xf0]  ;;  %v9636_v9 = vld [vmem:[#allocation5 + $0x64] sm:$0xf] }
 0xa04   :  { %v6920_v51 = vpack.c.bf16 %v6850_v15, %v6849_v63  ;;  %v6919_v10 = vpack.c.bf16 %v6848_v4, %v6847_v45  ;;  %v9036_v46 = vor.u32 %v9626_v40, %v9033_v21  ;;  %v9080_v3 = vor.u32 %v9639_v54, %v9079_v61  ;;  %v9073_v63 = vld [vmem:[#allocation5 + $0x68] sm:$0xf0]  ;;  %v9638_v4 = vld [vmem:[#allocation5 + $0x74] sm:$0xf]  ;;  %v9103_v58 = vld [vmem:[#allocation5 + $0xa0] sm:$0xf] }
 0xa05   :  { %v6917_v14 = vpack.c.bf16 %v6844_v36, %v6843_v18  ;;  %v9088_v62 = vor.u32 %v9641_v60, %v9087_v34  ;;  %v9076_v15 = vor.u32 %v9636_v9, %v9073_v63  ;;  %v9084_v59 = vor.u32 %v9638_v4, %v9081_v37  ;;  %v9640_v18 = vld [vmem:[#allocation5 + $0x84] sm:$0xf]  ;;  %v9089_v36 = vld [vmem:[#allocation5 + $0x88] sm:$0xf0]  ;;  %v9111_v56 = vld [vmem:[#allocation5 + $0xb0] sm:$0xf] }
 0xa06   :  { %7408 = vmatpush.bf16.msra.mxu0 %v6920_v51  ;;  %v9096_v51 = vor.u32 %v9643_v47, %v9095_v12  ;;  %v9104_v5 = vor.u32 %v9645_v6, %v9103_v58  ;;  %v9092_v22 = vor.u32 %v9640_v18, %v9089_v36  ;;  %v9647_v33 = vld [vmem:[#allocation5 + $0xb4] sm:$0xf0]  ;;  %v9642_v40 = vld [vmem:[#allocation5 + $0x94] sm:$0xf]  ;;  %v9097_v21 = vld [vmem:[#allocation5 + $0x98] sm:$0xf0] }
 0xa07   :  { %v9646_v55 = vld [vmem:[#allocation5 + $0xb4] sm:$0xf]  ;;  %v9113_v52 = vld [vmem:[#allocation5 + $0xb8] sm:$0xf0]  ;;  %v9653_v9 = vld [vmem:[#allocation5 + $0xe4] sm:$0xf0] }
 0xa08   :  { %7280 = vmatmul.bf16.gmra.mxu3 %v9048_v20  ;;  %v9648_v47 = vld [vmem:[#allocation5 + $0xc4] sm:$0xf]  ;;  %v9655_v58 = vld [vmem:[#allocation5 + $0xf4] sm:$0xf0]  ;;  %v9650_v18 = vld [vmem:[#allocation5 + $0xd4] sm:$0xf] }
 0xa09   :  { %v9129_v36 = vld [vmem:[#allocation5 + $0xd8] sm:$0xf0] }
 0xa0a   :  { %7409 = vmatpush.bf16.msra.mxu0 %v6919_v10 }
 0xa0e   :  { %7410 = vmatpush.bf16.msra.mxu0 %v6918_v24 }
 0xa12   :  { %7411 = vmatpush.bf16.msra.mxu0 %v6917_v14 }
 0xa16   :  { %7412 = vmatpush.bf16.msra.mxu0 %v6916_v49  ;;  %v9063_v49 = vld [vmem:[#allocation5 + $0x50] sm:$0xf] }
 0xa17   :  { %v9064_v19 = vor.u32 %v9635_v48, %v9063_v49 }
 0xa18   :  { %7285 = vmatmul.bf16.gmra.mxu3 %v9056_v57 }
 0xa1a   :  { %7413 = vmatpush.bf16.msra.mxu0 %v6915_v7  ;;  %v9072_v7 = vor.u32 %v9637_v35, %v9071_v31 }
 0xa1d   :  { %9245 = vmatmul.msk.bf16.vlgmr.msra.gmra.mxu0 %vm1234_vm8, %v9028_v39  ;;  %v9112_v39 = vor.u32 %v9647_v33, %v9111_v56 }
 0xa28   :  { %7290 = vmatmul.bf16.gmra.mxu3 %v9064_v19 }
 0xa2d   :  { %9246 = vmatmul.msk.bf16.gmra.mxu0 %vm1234_vm8, %v9036_v46  ;;  %v9100_v46 = vor.u32 %v9642_v40, %v9097_v21  ;;  %v9151_v21 = vld [vmem:[#allocation5 + $0x100] sm:$0xf] }
 0xa38   :  { %7295 = vmatmul.bf16.gmra.mxu3 %v9072_v7 }
 0xa3d   :  { %9247 = vmatmul.msk.bf16.gmra.mxu0 %vm1234_vm8, %v9044_v26  ;;  %v9120_v26 = vor.u32 %v9649_v25, %v9119_v2  ;;  %v15775_v2 = vpop.permute.xlu2 %7587 }
 0xa48   :  { %7300 = vmatmul.bf16.gmra.mxu3 %v9080_v3 }
 0xa4d   :  { %9248 = vmatmul.msk.bf16.gmra.mxu0 %vm1234_vm8, %v9052_v17  ;;  %v9108_v17 = vor.u32 %v9644_v11, %v9105_v44  ;;  %v15784_v11 = vpop.permute.xlu2 %7582  ;;  %v9654_v44 = vld [vmem:[#allocation5 + $0xf4] sm:$0xf] }
 0xa57   :  { %v7266_v53 = vpop.f32.mrf.mxu3 }
 0xa58   :  { %7305 = vmatmul.bf16.gmra.mxu3 %v9088_v62 }
 0xa5d   :  { %9249 = vmatmul.msk.bf16.gmra.mxu0 %vm1234_vm8, %v9060_v41  ;;  %v9128_v41 = vor.u32 %v9651_v42, %v9127_v16 }
 0xa5f   :  { %v7268_v28 = vpop.f32.mrf.mxu3 }
 0xa68   :  { %7310 = vmatmul.bf16.gmra.mxu3 %v9096_v51  ;;  %v9121_v51 = vld [vmem:[#allocation5 + $0xc8] sm:$0xf0] }
 0xa6b   :  { %v7271_v45 = vpop.f32.mrf.mxu3 }
 0xa6d   :  { %9250 = vmatmul.msk.bf16.gmra.mxu0 %vm1234_vm8, %v9068_v38  ;;  %v9116_v38 = vor.u32 %v9646_v55, %v9113_v52 }
 0xa73   :  { %v7273_v10 = vpop.f32.mrf.mxu3 }
 0xa78   :  { %7315 = vmatmul.bf16.gmra.mxu3 %v9104_v5 }
 0xa7b   :  { %v7276_v24 = vpop.f32.mrf.mxu3 }
 0xa7d   :  { %9251 = vmatmul.msk.bf16.gmra.mxu0 %vm1234_vm8, %v9076_v15 }
 0xa83   :  { %v7278_v14 = vpop.f32.mrf.mxu3 }
 0xa88   :  { %7320 = vmatmul.bf16.gmra.mxu3 %v9112_v39  ;;  %v9652_v39 = vld [vmem:[#allocation5 + $0xe4] sm:$0xf] }
 0xa8b   :  { %v7281_v20 = vpop.f32.mrf.mxu3 }
 0xa8d   :  { %9252 = vmatmul.msk.bf16.gmra.mxu0 %vm1234_vm8, %v9084_v59 }
 0xa93   :  { %v7283_v57 = vpop.f32.mrf.mxu3 }
 0xa98   :  { %7325 = vmatmul.bf16.gmra.mxu3 %v9120_v26 }
 0xa9a   :  { %v7415_v0 = vpop.f32.mrf.mxu0 }
 0xa9b   :  { %v15743_v43 = vadd.f32 %v7415_v0, %v7266_v53  ;;  %v7286_v19 = vpop.f32.mrf.mxu3  ;;  %v9135_v53 = vld [vmem:[#allocation5 + $0xe0] sm:$0xf] }
 0xa9c   :  { %v9136_v63 = vor.u32 %v9653_v9, %v9135_v53 }
 0xa9d   :  { %9253 = vmatmul.msk.bf16.gmra.mxu0 %vm1234_vm8, %v9092_v22  ;;  %v9132_v22 = vor.u32 %v9650_v18, %v9129_v36 }
 0xaa2   :  { %v7417_v27 = vpop.f32.mrf.mxu0 }
 0xaa3   :  { %v15746_v1 = vadd.f32 %v7417_v27, %v7268_v28  ;;  %v15755_v7 = vpop.f32.mrf.mxu3  ;;  %v9137_v27 = vld [vmem:[#allocation5 + $0xe8] sm:$0xf0] }
 0xaa4   :  { %v9140_v40 = vor.u32 %v9652_v39, %v9137_v27 }
 0xaa8   :  { %7330 = vmatmul.bf16.gmra.mxu3 %v9128_v41  ;;  %v9159_v41 = vld [vmem:[#allocation5 + $0x110] sm:$0xf] }
 0xaaa   :  { %v7420_v32 = vpop.f32.mrf.mxu0 }
 0xaab   :  { %v15748_v8 = vadd.f32 %v7420_v32, %v7271_v45  ;;  %v15758_v3 = vpop.f32.mrf.mxu3  ;;  %v9124_v45 = vor.u32 %v9648_v47, %v9121_v51 }
 0xaad   :  { %9254 = vmatmul.msk.bf16.gmra.mxu0 %vm1234_vm8, %v9100_v46  ;;  %v9657_v46 = vld [vmem:[#allocation5 + $0x104] sm:$0xf0] }
 0xab2   :  { %v7422_v49 = vpop.f32.mrf.mxu0 }
 0xab3   :  { %v15751_v48 = vadd.f32 %v7422_v49, %v7273_v10  ;;  %v15760_v62 = vpop.f32.mrf.mxu3  ;;  %v9143_v10 = vld [vmem:[#allocation5 + $0xf0] sm:$0xf] }
 0xab4   :  { %v9144_v6 = vor.u32 %v9655_v58, %v9143_v10 }
 0xab8   :  { %7335 = vmatmul.bf16.gmra.mxu3 %v9136_v63 }
 0xaba   :  { %v7425_v31 = vpop.f32.mrf.mxu0 }
 0xabb   :  { %v15753_v35 = vadd.f32 %v7425_v31, %v7276_v24  ;;  %v15763_v12 = vpop.f32.mrf.mxu3 }
 0xabd   :  { %9255 = vmatmul.msk.bf16.gmra.mxu0 %vm1234_vm8, %v9108_v17  ;;  %v9145_v17 = vld [vmem:[#allocation5 + $0xf8] sm:$0xf0] }
 0xac2   :  { %v7427_v61 = vpop.f32.mrf.mxu0 }
 0xac3   :  { %v7428_v54 = vadd.f32 %v7427_v61, %v7278_v14  ;;  %v7298_v59 = vpop.f32.mrf.mxu3  ;;  %v9659_v61 = vld [vmem:[#allocation5 + $0x114] sm:$0xf0] }
 0xac4   :  { %v9160_v55 = vor.u32 %v9659_v61, %v9159_v41 }
 0xac5   :  { %v7600_v16 = vadd.f32 %v15784_v11, %v7428_v54 }
 0xac7   :  { %v7656_v9 = vmax.f32 %v7600_v16, 0.0 }
 0xac8   :  { %7340 = vmatmul.bf16.gmra.mxu3 %v9144_v6 }
 0xaca   :  { %v7430_v34 = vpop.f32.mrf.mxu0 }
 0xacb   :  { %v7431_v60 = vadd.f32 %v7430_v34, %v7281_v20  ;;  %v7301_v24 = vpop.f32.mrf.mxu3  ;;  %v15773_v20 = vpop.permute.xlu0 %7592  ;;  %v9148_v34 = vor.u32 %v9654_v44, %v9145_v17 }
 0xacd   :  { %9256 = vmatmul.msk.bf16.gmra.mxu0 %vm1234_vm8, %v9116_v38  ;;  %v7601_v38 = vadd.f32 %v15775_v2, %v7431_v60 }
 0xacf   :  { %v7657_v51 = vmax.f32 %v7601_v38, 0.0 }
 0xad2   :  { %v7432_v15 = vpop.f32.mrf.mxu0 }
 0xad3   :  { %v7433_v28 = vadd.f32 %v7432_v15, %v7283_v57  ;;  %v7303_v14 = vpop.f32.mrf.mxu3  ;;  %v9152_v57 = vor.u32 %v9657_v46, %v9151_v21  ;;  %v15780_v49 = vpop.permute.xlu0 %7567 }
 0xad4   :  { %v7597_v18 = vadd.f32 %v15780_v49, %v15748_v8 }
 0xad5   :  { %v7602_v42 = vadd.f32 %v15773_v20, %v7433_v28 }
 0xad6   :  { %v7653_v21 = vmax.f32 %v7597_v18, 0.0 }
 0xad7   :  { %v7658_v63 = vmax.f32 %v7602_v42, 0.0  ;;  %v9167_v42 = vld [vmem:[#allocation5 + $0x120] sm:$0xf] }
 0xad8   :  { %7345 = vmatmul.bf16.gmra.mxu3 %v9152_v57 }
 0xad9   :  { %v15806_v10 = vpack.c.bf16 %v7658_v63, %v7657_v51 }
 0xada   :  { %v7435_v4 = vpop.f32.mrf.mxu0 }
 0xadb   :  { %v15765_v37 = vadd.f32 %v7435_v4, %v7286_v19  ;;  %v15771_v33 = vpop.f32.mrf.mxu3  ;;  %v15782_v19 = vpop.permute.xlu1 %7577 }
 0xadc   :  { %v7599_v52 = vadd.f32 %v15782_v19, %v15753_v35  ;;  %v15793_v15 = vpop.permute.xlu0 %7562  ;;  %v15802_v35 = vpop.permute.xlu2 %7557 }
 0xadd   :  { %9257 = vmatmul.msk.bf16.gmra.mxu0 %vm1234_vm8, %v9124_v45  ;;  %v7596_v28 = vadd.f32 %v15793_v15, %v15746_v1  ;;  %v7595_v6 = vadd.f32 %v15802_v35, %v15743_v43 }
 0xade   :  { %v7655_v47 = vmax.f32 %v7599_v52, 0.0 }
 0xadf   :  { %v7652_v39 = vmax.f32 %v7596_v28, 0.0 }
 0xae0   :  { %v15808_v58 = vpack.c.bf16 %v7656_v9, %v7655_v47  ;;  %v7603_v47 = vadd.f32 %v15802_v35, %v15765_v37 }
 0xae2   :  { %v15768_v5 = vpop.f32.mrf.mxu0 }
 0xae3   :  { %v15777_v25 = vpop.f32.mrf.mxu3  ;;  %v15796_v54 = vpop.permute.xlu1 %7572 }
 0xae4   :  { %v7598_v60 = vadd.f32 %v15796_v54, %v15751_v48 }
 0xae6   :  { %v7654_v27 = vmax.f32 %v7598_v60, 0.0 }
 0xae8   :  { %7350 = vmatmul.bf16.gmra.mxu3 %v9160_v55  ;;  %v7764_v16 = vpack.c.bf16 %v7654_v27, %v7653_v21  ;;  %v9663_v27 = vld [vmem:[#allocation5 + $0x134] sm:$0xf0] }
 0xaea   :  { %v7440_v0 = vpop.f32.mrf.mxu0 }
 0xaeb   :  { %v15786_v31 = vpop.f32.mrf.mxu3  ;;  %v7441_v44 = vadd.f32 %v7440_v0, %v15758_v3 }
 0xaed   :  { %9258 = vmatmul.msk.bf16.gmra.mxu0 %vm1234_vm8, %v9132_v22  ;;  %v7605_v38 = vadd.f32 %v15780_v49, %v7441_v44 }
 0xaef   :  { %v7661_v51 = vmax.f32 %v7605_v38, 0.0  ;;  %v9664_v38 = vld [vmem:[#allocation5 + $0x144] sm:$0xf] }
 0xaf2   :  { %v7442_v56 = vpop.f32.mrf.mxu0 }
 0xaf3   :  { %v15800_v45 = vpop.f32.mrf.mxu3  ;;  %v7443_v46 = vadd.f32 %v7442_v56, %v15760_v62  ;;  %v7438_v62 = vadd.f32 %v15768_v5, %v15755_v7 }
 0xaf5   :  { %v7606_v61 = vadd.f32 %v15796_v54, %v7443_v46  ;;  %v7604_v9 = vadd.f32 %v15793_v15, %v7438_v62  ;;  %v9191_v62 = vld [vmem:[#allocation5 + $0x150] sm:$0xf] }
 0xaf7   :  { %v7662_v63 = vmax.f32 %v7606_v61, 0.0  ;;  %v7660_v28 = vmax.f32 %v7604_v9, 0.0 }
 0xaf9   :  { %v7768_v60 = vpack.c.bf16 %v7662_v63, %v7661_v51  ;;  %v9199_v63 = vld [vmem:[#allocation5 + $0x160] sm:$0xf] }
 0xafa   :  { %v7445_v32 = vpop.f32.mrf.mxu0 }
 0xafb   :  { %v7446_v1 = vadd.f32 %v7445_v32, %v15763_v12  ;;  %v9153_v12 = vld [vmem:[#allocation5 + $0x108] sm:$0xf0]  ;;  %v7316_v32 = vpop.f32.mrf.mxu3 }
 0xafd   :  { %9259 = vmatmul.msk.bf16.gmra.mxu0 %vm1234_vm8, %v9140_v40  ;;  %v7607_v8 = vadd.f32 %v15782_v19, %v7446_v1  ;;  %v9161_v1 = vld [vmem:[#allocation5 + $0x118] sm:$0xf0] }
 0xb02   :  { %v7447_v26 = vpop.f32.mrf.mxu0 }
 0xb03   :  { %v7448_v36 = vadd.f32 %v7447_v26, %v7298_v59  ;;  %v9656_v59 = vld [vmem:[#allocation5 + $0x104] sm:$0xf]  ;;  %v7318_v5 = vpop.f32.mrf.mxu3 }
 0xb04   :  { %v9156_v3 = vor.u32 %v9656_v59, %v9153_v12 }
 0xb05   :  { %v7608_v57 = vadd.f32 %v15784_v11, %v7448_v36  ;;  %v9658_v36 = vld [vmem:[#allocation5 + $0x114] sm:$0xf] }
 0xb07   :  { %v7664_v55 = vmax.f32 %v7608_v57, 0.0  ;;  %v9660_v57 = vld [vmem:[#allocation5 + $0x124] sm:$0xf] }
 0xb0a   :  { %v7450_v53 = vpop.f32.mrf.mxu0 }
 0xb0b   :  { %v7451_v4 = vadd.f32 %v7450_v53, %v7301_v24  ;;  %v7651_v24 = vmax.f32 %v7595_v6, 0.0  ;;  %v7659_v6 = vmax.f32 %v7603_v47, 0.0 }
 0xb0d   :  { %9260 = vmatmul.msk.bf16.gmra.mxu0 %vm1234_vm8, %v9148_v34  ;;  %v7609_v40 = vadd.f32 %v15775_v2, %v7451_v4  ;;  %v7763_v41 = vpack.c.bf16 %v7652_v39, %v7651_v24  ;;  %v7663_v34 = vmax.f32 %v7607_v8, 0.0  ;;  %v7767_v18 = vpack.c.bf16 %v7660_v28, %v7659_v6  ;;  %v9175_v39 = vld [vmem:[#allocation5 + $0x130] sm:$0xf]  ;;  %v9183_v8 = vld [vmem:[#allocation5 + $0x140] sm:$0xf] }
 0xb0e   :  { %v9666_v6 = vld [vmem:[#allocation5 + $0x154] sm:$0xf] }
 0xb0f   :  { %v7665_v26 = vmax.f32 %v7609_v40, 0.0  ;;  %v7769_v7 = vpack.c.bf16 %v7664_v55, %v7663_v34  ;;  %v9176_v40 = vor.u32 %v9663_v27, %v9175_v39  ;;  %v9185_v34 = vld [vmem:[#allocation5 + $0x148] sm:$0xf0] }
 0xb10   :  { %v9188_v47 = vor.u32 %v9664_v38, %v9185_v34 }
 0xb12   :  { %v7452_v22 = vpop.f32.mrf.mxu0 }
 0xb13   :  { %v7453_v48 = vadd.f32 %v7452_v22, %v7303_v14  ;;  %v9661_v14 = vld [vmem:[#allocation5 + $0x124] sm:$0xf0]  ;;  %v7321_v22 = vpop.f32.mrf.mxu3 }
 0xb14   :  { %v9168_v56 = vor.u32 %v9661_v14, %v9167_v42  ;;  %v9662_v42 = vld [vmem:[#allocation5 + $0x134] sm:$0xf] }
 0xb15   :  { %v7610_v43 = vadd.f32 %v15773_v20, %v7453_v48  ;;  %v9164_v48 = vor.u32 %v9658_v36, %v9161_v1  ;;  %v9207_v36 = vld [vmem:[#allocation5 + $0x170] sm:$0xf]  ;;  %v9671_v1 = vld [vmem:[#allocation5 + $0x174] sm:$0xf0] }
 0xb16   :  { %7355 = vmatmul.bf16.gmra.mxu3 %v9168_v56 }
 0xb17   :  { %v7666_v17 = vmax.f32 %v7610_v43, 0.0  ;;  %v9169_v43 = vld [vmem:[#allocation5 + $0x128] sm:$0xf0] }
 0xb18   :  { %v9172_v12 = vor.u32 %v9660_v57, %v9169_v43  ;;  %v9215_v43 = vld [vmem:[#allocation5 + $0x180] sm:$0xf] }
 0xb19   :  { %v7770_v52 = vpack.c.bf16 %v7666_v17, %v7665_v26 }
 0xb1a   :  { %v7455_v0 = vpop.f32.mrf.mxu0 }
 0xb1b   :  { %v15826_v53 = vadd.f32 %v7455_v0, %v15771_v33  ;;  %8100 = vmatpush.bf16.msra.mxu2 %v7770_v52 }
 0xb1d   :  { %9261 = vmatmul.msk.bf16.gmra.mxu0 %vm1234_vm8, %v9156_v3 }
 0xb1f   :  { %8101 = vmatpush.bf16.msra.mxu2 %v7769_v7  ;;  %v9669_v7 = vld [vmem:[#allocation5 + $0x164] sm:$0xf0] }
 0xb22   :  { %v7457_v4 = vpop.f32.mrf.mxu0 }
 0xb23   :  { %v15833_v33 = vadd.f32 %v7457_v4, %v15777_v25  ;;  %8102 = vmatpush.bf16.msra.mxu2 %v7768_v60  ;;  %v7323_v25 = vpop.f32.mrf.mxu3 }
 0xb26   :  { %7360 = vmatmul.bf16.gmra.mxu3 %v9176_v40 }
 0xb27   :  { %8103 = vmatpush.bf16.msra.mxu2 %v7767_v18  ;;  %v9193_v18 = vld [vmem:[#allocation5 + $0x158] sm:$0xf0] }
 0xb28   :  { %v9196_v39 = vor.u32 %v9666_v6, %v9193_v18  ;;  %v7611_v18 = vadd.f32 %v15802_v35, %v15826_v53 }
 0xb2a   :  { %v7460_v37 = vpop.f32.mrf.mxu0 }
 0xb2b   :  { %v15836_v24 = vadd.f32 %v7460_v37, %v15786_v31  ;;  %8104 = vmatpush.bf16.msra.mxu2 %v15806_v10  ;;  %v7326_v44 = vpop.f32.mrf.mxu3  ;;  %v9665_v31 = vld [vmem:[#allocation5 + $0x144] sm:$0xf0] }
 0xb2c   :  { %v9184_v59 = vor.u32 %v9665_v31, %v9183_v8 }
 0xb2d   :  { %9262 = vmatmul.msk.bf16.gmra.mxu0 %vm1234_vm8, %v9164_v48 }
 0xb2f   :  { %8105 = vmatpush.bf16.msra.mxu2 %v15808_v58 }
 0xb32   :  { %v7462_v21 = vpop.f32.mrf.mxu0 }
 0xb33   :  { %v15842_v46 = vadd.f32 %v7462_v21, %v15800_v45  ;;  %8106 = vmatpush.bf16.msra.mxu2 %v7764_v16  ;;  %v15847_v58 = vpop.f32.mrf.mxu3  ;;  %v9177_v16 = vld [vmem:[#allocation5 + $0x138] sm:$0xf0]  ;;  %v9201_v21 = vld [vmem:[#allocation5 + $0x168] sm:$0xf0] }
 0xb34   :  { %v9180_v61 = vor.u32 %v9662_v42, %v9177_v16 }
 0xb36   :  { %7365 = vmatmul.bf16.gmra.mxu3 %v9184_v59 }
 0xb37   :  { %8107 = vmatpush.bf16.msra.mxu2 %v7763_v41  ;;  %v9667_v41 = vld [vmem:[#allocation5 + $0x154] sm:$0xf0] }
 0xb38   :  { %v9192_v56 = vor.u32 %v9667_v41, %v9191_v62  ;;  %v9223_v41 = vld [vmem:[#allocation5 + $0x190] sm:$0xf] }
 0xb3a   :  { %v7465_v10 = vpop.f32.mrf.mxu0 }
 0xb3b   :  { %v15844_v26 = vadd.f32 %v7465_v10, %v7316_v32  ;;  %v15849_v14 = vpop.f32.mrf.mxu3  ;;  %v9670_v10 = vld [vmem:[#allocation5 + $0x174] sm:$0xf] }
 0xb3d   :  { %9263 = vmatmul.msk.bf16.gmra.mxu0 %vm1234_vm8, %v9172_v12 }
 0xb42   :  { %v7467_v17 = vpop.f32.mrf.mxu0 }
 0xb43   :  { %v7468_v45 = vadd.f32 %v7467_v17, %v7318_v5  ;;  %v15852_v32 = vpop.f32.mrf.mxu3  ;;  %v9200_v5 = vor.u32 %v9669_v7, %v9199_v63  ;;  %v9209_v17 = vld [vmem:[#allocation5 + $0x178] sm:$0xf0] }
 0xb44   :  { %v9212_v38 = vor.u32 %v9670_v10, %v9209_v17 }
 0xb45   :  { %v7616_v42 = vadd.f32 %v15784_v11, %v7468_v45  ;;  %v7612_v45 = vadd.f32 %v15793_v15, %v15833_v33 }
 0xb46   :  { %7370 = vmatmul.bf16.gmra.mxu3 %v9192_v56  ;;  %v9675_v56 = vld [vmem:[#allocation5 + $0x194] sm:$0xf0] }
 0xb47   :  { %v7672_v63 = vmax.f32 %v7616_v42, 0.0  ;;  %v7668_v33 = vmax.f32 %v7612_v45, 0.0  ;;  %v9677_v42 = vld [vmem:[#allocation5 + $0x1a4] sm:$0xf0] }
 0xb4a   :  { %v7470_v55 = vpop.f32.mrf.mxu0 }
 0xb4b   :  { %v7471_v52 = vadd.f32 %v7470_v55, %v7321_v22  ;;  %v7336_v9 = vpop.f32.mrf.mxu3  ;;  %v9208_v22 = vor.u32 %v9671_v1, %v9207_v36  ;;  %v7615_v55 = vadd.f32 %v15782_v19, %v15844_v26  ;;  %v7613_v36 = vadd.f32 %v15780_v49, %v15836_v24 }
 0xb4d   :  { %9264 = vmatmul.msk.bf16.gmra.mxu0 %vm1234_vm8, %v9180_v61  ;;  %v9224_v61 = vor.u32 %v9675_v56, %v9223_v41 }
 0xb52   :  { %v7472_v3 = vpop.f32.mrf.mxu0 }
 0xb53   :  { %v7473_v0 = vadd.f32 %v7472_v3, %v7323_v25  ;;  %v7338_v60 = vpop.f32.mrf.mxu3  ;;  %v9668_v25 = vld [vmem:[#allocation5 + $0x164] sm:$0xf]  ;;  %v7617_v3 = vadd.f32 %v15775_v2, %v7471_v52 }
 0xb54   :  { %v9204_v57 = vor.u32 %v9668_v25, %v9201_v21  ;;  %v7667_v21 = vmax.f32 %v7611_v18, 0.0  ;;  %v9674_v18 = vld [vmem:[#allocation5 + $0x194] sm:$0xf] }
 0xb55   :  { %v7618_v16 = vadd.f32 %v15773_v20, %v7473_v0  ;;  %v7614_v0 = vadd.f32 %v15796_v54, %v15842_v46 }
 0xb56   :  { %7375 = vmatmul.bf16.gmra.mxu3 %v9200_v5  ;;  %v7671_v5 = vmax.f32 %v7615_v55, 0.0 }
 0xb57   :  { %v7674_v7 = vmax.f32 %v7618_v16, 0.0  ;;  %v7670_v25 = vmax.f32 %v7614_v0, 0.0  ;;  %v7771_v16 = vpack.c.bf16 %v7668_v33, %v7667_v21 }
 0xb58   :  { %v15877_v52 = vpack.c.bf16 %v7672_v63, %v7671_v5 }
 0xb5a   :  { %v7475_v51 = vpop.f32.mrf.mxu0 }
 0xb5b   :  { %v15854_v28 = vadd.f32 %v7475_v51, %v7326_v44  ;;  %v7341_v40 = vpop.f32.mrf.mxu3  ;;  %v9673_v44 = vld [vmem:[#allocation5 + $0x184] sm:$0xf0] }
 0xb5c   :  { %v9216_v31 = vor.u32 %v9673_v44, %v9215_v43 }
 0xb5d   :  { %9265 = vmatmul.msk.bf16.gmra.mxu0 %vm1234_vm8, %v9188_v47  ;;  %v7673_v47 = vmax.f32 %v7617_v3, 0.0 }
 0xb5f   :  { %v15875_v26 = vpack.c.bf16 %v7674_v7, %v7673_v47 }
 0xb62   :  { %v15857_v4 = vpop.f32.mrf.mxu0 }
 0xb63   :  { %v7343_v37 = vpop.f32.mrf.mxu3 }
 0xb66   :  { %7380 = vmatmul.bf16.gmra.mxu3 %v9208_v22 }
 0xb6a   :  { %v7480_v27 = vpop.f32.mrf.mxu0 }
 0xb6b   :  { %v7346_v59 = vpop.f32.mrf.mxu3  ;;  %v7481_v53 = vadd.f32 %v7480_v27, %v15849_v14 }
 0xb6d   :  { %9266 = vmatmul.msk.bf16.gmra.mxu0 %vm1234_vm8, %v9196_v39  ;;  %v7621_v55 = vadd.f32 %v15780_v49, %v7481_v53 }
 0xb6f   :  { %v7677_v7 = vmax.f32 %v7621_v55, 0.0 }
 0xb72   :  { %v7482_v48 = vpop.f32.mrf.mxu0 }
 0xb73   :  { %v15863_v62 = vpop.f32.mrf.mxu3  ;;  %v7483_v43 = vadd.f32 %v7482_v48, %v15852_v32  ;;  %v7478_v32 = vadd.f32 %v15857_v4, %v15847_v58  ;;  %v7619_v4 = vadd.f32 %v15802_v35, %v15854_v28 }
 0xb75   :  { %v7622_v41 = vadd.f32 %v15796_v54, %v7483_v43  ;;  %v9233_v43 = vld [vmem:[#allocation5 + $0x1a8] sm:$0xf0] }
 0xb76   :  { %7385 = vmatmul.bf16.gmra.mxu3 %v9216_v31 }
 0xb77   :  { %v7678_v63 = vmax.f32 %v7622_v41, 0.0 }
 0xb79   :  { %v7776_v45 = vpack.c.bf16 %v7678_v63, %v7677_v7 }
 0xb7a   :  { %v7485_v8 = vpop.f32.mrf.mxu0 }
 0xb7b   :  { %v15873_v6 = vpop.f32.mrf.mxu3  ;;  %v7486_v22 = vadd.f32 %v7485_v8, %v7336_v9  ;;  %v9217_v9 = vld [vmem:[#allocation5 + $0x188] sm:$0xf0] }
 0xb7d   :  { %9267 = vmatmul.msk.bf16.gmra.mxu0 %vm1234_vm8, %v9204_v57  ;;  %v7669_v57 = vmax.f32 %v7613_v36, 0.0  ;;  %v7623_v24 = vadd.f32 %v15782_v19, %v7486_v22  ;;  %v9225_v36 = vld [vmem:[#allocation5 + $0x198] sm:$0xf0]  ;;  %v9239_v22 = vld [vmem:[#allocation5 + $0x1b0] sm:$0xf] }
 0xb7f   :  { %v7772_v17 = vpack.c.bf16 %v7670_v25, %v7669_v57  ;;  %v7679_v3 = vmax.f32 %v7623_v24, 0.0  ;;  %v9228_v25 = vor.u32 %v9674_v18, %v9225_v36  ;;  %v9676_v57 = vld [vmem:[#allocation5 + $0x1a4] sm:$0xf] }
 0xb82   :  { %v7487_v12 = vpop.f32.mrf.mxu0 }
 0xb83   :  { %v7488_v1 = vadd.f32 %v7487_v12, %v7338_v60  ;;  %v9672_v60 = vld [vmem:[#allocation5 + $0x184] sm:$0xf]  ;;  %v15889_v10 = vpop.f32.mrf.mxu3 }
 0xb84   :  { %v9220_v27 = vor.u32 %v9672_v60, %v9217_v9  ;;  %v9678_v60 = vld [vmem:[#allocation5 + $0x1b4] sm:$0xf]  ;;  %v9241_v9 = vld [vmem:[#allocation5 + $0x1b8] sm:$0xf0] }
 0xb85   :  { %v7624_v44 = vadd.f32 %v15784_v11, %v7488_v1 }
 0xb86   :  { %7390 = vmatmul.bf16.gmra.mxu3 %v9224_v61 }
 0xb87   :  { %v7680_v56 = vmax.f32 %v7624_v44, 0.0 }
 0xb89   :  { %v7777_v58 = vpack.c.bf16 %v7680_v56, %v7679_v3 }
 0xb8a   :  { %v7490_v34 = vpop.f32.mrf.mxu0 }
 0xb8b   :  { %v7491_v51 = vadd.f32 %v7490_v34, %v7341_v40  ;;  %v7620_v34 = vadd.f32 %v15793_v15, %v7478_v32 }
 0xb8d   :  { %9268 = vmatmul.msk.bf16.gmra.mxu0 %vm1234_vm8, %v9212_v38  ;;  %v7625_v46 = vadd.f32 %v15775_v2, %v7491_v51  ;;  %v7676_v47 = vmax.f32 %v7620_v34, 0.0 }
 0xb8f   :  { %v7681_v8 = vmax.f32 %v7625_v46, 0.0 }
 0xb92   :  { %v7492_v39 = vpop.f32.mrf.mxu0 }
 0xb93   :  { %v7493_v40 = vadd.f32 %v7492_v39, %v7343_v37  ;;  %v9231_v37 = vld [vmem:[#allocation5 + $0x1a0] sm:$0xf]  ;;  %v9679_v39 = vld [vmem:[#allocation5 + $0x1b4] sm:$0xf0] }
 0xb94   :  { %v9232_v48 = vor.u32 %v9677_v42, %v9231_v37  ;;  %v9240_v33 = vor.u32 %v9679_v39, %v9239_v22 }
 0xb95   :  { %v7626_v31 = vadd.f32 %v15773_v20, %v7493_v40 }
 0xb96   :  { %7395 = vmatmul.bf16.gmra.mxu3 %v9232_v48 }
 0xb97   :  { %v7682_v12 = vmax.f32 %v7626_v31, 0.0  ;;  %v9236_v31 = vor.u32 %v9676_v57, %v9233_v43 }
 0xb99   :  { %v7778_v14 = vpack.c.bf16 %v7682_v12, %v7681_v8  ;;  %v7356_v5 = vpop.f32.mrf.mxu3 }
 0xb9a   :  { %v7495_v61 = vpop.f32.mrf.mxu0 }
 0xb9b   :  { %v15895_v38 = vadd.f32 %v7495_v61, %v7346_v59  ;;  %8155 = vmatpush.bf16.msra.mxu1 %v7778_v14  ;;  %v7675_v59 = vmax.f32 %v7619_v4, 0.0 }
 0xb9d   :  { %9269 = vmatmul.msk.bf16.gmra.mxu0 %vm1234_vm8, %v9220_v27  ;;  %v7775_v51 = vpack.c.bf16 %v7676_v47, %v7675_v59 }
 0xb9f   :  { %8156 = vmatpush.bf16.msra.mxu1 %v7777_v58 }
 0xba1   :  { %v15903_v1 = vpop.f32.mrf.mxu3 }
 0xba2   :  { %v15901_v0 = vpop.f32.mrf.mxu0 }
 0xba3   :  { %8157 = vmatpush.bf16.msra.mxu1 %v7776_v45 }
 0xba6   :  { %7400 = vmatmul.bf16.gmra.mxu3 %v9240_v33 }
 0xba7   :  { %8158 = vmatpush.bf16.msra.mxu1 %v7775_v51 }
 0xba9   :  { %v7361_v40 = vpop.f32.mrf.mxu3 }
 0xbaa   :  { %v7500_v28 = vpop.f32.mrf.mxu0 }
 0xbab   :  { %v15906_v46 = vadd.f32 %v7500_v28, %v15873_v6  ;;  %8159 = vmatpush.bf16.msra.mxu1 %v15875_v26 }
 0xbad   :  { %9270 = vmatmul.msk.bf16.gmra.mxu0 %vm1234_vm8, %v9228_v25 }
 0xbaf   :  { %8160 = vmatpush.bf16.msra.mxu1 %v15877_v52  ;;  %v9244_v52 = vor.u32 %v9678_v60, %v9241_v9 }
 0xbb1   :  { %v7363_v44 = vpop.f32.mrf.mxu3 }
 0xbb2   :  { %v15911_v21 = vpop.f32.mrf.mxu0 }
 0xbb3   :  { %8161 = vmatpush.bf16.msra.mxu1 %v7772_v17 }
 0xbb7   :  { %8162 = vmatpush.bf16.msra.mxu1 %v7771_v16 }
 0xbb9   :  { %v7366_v6 = vpop.f32.mrf.mxu3 }
 0xbba   :  { %v7505_v53 = vpop.f32.mrf.mxu0 }
 0xbbb   :  { %v15913_v24 = vadd.f32 %v7505_v53, %v7356_v5 }
 0xbbd   :  { %9271 = vmatmul.msk.bf16.gmra.mxu0 %vm1234_vm8, %v9236_v31 }
 0xbc1   :  { %v7368_v8 = vpop.f32.mrf.mxu3 }
 0xbc2   :  { %v7507_v26 = vpop.f32.mrf.mxu0 }
 0xbc9   :  { %v7371_v17 = vpop.f32.mrf.mxu3 }
 0xbca   :  { %v7510_v12 = vpop.f32.mrf.mxu0 }
 0xbcb   :  { %v7511_v37 = vadd.f32 %v7510_v12, %v7361_v40 }
 0xbcd   :  { %9272 = vmatmul.msk.bf16.gmra.mxu0 %vm1234_vm8, %v9244_v52  ;;  %vm8057_vm8 = vcmask 523264  }
 0xbd1   :  { %v7373_v32 = vpop.f32.mrf.mxu3 }
 0xbd2   :  { %v7512_v42 = vpop.f32.mrf.mxu0 }
 0xbd3   :  { %v7513_v12 = vadd.f32 %v7512_v42, %v7363_v44  ;;  %v7633_v44 = vadd.f32 %v15775_v2, %v7511_v37 }
 0xbd9   :  { %v7376_v56 = vpop.f32.mrf.mxu3 }
 0xbda   :  { %v7515_v16 = vpop.f32.mrf.mxu0 }
 0xbdb   :  { %v7516_v48 = vadd.f32 %v7515_v16, %v7366_v6 }
 0xbe1   :  { %v7378_v27 = vpop.f32.mrf.mxu3 }
 0xbe2   :  { %v7517_v41 = vpop.f32.mrf.mxu0 }
 0xbe3   :  { %v7518_v57 = vadd.f32 %v7517_v41, %v7368_v8  ;;  %v7508_v41 = vadd.f32 %v7507_v26, %v15903_v1  ;;  %v7631_v1 = vadd.f32 %v15782_v19, %v15913_v24  ;;  %v7689_v26 = vmax.f32 %v7633_v44, 0.0 }
 0xbe5   :  { %v7636_v16 = vadd.f32 %v15793_v15, %v7518_v57  ;;  %v9275_v57 = vld [vmem:[#allocation7] sm:$0xf] }
 0xbe9   :  { %v7381_v55 = vpop.f32.mrf.mxu3 }
 0xbea   :  { %v7520_v14 = vpop.f32.mrf.mxu0 }
 0xbeb   :  { %v7521_v33 = vadd.f32 %v7520_v14, %v7371_v17 }
 0xbed   :  { %v7637_v60 = vadd.f32 %v15780_v49, %v7521_v33 }
 0xbef   :  { %v7693_v14 = vmax.f32 %v7637_v60, 0.0 }
 0xbf1   :  { %v7383_v63 = vpop.f32.mrf.mxu3 }
 0xbf2   :  { %v7522_v61 = vpop.f32.mrf.mxu0 }
 0xbf3   :  { %v7523_v18 = vadd.f32 %v7522_v61, %v7373_v32  ;;  %v7692_v61 = vmax.f32 %v7636_v16, 0.0 }
 0xbf5   :  { %v7638_v43 = vadd.f32 %v15796_v54, %v7523_v18  ;;  %v7627_v18 = vadd.f32 %v15802_v35, %v15895_v38  ;;  %v9680_v38 = vld [vmem:[#allocation7 + $0x4] sm:$0xf] }
 0xbf7   :  { %v7694_v17 = vmax.f32 %v7638_v43, 0.0  ;;  %v7683_v33 = vmax.f32 %v7627_v18, 0.0  ;;  %v9682_v43 = vld [vmem:[#allocation7 + $0xc] sm:$0xf0] }
 0xbf9   :  { %v7386_v4 = vpop.f32.mrf.mxu3 }
 0xbfa   :  { %v7525_v3 = vpop.f32.mrf.mxu0 }
 0xbfb   :  { %v7526_v45 = vadd.f32 %v7525_v3, %v7376_v56  ;;  %v7635_v56 = vadd.f32 %v15802_v35, %v7516_v48  ;;  %v7632_v48 = vadd.f32 %v15784_v11, %v7508_v41  ;;  %v9299_v41 = vld [vmem:[#allocation7 + $0x28] sm:$0xf] }
 0xbfd   :  { %v7639_v25 = vadd.f32 %v15782_v19, %v7526_v45  ;;  %v7691_v42 = vmax.f32 %v7635_v56, 0.0  ;;  %v7688_v37 = vmax.f32 %v7632_v48, 0.0  ;;  %v9291_v56 = vld [vmem:[#allocation7 + $0x20] sm:$0xf] }
 0xbff   :  { %v7695_v9 = vmax.f32 %v7639_v25, 0.0 }
 0xc01   :  { %v15920_v39 = vpop.f32.mrf.mxu3 }
 0xc02   :  { %v7527_v34 = vpop.f32.mrf.mxu0 }
 0xc03   :  { %v7528_v5 = vadd.f32 %v7527_v34, %v7378_v27  ;;  %v7634_v27 = vadd.f32 %v15773_v20, %v7513_v12  ;;  %v7503_v34 = vadd.f32 %v15911_v21, %v15889_v10  ;;  %v7629_v10 = vadd.f32 %v15780_v49, %v15906_v46  ;;  %v9277_v12 = vld [vmem:[#allocation7 + $0x10] sm:$0xf0] }
 0xc04   :  { %v7687_v21 = vmax.f32 %v7631_v1, 0.0  ;;  %v9280_v16 = vor.u32 %v9680_v38, %v9277_v12  ;;  %v9702_v38 = vld [vmem:[#allocation7 + $0xac] sm:$0xf0] }
 0xc05   :  { %v7640_v36 = vadd.f32 %v15784_v11, %v7528_v5 }
 0xc06   :  { %v7781_v24 = vpack.c.bf16 %v7688_v37, %v7687_v21  ;;  %8163 = vmatmul.bf16.vlgmr.msra.gmra.mxu1 %v9280_v16  ;;  %v9371_v16 = vld [vmem:[#allocation7 + $0xc0] sm:$0xf] }
 0xc07   :  { %v7696_v31 = vmax.f32 %v7640_v36, 0.0  ;;  %v7685_v36 = vmax.f32 %v7629_v10, 0.0 }
 0xc09   :  { %v7785_v32 = vpack.c.bf16 %v7696_v31, %v7695_v9  ;;  %v15929_v8 = vpop.f32.mrf.mxu3  ;;  %v9276_v31 = vor.u32 %v9682_v43, %v9275_v57  ;;  %v9694_v57 = vld [vmem:[#allocation7 + $0x6c] sm:$0xf0] }
 0xc0a   :  { %v7530_v58 = vpop.f32.mrf.mxu0 }
 0xc0b   :  { %v7531_v7 = vadd.f32 %v7530_v58, %v7381_v55  ;;  %v7784_v55 = vpack.c.bf16 %v7694_v17, %v7693_v14  ;;  %v7783_v58 = vpack.c.bf16 %v7692_v61, %v7691_v42  ;;  %8108 = vmatmul.bf16.vlgmr.msra.gmra.mxu2 %v9276_v31  ;;  %v9686_v14 = vld [vmem:[#allocation7 + $0x2c] sm:$0xf0]  ;;  %v9684_v42 = vld [vmem:[#allocation7 + $0x24] sm:$0xf] }
 0xc0c   :  { %v9292_v61 = vor.u32 %v9686_v14, %v9291_v56  ;;  %v9387_v56 = vld [vmem:[#allocation7 + $0xe0] sm:$0xf]  ;;  %v9710_v14 = vld [vmem:[#allocation7 + $0xec] sm:$0xf0] }
 0xc0d   :  { %v7641_v59 = vadd.f32 %v15775_v2, %v7531_v7  ;;  %v7630_v7 = vadd.f32 %v15796_v54, %v7503_v34  ;;  %v9293_v34 = vld [vmem:[#allocation7 + $0x30] sm:$0xf0] }
 0xc0e   :  { %v9296_v1 = vor.u32 %v9684_v42, %v9293_v34 }
 0xc0f   :  { %v7697_v28 = vmax.f32 %v7641_v59, 0.0 }
 0xc11   :  { %v7393_v45 = vpop.f32.mrf.mxu3 }
 0xc12   :  { %v7532_v47 = vpop.f32.mrf.mxu0 }
 0xc13   :  { %v7533_v51 = vadd.f32 %v7532_v47, %v7383_v63  ;;  %v7690_v63 = vmax.f32 %v7634_v27, 0.0  ;;  %v9687_v27 = vld [vmem:[#allocation7 + $0x34] sm:$0xf0] }
 0xc14   :  { %v9300_v44 = vor.u32 %v9687_v27, %v9299_v41  ;;  %v9388_v41 = vor.u32 %v9710_v14, %v9387_v56 }
 0xc15   :  { %v7642_v22 = vadd.f32 %v15773_v20, %v7533_v51  ;;  %v7782_v5 = vpack.c.bf16 %v7690_v63, %v7689_v26  ;;  %v7686_v51 = vmax.f32 %v7630_v7, 0.0 }
 0xc16   :  { %8168 = vmatmul.bf16.gmra.mxu1 %v9296_v1  ;;  %v9419_v1 = vld [vmem:[#allocation7 + $0x120] sm:$0xf] }
 0xc17   :  { %v7698_v40 = vmax.f32 %v7642_v22, 0.0 }
 0xc19   :  { %v7786_v53 = vpack.c.bf16 %v7698_v40, %v7697_v28  ;;  %v7396_v25 = vpop.f32.mrf.mxu3 }
 0xc1a   :  { %v7535_v6 = vpop.f32.mrf.mxu0 }
 0xc1b   :  { %v15925_v52 = vadd.f32 %v7535_v6, %v7386_v4  ;;  %8210 = vmatpush.bf16.msrb.mxu3 %v7786_v53  ;;  %v7498_v4 = vadd.f32 %v15901_v0, %v15863_v62  ;;  %v7780_v0 = vpack.c.bf16 %v7686_v51, %v7685_v36  ;;  %v9283_v53 = vld [vmem:[#allocation7 + $0x8] sm:$0xf]  ;;  %v9683_v6 = vld [vmem:[#allocation7 + $0x14] sm:$0xf0]  ;;  %8113 = vmatmul.bf16.gmra.mxu2 %v9292_v61  ;;  %v9403_v61 = vld [vmem:[#allocation7 + $0x100] sm:$0xf] }
 0xc1c   :  { %v9284_v60 = vor.u32 %v9683_v6, %v9283_v53  ;;  %v9339_v53 = vld [vmem:[#allocation7 + $0x80] sm:$0xf]  ;;  %v9698_v6 = vld [vmem:[#allocation7 + $0x8c] sm:$0xf0] }
 0xc1d   :  { %v7628_v59 = vadd.f32 %v15793_v15, %v7498_v4 }
 0xc1f   :  { %8211 = vmatpush.bf16.msrb.mxu3 %v7785_v32  ;;  %v7684_v62 = vmax.f32 %v7628_v59, 0.0 }
 0xc21   :  { %v7779_v28 = vpack.c.bf16 %v7684_v62, %v7683_v33  ;;  %v7398_v40 = vpop.f32.mrf.mxu3  ;;  %v7643_v33 = vadd.f32 %v15802_v35, %v15925_v52  ;;  %v9685_v35 = vld [vmem:[#allocation7 + $0x2c] sm:$0xf]  ;;  %v9301_v52 = vld [vmem:[#allocation7 + $0x38] sm:$0xf0] }
 0xc22   :  { %v15933_v3 = vpop.f32.mrf.mxu0  ;;  %v9304_v31 = vor.u32 %v9685_v35, %v9301_v52 }
 0xc23   :  { %8212 = vmatpush.bf16.msrb.mxu3 %v7784_v55  ;;  %v7538_v18 = vadd.f32 %v15933_v3, %v15920_v39  ;;  %v7699_v3 = vmax.f32 %v7643_v33, 0.0  ;;  %v8327_v33 = vpop.permute.xlu1 %8326 }
 0xc27   :  { %8213 = vmatpush.bf16.msrb.mxu3 %v7783_v58 }
 0xc29   :  { %v7401_v17 = vpop.f32.mrf.mxu3 }
 0xc2a   :  { %v7540_v47 = vpop.f32.mrf.mxu0 }
 0xc2b   :  { %8214 = vmatpush.bf16.msrb.mxu3 %v7782_v5  ;;  %v7541_v21 = vadd.f32 %v7540_v47, %v15929_v8 }
 0xc2f   :  { %8215 = vmatpush.bf16.msrb.mxu3 %v7781_v24 }
 0xc31   :  { %v7403_v63 = vpop.f32.mrf.mxu3 }
 0xc32   :  { %v7542_v22 = vpop.f32.mrf.mxu0 }
 0xc33   :  { %8216 = vmatpush.bf16.msrb.mxu3 %v7780_v0  ;;  %v7543_v37 = vadd.f32 %v7542_v22, %v7393_v45  ;;  %v7645_v45 = vadd.f32 %v15780_v49, %v7541_v21  ;;  %v7644_v22 = vadd.f32 %v15793_v15, %v7538_v18  ;;  %v9681_v49 = vld [vmem:[#allocation7 + $0xc] sm:$0xf]  ;;  %v9323_v15 = vld [vmem:[#allocation7 + $0x60] sm:$0xf] }
 0xc34   :  { %v9324_v43 = vor.u32 %v9694_v57, %v9323_v15  ;;  %v8337_v57 = vpop.permute.xlu0 %8336 }
 0xc35   :  { %v7646_v36 = vadd.f32 %v15796_v54, %v7543_v37  ;;  %v7700_v39 = vmax.f32 %v7644_v22, 0.0 }
 0xc37   :  { %8217 = vmatpush.bf16.msrb.mxu3 %v7779_v28  ;;  %v7702_v8 = vmax.f32 %v7646_v36, 0.0  ;;  %v9285_v28 = vld [vmem:[#allocation7 + $0x18] sm:$0xf0] }
 0xc3a   :  { %v7545_v46 = vpop.f32.mrf.mxu0  ;;  %8218 = vmatmul.bf16.vlgmr.msrb.gmra.mxu3 %v9284_v60  ;;  %v9340_v60 = vor.u32 %v9698_v6, %v9339_v53 }
 0xc3b   :  { %v7546_v26 = vadd.f32 %v7545_v46, %v7396_v25  ;;  %v7701_v25 = vmax.f32 %v7645_v45, 0.0  ;;  %v7787_v46 = vpack.c.bf16 %v7700_v39, %v7699_v3 }
 0xc3d   :  { %v7647_v59 = vadd.f32 %v15782_v19, %v7546_v26  ;;  %v7788_v54 = vpack.c.bf16 %v7702_v8, %v7701_v25  ;;  %v9718_v26 = vld [vmem:[#allocation7 + $0x12c] sm:$0xf0] }
 0xc3f   :  { %v7703_v0 = vmax.f32 %v7647_v59, 0.0 }
 0xc42   :  { %v7547_v9 = vpop.f32.mrf.mxu0 }
 0xc43   :  { %v7548_v48 = vadd.f32 %v7547_v9, %v7398_v40  ;;  %v9288_v40 = vor.u32 %v9681_v49, %v9285_v28  ;;  %v9355_v9 = vld [vmem:[#allocation7 + $0xa0] sm:$0xf]  ;;  %v8332_v28 = vpop.permute.xlu2 %8331 }
 0xc44   :  { %v9356_v12 = vor.u32 %v9702_v38, %v9355_v9 }
 0xc45   :  { %v7648_v5 = vadd.f32 %v15784_v11, %v7548_v48  ;;  %v9307_v11 = vld [vmem:[#allocation7 + $0x40] sm:$0xf] }
 0xc4a   :  { %v7550_v32 = vpop.f32.mrf.mxu0  ;;  %8223 = vmatmul.bf16.gmra.mxu3 %v9300_v44 }
 0xc4b   :  { %v7551_v55 = vadd.f32 %v7550_v32, %v7401_v17  ;;  %v9706_v17 = vld [vmem:[#allocation7 + $0xcc] sm:$0xf0] }
 0xc4c   :  { %v9372_v32 = vor.u32 %v9706_v17, %v9371_v16  ;;  %v9691_v17 = vld [vmem:[#allocation7 + $0x54] sm:$0xf0] }
 0xc4d   :  { %v7649_v4 = vadd.f32 %v15775_v2, %v7551_v55  ;;  %v7704_v2 = vmax.f32 %v7648_v5, 0.0  ;;  %v9714_v55 = vld [vmem:[#allocation7 + $0x10c] sm:$0xf0] }
 0xc4e   :  { %v9404_v42 = vor.u32 %v9714_v55, %v9403_v61  ;;  %v9688_v61 = vld [vmem:[#allocation7 + $0x44] sm:$0xf]  ;;  %v9309_v55 = vld [vmem:[#allocation7 + $0x50] sm:$0xf0] }
 0xc4f   :  { %v7705_v51 = vmax.f32 %v7649_v4, 0.0  ;;  %v7789_v47 = vpack.c.bf16 %v7704_v2, %v7703_v0  ;;  %v9420_v4 = vor.u32 %v9718_v26, %v9419_v1 }
 0xc52   :  { %v7552_v58 = vpop.f32.mrf.mxu0 }
 0xc53   :  { %v7553_v7 = vadd.f32 %v7552_v58, %v7403_v63 }
 0xc55   :  { %v7650_v10 = vadd.f32 %v15773_v20, %v7553_v7  ;;  %v9690_v20 = vld [vmem:[#allocation7 + $0x4c] sm:$0xf0] }
 0xc56   :  { %v9308_v19 = vor.u32 %v9690_v20, %v9307_v11 }
 0xc57   :  { %v7706_v24 = vmax.f32 %v7650_v10, 0.0 }
 0xc58   :  { %8118 = vmatmul.bf16.gmra.mxu2 %v9308_v19 }
 0xc59   :  { %v7790_v62 = vpack.c.bf16 %v7706_v24, %v7705_v51 }
 0xc5b   :  { %8269 = vmatpush.bf16.msrb.mxu0 %v7790_v62 }
 0xc5f   :  { %8270 = vmatpush.bf16.msrb.mxu0 %v7789_v47 }
 0xc63   :  { %8271 = vmatpush.bf16.msrb.mxu0 %v7788_v54 }
 0xc67   :  { %8272 = vmatpush.bf16.msrb.mxu0 %v7787_v46 }
 0xc68   :  { %8121 = vmatmul.bf16.gmra.mxu2 %v9324_v43 }
 0xc6a   :  { %9497 = vmatmul.msk.bf16.vlgmr.msrb.gmra.mxu0 %vm8057_vm8, %v9288_v40 }
 0xc78   :  { %8124 = vmatmul.bf16.gmra.mxu2 %v9340_v60  ;;  %v8342_v60 = vpop.permute.xlu1 %8341 }
 0xc7a   :  { %9498 = vmatmul.msk.bf16.gmra.mxu0 %vm8057_vm8, %v9304_v31 }
 0xc83   :  { %v8164_v48 = vpop.f32.mrf.mxu1 }
 0xc88   :  { %8127 = vmatmul.bf16.gmra.mxu2 %v9356_v12 }
 0xc8b   :  { %v8166_v7 = vpop.f32.mrf.mxu1 }
 0xc8e   :  { %v8109_v27 = vpop.f32.mrf.mxu2 }
 0xc8f   :  { %v8165_v24 = vadd.f32 %v8164_v48, %v8109_v27 }
 0xc93   :  { %v8169_v21 = vpop.f32.mrf.mxu1 }
 0xc96   :  { %v8111_v44 = vpop.f32.mrf.mxu2 }
 0xc97   :  { %v8167_v18 = vadd.f32 %v8166_v7, %v8111_v44  ;;  %v9312_v44 = vor.u32 %v9688_v61, %v9309_v55  ;;  %v8433_v55 = vpop.permute.xlu1 %8432 }
 0xc98   :  { %8130 = vmatmul.bf16.gmra.mxu2 %v9372_v32 }
 0xc99   :  { %8173 = vmatmul.bf16.gmra.mxu1 %v9312_v44 }
 0xc9b   :  { %v8171_v8 = vpop.f32.mrf.mxu1 }
 0xc9e   :  { %v8114_v34 = vpop.f32.mrf.mxu2 }
 0xc9f   :  { %v8170_v36 = vadd.f32 %v8169_v21, %v8114_v34 }
 0xca6   :  { %v8116_v58 = vpop.f32.mrf.mxu2 }
 0xca7   :  { %v8172_v39 = vadd.f32 %v8171_v8, %v8116_v58  ;;  %v9333_v8 = vld [vmem:[#allocation7 + $0x78] sm:$0xf0] }
 0xca8   :  { %8133 = vmatmul.bf16.gmra.mxu2 %v9388_v41 }
 0xcb8   :  { %8136 = vmatmul.bf16.gmra.mxu2 %v9404_v42  ;;  %v9689_v42 = vld [vmem:[#allocation7 + $0x4c] sm:$0xf] }
 0xcbd   :  { %v8219_v63 = vpop.f32.mrf.mxu3 }
 0xcbe   :  { %v8220_v62 = vadd.f32 %v8219_v63, %v8165_v24 }
 0xcc5   :  { %v8221_v10 = vpop.f32.mrf.mxu3 }
 0xcc6   :  { %v8222_v45 = vadd.f32 %v8221_v10, %v8167_v18 }
 0xcc8   :  { %8139 = vmatmul.bf16.gmra.mxu2 %v9420_v4 }
 0xccd   :  { %v8224_v2 = vpop.f32.mrf.mxu3 }
 0xcce   :  { %v8225_v0 = vadd.f32 %v8224_v2, %v8170_v36 }
 0xcd5   :  { %v8226_v54 = vpop.f32.mrf.mxu3 }
 0xcd6   :  { %v8227_v40 = vadd.f32 %v8226_v54, %v8172_v39 }
 0xcdb   :  { %v8119_v37 = vpop.f32.mrf.mxu2 }
 0xce3   :  { %v8120_v59 = vpop.f32.mrf.mxu2 }
 0xce4   :  { %v9331_v59 = vld [vmem:[#allocation7 + $0x68] sm:$0xf] }
 0xce7   :  { %v8274_v5 = vpop.f32.mrf.mxu0 }
 0xce8   :  { %v8275_v47 = vadd.f32 %v8274_v5, %v8220_v62 }
 0xcea   :  { %v8320_v3 = vadd.f32 %v8275_v47, %v15515_v29 }
 0xceb   :  { %v8122_v20 = vpop.f32.mrf.mxu2 }
 0xcec   :  { %v8344_v35 = vadd.f32 %v8327_v33, %v8320_v3  ;;  %v9722_v33 = vld [vmem:[#allocation7 + $0x14c] sm:$0xf0] }
 0xcef   :  { %v8276_v51 = vpop.f32.mrf.mxu0 }
 0xcf0   :  { %v8277_v11 = vadd.f32 %v8276_v51, %v8222_v45  ;;  %v9695_v51 = vld [vmem:[#allocation7 + $0x74] sm:$0xf0] }
 0xcf1   :  { %v9332_v24 = vor.u32 %v9695_v51, %v9331_v59 }
 0xcf2   :  { %v8321_v25 = vadd.f32 %v8277_v11, %v15511_v50  ;;  %v9325_v11 = vld [vmem:[#allocation7 + $0x70] sm:$0xf0] }
 0xcf3   :  { %v8123_v15 = vpop.f32.mrf.mxu2 }
 0xcf4   :  { %v8345_v46 = vadd.f32 %v8332_v28, %v8321_v25  ;;  %v9699_v15 = vld [vmem:[#allocation7 + $0x94] sm:$0xf0] }
 0xcf6   :  { %v8348_v53 = vadd.f32 %v8345_v46, %v8344_v35 }
 0xcf7   :  { %v8279_v22 = vpop.f32.mrf.mxu0 }
 0xcf8   :  { %v8280_v19 = vadd.f32 %v8279_v22, %v8225_v0  ;;  %v9692_v0 = vld [vmem:[#allocation7 + $0x64] sm:$0xf]  ;;  %v9693_v22 = vld [vmem:[#allocation7 + $0x6c] sm:$0xf] }
 0xcf9   :  { %v9328_v20 = vor.u32 %v9692_v0, %v9325_v11  ;;  %v9336_v25 = vor.u32 %v9693_v22, %v9333_v8  ;;  %v8394_v8 = vpop.permute.xlu1 %8393 }
 0xcfa   :  { %v8322_v49 = vadd.f32 %v8280_v19, %v15518_v30  ;;  %v9315_v30 = vld [vmem:[#allocation7 + $0x48] sm:$0xf]  ;;  %v9435_v19 = vld [vmem:[#allocation7 + $0x140] sm:$0xf] }
 0xcfb   :  { %v8125_v12 = vpop.f32.mrf.mxu2  ;;  %v9316_v32 = vor.u32 %v9691_v17, %v9315_v30  ;;  %v9436_v39 = vor.u32 %v9722_v33, %v9435_v19  ;;  %8176 = vmatmul.bf16.gmra.mxu1 %v9328_v20  ;;  %v8404_v17 = vpop.permute.xlu0 %8403  ;;  %v9379_v33 = vld [vmem:[#allocation7 + $0xc8] sm:$0xf] }
 0xcfc   :  { %v8346_v52 = vadd.f32 %v8337_v57, %v8322_v49  ;;  %v9349_v12 = vld [vmem:[#allocation7 + $0x98] sm:$0xf0] }
 0xcfd   :  { %8228 = vmatmul.bf16.gmra.mxu3 %v9316_v32  ;;  %8142 = vmatmul.bf16.gmra.mxu2 %v9436_v39 }
 0xcfe   :  { %v8349_v50 = vadd.f32 %v8348_v53, %v8346_v52 }
 0xcff   :  { %v8281_v43 = vpop.f32.mrf.mxu0 }
 0xd00   :  { %v8282_v31 = vadd.f32 %v8281_v43, %v8227_v40  ;;  %v9347_v40 = vld [vmem:[#allocation7 + $0x88] sm:$0xf] }
 0xd01   :  { %v9348_v57 = vor.u32 %v9699_v15, %v9347_v40 }
 0xd02   :  { %v8323_v6 = vadd.f32 %v8282_v31, %v15523_v23  ;;  %v9317_v23 = vld [vmem:[#allocation7 + $0x58] sm:$0xf0]  ;;  %v9726_v31 = vld [vmem:[#allocation7 + $0x16c] sm:$0xf0] }
 0xd03   :  { %v8126_v41 = vpop.f32.mrf.mxu2  ;;  %v9320_v48 = vor.u32 %v9689_v42, %v9317_v23  ;;  %v9467_v42 = vld [vmem:[#allocation7 + $0x180] sm:$0xf]  ;;  %v9730_v23 = vld [vmem:[#allocation7 + $0x18c] sm:$0xf0] }
 0xd04   :  { %v8347_v9 = vadd.f32 %v8342_v60, %v8323_v6  ;;  %v9696_v6 = vld [vmem:[#allocation7 + $0x84] sm:$0xf]  ;;  %v9341_v60 = vld [vmem:[#allocation7 + $0x90] sm:$0xf0]  ;;  %v9703_v41 = vld [vmem:[#allocation7 + $0xb4] sm:$0xf0]  ;;  %v9468_v59 = vor.u32 %v9730_v23, %v9467_v42 }
 0xd05   :  { %9499 = vmatmul.msk.bf16.gmra.mxu0 %vm8057_vm8, %v9320_v48  ;;  %v9427_v42 = vld [vmem:[#allocation7 + $0x128] sm:$0xf]  ;;  %v9719_v23 = vld [vmem:[#allocation7 + $0x134] sm:$0xf0] }
 0xd06   :  { %v8350_v38 = vadd.f32 %v8349_v50, %v8347_v9  ;;  %v9697_v50 = vld [vmem:[#allocation7 + $0x8c] sm:$0xf] }
 0xd08   :  { %v8351_v29 = vrot.slane %v8350_v38, 4 }
 0xd0a   :  { %v8352_v16 = vadd.f32 %v8351_v29, %v8350_v38  ;;  %v9344_v38 = vor.u32 %v9696_v6, %v9341_v60  ;;  %v9352_v29 = vor.u32 %v9697_v50, %v9349_v12  ;;  %v9708_v60 = vld [vmem:[#allocation7 + $0xe4] sm:$0xf]  ;;  %v9389_v50 = vld [vmem:[#allocation7 + $0xf0] sm:$0xf0]  ;;  %v9397_v12 = vld [vmem:[#allocation7 + $0xf8] sm:$0xf0] }
 0xd0b   :  { %v8128_v4 = vpop.f32.mrf.mxu2 }
 0xd0c   :  { %v8353_v56 = vrot.slane %v8352_v16, 2  ;;  %8179 = vmatmul.bf16.gmra.mxu1 %v9344_v38  ;;  %v9700_v4 = vld [vmem:[#allocation7 + $0xa4] sm:$0xf]  ;;  %v9392_v38 = vor.u32 %v9708_v60, %v9389_v50  ;;  %v9469_v60 = vld [vmem:[#allocation7 + $0x190] sm:$0xf0] }
 0xd0d   :  { %8231 = vmatmul.bf16.gmra.mxu3 %v9332_v24  ;;  %v9365_v24 = vld [vmem:[#allocation7 + $0xb8] sm:$0xf0]  ;;  %v9729_v50 = vld [vmem:[#allocation7 + $0x18c] sm:$0xf] }
 0xd0e   :  { %v8354_v14 = vadd.f32 %v8353_v56, %v8352_v16  ;;  %v8409_v16 = vpop.permute.xlu2 %8408 }
 0xd10   :  { %v8355_v27 = vrot.slane %v8354_v14, 1 }
 0xd12   :  { %v8356_v34 = vadd.f32 %v8355_v27, %v8354_v14  ;;  %v9363_v14 = vld [vmem:[#allocation7 + $0xa8] sm:$0xf] }
 0xd13   :  { %v8129_v62 = vpop.f32.mrf.mxu2  ;;  %v9364_v61 = vor.u32 %v9703_v41, %v9363_v14  ;;  %v9712_v14 = vld [vmem:[#allocation7 + $0x104] sm:$0xf]  ;;  %v9405_v41 = vld [vmem:[#allocation7 + $0x110] sm:$0xf0] }
 0xd14   :  { %v8357_v63 = vmul.f32 %v8356_v34, %v17116_v13 }
 0xd15   :  { %9500 = vmatmul.msk.bf16.gmra.mxu0 %vm8057_vm8, %v9336_v25 }
 0xd16   :  { %v15969_v58 = vsub.f32 %v8344_v35, %v8357_v63  ;;  %v15971_v1 = vsub.f32 %v8345_v46, %v8357_v63  ;;  %v15973_v26 = vsub.f32 %v8346_v52, %v8357_v63  ;;  %v15975_v7 = vsub.f32 %v8347_v9, %v8357_v63  ;;  %v9451_v52 = vld [vmem:[#allocation7 + $0x160] sm:$0xf]  ;;  %v8399_v48 = vpop.permute.xlu2 %8398 }
 0xd17   :  { %v9452_v9 = vor.u32 %v9726_v31, %v9451_v52  ;;  %v9395_v31 = vld [vmem:[#allocation7 + $0xe8] sm:$0xf] }
 0xd18   :  { %v8362_v37 = vmul.f32 %v15969_v58, %v15969_v58  ;;  %v8363_v5 = vmul.f32 %v15971_v1, %v15971_v1  ;;  %v8364_v10 = vmul.f32 %v15973_v26, %v15973_v26  ;;  %v8365_v18 = vmul.f32 %v15975_v7, %v15975_v7 }
 0xd19   :  { %8145 = vmatmul.bf16.gmra.mxu2 %v9452_v9  ;;  %v9709_v9 = vld [vmem:[#allocation7 + $0xec] sm:$0xf] }
 0xd1a   :  { %v8366_v21 = vadd.f32 %v8363_v5, %v8362_v37  ;;  %v9357_v37 = vld [vmem:[#allocation7 + $0xb0] sm:$0xf0]  ;;  %v9701_v5 = vld [vmem:[#allocation7 + $0xac] sm:$0xf] }
 0xd1b   :  { %v8131_v49 = vpop.f32.mrf.mxu2  ;;  %v9360_v51 = vor.u32 %v9700_v4, %v9357_v37  ;;  %v9368_v62 = vor.u32 %v9701_v5, %v9365_v24  ;;  %v9717_v4 = vld [vmem:[#allocation7 + $0x12c] sm:$0xf]  ;;  %v9429_v5 = vld [vmem:[#allocation7 + $0x138] sm:$0xf0]  ;;  %v8174_v24 = vpop.f32.mrf.mxu1 }
 0xd1c   :  { %v8367_v36 = vadd.f32 %v8366_v21, %v8364_v10  ;;  %v8428_v10 = vpop.permute.xlu0 %8427  ;;  %v9704_v49 = vld [vmem:[#allocation7 + $0xc4] sm:$0xf] }
 0xd1d   :  { %8234 = vmatmul.bf16.gmra.mxu3 %v9348_v57  ;;  %8182 = vmatmul.bf16.gmra.mxu1 %v9360_v51  ;;  %v9381_v57 = vld [vmem:[#allocation7 + $0xd8] sm:$0xf0] }
 0xd1e   :  { %v8368_v2 = vadd.f32 %v8367_v36, %v8365_v18 }
 0xd20   :  { %v8369_v45 = vrot.slane %v8368_v2, 4 }
 0xd22   :  { %v8370_v47 = vadd.f32 %v8369_v45, %v8368_v2 }
 0xd23   :  { %v8132_v53 = vpop.f32.mrf.mxu2 }
 0xd24   :  { %v8371_v54 = vrot.slane %v8370_v47, 2  ;;  %v8418_v25 = vpop.permute.xlu0 %8417  ;;  %v9711_v53 = vld [vmem:[#allocation7 + $0xf4] sm:$0xf0] }
 0xd25   :  { %9501 = vmatmul.msk.bf16.gmra.mxu0 %vm8057_vm8, %v9352_v29  ;;  %v9396_v6 = vor.u32 %v9711_v53, %v9395_v31  ;;  %v8439_v29 = vld [vmem:[%s16014_s7] sm:$0x1]  ;;  %s10355_s7 = smov [#allocation8]  }
 0xd26   :  { %v8372_v3 = vadd.f32 %v8371_v54, %v8370_v47  ;;  %s8475_s13 = sshll.u32 %s10355_s7, 4  ;;  %s8476_s13 = int_to_ptr.vmem [resolvable:$true] %s8475_s13 }
 0xd28   :  { %v8373_v28 = vrot.slane %v8372_v3, 1 }
 0xd29   :  { %8148 = vmatmul.bf16.gmra.mxu2 %v9468_v59  ;;  %v9723_v59 = vld [vmem:[#allocation7 + $0x154] sm:$0xf0] }
 0xd2a   :  { %v8374_v46 = vadd.f32 %v8373_v28, %v8372_v3  ;;  %v9734_v3 = vld [vmem:[#allocation7 + $0x1ac] sm:$0xf0]  ;;  %v9373_v28 = vld [vmem:[#allocation7 + $0xd0] sm:$0xf0] }
 0xd2b   :  { %v9376_v15 = vor.u32 %v9704_v49, %v9373_v28  ;;  %v9461_v49 = vld [vmem:[#allocation7 + $0x178] sm:$0xf0] }
 0xd2c   :  { %v8375_v43 = vmul.f32 %v8374_v46, %v17116_v13  ;;  %v8134_v13 = vpop.f32.mrf.mxu2  ;;  %v9705_v46 = vld [vmem:[#allocation7 + $0xcc] sm:$0xf] }
 0xd2d   :  { %8237 = vmatmul.bf16.gmra.mxu3 %v9364_v61  ;;  %8185 = vmatmul.bf16.gmra.mxu1 %v9376_v15  ;;  %v9411_v13 = vld [vmem:[#allocation7 + $0x108] sm:$0xf]  ;;  %v9408_v61 = vor.u32 %v9712_v14, %v9405_v41  ;;  %v9735_v14 = vld [vmem:[#allocation7 + $0x1b4] sm:$0xf0] }
 0xd2e   :  { %v8376_v35 = vadd.f32 1e-05, %v8375_v43 }
 0xd30   :  { %10242 = vrsqrt.f32 %v8376_v35  ;;  %vm8383_vm9 = vweird.f32 %v8376_v35 }
 0xd34   :  { %v8135_v34 = vpop.f32.mrf.mxu2 }
 0xd35   :  { %9502 = vmatmul.msk.bf16.gmra.mxu0 %vm8057_vm8, %v9368_v62  ;;  %v9428_v34 = vor.u32 %v9719_v23, %v9427_v42  ;;  %v9721_v62 = vld [vmem:[#allocation7 + $0x14c] sm:$0xf] }
 0xd36   :  { %v10243_v30 = vpop.eup %10242  ;;  %v9733_v42 = vld [vmem:[#allocation7 + $0x1ac] sm:$0xf] }
 0xd37   :  { %v8378_v32 = vmul.f32 %v10243_v30, %v8376_v35  ;;  %vm8384_vm7 = vweird.f32 %v10243_v30  ;;  %v9384_v35 = vor.u32 %v9705_v46, %v9381_v57 }
 0xd38   :  { %vm8385_vm10 = vmor %vm8383_vm9, %vm8384_vm7 }
 0xd39   :  { %v8379_v56 = vmul.f32 %v10243_v30, %v8378_v32 }
 0xd3b   :  { %v8380_v27 = vmul.f32 0.5, %v8379_v56 }
 0xd3c   :  { %v8137_v43 = vpop.f32.mrf.mxu2 }
 0xd3d   :  { %v8381_v44 = vsub.f32 1.5, %v8380_v27  ;;  %8188 = vmatmul.bf16.gmra.mxu1 %v9392_v38  ;;  %v9713_v27 = vld [vmem:[#allocation7 + $0x10c] sm:$0xf]  ;;  %v9475_v43 = vld [vmem:[#allocation7 + $0x188] sm:$0xf] }
 0xd3f   :  { %v8382_v63 = vmul.f32 %v10243_v30, %v8381_v44 }
 0xd41   :  { %v8386_v21 = vsel %vm8385_vm10, %v10243_v30, %v8382_v63  ;;  %v9421_v63 = vld [vmem:[#allocation7 + $0x130] sm:$0xf0] }
 0xd42   :  { %v8390_v18 = vmul.f32 %v8386_v21, %v15975_v7  ;;  %v8389_v36 = vmul.f32 %v8386_v21, %v15973_v26  ;;  %v8388_v2 = vmul.f32 %v8386_v21, %v15971_v1  ;;  %v8387_v11 = vmul.f32 %v8386_v21, %v15969_v58  ;;  %v8423_v7 = vpop.permute.xlu2 %8422  ;;  %v9707_v1 = vld [vmem:[#allocation7 + $0xd4] sm:$0xf0]  ;;  %v9483_v58 = vld [vmem:[#allocation7 + $0x1a0] sm:$0xf]  ;;  %v9443_v21 = vld [vmem:[#allocation7 + $0x148] sm:$0xf] }
 0xd43   :  { %v9380_v39 = vor.u32 %v9707_v1, %v9379_v33  ;;  %v9484_v40 = vor.u32 %v9734_v3, %v9483_v58  ;;  %v9444_v51 = vor.u32 %v9723_v59, %v9443_v21 }
 0xd44   :  { %v8414_v45 = vmul.f32 %v8409_v16, %v8390_v18  ;;  %v8413_v0 = vmul.f32 %v8404_v17, %v8389_v36  ;;  %v8412_v22 = vmul.f32 %v8399_v48, %v8388_v2  ;;  %v8411_v19 = vmul.f32 %v8394_v8, %v8387_v11  ;;  %v8138_v52 = vpop.f32.mrf.mxu2  ;;  %v9715_v17 = vld [vmem:[#allocation7 + $0x114] sm:$0xf0]  ;;  %v9716_v48 = vld [vmem:[#allocation7 + $0x124] sm:$0xf]  ;;  %v9437_v2 = vld [vmem:[#allocation7 + $0x150] sm:$0xf0] }
 0xd45   :  { %8240 = vmatmul.bf16.gmra.mxu3 %v9380_v39  ;;  %8151 = vmatmul.bf16.gmra.mxu2 %v9484_v40  ;;  %v9400_v16 = vor.u32 %v9709_v9, %v9397_v12  ;;  %v9412_v32 = vor.u32 %v9715_v17, %v9411_v13  ;;  %v9424_v37 = vor.u32 %v9716_v48, %v9421_v63  ;;  %v9720_v36 = vld [vmem:[#allocation7 + $0x144] sm:$0xf]  ;;  %v9445_v11 = vld [vmem:[#allocation7 + $0x158] sm:$0xf0]  ;;  %v9453_v39 = vld [vmem:[#allocation7 + $0x170] sm:$0xf0] }
 0xd46   :  { %v8438_v20 = vadd.f32 %v8433_v55, %v8414_v45  ;;  %v8437_v47 = vadd.f32 %v8428_v10, %v8413_v0  ;;  %v8436_v26 = vadd.f32 %v8423_v7, %v8412_v22  ;;  %v8435_v54 = vadd.f32 %v8418_v25, %v8411_v19  ;;  %9503 = vmatmul.msk.bf16.gmra.mxu0 %vm8057_vm8, %v9384_v35  ;;  %v9413_v55 = vld [vmem:[#allocation7 + $0x118] sm:$0xf0]  ;;  %v8175_v22 = vpop.f32.mrf.mxu1  ;;  %v9459_v19 = vld [vmem:[#allocation7 + $0x168] sm:$0xf]  ;;  %v9727_v7 = vld [vmem:[#allocation7 + $0x174] sm:$0xf0] }
 0xd47   :  { %v9416_v44 = vor.u32 %v9713_v27, %v9413_v55  ;;  %v9432_v10 = vor.u32 %v9717_v4, %v9429_v5  ;;  %v9440_v0 = vor.u32 %v9720_v36, %v9437_v2  ;;  %v9724_v25 = vld [vmem:[#allocation7 + $0x164] sm:$0xf]  ;;  %v9731_v35 = vld [vmem:[#allocation7 + $0x194] sm:$0xf0]  ;;  %v9493_v48 = vld [vmem:[#allocation7 + $0x1b8] sm:$0xf0] }
 0xd48   :  { %8461 = vmatpush.msrb.mxu2 %v8438_v20  ;;  %v9448_v20 = vor.u32 %v9721_v62, %v9445_v11  ;;  %v9456_v3 = vor.u32 %v9724_v25, %v9453_v39  ;;  %v9476_v52 = vor.u32 %v9731_v35, %v9475_v43  ;;  %v9732_v55 = vld [vmem:[#allocation7 + $0x1a4] sm:$0xf]  ;;  %v9496_v4 = vor.u32 %v9733_v42, %v9493_v48 }
 0xd4a   :  { %8462 = vmatpush.msrb.mxu2 %v8437_v47 }
 0xd4c   :  { %8463 = vmatpush.msrb.mxu2 %v8436_v26  ;;  %v8140_v30 = vpop.f32.mrf.mxu2  ;;  %v9460_v26 = vor.u32 %v9727_v7, %v9459_v19 }
 0xd4d   :  { %8191 = vmatmul.bf16.gmra.mxu1 %v9408_v61 }
 0xd4e   :  { %8464 = vmatpush.msrb.mxu2 %v8435_v54  ;;  %v9725_v54 = vld [vmem:[#allocation7 + $0x16c] sm:$0xf] }
 0xd4f   :  { %v9464_v28 = vor.u32 %v9725_v54, %v9461_v49 }
 0xd54   :  { %v8141_v56 = vpop.f32.mrf.mxu2 }
 0xd55   :  { %8243 = vmatmul.bf16.gmra.mxu3 %v9396_v6  ;;  %9511 = vmatmul.msk.f32.vlgmr.msrb.gmra.mxu2 %vm8445_vm11, %v8439_v29  ;;  %v9728_v6 = vld [vmem:[#allocation7 + $0x184] sm:$0xf]  ;;  %v9477_v29 = vld [vmem:[#allocation7 + $0x198] sm:$0xf0]  ;;  %v9491_v56 = vld [vmem:[#allocation7 + $0x1a8] sm:$0xf] }
 0xd56   :  { %9504 = vmatmul.msk.bf16.gmra.mxu0 %vm8057_vm8, %v9400_v16  ;;  %v9472_v12 = vor.u32 %v9728_v6, %v9469_v60  ;;  %v9480_v16 = vor.u32 %v9729_v50, %v9477_v29  ;;  %v9492_v41 = vor.u32 %v9735_v14, %v9491_v56 }
 0xd5d   :  { %8194 = vmatmul.bf16.gmra.mxu1 %v9424_v37 }
 0xd65   :  { %8246 = vmatmul.bf16.gmra.mxu3 %v9412_v32 }
 0xd66   :  { %9505 = vmatmul.msk.bf16.gmra.mxu0 %vm8057_vm8, %v9416_v44  ;;  %v9485_v44 = vld [vmem:[#allocation7 + $0x1b0] sm:$0xf0] }
 0xd6d   :  { %8197 = vmatmul.bf16.gmra.mxu1 %v9440_v0 }
 0xd75   :  { %8249 = vmatmul.bf16.gmra.mxu3 %v9428_v34  ;;  %v9488_v34 = vor.u32 %v9732_v55, %v9485_v44 }
 0xd76   :  { %9506 = vmatmul.msk.bf16.gmra.mxu0 %vm8057_vm8, %v9432_v10 }
 0xd78   :  { %v8177_v33 = vpop.f32.mrf.mxu1 }
 0xd7d   :  { %8200 = vmatmul.bf16.gmra.mxu1 %v9456_v3 }
 0xd80   :  { %v8229_v18 = vpop.f32.mrf.mxu3  ;;  %v8143_v46 = vpop.f32.mrf.mxu2 }
 0xd81   :  { %v8178_v40 = vpop.f32.mrf.mxu1 }
 0xd82   :  { %v8284_v45 = vpop.f32.mrf.mxu0 }
 0xd85   :  { %8252 = vmatmul.bf16.gmra.mxu3 %v9444_v51 }
 0xd86   :  { %9507 = vmatmul.msk.bf16.gmra.mxu0 %vm8057_vm8, %v9448_v20 }
 0xd88   :  { %v8230_v8 = vpop.f32.mrf.mxu3  ;;  %v8144_v31 = vpop.f32.mrf.mxu2 }
 0xd89   :  { %v8180_v53 = vpop.f32.mrf.mxu1  ;;  %v8443_v8 = vpop.permute.xlu1 %8442 }
 0xd8a   :  { %v8285_v47 = vpop.f32.mrf.mxu0 }
 0xd8d   :  { %8203 = vmatmul.bf16.gmra.mxu1 %v9472_v12 }
 0xd90   :  { %v8232_v1 = vpop.f32.mrf.mxu3 }
 0xd91   :  { %v8181_v13 = vpop.f32.mrf.mxu1 }
 0xd92   :  { %v8287_v58 = vpop.f32.mrf.mxu0 }
 0xd95   :  { %8255 = vmatmul.bf16.gmra.mxu3 %v9460_v26 }
 0xd96   :  { %9508 = vmatmul.msk.bf16.gmra.mxu0 %vm8057_vm8, %v9464_v28 }
 0xd98   :  { %v8233_v15 = vpop.f32.mrf.mxu3 }
 0xd9a   :  { %v8288_v57 = vpop.f32.mrf.mxu0  ;;  %v8183_v61 = vpop.f32.mrf.mxu1 }
 0xd9c   :  { %v8146_v30 = vpop.f32.mrf.mxu2 }
 0xd9d   :  { %8206 = vmatmul.bf16.gmra.mxu1 %v9488_v34 }
 0xda0   :  { %v8235_v9 = vpop.f32.mrf.mxu3 }
 0xda2   :  { %v8290_v38 = vpop.f32.mrf.mxu0  ;;  %v8184_v5 = vpop.f32.mrf.mxu1 }
 0xda4   :  { %v8147_v27 = vpop.f32.mrf.mxu2 }
 0xda5   :  { %8258 = vmatmul.bf16.gmra.mxu3 %v9476_v52 }
 0xda6   :  { %9509 = vmatmul.msk.bf16.gmra.mxu0 %vm8057_vm8, %v9480_v16 }
 0xda8   :  { %v8236_v17 = vpop.f32.mrf.mxu3 }
 0xdaa   :  { %v8291_v32 = vpop.f32.mrf.mxu0  ;;  %v8186_v51 = vpop.f32.mrf.mxu1 }
 0xdac   :  { %v8149_v37 = vpop.f32.mrf.mxu2 }
 0xdb0   :  { %v8238_v23 = vpop.f32.mrf.mxu3 }
 0xdb2   :  { %v8293_v63 = vpop.f32.mrf.mxu0  ;;  %v8187_v2 = vpop.f32.mrf.mxu1 }
 0xdb4   :  { %v8150_v59 = vpop.f32.mrf.mxu2 }
 0xdb5   :  { %8261 = vmatmul.bf16.gmra.mxu3 %v9492_v41 }
 0xdb6   :  { %9510 = vmatmul.msk.bf16.gmra.mxu0 %vm8057_vm8, %v9496_v4 }
 0xdb8   :  { %v8239_v10 = vpop.f32.mrf.mxu3 }
 0xdba   :  { %v8294_v21 = vpop.f32.mrf.mxu0  ;;  %v8189_v11 = vpop.f32.mrf.mxu1 }
 0xdc2   :  { %v8190_v19 = vpop.f32.mrf.mxu1 }
 0xdc3   :  { %v8296_v18 = vpop.f32.mrf.mxu0 }
 0xdc8   :  { %v8241_v24 = vpop.f32.mrf.mxu3  ;;  %v8152_v36 = vpop.f32.mrf.mxu2 }
 0xdca   :  { %v8192_v1 = vpop.f32.mrf.mxu1 }
 0xdcb   :  { %v8297_v45 = vpop.f32.mrf.mxu0 }
 0xdd0   :  { %v8242_v62 = vpop.f32.mrf.mxu3  ;;  %v8153_v0 = vpop.f32.mrf.mxu2 }
 0xdd2   :  { %v8193_v54 = vpop.f32.mrf.mxu1 }
 0xdd3   :  { %v8299_v22 = vpop.f32.mrf.mxu0 }
 0xdd8   :  { %v8244_v20 = vpop.f32.mrf.mxu3  ;;  %v8466_v47 = vpop.f32.mrf.mxu2 }
 0xdd9   :  { %v8467_v7 = vadd.f32 %v8466_v47, %v8443_v8 }
 0xdda   :  { %v8195_v49 = vpop.f32.mrf.mxu1 }
 0xddb   :  { %v8300_v33 = vpop.f32.mrf.mxu0  ;;  %8469 = vst [vmem:[#allocation8] sm:$0x1] %v8467_v7 }
 0xddc   :  { %8480 = dma.vmem_to_hbm [thread:$0]  %s8476_s13, 16, %s8478_s16, [#allocation4]  }
 0xde0   :  { %v8245_v26 = vpop.f32.mrf.mxu3 }
 0xde2   :  { %v8196_v40 = vpop.f32.mrf.mxu1 }
 0xde3   :  { %v8302_v39 = vpop.f32.mrf.mxu0 }
 0xde8   :  { %v8247_v25 = vpop.f32.mrf.mxu3 }
 0xdea   :  { %v8198_v43 = vpop.f32.mrf.mxu1 }
 0xdeb   :  { %v8303_v3 = vpop.f32.mrf.mxu0 }
 0xdf0   :  { %v8248_v58 = vpop.f32.mrf.mxu3 }
 0xdf2   :  { %v8199_v31 = vpop.f32.mrf.mxu1 }
 0xdf3   :  { %v8305_v46 = vpop.f32.mrf.mxu0 }
 0xdf8   :  { %v8250_v28 = vpop.f32.mrf.mxu3 }
 0xdfa   :  { %v8201_v60 = vpop.f32.mrf.mxu1 }
 0xdfb   :  { %v8306_v57 = vpop.f32.mrf.mxu0 }
 0xe00   :  { %v8251_v15 = vpop.f32.mrf.mxu3 }
 0xe02   :  { %v8202_v38 = vpop.f32.mrf.mxu1 }
 0xe03   :  { %v8308_v52 = vpop.f32.mrf.mxu0 }
 0xe08   :  { %v8253_v35 = vpop.f32.mrf.mxu3 }
 0xe0a   :  { %v8204_v16 = vpop.f32.mrf.mxu1 }
 0xe0b   :  { %v8309_v6 = vpop.f32.mrf.mxu0 }
 0xe10   :  { %v8254_v53 = vpop.f32.mrf.mxu3 }
 0xe12   :  { %v8205_v17 = vpop.f32.mrf.mxu1 }
 0xe13   :  { %v8311_v9 = vpop.f32.mrf.mxu0 }
 0xe18   :  { %v8256_v50 = vpop.f32.mrf.mxu3 }
 0xe1a   :  { %v8207_v14 = vpop.f32.mrf.mxu1 }
 0xe1b   :  { %v8312_v29 = vpop.f32.mrf.mxu0 }
 0xe20   :  { %v8257_v12 = vpop.f32.mrf.mxu3 }
 0xe22   :  { %v8208_v61 = vpop.f32.mrf.mxu1 }
 0xe23   :  { %v8314_v13 = vpop.f32.mrf.mxu0 }
 0xe28   :  { %v8259_v30 = vpop.f32.mrf.mxu3 }
 0xe2b   :  { %v8315_v56 = vpop.f32.mrf.mxu0 }
 0xe30   :  { %v8260_v32 = vpop.f32.mrf.mxu3 }
 0xe33   :  { %v8317_v27 = vpop.f32.mrf.mxu0 }
 0xe38   :  { %v8262_v41 = vpop.f32.mrf.mxu3 }
 0xe3b   :  { %v8318_v44 = vpop.f32.mrf.mxu0 }
 0xe40   :  { %v8263_v55 = vpop.f32.mrf.mxu3 }
 0xe41   :  { %10344 = dma.done.wait [#allocation4], 16  }
 0xe42   :  { %10345 = vsyncadd [#allocation4], 4294967280 }
 0xe43   :  { %8485 = vsyncpa [#allocation3], 1 }
 0xe44   :  { %8486 = vsyncpa [#allocation6], 1 }
 0xe45   :  { %8487 = vsyncpa [#allocation4], 1 }

</bundles_post_ra>
